<compile_context>
chip_gen: v6e
topology: v6e:2x2x1
jax: 0.10.0
libtpu: 0.0.40
codegen_flags: <defaults>
</compile_context>

<pallas_src>
import functools

import jax
import jax.numpy as jnp
from jax.experimental import pallas as pl
from jax.experimental.pallas import tpu as pltpu


NF = 32      # feature channels
HALO = 6     # six chained 3x3 convs -> 6-row halo on each side of a row tile


# ----------------------------------------------------------------------------
# Fused kernel: conv_in(+ReLU) -> RB1 -> RB2 -> conv_out for one row tile.
# ----------------------------------------------------------------------------
def _vivo_fused_kernel(xp_ref,                      # [1, 1, (TH+10)*W, 9]  f32
                       w_in_ref, b_in_ref,          # [9, nf], [1, nf]
                       w11_ref, b11_ref,            # [9*nf, nf], [1, nf]
                       w12_ref, b12_ref,
                       w21_ref, b21_ref,
                       w22_ref, b22_ref,
                       w_out_ref, b_out_ref,        # [9*nf, 4], [1, 4]
                       o_ref,                       # [1, TH, W, 4]
                       *, img_h, compute_dtype):
    TH = o_ref.shape[1]
    W = o_ref.shape[2]
    nf = w_in_ref.shape[1]
    RoW = xp_ref.shape[2]
    Ro = RoW // W                                   # = TH + 10

    # Global image row of this tile's first *output* row.
    base = pl.program_id(1) * TH

    def mask_oob_rows(a2d, offset):
        # a2d is [R*W, C], row-major over (row, w); local row j corresponds to
        # global image row (base - offset + j).  Rows outside [0, img_h) are
        # exactly the zero padding every SAME conv of the reference net sees,
        # so they must be zero before feeding the next conv (bias/ReLU would
        # otherwise leak through the halo).  keep <=> 0 <= global_row < img_h,
        # written without integer division via t = global_row*W + w.
        t = jax.lax.broadcasted_iota(jnp.int32, a2d.shape, 0) + (base - offset) * W
        keep = jnp.logical_and(t >= 0, t < img_h * W)
        return jnp.where(keep, a2d, 0.0)

    # ---- conv_in (Cin=1) + ReLU: one small K=9 matmul on the prebuilt
    #      im2col slab (f32; the raw input is tiny). -------------------------
    p_in = xp_ref[...].reshape(RoW, 9)
    y0 = jnp.dot(p_in, w_in_ref[...], preferred_element_type=jnp.float32)
    y0 = jnp.maximum(y0 + b_in_ref[...], 0.0)       # [RoW, nf]
    y0 = mask_oob_rows(y0, HALO - 1)                # rows cover [base-5, ...)
    y = y0.reshape(Ro, W, nf)                       # rows shrink by 2 per conv

    # ---- generic fused 3x3 conv: im2col -> ONE K=9*Cin MXU matmul ----------
    def conv3x3(z, w_ref, b_ref, relu=False, identity=None, mask_offset=None):
        Rz, Wz, Cz = z.shape
        Rout = Rz - 2
        zc = z.astype(compute_dtype)
        zpad = jnp.zeros((Rz, 1, Cz), compute_dtype)
        zp = jnp.concatenate([zpad, zc, zpad], axis=1)      # same-pad along W
        taps = [zp[dy:dy + Rout, dx:dx + Wz, :]
                for dy in range(3) for dx in range(3)]
        patches = jnp.concatenate(taps, axis=-1).reshape(Rout * Wz, 9 * Cz)
        out = jnp.dot(patches, w_ref[...].astype(compute_dtype),
                      preferred_element_type=jnp.float32)
        out = out + b_ref[...]                              # f32 bias
        if relu:
            out = jnp.maximum(out, 0.0)
        if mask_offset is not None:                         # zero out-of-image rows
            out = mask_oob_rows(out, mask_offset)
        out = out.reshape(Rout, Wz, -1)
        if identity is not None:
            out = out + identity                            # f32 residual add
        return out

    # residual block 1
    h = conv3x3(y, w11_ref, b11_ref, relu=True, mask_offset=4)
    y = conv3x3(h, w12_ref, b12_ref, identity=y[2:-2], mask_offset=3)
    # residual block 2
    h = conv3x3(y, w21_ref, b21_ref, relu=True, mask_offset=2)
    y = conv3x3(h, w22_ref, b22_ref, identity=y[2:-2], mask_offset=1)
    # conv_out (Cout = 4); its out-of-image rows are cropped by the wrapper,
    # and PixelShuffle is a pure layout op also done in the wrapper.
    out = conv3x3(y, w_out_ref, b_out_ref)                  # [TH, W, 4]
    o_ref[...] = out[None].astype(o_ref.dtype)


# ----------------------------------------------------------------------------
# Parameter init (PyTorch Conv2d default-style uniform), im2col weight layout:
#   w: [9*Cin, Cout] with row index = (dy*3+dx)*Cin + cin ;  b: [1, Cout]
# ----------------------------------------------------------------------------
def _conv_init(key, cin, cout):
    kw, kb = jax.random.split(key)
    bound = 1.0 / float(cin * 9) ** 0.5
    w = jax.random.uniform(kw, (9 * cin, cout), jnp.float32, -bound, bound)
    b = jax.random.uniform(kb, (1, cout), jnp.float32, -bound, bound)
    return w, b


def init_params(key, nf=NF):
    ks = jax.random.split(key, 6)
    return {
        "conv_in":   _conv_init(ks[0], 1, nf),
        "rb1_conv1": _conv_init(ks[1], nf, nf),
        "rb1_conv2": _conv_init(ks[2], nf, nf),
        "rb2_conv1": _conv_init(ks[3], nf, nf),
        "rb2_conv2": _conv_init(ks[4], nf, nf),
        "conv_out":  _conv_init(ks[5], nf, 4),
    }


def _flatten_params(params):
    return [params["conv_in"][0],   params["conv_in"][1],
            params["rb1_conv1"][0], params["rb1_conv1"][1],
            params["rb1_conv2"][0], params["rb1_conv2"][1],
            params["rb2_conv1"][0], params["rb2_conv1"][1],
            params["rb2_conv2"][0], params["rb2_conv2"][1],
            params["conv_out"][0],  params["conv_out"][1]]


def _pick_tile_rows(H, W, nf=NF):
    # Rough per-output-row VMEM bytes: bf16 im2col patches (9*nf*2) + a few
    # f32 activation planes + double-buffered I/O blocks.  Budget well under
    # the v7x 64 MiB VMEM so the same tiling is safe on v5e/v6e (128 MiB).
    per_row = W * (9 * nf * 2 + 8 * nf * 4 + 128 * 4 * 2)
    th = (20 * 1024 * 1024) // max(per_row, 1)
    th = max(8, min(256, th))
    return (th // 8) * 8


# ----------------------------------------------------------------------------
# Forward pass (NCHW in / NCHW out, like the PyTorch module)
# ----------------------------------------------------------------------------
def vivo_forward(params, x_nchw, *, tile_rows=None, compute_dtype=jnp.bfloat16):
    N, C, H, W = x_nchw.shape
    assert C == 1, "Vivo32ch2RBs takes a single-channel input"
    x = x_nchw[:, 0]                                        # [N, H, W]

    th = tile_rows if tile_rows is not None else _pick_tile_rows(H, W)
    if H <= th:
        TH, n_tiles, Hp = H, 1, H
    else:
        TH = max(8, (th // 8) * 8)
        Hp = ((H + TH - 1) // TH) * TH
        n_tiles = Hp // TH
    # TODO(synk): very wide images would additionally need W tiling; rows-only
    # tiling (full W per block) is used here.

    # 6-row halo each side; bottom padded up to the tile multiple.  Out-of-image
    # rows of every intermediate layer are re-zeroed inside the kernel.
    x_p = jnp.pad(x, ((0, 0), (HALO, Hp - H + HALO), (0, 0)))   # [N, Hp+12, W]
    xw = jnp.pad(x_p, ((0, 0), (0, 0), (1, 1)))                 # [N, Hp+12, W+2]

    # Tiny first-layer im2col ([rows, 9], 36 B/px) built in XLA: lets the
    # kernel start straight from a K=9 matmul with no in-kernel relayout.
    Ro = TH + 2 * HALO - 2                                      # = TH + 10
    tiles = []
    for i in range(n_tiles):
        base = i * TH
        taps = [xw[:, base + dy: base + dy + Ro, dx: dx + W]
                for dy in range(3) for dx in range(3)]          # 9 x [N, Ro, W]
        tiles.append(jnp.stack(taps, axis=-1).reshape(N, Ro * W, 9))
    x_patches = jnp.stack(tiles, axis=1)                        # [N, nt, Ro*W, 9]

    plist = _flatten_params(params)
    in_specs = [pl.BlockSpec((1, 1, Ro * W, 9), lambda n, i: (n, i, 0, 0))]
    in_specs += [pl.BlockSpec(p.shape, lambda n, i: (0, 0)) for p in plist]
    out_specs = pl.BlockSpec((1, TH, W, 4), lambda n, i: (n, i, 0, 0))

    kernel = functools.partial(_vivo_fused_kernel, img_h=H,
                               compute_dtype=compute_dtype)
    y = pl.pallas_call(
        kernel,
        grid=(N, n_tiles),
        in_specs=in_specs,
        out_specs=out_specs,
        out_shape=jax.ShapeDtypeStruct((N, Hp, W, 4), jnp.float32),
        compiler_params=pltpu.CompilerParams(
            dimension_semantics=("parallel", "parallel"),
            vmem_limit_bytes=48 * 1024 * 1024),
    )(x_patches, *plist)

    y = y[:, :H]                                                # [N, H, W, 4]
    # PixelShuffle(2): out[n, 2h+i, 2w+j] = y[n, h, w, 2*i+j]
    out = y.reshape(N, H, W, 2, 2).transpose(0, 1, 3, 2, 4).reshape(N, 2 * H, 2 * W)
    return out[:, None]                                         # [N, 1, 2H, 2W]


# ----------------------------------------------------------------------------
# Pure-JAX reference (lax.conv) for a correctness check
# ----------------------------------------------------------------------------
def _conv3x3_ref(x, w_flat, b, *, relu=False, identity=None, dt=None):
    cout = w_flat.shape[1]
    cin = w_flat.shape[0] // 9
    w_hwio = w_flat.reshape(3, 3, cin, cout)
    xin = x if dt is None else x.astype(dt)
    win = w_hwio if dt is None else w_hwio.astype(dt)
    out = jax.lax.conv_general_dilated(
        xin, win, window_strides=(1, 1), padding="SAME",
        dimension_numbers=("NHWC", "HWIO", "NHWC"),
        preferred_element_type=jnp.float32)
    out = out + b.reshape(1, 1, 1, -1)
    if relu:
        out = jnp.maximum(out, 0.0)
    if identity is not None:
        out = out + identity
    return out


def vivo_forward_ref(params, x_nchw, *, compute_dtype=jnp.bfloat16):
    x = jnp.transpose(x_nchw, (0, 2, 3, 1))                     # NCHW -> NHWC
    y = _conv3x3_ref(x, *params["conv_in"], relu=True, dt=None)  # f32, as kernel
    for rb in ("rb1", "rb2"):
        identity = y
        h = _conv3x3_ref(y, *params[f"{rb}_conv1"], relu=True, dt=compute_dtype)
        y = _conv3x3_ref(h, *params[f"{rb}_conv2"], identity=identity,
                         dt=compute_dtype)
    y = _conv3x3_ref(y, *params["conv_out"], dt=compute_dtype)   # [N, H, W, 4]
    N, H, W, _ = y.shape
    out = y.reshape(N, H, W, 2, 2).transpose(0, 1, 3, 2, 4).reshape(N, 2 * H, 2 * W)
    return out[:, None]


if __name__ == "__main__":
    key = jax.random.PRNGKey(0)
    kx1, kx2, kp = jax.random.split(key, 3)
    params = init_params(kp, nf=NF)

    # --- Test 1: single row-tile, 16x16 (exercises top/bottom image masking).
    x = jax.random.normal(kx1, (2, 1, 16, 16), jnp.float32)      # NCHW
    out = jax.block_until_ready(jax.jit(vivo_forward)(params, x))
    assert out.shape == (2, 1, 32, 32), out.shape
    ref = jax.block_until_ready(jax.jit(vivo_forward_ref)(params, x))
    err = float(jnp.max(jnp.abs(out - ref)))
    assert jnp.allclose(out, ref, atol=5e-2, rtol=5e-2), f"t1 mismatch: max|err|={err}"

    # --- Test 2: multi row-tile path (H not a multiple of the tile) exercises
    #     halo reuse across tile boundaries and cropping of the padded bottom.
    x2 = jax.random.normal(kx2, (1, 1, 20, 24), jnp.float32)
    fwd2 = jax.jit(functools.partial(vivo_forward, tile_rows=8))
    out2 = jax.block_until_ready(fwd2(params, x2))
    assert out2.shape == (1, 1, 40, 48), out2.shape
    ref2 = jax.block_until_ready(jax.jit(vivo_forward_ref)(params, x2))
    err2 = float(jnp.max(jnp.abs(out2 - ref2)))
    assert jnp.allclose(out2, ref2, atol=5e-2, rtol=5e-2), f"t2 mismatch: max|err|={err2}"

    print("KERNEL_OK")
</pallas_src>

<mosaic_0001>
module attributes {stable_mosaic.version = 11 : i64} {
  func.func @_vivo_fused_kernel(%arg0: i32, %arg1: i32, %arg2: memref<1x1x416x9xf32, #tpu.memory_space<vmem>>, %arg3: memref<9x32xf32, #tpu.memory_space<vmem>>, %arg4: memref<1x32xf32, #tpu.memory_space<vmem>>, %arg5: memref<288x32xf32, #tpu.memory_space<vmem>>, %arg6: memref<1x32xf32, #tpu.memory_space<vmem>>, %arg7: memref<288x32xf32, #tpu.memory_space<vmem>>, %arg8: memref<1x32xf32, #tpu.memory_space<vmem>>, %arg9: memref<288x32xf32, #tpu.memory_space<vmem>>, %arg10: memref<1x32xf32, #tpu.memory_space<vmem>>, %arg11: memref<288x32xf32, #tpu.memory_space<vmem>>, %arg12: memref<1x32xf32, #tpu.memory_space<vmem>>, %arg13: memref<288x4xf32, #tpu.memory_space<vmem>>, %arg14: memref<1x4xf32, #tpu.memory_space<vmem>>, %arg15: memref<1x16x16x4xf32, #tpu.memory_space<vmem>>) attributes {dimension_semantics = [#tpu.dimension_semantics<parallel>, #tpu.dimension_semantics<parallel>], iteration_bounds = array<i64: 2, 1>, scalar_prefetch = 0 : i64, scratch_operands = 0 : i64, tpu.core_type = #tpu.core_type<tc>, window_params = [{transform_indices = @transform_0, window_bounds = array<i64: 1, 1, 416, 9>}, {pipeline_mode = #tpu.pipeline_mode<synchronous>, transform_indices = @transform_1, window_bounds = array<i64: 9, 32>}, {pipeline_mode = #tpu.pipeline_mode<synchronous>, transform_indices = @transform_2, window_bounds = array<i64: 1, 32>}, {pipeline_mode = #tpu.pipeline_mode<synchronous>, transform_indices = @transform_3, window_bounds = array<i64: 288, 32>}, {pipeline_mode = #tpu.pipeline_mode<synchronous>, transform_indices = @transform_4, window_bounds = array<i64: 1, 32>}, {pipeline_mode = #tpu.pipeline_mode<synchronous>, transform_indices = @transform_5, window_bounds = array<i64: 288, 32>}, {pipeline_mode = #tpu.pipeline_mode<synchronous>, transform_indices = @transform_6, window_bounds = array<i64: 1, 32>}, {pipeline_mode = #tpu.pipeline_mode<synchronous>, transform_indices = @transform_7, window_bounds = array<i64: 288, 32>}, {pipeline_mode = #tpu.pipeline_mode<synchronous>, transform_indices = @transform_8, window_bounds = array<i64: 1, 32>}, {pipeline_mode = #tpu.pipeline_mode<synchronous>, transform_indices = @transform_9, window_bounds = array<i64: 288, 32>}, {pipeline_mode = #tpu.pipeline_mode<synchronous>, transform_indices = @transform_10, window_bounds = array<i64: 1, 32>}, {pipeline_mode = #tpu.pipeline_mode<synchronous>, transform_indices = @transform_11, window_bounds = array<i64: 288, 4>}, {pipeline_mode = #tpu.pipeline_mode<synchronous>, transform_indices = @transform_12, window_bounds = array<i64: 1, 4>}, {transform_indices = @transform_13, window_bounds = array<i64: 1, 16, 16, 4>}]} {
    %c16_i32 = arith.constant 16 : i32
    %0 = arith.muli %arg1, %c16_i32 : i32
    %c0 = arith.constant 0 : index
    %c0_0 = arith.constant 0 : index
    %c0_1 = arith.constant 0 : index
    %c0_2 = arith.constant 0 : index
    %1 = vector.load %arg2[%c0, %c0_0, %c0_1, %c0_2] : memref<1x1x416x9xf32, #tpu.memory_space<vmem>>, vector<1x1x416x9xf32>
    %2 = vector.shape_cast %1 : vector<1x1x416x9xf32> to vector<416x9xf32>
    %c0_3 = arith.constant 0 : index
    %c0_4 = arith.constant 0 : index
    %3 = vector.load %arg3[%c0_3, %c0_4] : memref<9x32xf32, #tpu.memory_space<vmem>>, vector<9x32xf32>
    %cst = arith.constant dense<0.000000e+00> : vector<416x32xf32>
    %4 = tpu.matmul %2, %3, %cst {dimension_numbers = #tpu.dot_dimension_numbers<[1], [0], [0], [1], [0, 0, 1, 1], [], []>} : vector<416x9xf32>, vector<9x32xf32>, vector<416x32xf32> -> vector<416x32xf32>
    %c0_5 = arith.constant 0 : index
    %c0_6 = arith.constant 0 : index
    %5 = vector.load %arg4[%c0_5, %c0_6] : memref<1x32xf32, #tpu.memory_space<vmem>>, vector<1x32xf32>
    %6 = vector.broadcast %5 : vector<1x32xf32> to vector<416x32xf32>
    %7 = arith.addf %4, %6 : vector<416x32xf32>
    %cst_7 = arith.constant 0.000000e+00 : f32
    %8 = vector.broadcast %cst_7 : f32 to vector<416x32xf32>
    %9 = arith.maximumf %7, %8 : vector<416x32xf32>
    %10 = tpu.iota {dimensions = array<i32: 0>} : vector<416x32xi32>
    %c5_i32 = arith.constant 5 : i32
    %11 = arith.subi %0, %c5_i32 : i32
    %c16_i32_8 = arith.constant 16 : i32
    %12 = arith.muli %11, %c16_i32_8 : i32
    %13 = vector.broadcast %12 : i32 to vector<416x32xi32>
    %14 = arith.addi %10, %13 : vector<416x32xi32>
    %c0_i32 = arith.constant 0 : i32
    %15 = vector.broadcast %c0_i32 : i32 to vector<416x32xi32>
    %16 = arith.cmpi sge, %14, %15 : vector<416x32xi32>
    %c256_i32 = arith.constant 256 : i32
    %17 = vector.broadcast %c256_i32 : i32 to vector<416x32xi32>
    %18 = arith.cmpi slt, %14, %17 : vector<416x32xi32>
    %19 = arith.andi %16, %18 : vector<416x32xi1>
    %cst_9 = arith.constant 0.000000e+00 : f32
    %20 = vector.broadcast %cst_9 : f32 to vector<416x32xf32>
    %21 = arith.select %19, %9, %20 : vector<416x32xi1>, vector<416x32xf32>
    %22 = vector.shape_cast %21 : vector<416x32xf32> to vector<26x16x32xf32>
    %23 = arith.truncf %22 : vector<26x16x32xf32> to vector<26x16x32xbf16>
    %cst_10 = arith.constant 0.000000e+00 : bf16
    %24 = vector.broadcast %cst_10 : bf16 to vector<26x1x32xbf16>
    %25 = tpu.concatenate %24, %23, %24 in 1 : vector<26x1x32xbf16>, vector<26x16x32xbf16>, vector<26x1x32xbf16> -> vector<26x18x32xbf16>
    %26 = vector.extract_strided_slice %25 {offsets = [0, 0, 0], sizes = [24, 16, 32], strides = [1, 1, 1]} : vector<26x18x32xbf16> to vector<24x16x32xbf16>
    %27 = vector.extract_strided_slice %25 {offsets = [0, 1, 0], sizes = [24, 16, 32], strides = [1, 1, 1]} : vector<26x18x32xbf16> to vector<24x16x32xbf16>
    %28 = vector.extract_strided_slice %25 {offsets = [0, 2, 0], sizes = [24, 16, 32], strides = [1, 1, 1]} : vector<26x18x32xbf16> to vector<24x16x32xbf16>
    %29 = vector.extract_strided_slice %25 {offsets = [1, 0, 0], sizes = [24, 16, 32], strides = [1, 1, 1]} : vector<26x18x32xbf16> to vector<24x16x32xbf16>
    %30 = vector.extract_strided_slice %25 {offsets = [1, 1, 0], sizes = [24, 16, 32], strides = [1, 1, 1]} : vector<26x18x32xbf16> to vector<24x16x32xbf16>
    %31 = vector.extract_strided_slice %25 {offsets = [1, 2, 0], sizes = [24, 16, 32], strides = [1, 1, 1]} : vector<26x18x32xbf16> to vector<24x16x32xbf16>
    %32 = vector.extract_strided_slice %25 {offsets = [2, 0, 0], sizes = [24, 16, 32], strides = [1, 1, 1]} : vector<26x18x32xbf16> to vector<24x16x32xbf16>
    %33 = vector.extract_strided_slice %25 {offsets = [2, 1, 0], sizes = [24, 16, 32], strides = [1, 1, 1]} : vector<26x18x32xbf16> to vector<24x16x32xbf16>
    %34 = vector.extract_strided_slice %25 {offsets = [2, 2, 0], sizes = [24, 16, 32], strides = [1, 1, 1]} : vector<26x18x32xbf16> to vector<24x16x32xbf16>
    %35 = tpu.concatenate %26, %27, %28, %29, %30, %31, %32, %33, %34 in 2 : vector<24x16x32xbf16>, vector<24x16x32xbf16>, vector<24x16x32xbf16>, vector<24x16x32xbf16>, vector<24x16x32xbf16>, vector<24x16x32xbf16>, vector<24x16x32xbf16>, vector<24x16x32xbf16>, vector<24x16x32xbf16> -> vector<24x16x288xbf16>
    %36 = vector.shape_cast %35 : vector<24x16x288xbf16> to vector<384x288xbf16>
    %c0_11 = arith.constant 0 : index
    %c0_12 = arith.constant 0 : index
    %37 = vector.load %arg5[%c0_11, %c0_12] : memref<288x32xf32, #tpu.memory_space<vmem>>, vector<288x32xf32>
    %38 = arith.truncf %37 : vector<288x32xf32> to vector<288x32xbf16>
    %cst_13 = arith.constant dense<0.000000e+00> : vector<384x32xf32>
    %39 = tpu.matmul %36, %38, %cst_13 {dimension_numbers = #tpu.dot_dimension_numbers<[1], [0], [0], [1], [0, 0, 1, 1], [], []>} : vector<384x288xbf16>, vector<288x32xbf16>, vector<384x32xf32> -> vector<384x32xf32>
    %c0_14 = arith.constant 0 : index
    %c0_15 = arith.constant 0 : index
    %40 = vector.load %arg6[%c0_14, %c0_15] : memref<1x32xf32, #tpu.memory_space<vmem>>, vector<1x32xf32>
    %41 = vector.broadcast %40 : vector<1x32xf32> to vector<384x32xf32>
    %42 = arith.addf %39, %41 : vector<384x32xf32>
    %cst_16 = arith.constant 0.000000e+00 : f32
    %43 = vector.broadcast %cst_16 : f32 to vector<384x32xf32>
    %44 = arith.maximumf %42, %43 : vector<384x32xf32>
    %45 = tpu.iota {dimensions = array<i32: 0>} : vector<384x32xi32>
    %c4_i32 = arith.constant 4 : i32
    %46 = arith.subi %0, %c4_i32 : i32
    %c16_i32_17 = arith.constant 16 : i32
    %47 = arith.muli %46, %c16_i32_17 : i32
    %48 = vector.broadcast %47 : i32 to vector<384x32xi32>
    %49 = arith.addi %45, %48 : vector<384x32xi32>
    %c0_i32_18 = arith.constant 0 : i32
    %50 = vector.broadcast %c0_i32_18 : i32 to vector<384x32xi32>
    %51 = arith.cmpi sge, %49, %50 : vector<384x32xi32>
    %c256_i32_19 = arith.constant 256 : i32
    %52 = vector.broadcast %c256_i32_19 : i32 to vector<384x32xi32>
    %53 = arith.cmpi slt, %49, %52 : vector<384x32xi32>
    %54 = arith.andi %51, %53 : vector<384x32xi1>
    %cst_20 = arith.constant 0.000000e+00 : f32
    %55 = vector.broadcast %cst_20 : f32 to vector<384x32xf32>
    %56 = arith.select %54, %44, %55 : vector<384x32xi1>, vector<384x32xf32>
    %57 = vector.shape_cast %56 : vector<384x32xf32> to vector<24x16x32xf32>
    %58 = vector.extract_strided_slice %22 {offsets = [2, 0, 0], sizes = [22, 16, 32], strides = [1, 1, 1]} : vector<26x16x32xf32> to vector<22x16x32xf32>
    %59 = arith.truncf %57 : vector<24x16x32xf32> to vector<24x16x32xbf16>
    %cst_21 = arith.constant 0.000000e+00 : bf16
    %60 = vector.broadcast %cst_21 : bf16 to vector<24x1x32xbf16>
    %61 = tpu.concatenate %60, %59, %60 in 1 : vector<24x1x32xbf16>, vector<24x16x32xbf16>, vector<24x1x32xbf16> -> vector<24x18x32xbf16>
    %62 = vector.extract_strided_slice %61 {offsets = [0, 0, 0], sizes = [22, 16, 32], strides = [1, 1, 1]} : vector<24x18x32xbf16> to vector<22x16x32xbf16>
    %63 = vector.extract_strided_slice %61 {offsets = [0, 1, 0], sizes = [22, 16, 32], strides = [1, 1, 1]} : vector<24x18x32xbf16> to vector<22x16x32xbf16>
    %64 = vector.extract_strided_slice %61 {offsets = [0, 2, 0], sizes = [22, 16, 32], strides = [1, 1, 1]} : vector<24x18x32xbf16> to vector<22x16x32xbf16>
    %65 = vector.extract_strided_slice %61 {offsets = [1, 0, 0], sizes = [22, 16, 32], strides = [1, 1, 1]} : vector<24x18x32xbf16> to vector<22x16x32xbf16>
    %66 = vector.extract_strided_slice %61 {offsets = [1, 1, 0], sizes = [22, 16, 32], strides = [1, 1, 1]} : vector<24x18x32xbf16> to vector<22x16x32xbf16>
    %67 = vector.extract_strided_slice %61 {offsets = [1, 2, 0], sizes = [22, 16, 32], strides = [1, 1, 1]} : vector<24x18x32xbf16> to vector<22x16x32xbf16>
    %68 = vector.extract_strided_slice %61 {offsets = [2, 0, 0], sizes = [22, 16, 32], strides = [1, 1, 1]} : vector<24x18x32xbf16> to vector<22x16x32xbf16>
    %69 = vector.extract_strided_slice %61 {offsets = [2, 1, 0], sizes = [22, 16, 32], strides = [1, 1, 1]} : vector<24x18x32xbf16> to vector<22x16x32xbf16>
    %70 = vector.extract_strided_slice %61 {offsets = [2, 2, 0], sizes = [22, 16, 32], strides = [1, 1, 1]} : vector<24x18x32xbf16> to vector<22x16x32xbf16>
    %71 = tpu.concatenate %62, %63, %64, %65, %66, %67, %68, %69, %70 in 2 : vector<22x16x32xbf16>, vector<22x16x32xbf16>, vector<22x16x32xbf16>, vector<22x16x32xbf16>, vector<22x16x32xbf16>, vector<22x16x32xbf16>, vector<22x16x32xbf16>, vector<22x16x32xbf16>, vector<22x16x32xbf16> -> vector<22x16x288xbf16>
    %72 = vector.shape_cast %71 : vector<22x16x288xbf16> to vector<352x288xbf16>
    %c0_22 = arith.constant 0 : index
    %c0_23 = arith.constant 0 : index
    %73 = vector.load %arg7[%c0_22, %c0_23] : memref<288x32xf32, #tpu.memory_space<vmem>>, vector<288x32xf32>
    %74 = arith.truncf %73 : vector<288x32xf32> to vector<288x32xbf16>
    %cst_24 = arith.constant dense<0.000000e+00> : vector<352x32xf32>
    %75 = tpu.matmul %72, %74, %cst_24 {dimension_numbers = #tpu.dot_dimension_numbers<[1], [0], [0], [1], [0, 0, 1, 1], [], []>} : vector<352x288xbf16>, vector<288x32xbf16>, vector<352x32xf32> -> vector<352x32xf32>
    %c0_25 = arith.constant 0 : index
    %c0_26 = arith.constant 0 : index
    %76 = vector.load %arg8[%c0_25, %c0_26] : memref<1x32xf32, #tpu.memory_space<vmem>>, vector<1x32xf32>
    %77 = vector.broadcast %76 : vector<1x32xf32> to vector<352x32xf32>
    %78 = arith.addf %75, %77 : vector<352x32xf32>
    %79 = tpu.iota {dimensions = array<i32: 0>} : vector<352x32xi32>
    %c3_i32 = arith.constant 3 : i32
    %80 = arith.subi %0, %c3_i32 : i32
    %c16_i32_27 = arith.constant 16 : i32
    %81 = arith.muli %80, %c16_i32_27 : i32
    %82 = vector.broadcast %81 : i32 to vector<352x32xi32>
    %83 = arith.addi %79, %82 : vector<352x32xi32>
    %c0_i32_28 = arith.constant 0 : i32
    %84 = vector.broadcast %c0_i32_28 : i32 to vector<352x32xi32>
    %85 = arith.cmpi sge, %83, %84 : vector<352x32xi32>
    %c256_i32_29 = arith.constant 256 : i32
    %86 = vector.broadcast %c256_i32_29 : i32 to vector<352x32xi32>
    %87 = arith.cmpi slt, %83, %86 : vector<352x32xi32>
    %88 = arith.andi %85, %87 : vector<352x32xi1>
    %cst_30 = arith.constant 0.000000e+00 : f32
    %89 = vector.broadcast %cst_30 : f32 to vector<352x32xf32>
    %90 = arith.select %88, %78, %89 : vector<352x32xi1>, vector<352x32xf32>
    %91 = vector.shape_cast %90 : vector<352x32xf32> to vector<22x16x32xf32>
    %92 = arith.addf %91, %58 : vector<22x16x32xf32>
    %93 = arith.truncf %92 : vector<22x16x32xf32> to vector<22x16x32xbf16>
    %cst_31 = arith.constant 0.000000e+00 : bf16
    %94 = vector.broadcast %cst_31 : bf16 to vector<22x1x32xbf16>
    %95 = tpu.concatenate %94, %93, %94 in 1 : vector<22x1x32xbf16>, vector<22x16x32xbf16>, vector<22x1x32xbf16> -> vector<22x18x32xbf16>
    %96 = vector.extract_strided_slice %95 {offsets = [0, 0, 0], sizes = [20, 16, 32], strides = [1, 1, 1]} : vector<22x18x32xbf16> to vector<20x16x32xbf16>
    %97 = vector.extract_strided_slice %95 {offsets = [0, 1, 0], sizes = [20, 16, 32], strides = [1, 1, 1]} : vector<22x18x32xbf16> to vector<20x16x32xbf16>
    %98 = vector.extract_strided_slice %95 {offsets = [0, 2, 0], sizes = [20, 16, 32], strides = [1, 1, 1]} : vector<22x18x32xbf16> to vector<20x16x32xbf16>
    %99 = vector.extract_strided_slice %95 {offsets = [1, 0, 0], sizes = [20, 16, 32], strides = [1, 1, 1]} : vector<22x18x32xbf16> to vector<20x16x32xbf16>
    %100 = vector.extract_strided_slice %95 {offsets = [1, 1, 0], sizes = [20, 16, 32], strides = [1, 1, 1]} : vector<22x18x32xbf16> to vector<20x16x32xbf16>
    %101 = vector.extract_strided_slice %95 {offsets = [1, 2, 0], sizes = [20, 16, 32], strides = [1, 1, 1]} : vector<22x18x32xbf16> to vector<20x16x32xbf16>
    %102 = vector.extract_strided_slice %95 {offsets = [2, 0, 0], sizes = [20, 16, 32], strides = [1, 1, 1]} : vector<22x18x32xbf16> to vector<20x16x32xbf16>
    %103 = vector.extract_strided_slice %95 {offsets = [2, 1, 0], sizes = [20, 16, 32], strides = [1, 1, 1]} : vector<22x18x32xbf16> to vector<20x16x32xbf16>
    %104 = vector.extract_strided_slice %95 {offsets = [2, 2, 0], sizes = [20, 16, 32], strides = [1, 1, 1]} : vector<22x18x32xbf16> to vector<20x16x32xbf16>
    %105 = tpu.concatenate %96, %97, %98, %99, %100, %101, %102, %103, %104 in 2 : vector<20x16x32xbf16>, vector<20x16x32xbf16>, vector<20x16x32xbf16>, vector<20x16x32xbf16>, vector<20x16x32xbf16>, vector<20x16x32xbf16>, vector<20x16x32xbf16>, vector<20x16x32xbf16>, vector<20x16x32xbf16> -> vector<20x16x288xbf16>
    %106 = vector.shape_cast %105 : vector<20x16x288xbf16> to vector<320x288xbf16>
    %c0_32 = arith.constant 0 : index
    %c0_33 = arith.constant 0 : index
    %107 = vector.load %arg9[%c0_32, %c0_33] : memref<288x32xf32, #tpu.memory_space<vmem>>, vector<288x32xf32>
    %108 = arith.truncf %107 : vector<288x32xf32> to vector<288x32xbf16>
    %cst_34 = arith.constant dense<0.000000e+00> : vector<320x32xf32>
    %109 = tpu.matmul %106, %108, %cst_34 {dimension_numbers = #tpu.dot_dimension_numbers<[1], [0], [0], [1], [0, 0, 1, 1], [], []>} : vector<320x288xbf16>, vector<288x32xbf16>, vector<320x32xf32> -> vector<320x32xf32>
    %c0_35 = arith.constant 0 : index
    %c0_36 = arith.constant 0 : index
    %110 = vector.load %arg10[%c0_35, %c0_36] : memref<1x32xf32, #tpu.memory_space<vmem>>, vector<1x32xf32>
    %111 = vector.broadcast %110 : vector<1x32xf32> to vector<320x32xf32>
    %112 = arith.addf %109, %111 : vector<320x32xf32>
    %cst_37 = arith.constant 0.000000e+00 : f32
    %113 = vector.broadcast %cst_37 : f32 to vector<320x32xf32>
    %114 = arith.maximumf %112, %113 : vector<320x32xf32>
    %115 = tpu.iota {dimensions = array<i32: 0>} : vector<320x32xi32>
    %c2_i32 = arith.constant 2 : i32
    %116 = arith.subi %0, %c2_i32 : i32
    %c16_i32_38 = arith.constant 16 : i32
    %117 = arith.muli %116, %c16_i32_38 : i32
    %118 = vector.broadcast %117 : i32 to vector<320x32xi32>
    %119 = arith.addi %115, %118 : vector<320x32xi32>
    %c0_i32_39 = arith.constant 0 : i32
    %120 = vector.broadcast %c0_i32_39 : i32 to vector<320x32xi32>
    %121 = arith.cmpi sge, %119, %120 : vector<320x32xi32>
    %c256_i32_40 = arith.constant 256 : i32
    %122 = vector.broadcast %c256_i32_40 : i32 to vector<320x32xi32>
    %123 = arith.cmpi slt, %119, %122 : vector<320x32xi32>
    %124 = arith.andi %121, %123 : vector<320x32xi1>
    %cst_41 = arith.constant 0.000000e+00 : f32
    %125 = vector.broadcast %cst_41 : f32 to vector<320x32xf32>
    %126 = arith.select %124, %114, %125 : vector<320x32xi1>, vector<320x32xf32>
    %127 = vector.shape_cast %126 : vector<320x32xf32> to vector<20x16x32xf32>
    %128 = vector.extract_strided_slice %92 {offsets = [2, 0, 0], sizes = [18, 16, 32], strides = [1, 1, 1]} : vector<22x16x32xf32> to vector<18x16x32xf32>
    %129 = arith.truncf %127 : vector<20x16x32xf32> to vector<20x16x32xbf16>
    %cst_42 = arith.constant 0.000000e+00 : bf16
    %130 = vector.broadcast %cst_42 : bf16 to vector<20x1x32xbf16>
    %131 = tpu.concatenate %130, %129, %130 in 1 : vector<20x1x32xbf16>, vector<20x16x32xbf16>, vector<20x1x32xbf16> -> vector<20x18x32xbf16>
    %132 = vector.extract_strided_slice %131 {offsets = [0, 0, 0], sizes = [18, 16, 32], strides = [1, 1, 1]} : vector<20x18x32xbf16> to vector<18x16x32xbf16>
    %133 = vector.extract_strided_slice %131 {offsets = [0, 1, 0], sizes = [18, 16, 32], strides = [1, 1, 1]} : vector<20x18x32xbf16> to vector<18x16x32xbf16>
    %134 = vector.extract_strided_slice %131 {offsets = [0, 2, 0], sizes = [18, 16, 32], strides = [1, 1, 1]} : vector<20x18x32xbf16> to vector<18x16x32xbf16>
    %135 = vector.extract_strided_slice %131 {offsets = [1, 0, 0], sizes = [18, 16, 32], strides = [1, 1, 1]} : vector<20x18x32xbf16> to vector<18x16x32xbf16>
    %136 = vector.extract_strided_slice %131 {offsets = [1, 1, 0], sizes = [18, 16, 32], strides = [1, 1, 1]} : vector<20x18x32xbf16> to vector<18x16x32xbf16>
    %137 = vector.extract_strided_slice %131 {offsets = [1, 2, 0], sizes = [18, 16, 32], strides = [1, 1, 1]} : vector<20x18x32xbf16> to vector<18x16x32xbf16>
    %138 = vector.extract_strided_slice %131 {offsets = [2, 0, 0], sizes = [18, 16, 32], strides = [1, 1, 1]} : vector<20x18x32xbf16> to vector<18x16x32xbf16>
    %139 = vector.extract_strided_slice %131 {offsets = [2, 1, 0], sizes = [18, 16, 32], strides = [1, 1, 1]} : vector<20x18x32xbf16> to vector<18x16x32xbf16>
    %140 = vector.extract_strided_slice %131 {offsets = [2, 2, 0], sizes = [18, 16, 32], strides = [1, 1, 1]} : vector<20x18x32xbf16> to vector<18x16x32xbf16>
    %141 = tpu.concatenate %132, %133, %134, %135, %136, %137, %138, %139, %140 in 2 : vector<18x16x32xbf16>, vector<18x16x32xbf16>, vector<18x16x32xbf16>, vector<18x16x32xbf16>, vector<18x16x32xbf16>, vector<18x16x32xbf16>, vector<18x16x32xbf16>, vector<18x16x32xbf16>, vector<18x16x32xbf16> -> vector<18x16x288xbf16>
    %142 = vector.shape_cast %141 : vector<18x16x288xbf16> to vector<288x288xbf16>
    %c0_43 = arith.constant 0 : index
    %c0_44 = arith.constant 0 : index
    %143 = vector.load %arg11[%c0_43, %c0_44] : memref<288x32xf32, #tpu.memory_space<vmem>>, vector<288x32xf32>
    %144 = arith.truncf %143 : vector<288x32xf32> to vector<288x32xbf16>
    %cst_45 = arith.constant dense<0.000000e+00> : vector<288x32xf32>
    %145 = tpu.matmul %142, %144, %cst_45 {dimension_numbers = #tpu.dot_dimension_numbers<[1], [0], [0], [1], [0, 0, 1, 1], [], []>} : vector<288x288xbf16>, vector<288x32xbf16>, vector<288x32xf32> -> vector<288x32xf32>
    %c0_46 = arith.constant 0 : index
    %c0_47 = arith.constant 0 : index
    %146 = vector.load %arg12[%c0_46, %c0_47] : memref<1x32xf32, #tpu.memory_space<vmem>>, vector<1x32xf32>
    %147 = vector.broadcast %146 : vector<1x32xf32> to vector<288x32xf32>
    %148 = arith.addf %145, %147 : vector<288x32xf32>
    %149 = tpu.iota {dimensions = array<i32: 0>} : vector<288x32xi32>
    %c1_i32 = arith.constant 1 : i32
    %150 = arith.subi %0, %c1_i32 : i32
    %c16_i32_48 = arith.constant 16 : i32
    %151 = arith.muli %150, %c16_i32_48 : i32
    %152 = vector.broadcast %151 : i32 to vector<288x32xi32>
    %153 = arith.addi %149, %152 : vector<288x32xi32>
    %c0_i32_49 = arith.constant 0 : i32
    %154 = vector.broadcast %c0_i32_49 : i32 to vector<288x32xi32>
    %155 = arith.cmpi sge, %153, %154 : vector<288x32xi32>
    %c256_i32_50 = arith.constant 256 : i32
    %156 = vector.broadcast %c256_i32_50 : i32 to vector<288x32xi32>
    %157 = arith.cmpi slt, %153, %156 : vector<288x32xi32>
    %158 = arith.andi %155, %157 : vector<288x32xi1>
    %cst_51 = arith.constant 0.000000e+00 : f32
    %159 = vector.broadcast %cst_51 : f32 to vector<288x32xf32>
    %160 = arith.select %158, %148, %159 : vector<288x32xi1>, vector<288x32xf32>
    %161 = vector.shape_cast %160 : vector<288x32xf32> to vector<18x16x32xf32>
    %162 = arith.addf %161, %128 : vector<18x16x32xf32>
    %163 = arith.truncf %162 : vector<18x16x32xf32> to vector<18x16x32xbf16>
    %cst_52 = arith.constant 0.000000e+00 : bf16
    %164 = vector.broadcast %cst_52 : bf16 to vector<18x1x32xbf16>
    %165 = tpu.concatenate %164, %163, %164 in 1 : vector<18x1x32xbf16>, vector<18x16x32xbf16>, vector<18x1x32xbf16> -> vector<18x18x32xbf16>
    %166 = vector.extract_strided_slice %165 {offsets = [0, 0, 0], sizes = [16, 16, 32], strides = [1, 1, 1]} : vector<18x18x32xbf16> to vector<16x16x32xbf16>
    %167 = vector.extract_strided_slice %165 {offsets = [0, 1, 0], sizes = [16, 16, 32], strides = [1, 1, 1]} : vector<18x18x32xbf16> to vector<16x16x32xbf16>
    %168 = vector.extract_strided_slice %165 {offsets = [0, 2, 0], sizes = [16, 16, 32], strides = [1, 1, 1]} : vector<18x18x32xbf16> to vector<16x16x32xbf16>
    %169 = vector.extract_strided_slice %165 {offsets = [1, 0, 0], sizes = [16, 16, 32], strides = [1, 1, 1]} : vector<18x18x32xbf16> to vector<16x16x32xbf16>
    %170 = vector.extract_strided_slice %165 {offsets = [1, 1, 0], sizes = [16, 16, 32], strides = [1, 1, 1]} : vector<18x18x32xbf16> to vector<16x16x32xbf16>
    %171 = vector.extract_strided_slice %165 {offsets = [1, 2, 0], sizes = [16, 16, 32], strides = [1, 1, 1]} : vector<18x18x32xbf16> to vector<16x16x32xbf16>
    %172 = vector.extract_strided_slice %165 {offsets = [2, 0, 0], sizes = [16, 16, 32], strides = [1, 1, 1]} : vector<18x18x32xbf16> to vector<16x16x32xbf16>
    %173 = vector.extract_strided_slice %165 {offsets = [2, 1, 0], sizes = [16, 16, 32], strides = [1, 1, 1]} : vector<18x18x32xbf16> to vector<16x16x32xbf16>
    %174 = vector.extract_strided_slice %165 {offsets = [2, 2, 0], sizes = [16, 16, 32], strides = [1, 1, 1]} : vector<18x18x32xbf16> to vector<16x16x32xbf16>
    %175 = tpu.concatenate %166, %167, %168, %169, %170, %171, %172, %173, %174 in 2 : vector<16x16x32xbf16>, vector<16x16x32xbf16>, vector<16x16x32xbf16>, vector<16x16x32xbf16>, vector<16x16x32xbf16>, vector<16x16x32xbf16>, vector<16x16x32xbf16>, vector<16x16x32xbf16>, vector<16x16x32xbf16> -> vector<16x16x288xbf16>
    %176 = vector.shape_cast %175 : vector<16x16x288xbf16> to vector<256x288xbf16>
    %c0_53 = arith.constant 0 : index
    %c0_54 = arith.constant 0 : index
    %177 = vector.load %arg13[%c0_53, %c0_54] : memref<288x4xf32, #tpu.memory_space<vmem>>, vector<288x4xf32>
    %178 = arith.truncf %177 : vector<288x4xf32> to vector<288x4xbf16>
    %cst_55 = arith.constant dense<0.000000e+00> : vector<256x4xf32>
    %179 = tpu.matmul %176, %178, %cst_55 {dimension_numbers = #tpu.dot_dimension_numbers<[1], [0], [0], [1], [0, 0, 1, 1], [], []>} : vector<256x288xbf16>, vector<288x4xbf16>, vector<256x4xf32> -> vector<256x4xf32>
    %c0_56 = arith.constant 0 : index
    %c0_57 = arith.constant 0 : index
    %180 = vector.load %arg14[%c0_56, %c0_57] : memref<1x4xf32, #tpu.memory_space<vmem>>, vector<1x4xf32>
    %181 = vector.broadcast %180 : vector<1x4xf32> to vector<256x4xf32>
    %182 = arith.addf %179, %181 : vector<256x4xf32>
    %183 = vector.shape_cast %182 : vector<256x4xf32> to vector<16x16x4xf32>
    %184 = vector.shape_cast %183 : vector<16x16x4xf32> to vector<1x16x16x4xf32>
    %c0_58 = arith.constant 0 : index
    %c0_59 = arith.constant 0 : index
    %c0_60 = arith.constant 0 : index
    %c0_61 = arith.constant 0 : index
    %185 = vector.load %arg15[%c0_58, %c0_59, %c0_60, %c0_61] : memref<1x16x16x4xf32, #tpu.memory_space<vmem>>, vector<1x16x16x4xf32>
    tpu.vector_store %arg15[%c0_58, %c0_59, %c0_60, %c0_61], %184 {strides = array<i32>} : memref<1x16x16x4xf32, #tpu.memory_space<vmem>>, vector<1x16x16x4xf32>,
    return
  }
  func.func @transform_0(%arg0: i32, %arg1: i32) -> (i32, i32, i32, i32) {
    %c0_i32 = arith.constant 0 : i32
    %c0_i32_0 = arith.constant 0 : i32
    %c0_i32_1 = arith.constant 0 : i32
    return %arg0, %arg1, %c0_i32, %c0_i32_0 : i32, i32, i32, i32
  }
  func.func @transform_1(%arg0: i32, %arg1: i32) -> (i32, i32) {
    %c0_i32 = arith.constant 0 : i32
    %c0_i32_0 = arith.constant 0 : i32
    %c0_i32_1 = arith.constant 0 : i32
    return %c0_i32, %c0_i32_0 : i32, i32
  }
  func.func @transform_2(%arg0: i32, %arg1: i32) -> (i32, i32) {
    %c0_i32 = arith.constant 0 : i32
    %c0_i32_0 = arith.constant 0 : i32
    %c0_i32_1 = arith.constant 0 : i32
    return %c0_i32, %c0_i32_0 : i32, i32
  }
  func.func @transform_3(%arg0: i32, %arg1: i32) -> (i32, i32) {
    %c0_i32 = arith.constant 0 : i32
    %c0_i32_0 = arith.constant 0 : i32
    %c0_i32_1 = arith.constant 0 : i32
    return %c0_i32, %c0_i32_0 : i32, i32
  }
  func.func @transform_4(%arg0: i32, %arg1: i32) -> (i32, i32) {
    %c0_i32 = arith.constant 0 : i32
    %c0_i32_0 = arith.constant 0 : i32
    %c0_i32_1 = arith.constant 0 : i32
    return %c0_i32, %c0_i32_0 : i32, i32
  }
  func.func @transform_5(%arg0: i32, %arg1: i32) -> (i32, i32) {
    %c0_i32 = arith.constant 0 : i32
    %c0_i32_0 = arith.constant 0 : i32
    %c0_i32_1 = arith.constant 0 : i32
    return %c0_i32, %c0_i32_0 : i32, i32
  }
  func.func @transform_6(%arg0: i32, %arg1: i32) -> (i32, i32) {
    %c0_i32 = arith.constant 0 : i32
    %c0_i32_0 = arith.constant 0 : i32
    %c0_i32_1 = arith.constant 0 : i32
    return %c0_i32, %c0_i32_0 : i32, i32
  }
  func.func @transform_7(%arg0: i32, %arg1: i32) -> (i32, i32) {
    %c0_i32 = arith.constant 0 : i32
    %c0_i32_0 = arith.constant 0 : i32
    %c0_i32_1 = arith.constant 0 : i32
    return %c0_i32, %c0_i32_0 : i32, i32
  }
  func.func @transform_8(%arg0: i32, %arg1: i32) -> (i32, i32) {
    %c0_i32 = arith.constant 0 : i32
    %c0_i32_0 = arith.constant 0 : i32
    %c0_i32_1 = arith.constant 0 : i32
    return %c0_i32, %c0_i32_0 : i32, i32
  }
  func.func @transform_9(%arg0: i32, %arg1: i32) -> (i32, i32) {
    %c0_i32 = arith.constant 0 : i32
    %c0_i32_0 = arith.constant 0 : i32
    %c0_i32_1 = arith.constant 0 : i32
    return %c0_i32, %c0_i32_0 : i32, i32
  }
  func.func @transform_10(%arg0: i32, %arg1: i32) -> (i32, i32) {
    %c0_i32 = arith.constant 0 : i32
    %c0_i32_0 = arith.constant 0 : i32
    %c0_i32_1 = arith.constant 0 : i32
    return %c0_i32, %c0_i32_0 : i32, i32
  }
  func.func @transform_11(%arg0: i32, %arg1: i32) -> (i32, i32) {
    %c0_i32 = arith.constant 0 : i32
    %c0_i32_0 = arith.constant 0 : i32
    %c0_i32_1 = arith.constant 0 : i32
    return %c0_i32, %c0_i32_0 : i32, i32
  }
  func.func @transform_12(%arg0: i32, %arg1: i32) -> (i32, i32) {
    %c0_i32 = arith.constant 0 : i32
    %c0_i32_0 = arith.constant 0 : i32
    %c0_i32_1 = arith.constant 0 : i32
    return %c0_i32, %c0_i32_0 : i32, i32
  }
  func.func @transform_13(%arg0: i32, %arg1: i32) -> (i32, i32, i32, i32) {
    %c0_i32 = arith.constant 0 : i32
    %c0_i32_0 = arith.constant 0 : i32
    %c0_i32_1 = arith.constant 0 : i32
    return %arg0, %arg1, %c0_i32, %c0_i32_0 : i32, i32, i32, i32
  }
}

</mosaic_0001>

<bundles_post_ra>
// kernel: vivo_forward.1
= control target key start
LH: loop header
LB: loop body
LE: loop exit
PB: predicated region body
PF: predicated region fallthrough
CT: control target
= control target key end

     0   :  { %s12050_s25 = smov 0   ;;  %s12052_s26 = smov 0   ;;  %s17378_s0 = inlined_call_operand.vmem [shape: f32[2,1,416,9], index: 0, kind: input, shape index: {}]   ;;  %s17379_s1 = inlined_call_operand.vmem [shape: f32[9,32], index: 1, kind: input, shape index: {}]   ;;  %s17380_s2 = inlined_call_operand.vmem [shape: f32[1,32], index: 2, kind: input, shape index: {}]   ;;  %s17381_s3 = inlined_call_operand.vmem [shape: f32[288,32], index: 3, kind: input, shape index: {}]   ;;  %s17382_s4 = inlined_call_operand.vmem [shape: f32[1,32], index: 4, kind: input, shape index: {}]   ;;  %s17383_s5 = inlined_call_operand.vmem [shape: f32[288,32], index: 5, kind: input, shape index: {}]   ;;  %s17384_s6 = inlined_call_operand.vmem [shape: f32[1,32], index: 6, kind: input, shape index: {}]   ;;  %s17385_s7 = inlined_call_operand.vmem [shape: f32[288,32], index: 7, kind: input, shape index: {}]   ;;  %s17386_s8 = inlined_call_operand.vmem [shape: f32[1,32], index: 8, kind: input, shape index: {}]   ;;  %s17387_s9 = inlined_call_operand.vmem [shape: f32[288,32], index: 9, kind: input, shape index: {}]   ;;  %s17388_s10 = inlined_call_operand.vmem [shape: f32[1,32], index: 10, kind: input, shape index: {}]   ;;  %s17389_s11 = inlined_call_operand.vmem [shape: f32[288,4], index: 11, kind: input, shape index: {}]   ;;  %s17390_s12 = inlined_call_operand.vmem [shape: f32[1,4], index: 12, kind: input, shape index: {}]   ;;  %s17391_s13 = inlined_call_operand.vmem [shape: f32[2,16,16,4], index: 13, kind: output, shape index: {}]  }
   0x1   :  { %s12054_s27 = smov 0  }
   0x2 LB: > { %s35_s28 = sadd.s32 1, %s11970_s26  ;;  %p10983_p0 = scmp.ge.s32.totalorder %s11974_s27, 1  ;;  %s11974_s27 = sphi %s12054_s27, %s23_s27   ;;  %s11970_s26 = sphi %s12052_s26, %s17693_s26   ;;  %s11966_s25 = sphi %s12050_s25, %s17692_s25  }
   0x3   : > { %p37_p1 = scmp.ge.s32.totalorder %s35_s28, 2  ;;  %p407_p2 = scmp.lt.s32.totalorder %s11974_s27, 3 }
   0x5   : > { %s17695_s28 = smov (%p37_p1, %s35_s28), 0  ;;  %p408_p3 = pnand %p10983_p0, %p407_p2 }
   0x7   : > { %411 = sbr.rel (%p408_p3) target bundleno = 2167 (0x877), region = 72 }
   0xc   : > { %v535_v0 = vld [vmem:[%s17379_s1 + $0x8] sm:$0x1]  ;;  %vm700_vm0 = vcmask 1040384   ;;  %vm1658_vm1 = vsmask.f32 256  ;;  %v534_v1 = vld [vmem:[%s17379_s1] sm:$0xff] }
   0xd   : > { %11425 = vmatprep.subr.msk.mxu0 %vm700_vm0, %v535_v0  ;;  %vm12074_vm2 = vmand %vm700_vm0, %vm1658_vm1  ;;  %v17499_v2 = vmov 0  ;;  %p460_p4 = scmp.lt.s32.totalorder %s11966_s25, 1  ;;  %v17406_v3 = vmov 0   ;;  %v2821_v5 = vld [vmem:[%s17381_s3 + $0x70] sm:$0xff]  ;;  %v2822_v6 = vld [vmem:[%s17381_s3 + $0x78] sm:$0xff]  ;;  %vm2097_vm3 = vcmask 1046528  }
   0xe   : > { %v17500_v2 = vsel %vm12074_vm2, 4294967295, %v17499_v2  ;;  %11426 = vmatpush3.msk.msra.mxu0 %vm700_vm0, %v535_v0  ;;  %v1426_v4 = vrot.slane %v17406_v3, 7  ;;  %11727 = vmatprep.subr.bf16.mxu1 %v17406_v3  ;;  %v2850_v7 = vpack.c.bf16 %v2822_v6, %v2821_v5  ;;  %v2819_v10 = vld [vmem:[%s17381_s3 + $0x60] sm:$0xff]  ;;  %v2820_v11 = vld [vmem:[%s17381_s3 + $0x68] sm:$0xff]  ;;  %vm543_vm4 = vcmask 72704   ;;  %s11977_s15 = smov 96  }
   0xf   : > { %17501 = vst [vmem:[#allocation2_spill] sm:$0xff] %v17500_v2  ;;  %11427 = vmatprep.subr.mxu0 %v534_v1  ;;  %s17697_s25 = smov (!%p460_p4, %s11966_s25), 1  ;;  %v2849_v19 = vpack.c.bf16 %v2820_v11, %v2819_v10  ;;  %v2817_v20 = vld [vmem:[%s17381_s3 + $0x50] sm:$0xff]  ;;  %v2818_v21 = vld [vmem:[%s17381_s3 + $0x58] sm:$0xff]  ;;  %vm1712_vm5 = vsmask.f32 7424 }
  0x10   : > { %11428 = vmatpush3.msra.mxu0 %v534_v1  ;;  %v12090_v8 = vsel %vm12074_vm2, 0, %v1426_v4  ;;  %v1686_v9 = vsel %vm12074_vm2, %v1426_v4, 0  ;;  %s11759_s24 = smul.u32 416, %s17697_s25  ;;  %11743 = vmatpush1.bf16.msra.mxu1 %v2850_v7  ;;  %s11978_s20 = smov 64   ;;  %v2848_v31 = vpack.c.bf16 %v2818_v21, %v2817_v20  ;;  %v2815_v34 = vld [vmem:[%s17381_s3 + $0x40] sm:$0xff]  ;;  %v2816_v35 = vld [vmem:[%s17381_s3 + $0x48] sm:$0xff] }
  0x11   : > { %v12103_v12 = vpack.i.bf16 %v12090_v8, %v12090_v8  ;;  %v1721_v13 = vshll.u32 %v1686_v9, 16  ;;  %v2098_v14 = vrot.slane %v12090_v8, 1  ;;  %v2099_v15 = vrot.slane %v1686_v9, 1  ;;  %2940 = vmatprep.subr.bf16.mxu0 %v17406_v3  ;;  %11728 = vmatprep.subr.bf16.mxu1 %v17406_v3  ;;  %s11979_s21 = smov 32   ;;  %v2813_v39 = vld [vmem:[%s17381_s3 + $0x30] sm:$0xff]  ;;  %v2814_v40 = vld [vmem:[%s17381_s3 + $0x38] sm:$0xff] }
  0x12   : > { %v1714_v16 = vshrl.u32 %v12090_v8, 16  ;;  %v1716_v17 = vshll.u32 %v12090_v8, 16  ;;  %s12113_s14 = scalar_lea.vmem %s17378_s0, %s11759_s24  ;;  %v2847_v37 = vpack.c.bf16 %v2816_v35, %v2815_v34  ;;  %v2846_v42 = vpack.c.bf16 %v2814_v40, %v2813_v39  ;;  %v2811_v44 = vld [vmem:[%s17381_s3 + $0x20] sm:$0xff]  ;;  %v2812_v45 = vld [vmem:[%s17381_s3 + $0x28] sm:$0xff]  ;;  %v2809_v49 = vld [vmem:[%s17381_s3 + $0x10] sm:$0xff] }
  0x13   : > { %17502 = vst [vmem:[#allocation3_spill] sm:$0xff] %v12103_v12  ;;  %11789 = vrot.lane.b32.xlu0 %v12103_v12, %s11977_s15  ;;  %v12118_v18 = vsel %vm2097_vm3, %v2098_v14, %v2099_v15  ;;  %v482_v22 = vld [vmem:[%s12113_s14] sm:$0xff]  ;;  %v483_v23 = vld [vmem:[%s12113_s14 + $0x8] sm:$0xff]  ;;  %v484_v24 = vld [vmem:[%s12113_s14 + $0x10] sm:$0xff]  ;;  %v1723_v25 = vrot.slane %v1721_v13, 1  ;;  %v2845_v47 = vpack.c.bf16 %v2812_v45, %v2811_v44  ;;  %vm2444_vm6 = vcmask 261120  }
  0x14   : > { %v12131_v26 = vpack.i.bf16 %v12118_v18, %v12118_v18  ;;  %v1718_v27 = vrot.slane %v1716_v17, 1  ;;  %v12135_v28 = vpack.i.bf16 %v12118_v18, %v12090_v8  ;;  %11429 = vmatprep.mubr.msk.f32.mxu0 %vm543_vm4, %v482_v22  ;;  %11744 = vmatpush1.bf16.msra.mxu1 %v2849_v19  ;;  %v485_v30 = vld [vmem:[%s12113_s14 + $0x18] sm:$0xff]  ;;  %v486_v32 = vld [vmem:[%s12113_s14 + $0x20] sm:$0xff]  ;;  %v487_v36 = vld [vmem:[%s12113_s14 + $0x28] sm:$0xff]  ;;  %vm2493_vm7 = vcmask 523264  }
  0x15   : > { %11430 = vmatmul.mubr.msk.f32.vlgmr.msra.gmra.mxu0 %vm543_vm4, %v483_v23  ;;  %11729 = vmatprep.subr.bf16.mxu1 %v17406_v3  ;;  %v488_v38 = vld [vmem:[%s12113_s14 + $0x30] sm:$0xff]  ;;  %v489_v41 = vld [vmem:[%s12113_s14 + $0x38] sm:$0xff]  ;;  %v490_v43 = vld [vmem:[%s12113_s14 + $0x40] sm:$0xff]  ;;  %vm2542_vm8 = vcmask 785408   ;;  %vm10850_vm9 = vcmask 31744  }
  0x16   : > { %17503 = vst [vmem:[#allocation4_spill] sm:$0xff] %v12131_v26  ;;  %17504 = vst [vmem:[#allocation5_spill] sm:$0xff] %v12135_v28  ;;  %v1719_v29 = vor.u32 %v1718_v27, %v1714_v16  ;;  %11799 = vrot.lane.b32.xlu1 %v12135_v28, %s11978_s20  ;;  %11432 = vmatprep.mubr.msk.f32.mxu0 %vm543_vm4, %v484_v24  ;;  %v491_v46 = vld [vmem:[%s12113_s14 + $0x48] sm:$0xff]  ;;  %v492_v48 = vld [vmem:[%s12113_s14 + $0x50] sm:$0xff] }
  0x17   : > { %11794 = vrot.lane.b32.xlu0 %v12131_v26, %s11979_s21  ;;  %2941 = vmatpush1.bf16.msra.mxu0 %v2850_v7  ;;  %v2810_v50 = vld [vmem:[%s17381_s3 + $0x18] sm:$0xff]  ;;  %v494_v53 = vld [vmem:[%s12113_s14 + $0x60] sm:$0xff]  ;;  %v2808_v55 = vld [vmem:[%s17381_s3 + $0x8] sm:$0xff] }
  0x18   : > { %v12147_v33 = vsel %vm1712_vm5, %v1719_v29, %v1723_v25  ;;  %2942 = vmatprep.subr.bf16.mxu0 %v17406_v3  ;;  %11745 = vmatpush1.bf16.msra.mxu1 %v2848_v31  ;;  %v493_v51 = vld [vmem:[%s12113_s14 + $0x58] sm:$0xff]  ;;  %v2844_v52 = vpack.c.bf16 %v2810_v50, %v2809_v49  ;;  %v2807_v54 = vld [vmem:[%s17381_s3] sm:$0xff]  ;;  %v495_v56 = vld [vmem:[%s12113_s14 + $0x68] sm:$0xff] }
  0x19   : > { %11433 = vmatmul.mubr.msk.f32.gmra.mxu0 %vm543_vm4, %v485_v30  ;;  %11730 = vmatprep.subr.bf16.mxu1 %v17406_v3  ;;  %v2843_v57 = vpack.c.bf16 %v2808_v55, %v2807_v54  ;;  %v496_v58 = vld [vmem:[%s12113_s14 + $0x70] sm:$0xff]  ;;  %v2838_v60 = vld [vmem:[%s17381_s3 + $0xf8] sm:$0xff]  ;;  %v498_v63 = vld [vmem:[%s12113_s14 + $0x80] sm:$0xff] }
  0x1a   : > { %2392 = vrot.lane.b32.xlu1 %v12147_v33, %s11977_s15  ;;  %11435 = vmatprep.mubr.msk.f32.mxu0 %vm543_vm4, %v486_v32  ;;  %v2837_v59 = vld [vmem:[%s17381_s3 + $0xf0] sm:$0xff]  ;;  %v497_v61 = vld [vmem:[%s12113_s14 + $0x78] sm:$0xff]  ;;  %v2835_v0 = vld [vmem:[%s17381_s3 + $0xe0] sm:$0xff] }
  0x1b   : > { %2001 = vrot.lane.b32.xlu0 %v12147_v33, %s11979_s21  ;;  %2943 = vmatpush1.bf16.msra.mxu0 %v2849_v19  ;;  %v2858_v62 = vpack.c.bf16 %v2838_v60, %v2837_v59  ;;  %v2836_v1 = vld [vmem:[%s17381_s3 + $0xe8] sm:$0xff]  ;;  %v500_v6 = vld [vmem:[%s12113_s14 + $0x90] sm:$0xff]  ;;  %v2834_v9 = vld [vmem:[%s17381_s3 + $0xd8] sm:$0xff] }
  0x1c   : > { %2944 = vmatprep.subr.bf16.mxu0 %v17406_v3  ;;  %11746 = vmatpush1.bf16.msra.mxu1 %v2847_v37  ;;  %v499_v4 = vld [vmem:[%s12113_s14 + $0x88] sm:$0xff]  ;;  %v2857_v5 = vpack.c.bf16 %v2836_v1, %v2835_v0  ;;  %v2833_v7 = vld [vmem:[%s17381_s3 + $0xd0] sm:$0xff]  ;;  %v501_v10 = vld [vmem:[%s12113_s14 + $0x98] sm:$0xff] }
  0x1d   : > { %11436 = vmatmul.mubr.msk.f32.gmra.mxu0 %vm543_vm4, %v487_v36  ;;  %11731 = vmatprep.subr.bf16.mxu1 %v17406_v3  ;;  %v2856_v11 = vpack.c.bf16 %v2834_v9, %v2833_v7  ;;  %v502_v13 = vld [vmem:[%s12113_s14 + $0xa0] sm:$0xff]  ;;  %v2832_v15 = vld [vmem:[%s17381_s3 + $0xc8] sm:$0xff]  ;;  %v504_v19 = vld [vmem:[%s12113_s14 + $0xb0] sm:$0xff] }
  0x1e   : > { %2003 = vrot.lane.b32.xlu1 %v12147_v33, %s11979_s21  ;;  %11438 = vmatprep.mubr.msk.f32.mxu0 %vm543_vm4, %v488_v38  ;;  %v2831_v14 = vld [vmem:[%s17381_s3 + $0xc0] sm:$0xff]  ;;  %v503_v16 = vld [vmem:[%s12113_s14 + $0xa8] sm:$0xff]  ;;  %v505_v20 = vld [vmem:[%s12113_s14 + $0xb8] sm:$0xff] }
  0x1f   : > { %11804 = vrot.lane.b32.xlu0 %v12135_v28, %s11978_s20  ;;  %2945 = vmatpush1.bf16.msra.mxu0 %v2848_v31  ;;  %v2855_v17 = vpack.c.bf16 %v2832_v15, %v2831_v14  ;;  %v506_v21 = vld [vmem:[%s12113_s14 + $0xc0] sm:$0xff]  ;;  %v507_v22 = vld [vmem:[%s12113_s14 + $0xc8] sm:$0xff]  ;;  %v508_v23 = vld [vmem:[%s12113_s14 + $0xd0] sm:$0xff] }
  0x20   : > { %2946 = vmatprep.subr.bf16.mxu0 %v17406_v3  ;;  %11747 = vmatpush1.bf16.msra.mxu1 %v2846_v42  ;;  %v509_v24 = vld [vmem:[%s12113_s14 + $0xd8] sm:$0xff]  ;;  %v510_v25 = vld [vmem:[%s12113_s14 + $0xe0] sm:$0xff]  ;;  %v511_v27 = vld [vmem:[%s12113_s14 + $0xe8] sm:$0xff] }
  0x21   : > { %11439 = vmatmul.mubr.msk.f32.gmra.mxu0 %vm543_vm4, %v489_v41  ;;  %11732 = vmatprep.subr.bf16.mxu1 %v17406_v3  ;;  %v512_v29 = vld [vmem:[%s12113_s14 + $0xf0] sm:$0xff]  ;;  %v513_v30 = vld [vmem:[%s12113_s14 + $0xf8] sm:$0xff]  ;;  %v514_v31 = vld [vmem:[%s12113_s14 + $0x100] sm:$0xff] }
  0x22   : > { %2394 = vrot.lane.b32.xlu1 %v12147_v33, %s11977_s15  ;;  %11441 = vmatprep.mubr.msk.f32.mxu0 %vm543_vm4, %v490_v43  ;;  %v515_v32 = vld [vmem:[%s12113_s14 + $0x108] sm:$0xff]  ;;  %v2829_v34 = vld [vmem:[%s17381_s3 + $0xb0] sm:$0xff]  ;;  %v2830_v35 = vld [vmem:[%s17381_s3 + $0xb8] sm:$0xff] }
  0x23   : > { %2947 = vmatpush1.bf16.msra.mxu0 %v2847_v37  ;;  %v516_v36 = vld [vmem:[%s12113_s14 + $0x110] sm:$0xff]  ;;  %v2854_v37 = vpack.c.bf16 %v2830_v35, %v2829_v34  ;;  %v517_v38 = vld [vmem:[%s12113_s14 + $0x118] sm:$0xff]  ;;  %v2827_v39 = vld [vmem:[%s17381_s3 + $0xa0] sm:$0xff]  ;;  %11809 = vrot.lane.b32.xlu0 %v12131_v26, %s11979_s21 }
  0x24   : > { %2948 = vmatprep.subr.bf16.mxu0 %v17406_v3  ;;  %11748 = vmatpush1.bf16.msra.mxu1 %v2845_v47  ;;  %v2828_v40 = vld [vmem:[%s17381_s3 + $0xa8] sm:$0xff]  ;;  %v518_v41 = vld [vmem:[%s12113_s14 + $0x120] sm:$0xff]  ;;  %v2825_v44 = vld [vmem:[%s17381_s3 + $0x90] sm:$0xff] }
  0x25   : > { %11442 = vmatmul.mubr.msk.f32.gmra.mxu0 %vm543_vm4, %v491_v46  ;;  %11733 = vmatprep.subr.bf16.mxu1 %v17406_v3  ;;  %v519_v43 = vld [vmem:[%s12113_s14 + $0x128] sm:$0xff]  ;;  %v2826_v45 = vld [vmem:[%s17381_s3 + $0x98] sm:$0xff]  ;;  %v520_v46 = vld [vmem:[%s12113_s14 + $0x130] sm:$0xff] }
  0x26   : > { %2005 = vrot.lane.b32.xlu1 %v12147_v33, %s11979_s21  ;;  %11444 = vmatprep.mubr.msk.f32.mxu0 %vm543_vm4, %v492_v48  ;;  %v521_v48 = vld [vmem:[%s12113_s14 + $0x138] sm:$0xff]  ;;  %v2823_v49 = vld [vmem:[%s17381_s3 + $0x80] sm:$0xff]  ;;  %v2824_v50 = vld [vmem:[%s17381_s3 + $0x88] sm:$0xff] }
  0x27   : > { %2949 = vmatpush1.bf16.msra.mxu0 %v2846_v42  ;;  %v2853_v42 = vpack.c.bf16 %v2828_v40, %v2827_v39  ;;  %v524_v54 = vld [vmem:[%s12113_s14 + $0x150] sm:$0xff]  ;;  %v525_v55 = vld [vmem:[%s12113_s14 + $0x158] sm:$0xff]  ;;  %11814 = vrot.lane.b32.xlu0 %v12135_v28, %s11978_s20  ;;  %v527_v59 = vld [vmem:[%s12113_s14 + $0x168] sm:$0xff] }
  0x28   : > { %2950 = vmatprep.subr.bf16.mxu0 %v17406_v3  ;;  %11749 = vmatpush1.bf16.msra.mxu1 %v2844_v52  ;;  %v531_v0 = vld [vmem:[%s12113_s14 + $0x188] sm:$0xff]  ;;  %v532_v1 = vld [vmem:[%s12113_s14 + $0x190] sm:$0xff] }
  0x29   : > { %11445 = vmatmul.mubr.msk.f32.gmra.mxu0 %vm543_vm4, %v493_v51  ;;  %11734 = vmatprep.subr.bf16.mxu1 %v17406_v3  ;;  %v522_v51 = vld [vmem:[%s12113_s14 + $0x140] sm:$0xff] }
  0x2a   : > { %2396 = vrot.lane.b32.xlu1 %v12147_v33, %s11977_s15  ;;  %11447 = vmatprep.mubr.msk.f32.mxu0 %vm543_vm4, %v494_v53  ;;  %v523_v53 = vld [vmem:[%s12113_s14 + $0x148] sm:$0xff] }
  0x2b   : > { %2951 = vmatpush1.bf16.msra.mxu0 %v2845_v47  ;;  %v2852_v47 = vpack.c.bf16 %v2826_v45, %v2825_v44  ;;  %11819 = vrot.lane.b32.xlu0 %v12103_v12, %s11977_s15 }
  0x2c   : > { %2952 = vmatprep.subr.bf16.mxu0 %v17406_v3  ;;  %11750 = vmatpush1.bf16.msra.mxu1 %v2843_v57 }
  0x2d   : > { %11448 = vmatmul.mubr.msk.f32.gmra.mxu0 %vm543_vm4, %v495_v56  ;;  %11735 = vmatprep.subr.bf16.mxu1 %v17406_v3  ;;  %v526_v56 = vld [vmem:[%s12113_s14 + $0x160] sm:$0xff] }
  0x2e   : > { %2007 = vrot.lane.b32.xlu1 %v12147_v33, %s11979_s21  ;;  %11450 = vmatprep.mubr.msk.f32.mxu0 %vm543_vm4, %v496_v58  ;;  %v2842_v58 = vld [vmem:[%s17381_s3 + $0x118] sm:$0xff] }
  0x2f   : > { %2953 = vmatpush1.bf16.msra.mxu0 %v2844_v52  ;;  %v2851_v52 = vpack.c.bf16 %v2824_v50, %v2823_v49  ;;  %2009 = vrot.lane.b32.xlu0 %v12147_v33, %s11979_s21 }
  0x30   : > { %2954 = vmatprep.subr.bf16.mxu0 %v17406_v3  ;;  %11751 = vmatpush2.bf16.msra.mxu1 %v2858_v62 }
  0x31   : > { %11451 = vmatmul.mubr.msk.f32.gmra.mxu0 %vm543_vm4, %v497_v61  ;;  %11736 = vmatprep.subr.bf16.mxu1 %v17406_v3  ;;  %v528_v61 = vld [vmem:[%s12113_s14 + $0x170] sm:$0xff] }
  0x32   : > { %11453 = vmatprep.mubr.msk.f32.mxu0 %vm543_vm4, %v498_v63  ;;  %v530_v63 = vld [vmem:[%s12113_s14 + $0x180] sm:$0xff]  ;;  %11824 = vrot.lane.b32.xlu1 %v12131_v26, %s11978_s20 }
  0x33   : > { %2955 = vmatpush1.bf16.msra.mxu0 %v2843_v57  ;;  %v2841_v57 = vld [vmem:[%s17381_s3 + $0x110] sm:$0xff] }
  0x34   : > { %2956 = vmatprep.subr.bf16.mxu0 %v17406_v3  ;;  %11752 = vmatpush2.bf16.msra.mxu1 %v2857_v5  ;;  %v2860_v60 = vpack.c.bf16 %v2842_v58, %v2841_v57 }
  0x35   : > { %11454 = vmatmul.mubr.msk.f32.gmra.mxu0 %vm543_vm4, %v499_v4  ;;  %11737 = vmatprep.subr.bf16.mxu1 %v17406_v3  ;;  %v533_v4 = vld [vmem:[%s12113_s14 + $0x198] sm:$0xff] }
  0x36   : > { %11456 = vmatprep.mubr.msk.f32.mxu0 %vm543_vm4, %v500_v6 }
  0x37   : > { %2957 = vmatpush2.bf16.msra.mxu0 %v2858_v62  ;;  %v529_v62 = vld [vmem:[%s12113_s14 + $0x178] sm:$0xff] }
  0x38   : > { %2958 = vmatprep.subr.bf16.mxu0 %v17406_v3  ;;  %11753 = vmatpush2.bf16.msra.mxu1 %v2856_v11 }
  0x39   : > { %11457 = vmatmul.mubr.msk.f32.gmra.mxu0 %vm543_vm4, %v501_v10  ;;  %11738 = vmatprep.subr.bf16.mxu1 %v17406_v3 }
  0x3a   : > { %11459 = vmatprep.mubr.msk.f32.mxu0 %vm543_vm4, %v502_v13 }
  0x3b   : > { %2959 = vmatpush2.bf16.msra.mxu0 %v2857_v5 }
  0x3c   : > { %2960 = vmatprep.subr.bf16.mxu0 %v17406_v3  ;;  %11754 = vmatpush2.bf16.msra.mxu1 %v2855_v17 }
  0x3d   : > { %11460 = vmatmul.mubr.msk.f32.gmra.mxu0 %vm543_vm4, %v503_v16  ;;  %11739 = vmatprep.subr.bf16.mxu1 %v17406_v3  ;;  %v2839_v16 = vld [vmem:[%s17381_s3 + $0x100] sm:$0xff] }
  0x3e   : > { %11462 = vmatprep.mubr.msk.f32.mxu0 %vm543_vm4, %v504_v19 }
  0x3f   : > { %2961 = vmatpush2.bf16.msra.mxu0 %v2856_v11 }
  0x40   : > { %2962 = vmatprep.subr.bf16.mxu0 %v17406_v3  ;;  %11755 = vmatpush2.bf16.msra.mxu1 %v2854_v37 }
  0x41   : > { %11463 = vmatmul.mubr.msk.f32.gmra.mxu0 %vm543_vm4, %v505_v20  ;;  %11740 = vmatprep.subr.bf16.mxu1 %v17406_v3 }
  0x42   : > { %11465 = vmatprep.mubr.msk.f32.mxu0 %vm543_vm4, %v506_v21 }
  0x43   : > { %2963 = vmatpush2.bf16.msra.mxu0 %v2855_v17  ;;  %v2840_v17 = vld [vmem:[%s17381_s3 + $0x108] sm:$0xff] }
  0x44   : > { %2964 = vmatprep.subr.bf16.mxu0 %v17406_v3  ;;  %11756 = vmatpush2.bf16.msra.mxu1 %v2853_v42 }
  0x45   : > { %11466 = vmatmul.mubr.msk.f32.gmra.mxu0 %vm543_vm4, %v507_v22  ;;  %11741 = vmatprep.subr.bf16.mxu1 %v17406_v3 }
  0x46   : > { %11468 = vmatprep.mubr.msk.f32.mxu0 %vm543_vm4, %v508_v23 }
  0x47   : > { %2965 = vmatpush2.bf16.msra.mxu0 %v2854_v37 }
  0x48   : > { %2966 = vmatprep.subr.bf16.mxu0 %v17406_v3  ;;  %11757 = vmatpush2.bf16.msra.mxu1 %v2852_v47 }
  0x49   : > { %11469 = vmatmul.mubr.msk.f32.gmra.mxu0 %vm543_vm4, %v509_v24  ;;  %11742 = vmatprep.subr.bf16.mxu1 %v17406_v3 }
  0x4a   : > { %11471 = vmatprep.mubr.msk.f32.mxu0 %vm543_vm4, %v510_v25  ;;  %v2859_v25 = vpack.c.bf16 %v2840_v17, %v2839_v16 }
  0x4b   : > { %2967 = vmatpush2.bf16.msra.mxu0 %v2853_v42 }
  0x4c   : > { %2968 = vmatprep.subr.bf16.mxu0 %v17406_v3  ;;  %11758 = vmatpush2.bf16.msra.mxu1 %v2851_v52 }
  0x4d   : > { %11472 = vmatmul.mubr.msk.f32.gmra.mxu0 %vm543_vm4, %v511_v27 }
  0x4e   : > { %11474 = vmatprep.mubr.msk.f32.mxu0 %vm543_vm4, %v512_v29 }
  0x4f   : > { %2969 = vmatpush2.bf16.msra.mxu0 %v2852_v47 }
  0x50   : > { %2970 = vmatprep.subr.bf16.mxu0 %v17406_v3 }
  0x51   : > { %11475 = vmatmul.mubr.msk.f32.gmra.mxu0 %vm543_vm4, %v513_v30 }
  0x52   : > { %11477 = vmatprep.mubr.msk.f32.mxu0 %vm543_vm4, %v514_v31 }
  0x53   : > { %2971 = vmatpush2.bf16.msra.mxu0 %v2851_v52 }
  0x54   : > { %11507 = vmatprep.subr.bf16.mxu0 %v2860_v60 }
  0x55   : > { %11478 = vmatmul.mubr.msk.f32.gmra.mxu0 %vm543_vm4, %v515_v32 }
  0x56   : > { %11480 = vmatprep.mubr.msk.f32.mxu0 %vm543_vm4, %v516_v36 }
  0x59   : > { %11481 = vmatmul.mubr.msk.f32.gmra.mxu0 %vm543_vm4, %v517_v38 }
  0x5a   : > { %11483 = vmatprep.mubr.msk.f32.mxu0 %vm543_vm4, %v518_v41 }
  0x5d   : > { %11484 = vmatmul.mubr.msk.f32.gmra.mxu0 %vm543_vm4, %v519_v43 }
  0x5e   : > { %11486 = vmatprep.mubr.msk.f32.mxu0 %vm543_vm4, %v520_v46 }
  0x61   : > { %11487 = vmatmul.mubr.msk.f32.gmra.mxu0 %vm543_vm4, %v521_v48 }
  0x62   : > { %11489 = vmatprep.mubr.msk.f32.mxu0 %vm543_vm4, %v522_v51 }
  0x65   : > { %11490 = vmatmul.mubr.msk.f32.gmra.mxu0 %vm543_vm4, %v523_v53 }
  0x66   : > { %11492 = vmatprep.mubr.msk.f32.mxu0 %vm543_vm4, %v524_v54 }
  0x69   : > { %11493 = vmatmul.mubr.msk.f32.gmra.mxu0 %vm543_vm4, %v525_v55 }
  0x6a   : > { %11495 = vmatprep.mubr.msk.f32.mxu0 %vm543_vm4, %v526_v56 }
  0x6d   : > { %11496 = vmatmul.mubr.msk.f32.gmra.mxu0 %vm543_vm4, %v527_v59 }
  0x6e   : > { %11498 = vmatprep.mubr.msk.f32.mxu0 %vm543_vm4, %v528_v61 }
  0x71   : > { %11499 = vmatmul.mubr.msk.f32.gmra.mxu0 %vm543_vm4, %v529_v62 }
  0x72   : > { %11501 = vmatprep.mubr.msk.f32.mxu0 %vm543_vm4, %v530_v63 }
  0x75   : > { %11502 = vmatmul.mubr.msk.f32.gmra.mxu0 %vm543_vm4, %v531_v0 }
  0x76   : > { %11504 = vmatprep.mubr.msk.f32.mxu0 %vm543_vm4, %v532_v1 }
  0x79   : > { %11505 = vmatmul.mubr.msk.f32.gmra.mxu0 %vm543_vm4, %v533_v4 }
  0x85   : > { %v11790_v5 = vpop.permute.xlu0 %11789 }
  0x86   : > { %v11791_v13 = vunpack.i.l.bf16 %v11790_v5  ;;  %v11792_v34 = vunpack.i.h.bf16 %v11790_v5  ;;  %v12430_v5 = vld [vmem:[%s17380_s2] ss:$0 sm:$0xff] }
  0x88   : > { %v11800_v6 = vpop.permute.xlu1 %11799 }
  0x89   : > { %v11795_v7 = vpop.permute.xlu0 %11794  ;;  %v11801_v9 = vunpack.i.l.bf16 %v11800_v6  ;;  %v11802_v11 = vunpack.i.h.bf16 %v11800_v6 }
  0x8a   : > { %v11796_v10 = vunpack.i.l.bf16 %v11795_v7  ;;  %v11797_v19 = vunpack.i.h.bf16 %v11795_v7 }
  0x8c   : > { %v2393_v14 = vpop.permute.xlu1 %2392  ;;  %v2617_v15 = vsel %vm2444_vm6, %v12147_v33, %v11796_v10  ;;  %v2620_v32 = vsel %vm2444_vm6, %v12147_v33, %v11797_v19 }
  0x8d   : > { %v2002_v20 = vpop.permute.xlu0 %2001  ;;  %v2688_v21 = vsel %vm2493_vm7, %v2617_v15, %v11801_v9 }
  0x8e   : > { %v2446_v22 = vsel %vm2444_vm6, %v12090_v8, %v2002_v20  ;;  %v2736_v23 = vsel %vm2542_vm8, %v2688_v21, %v2393_v14 }
  0x8f   : > { %v2495_v24 = vsel %vm2493_vm7, %v2446_v22, %v11802_v11  ;;  %2972 = vmatprep.mubr.bf16.mxu0 %v2736_v23 }
  0x90   : > { %v2544_v27 = vsel %vm2542_vm8, %v2495_v24, %v11791_v13  ;;  %v2004_v29 = vpop.permute.xlu1 %2003 }
  0x91   : > { %2973 = vmatmul.mubr.bf16.vlgmr.msra.gmra.mxu0 %v2544_v27  ;;  %v2448_v30 = vsel %vm2444_vm6, %v12090_v8, %v2004_v29  ;;  %v11805_v31 = vpop.permute.xlu0 %11804 }
  0x92   : > { %v11807_v35 = vunpack.i.h.bf16 %v11805_v31  ;;  %v11806_v36 = vunpack.i.l.bf16 %v11805_v31  ;;  %11508 = vmatpush3.bf16.msra.mxu0 %v2860_v60 }
  0x93   : > { %11509 = vmatprep.subr.bf16.mxu0 %v2859_v25 }
  0x94   : > { %v2395_v37 = vpop.permute.xlu1 %2394  ;;  %v2690_v38 = vsel %vm2493_vm7, %v2620_v32, %v11806_v36  ;;  %v2497_v39 = vsel %vm2493_vm7, %v2448_v30, %v11807_v35 }
  0x95   : > { %v2739_v40 = vsel %vm2542_vm8, %v2690_v38, %v2395_v37  ;;  %v2547_v41 = vsel %vm2542_vm8, %v2497_v39, %v11792_v34  ;;  %v12413_v43 = vpop.permute.xlu0 %11809 }
  0x96   : > { %2980 = vmatprep.mubr.bf16.mxu0 %v2739_v40  ;;  %11510 = vmatpush3.bf16.msra.mxu0 %v2859_v25  ;;  %v11811_v47 = vunpack.i.l.bf16 %v12413_v43 }
  0x97   : > { %5098 = vmatprep.subr.bf16.mxu0 %v17406_v3 }
  0x98   : > { %v2006_v49 = vpop.permute.xlu1 %2005  ;;  %v2623_v57 = vsel %vm2444_vm6, %v12147_v33, %v11811_v47 }
  0x99   : > { %2981 = vmatmul.mubr.bf16.gmra.mxu0 %v2547_v41  ;;  %v11815_v46 = vpop.permute.xlu0 %11814  ;;  %v2450_v52 = vsel %vm2444_vm6, %v12090_v8, %v2006_v49 }
  0x9a   : > { %11511 = vmatprep.mubr.msk.bf16.mxu0 %vm2444_vm6, %v12118_v18  ;;  %v11817_v48 = vunpack.i.h.bf16 %v11815_v46  ;;  %v11816_v51 = vunpack.i.l.bf16 %v11815_v46 }
  0x9c   : > { %v2397_v56 = vpop.permute.xlu1 %2396  ;;  %v2499_v58 = vsel %vm2493_vm7, %v2450_v52, %v11817_v48  ;;  %v2692_v60 = vsel %vm2493_vm7, %v2623_v57, %v11816_v51 }
  0x9d   : > { %v12418_v54 = vpop.permute.xlu0 %11819  ;;  %v2742_v61 = vsel %vm2542_vm8, %v2692_v60, %v2397_v56 }
  0x9e   : > { %v11821_v55 = vunpack.i.l.bf16 %v12418_v54  ;;  %2988 = vmatprep.mubr.bf16.mxu1 %v2742_v61 }
  0xa0   : > { %v2550_v62 = vsel %vm2542_vm8, %v2499_v58, %v11821_v55 }
  0xa1   : > { %11512 = vmatmul.mubr.msk.bf16.vlgmr.msra.gmra.mxu0 %vm2444_vm6, %v12118_v18  ;;  %2989 = vmatmul.mubr.bf16.vlgmr.msra.gmra.mxu1 %v2550_v62 }
  0xa2   : > { %11515 = vmatprep.mubr.msk.bf16.mxu0 %vm2444_vm6, %v12118_v18 }
  0xd5   : > { %v11431_v42 = vpop.f32.mrf.mxu0 }
  0xd7   : > { %v770_v44 = vpop.f32.mrf.mxu0 }
  0xd9   : > { %v11434_v45 = vpop.f32.mrf.mxu0 }
  0xdb   : > { %v780_v50 = vpop.f32.mrf.mxu0 }
  0xdd   : > { %v11437_v53 = vpop.f32.mrf.mxu0 }
  0xdf   : > { %v790_v59 = vpop.f32.mrf.mxu0 }
  0xe1   : > { %v11440_v63 = vpop.f32.mrf.mxu0 }
  0xe3   : > { %v800_v0 = vpop.f32.mrf.mxu0 }
  0xe5   : > { %v11443_v1 = vpop.f32.mrf.mxu0 }
  0xe7   : > { %v810_v4 = vpop.f32.mrf.mxu0 }
  0xe9   : > { %v11446_v6 = vpop.f32.mrf.mxu0 }
  0xea   : > { %v12433_v7 = vadd.f32 %v11446_v6, %v12430_v5 }
  0xeb   : > { %v820_v9 = vpop.f32.mrf.mxu0 }
  0xec   : > { %17505 = vst [vmem:[#allocation6_spill] sm:$0xff] %v12433_v7  ;;  %v12436_v10 = vadd.f32 %v12430_v5, %v820_v9  ;;  %v17404_v13 = vmax.f32 %v12433_v7, 0.0 }
  0xed   : > { %v11449_v11 = vpop.f32.mrf.mxu0 }
  0xee   : > { %17506 = vst [vmem:[#allocation7_spill] sm:$0xff] %v12436_v10  ;;  %v17405_v14 = vmax.f32 %v12436_v10, 0.0  ;;  %v12441_v15 = vadd.f32 %v11449_v11, %v12430_v5 }
  0xef   : > { %v830_v16 = vpop.f32.mrf.mxu0 }
  0xf0   : > { %17507 = vst [vmem:[#allocation8_spill] sm:$0xff] %v12441_v15  ;;  %v1402_v17 = vpack.c.bf16 %v17404_v13, %v17405_v14  ;;  %v17402_v19 = vmax.f32 %v12441_v15, 0.0  ;;  %v12449_v20 = vadd.f32 %v12430_v5, %v830_v16 }
  0xf1   : > { %v11452_v21 = vpop.f32.mrf.mxu0 }
  0xf2   : > { %17508 = vst [vmem:[#allocation9_spill] sm:$0xff] %v12449_v20  ;;  %v1459_v22 = vshrl.u32 %v1402_v17, 16  ;;  %v17403_v23 = vmax.f32 %v12449_v20, 0.0  ;;  %v12453_v24 = vadd.f32 %v11452_v21, %v12430_v5  ;;  %v1462_v29 = vshll.u32 %v1402_v17, 16 }
  0xf3   : > { %v840_v25 = vpop.f32.mrf.mxu0 }
  0xf4   : > { %17509 = vst [vmem:[#allocation10_spill] sm:$0xff] %v12453_v24  ;;  %v1461_v27 = vrot.slane %v1459_v22, 7  ;;  %v1403_v30 = vpack.c.bf16 %v17402_v19, %v17403_v23  ;;  %v12460_v31 = vadd.f32 %v12430_v5, %v840_v25  ;;  %v17400_v32 = vmax.f32 %v12453_v24, 0.0 }
  0xf5   : > { %v11455_v34 = vpop.f32.mrf.mxu0 }
  0xf6   : > { %17510 = vst [vmem:[#allocation11_spill] sm:$0xff] %v12460_v31  ;;  %v1464_v35 = vor.u32 %v1462_v29, %v1461_v27  ;;  %v1691_v36 = vsel %vm12074_vm2, %v1461_v27, 0  ;;  %v1466_v37 = vshrl.u32 %v1403_v30, 16  ;;  %v1469_v38 = vshll.u32 %v1403_v30, 16 }
  0xf7   : > { %v17401_v39 = vmax.f32 %v12460_v31, 0.0  ;;  %v12467_v40 = vadd.f32 %v11455_v34, %v12430_v5  ;;  %v850_v41 = vpop.f32.mrf.mxu0  ;;  %v2114_v45 = vrot.slane %v1691_v36, 1  ;;  %v1781_v50 = vshll.u32 %v1691_v36, 16 }
  0xf8   : > { %v1468_v42 = vrot.slane %v1466_v37, 7  ;;  %v12471_v44 = vsel %vm12074_vm2, 0, %v1464_v35  ;;  %v12474_v46 = vadd.f32 %v12430_v5, %v850_v41 }
  0xf9   : > { %17511 = vst [vmem:[#allocation12_spill] sm:$0xff] %v12467_v40  ;;  %v1404_v47 = vpack.c.bf16 %v17400_v32, %v17401_v39  ;;  %2227 = vrot.lane.b32.xlu1 %v12471_v44, %s11977_s15  ;;  %2338 = vrot.lane.b32.xlu0 %v12471_v44, %s11978_s20  ;;  %v2113_v48 = vrot.slane %v12471_v44, 1  ;;  %v17396_v49 = vmax.f32 %v12467_v40, 0.0  ;;  %v11458_v51 = vpop.f32.mrf.mxu0  ;;  %v1776_v56 = vshll.u32 %v12471_v44, 16 }
  0xfa   : > { %17512 = vst [vmem:[#allocation13_spill] sm:$0xff] %v12474_v46  ;;  %v1471_v52 = vor.u32 %v1469_v38, %v1468_v42  ;;  %v12488_v53 = vsel %vm12074_vm2, %v1468_v42, 0  ;;  %v17397_v55 = vmax.f32 %v12474_v46, 0.0  ;;  %v1774_v0 = vshrl.u32 %v12471_v44, 16 }
  0xfb   : > { %v1473_v57 = vshrl.u32 %v1404_v47, 16  ;;  %v1476_v58 = vshll.u32 %v1404_v47, 16  ;;  %v2115_v59 = vsel %vm2097_vm3, %v2113_v48, %v2114_v45  ;;  %v2117_v60 = vrot.slane %v12488_v53, 1  ;;  %v860_v61 = vpop.f32.mrf.mxu0 }
  0xfc   : > { %v12496_v62 = vsel %vm12074_vm2, 0, %v1471_v52  ;;  %11516 = vmatmul.mubr.msk.bf16.gmra.mxu0 %vm2444_vm6, %v2115_v59  ;;  %v1405_v63 = vpack.c.bf16 %v17396_v49, %v17397_v55  ;;  %v1778_v1 = vrot.slane %v1776_v56, 1  ;;  %v12507_v9 = vadd.f32 %v11458_v51, %v12430_v5 }
  0xfd   : > { %v1475_v4 = vrot.slane %v1473_v57, 7  ;;  %2291 = vrot.lane.b32.xlu1 %v2115_v59, %s11979_s21  ;;  %v2116_v6 = vrot.slane %v12496_v62, 1  ;;  %v12510_v11 = vadd.f32 %v12430_v5, %v860_v61  ;;  %v11461_v16 = vpop.f32.mrf.mxu0  ;;  %v1783_v25 = vrot.slane %v1781_v50, 1 }
  0xfe   : > { %17513 = vst [vmem:[#allocation14_spill] sm:$0xff] %v12507_v9  ;;  %v1480_v17 = vshrl.u32 %v1405_v63, 16  ;;  %v1483_v21 = vshll.u32 %v1405_v63, 16  ;;  %v1779_v22 = vor.u32 %v1778_v1, %v1774_v0  ;;  %v17394_v34 = vmax.f32 %v12507_v9, 0.0 }
  0xff   : > { %17514 = vst [vmem:[#allocation15_spill] sm:$0xff] %v12510_v11  ;;  %v1478_v27 = vor.u32 %v1476_v58, %v1475_v4  ;;  %v12514_v29 = vsel %vm12074_vm2, %v1475_v4, 0  ;;  %v12517_v30 = vsel %vm2097_vm3, %v2116_v6, %v2117_v60  ;;  %v870_v35 = vpop.f32.mrf.mxu0  ;;  %v17395_v41 = vmax.f32 %v12510_v11, 0.0 }
 0x100   : > { %v1482_v36 = vrot.slane %v1480_v17, 7  ;;  %11519 = vmatprep.mubr.msk.bf16.mxu0 %vm2444_vm6, %v12517_v30  ;;  %v12523_v37 = vsel %vm1712_vm5, %v1779_v22, %v1783_v25  ;;  %v2120_v38 = vrot.slane %v12514_v29, 1  ;;  %v1788_v45 = vshll.u32 %v12496_v62, 16 }
 0x101   : > { %v12529_v42 = vsel %vm12074_vm2, 0, %v1478_v27  ;;  %2398 = vrot.lane.b32.xlu0 %v12523_v37, %s11977_s15  ;;  %2180 = vrot.lane.b32.xlu1 %v2115_v59, %s11978_s20  ;;  %v12536_v47 = vadd.f32 %v11461_v16, %v12430_v5  ;;  %v11464_v48 = vpop.f32.mrf.mxu0  ;;  %v1406_v56 = vpack.c.bf16 %v17394_v34, %v17395_v41  ;;  %v12562_v6 = vadd.f32 %v12430_v5, %v870_v35 }
 0x102   : > { %v1485_v50 = vor.u32 %v1483_v21, %v1482_v36  ;;  %v12540_v51 = vsel %vm12074_vm2, %v1482_v36, 0  ;;  %v2119_v52 = vrot.slane %v12529_v42, 1  ;;  %v1790_v57 = vrot.slane %v1788_v45, 1 }
 0x103   : > { %17515 = vst [vmem:[#allocation16_spill] sm:$0xff] %v12536_v47  ;;  %v2123_v58 = vrot.slane %v12540_v51, 1  ;;  %v880_v59 = vpop.f32.mrf.mxu0  ;;  %v1487_v63 = vshrl.u32 %v1406_v56, 16  ;;  %v1490_v0 = vshll.u32 %v1406_v56, 16  ;;  %v17392_v4 = vmax.f32 %v12536_v47, 0.0  ;;  %17516 = vst [vmem:[#allocation17_spill] sm:$0xff] %v12562_v6 }
 0x104   : > { %v12550_v60 = vsel %vm12074_vm2, 0, %v1485_v50  ;;  %v12553_v61 = vsel %vm2097_vm3, %v2119_v52, %v2120_v38  ;;  %v1786_v21 = vshrl.u32 %v12496_v62, 16  ;;  %v1793_v22 = vshll.u32 %v12488_v53, 16 }
 0x105   : > { %11520 = vmatmul.mubr.msk.bf16.gmra.mxu0 %vm2444_vm6, %v12553_v61  ;;  %2293 = vrot.lane.b32.xlu0 %v12517_v30, %s11979_s21  ;;  %v2122_v1 = vrot.slane %v12550_v60, 1  ;;  %v11467_v16 = vpop.f32.mrf.mxu0  ;;  %v1489_v17 = vrot.slane %v1487_v63, 7  ;;  %v12569_v25 = vadd.f32 %v11464_v48, %v12430_v5  ;;  %v17393_v36 = vmax.f32 %v12562_v6, 0.0 }
 0x106   : > { %2340 = vrot.lane.b32.xlu1 %v12496_v62, %s11978_s20  ;;  %v12576_v35 = vadd.f32 %v12430_v5, %v880_v59  ;;  %v1791_v52 = vor.u32 %v1790_v57, %v1786_v21  ;;  %v1795_v63 = vrot.slane %v1793_v22, 1  ;;  %v12609_v34 = vadd.f32 %v11467_v16, %v12430_v5 }
 0x107   : > { %17517 = vst [vmem:[#allocation18_spill] sm:$0xff] %v12569_v25  ;;  %v12572_v27 = vsel %vm2097_vm3, %v2122_v1, %v2123_v58  ;;  %v890_v38 = vpop.f32.mrf.mxu0  ;;  %v1492_v45 = vor.u32 %v1490_v0, %v1489_v17  ;;  %v12580_v50 = vsel %vm12074_vm2, %v1489_v17, 0  ;;  %v1407_v53 = vpack.c.bf16 %v17392_v4, %v17393_v36 }
 0x108   : > { %17518 = vst [vmem:[#allocation19_spill] sm:$0xff] %v12576_v35  ;;  %11523 = vmatprep.mubr.msk.bf16.mxu0 %vm2444_vm6, %v12572_v27  ;;  %v2126_v48 = vrot.slane %v12580_v50, 1  ;;  %v17398_v56 = vmax.f32 %v12569_v25, 0.0  ;;  %v17399_v58 = vmax.f32 %v12576_v35, 0.0  ;;  %v12605_v36 = vsel %vm1712_vm5, %v1791_v52, %v1795_v63  ;;  %17519 = vst [vmem:[#allocation20_spill] sm:$0xff] %v12609_v34 }
 0x109   : > { %2342 = vrot.lane.b32.xlu0 %v12529_v42, %s11978_s20  ;;  %v11470_v59 = vpop.f32.mrf.mxu0  ;;  %v12595_v57 = vsel %vm12074_vm2, 0, %v1492_v45  ;;  %v1494_v0 = vshrl.u32 %v1407_v53, 16  ;;  %v1497_v1 = vshll.u32 %v1407_v53, 16  ;;  %v1800_v45 = vshll.u32 %v12529_v42, 16 }
 0x10a   : > { %2229 = vrot.lane.b32.xlu1 %v12496_v62, %s11977_s15  ;;  %v2125_v17 = vrot.slane %v12595_v57, 1  ;;  %v1408_v21 = vpack.c.bf16 %v17398_v56, %v17399_v58  ;;  %v1805_v52 = vshll.u32 %v12514_v29, 16  ;;  %v17408_v16 = vmax.f32 %v12609_v34, 0.0 }
 0x10b   : > { %v900_v4 = vpop.f32.mrf.mxu0  ;;  %v1496_v22 = vrot.slane %v1494_v0, 7  ;;  %v12623_v63 = vadd.f32 %v12430_v5, %v890_v38  ;;  %v1798_v56 = vshrl.u32 %v12529_v42, 16  ;;  %v1802_v58 = vrot.slane %v1800_v45, 1 }
 0x10c   : > { %v12614_v53 = vsel %vm2097_vm3, %v2125_v17, %v2126_v48  ;;  %v1501_v41 = vshrl.u32 %v1408_v21, 16  ;;  %v1504_v49 = vshll.u32 %v1408_v21, 16  ;;  %v1807_v45 = vrot.slane %v1805_v52, 1 }
 0x10d   : > { %2400 = vrot.lane.b32.xlu0 %v12605_v36, %s11977_s15  ;;  %v11473_v55 = vpop.f32.mrf.mxu0  ;;  %11524 = vmatmul.mubr.msk.bf16.gmra.mxu0 %vm2444_vm6, %v12614_v53  ;;  %17520 = vst [vmem:[#allocation21_spill] sm:$0xff] %v12623_v63  ;;  %v1499_v0 = vor.u32 %v1497_v1, %v1496_v22  ;;  %v12627_v48 = vsel %vm12074_vm2, %v1496_v22, 0  ;;  %v17409_v32 = vmax.f32 %v12623_v63, 0.0  ;;  %v12658_v23 = vadd.f32 %v12430_v5, %v900_v4 }
 0x10e   : > { %2011 = vrot.lane.b32.xlu1 %v12523_v37, %s11979_s21  ;;  %v1503_v17 = vrot.slane %v1501_v41, 7  ;;  %v2129_v29 = vrot.slane %v12627_v48, 1  ;;  %v1803_v52 = vor.u32 %v1802_v58, %v1798_v56  ;;  %v1822_v46 = vshrl.u32 %v12595_v57, 16 }
 0x10f   : > { %v910_v21 = vpop.f32.mrf.mxu0  ;;  %v12636_v38 = vsel %vm12074_vm2, 0, %v1499_v0  ;;  %v1409_v19 = vpack.c.bf16 %v17408_v16, %v17409_v32  ;;  %17522 = vst [vmem:[#allocation23_spill] sm:$0xff] %v12658_v23  ;;  %v17414_v4 = vmax.f32 %v12658_v23, 0.0 }
 0x110   : > { %v1506_v1 = vor.u32 %v1504_v49, %v1503_v17  ;;  %v12640_v22 = vsel %vm12074_vm2, %v1503_v17, 0  ;;  %v2128_v39 = vrot.slane %v12636_v38, 1  ;;  %v12655_v17 = vadd.f32 %v11470_v59, %v12430_v5 }
 0x111   : > { %2295 = vrot.lane.b32.xlu0 %v12553_v61, %s11979_s21  ;;  %v11476_v41 = vpop.f32.mrf.mxu0  ;;  %v2132_v49 = vrot.slane %v12640_v22, 1  ;;  %v1508_v14 = vshrl.u32 %v1409_v19, 16  ;;  %v1511_v3 = vshll.u32 %v1409_v19, 16  ;;  %v12684_v32 = vadd.f32 %v12430_v5, %v910_v21 }
 0x112   : > { %2182 = vrot.lane.b32.xlu1 %v12517_v30, %s11978_s20  ;;  %v12651_v0 = vsel %vm12074_vm2, 0, %v1506_v1  ;;  %17521 = vst [vmem:[#allocation22_spill] sm:$0xff] %v12655_v17  ;;  %v12661_v13 = vsel %vm2097_vm3, %v2128_v39, %v2129_v29  ;;  %v17413_v59 = vmax.f32 %v12655_v17, 0.0  ;;  %v1812_v39 = vshll.u32 %v12550_v60, 16 }
 0x113   : > { %v920_v30 = vpop.f32.mrf.mxu0  ;;  %11527 = vmatprep.mubr.msk.bf16.mxu0 %vm2444_vm6, %v12661_v13  ;;  %v2131_v1 = vrot.slane %v12651_v0, 1  ;;  %v1510_v56 = vrot.slane %v1508_v14, 7  ;;  %v12681_v29 = vadd.f32 %v11473_v55, %v12430_v5  ;;  %17524 = vst [vmem:[#allocation25_spill] sm:$0xff] %v12684_v32  ;;  %v12687_v63 = vsel %vm1712_vm5, %v1803_v52, %v1807_v45 }
 0x114   : > { %v1410_v58 = vpack.c.bf16 %v17413_v59, %v17414_v4  ;;  %v1814_v45 = vrot.slane %v1812_v39, 1  ;;  %v1817_v4 = vshll.u32 %v12540_v51, 16  ;;  %v12714_v47 = vadd.f32 %v11476_v41, %v12430_v5 }
 0x115   : > { %2344 = vrot.lane.b32.xlu0 %v12550_v60, %s11978_s20  ;;  %v11479_v16 = vpop.f32.mrf.mxu0  ;;  %v12674_v19 = vsel %vm2097_vm3, %v2131_v1, %v2132_v49  ;;  %17523 = vst [vmem:[#allocation24_spill] sm:$0xff] %v12681_v29  ;;  %v1513_v25 = vor.u32 %v1511_v3, %v1510_v56  ;;  %v12691_v14 = vsel %vm12074_vm2, %v1510_v56, 0  ;;  %v17420_v1 = vmax.f32 %v12681_v29, 0.0 }
 0x116   : > { %2231 = vrot.lane.b32.xlu1 %v12529_v42, %s11977_s15  ;;  %11528 = vmatmul.mubr.msk.bf16.gmra.mxu0 %vm2444_vm6, %v12674_v19  ;;  %v1515_v55 = vshrl.u32 %v1410_v58, 16  ;;  %v1518_v49 = vshll.u32 %v1410_v58, 16  ;;  %v2135_v21 = vrot.slane %v12691_v14, 1  ;;  %v1810_v3 = vshrl.u32 %v12550_v60, 16  ;;  %17525 = vst [vmem:[#allocation26_spill] sm:$0xff] %v12714_v47 }
 0x117   : > { %v930_v34 = vpop.f32.mrf.mxu0  ;;  %v12704_v52 = vsel %vm12074_vm2, 0, %v1513_v25  ;;  %v17421_v56 = vmax.f32 %v12684_v32, 0.0  ;;  %v12717_v39 = vadd.f32 %v12430_v5, %v920_v30 }
 0x118   : > { %v1517_v58 = vrot.slane %v1515_v55, 7  ;;  %v2134_v17 = vrot.slane %v12704_v52, 1  ;;  %v1815_v41 = vor.u32 %v1814_v45, %v1810_v3 }
 0x119   : > { %2402 = vrot.lane.b32.xlu0 %v12687_v63, %s11977_s15  ;;  %v11482_v59 = vpop.f32.mrf.mxu0  ;;  %v1411_v35 = vpack.c.bf16 %v17420_v1, %v17421_v56  ;;  %17526 = vst [vmem:[#allocation27_spill] sm:$0xff] %v12717_v39 }
 0x11a   : > { %2013 = vrot.lane.b32.xlu1 %v12605_v36, %s11979_s21  ;;  %v1520_v25 = vor.u32 %v1518_v49, %v1517_v58  ;;  %v12723_v51 = vsel %vm12074_vm2, %v1517_v58, 0  ;;  %v12726_v55 = vsel %vm2097_vm3, %v2134_v17, %v2135_v21  ;;  %v1819_v49 = vrot.slane %v1817_v4, 1 }
 0x11b   : > { %v940_v23 = vpop.f32.mrf.mxu0  ;;  %11531 = vmatprep.mubr.msk.bf16.mxu0 %vm2444_vm6, %v12726_v55  ;;  %v1522_v30 = vshrl.u32 %v1411_v35, 16  ;;  %v1525_v1 = vshll.u32 %v1411_v35, 16  ;;  %v2138_v56 = vrot.slane %v12723_v51, 1  ;;  %v17425_v17 = vmax.f32 %v12714_v47, 0.0 }
 0x11c   : > { %v12735_v58 = vsel %vm12074_vm2, 0, %v1520_v25  ;;  %v17426_v21 = vmax.f32 %v12717_v39, 0.0  ;;  %v12747_v4 = vadd.f32 %v11479_v16, %v12430_v5  ;;  %v12761_v39 = vsel %vm1712_vm5, %v1815_v41, %v1819_v49 }
 0x11d   : > { %2297 = vrot.lane.b32.xlu0 %v12572_v27, %s11979_s21  ;;  %v11485_v32 = vpop.f32.mrf.mxu0  ;;  %v1524_v6 = vrot.slane %v1522_v30, 7  ;;  %v12775_v41 = vadd.f32 %v12430_v5, %v930_v34 }
 0x11e   : > { %2184 = vrot.lane.b32.xlu1 %v12553_v61, %s11978_s20  ;;  %v2137_v61 = vrot.slane %v12735_v58, 1  ;;  %v1412_v35 = vpack.c.bf16 %v17425_v17, %v17426_v21  ;;  %17527 = vst [vmem:[#allocation28_spill] sm:$0xff] %v12747_v4  ;;  %v12821_v15 = vadd.f32 %v11485_v32, %v12430_v5 }
 0x11f   : > { %v950_v29 = vpop.f32.mrf.mxu0  ;;  %v1527_v45 = vor.u32 %v1525_v1, %v1524_v6  ;;  %v12755_v25 = vsel %vm12074_vm2, %v1524_v6, 0  ;;  %v1824_v1 = vshll.u32 %v12595_v57, 16  ;;  %17529 = vst [vmem:[#allocation30_spill] sm:$0xff] %v12775_v41  ;;  %v17434_v9 = vmax.f32 %v12775_v41, 0.0 }
 0x120   : > { %v12758_v30 = vsel %vm2097_vm3, %v2137_v61, %v2138_v56  ;;  %v1529_v16 = vshrl.u32 %v1412_v35, 16  ;;  %v1532_v17 = vshll.u32 %v1412_v35, 16  ;;  %v2141_v21 = vrot.slane %v12755_v25, 1  ;;  %17533 = vst [vmem:[#allocation33_spill] sm:$0xff] %v12821_v15 }
 0x121   : > { %2346 = vrot.lane.b32.xlu0 %v12595_v57, %s11978_s20  ;;  %v12749_v3 = vpop.f32.mrf.mxu0  ;;  %11532 = vmatmul.mubr.msk.bf16.gmra.mxu0 %vm2444_vm6, %v12758_v30  ;;  %v12771_v6 = vsel %vm12074_vm2, 0, %v1527_v45  ;;  %v12786_v45 = vadd.f32 %v11482_v59, %v12430_v5  ;;  %v1829_v56 = vshll.u32 %v12580_v50, 16  ;;  %v1826_v24 = vrot.slane %v1824_v1, 1 }
 0x122   : > { %2233 = vrot.lane.b32.xlu1 %v12550_v60, %s11977_s15  ;;  %17528 = vst [vmem:[#allocation29_spill] sm:$0xff] %v12771_v6  ;;  %v1531_v49 = vrot.slane %v1529_v16, 7  ;;  %v2140_v61 = vrot.slane %v12771_v6, 1  ;;  %v17531_v50 = vmax.f32 %v12747_v4, 0.0  ;;  %v12814_v1 = vadd.f32 %v12430_v5, %v940_v23 }
 0x123   : > { %v12766_v47 = vpop.f32.mrf.mxu0  ;;  %17530 = vst [vmem:[#allocation31_spill] sm:$0xff] %v12786_v45  ;;  %v1831_v41 = vrot.slane %v1829_v56, 1  ;;  %v1827_v20 = vor.u32 %v1826_v24, %v1822_v46  ;;  %v17535_v32 = vmax.f32 %v12786_v45, 0.0  ;;  %v17441_v24 = vmax.f32 %v12821_v15, 0.0 }
 0x124   : > { %v1534_v34 = vor.u32 %v1532_v17, %v1531_v49  ;;  %v12791_v11 = vsel %vm12074_vm2, %v1531_v49, 0  ;;  %v12794_v16 = vsel %vm2097_vm3, %v2140_v61, %v2141_v21  ;;  %v1413_v59 = vpack.c.bf16 %v17531_v50, %v17434_v9  ;;  %17532 = vst [vmem:[#allocation32_spill] sm:$0xff] %v12814_v1 }
 0x125   : > { %2404 = vrot.lane.b32.xlu0 %v12761_v39, %s11977_s15  ;;  %v12780_v35 = vpop.f32.mrf.mxu0  ;;  %11535 = vmatprep.mubr.msk.bf16.mxu0 %vm2444_vm6, %v12794_v16  ;;  %v2144_v17 = vrot.slane %v12791_v11, 1  ;;  %v17439_v31 = vmax.f32 %v12814_v1, 0.0  ;;  %v1836_v56 = vshll.u32 %v12636_v38, 16 }
 0x126   : > { %2015 = vrot.lane.b32.xlu1 %v12687_v63, %s11979_s21  ;;  %v12810_v21 = vsel %vm12074_vm2, 0, %v1534_v34  ;;  %v1536_v4 = vshrl.u32 %v1413_v59, 16  ;;  %v1539_v50 = vshll.u32 %v1413_v59, 16 }
 0x127   : > { %v12796_v40 = vpop.f32.mrf.mxu0  ;;  %v2143_v9 = vrot.slane %v12810_v21, 1 }
 0x128   : > { %v1538_v49 = vrot.slane %v1536_v4, 7 }
 0x129   : > { %2299 = vrot.lane.b32.xlu0 %v12614_v53, %s11979_s21  ;;  %v11494_v61 = vpop.f32.mrf.mxu0  ;;  %v12824_v23 = vsel %vm2097_vm3, %v2143_v9, %v2144_v17 }
 0x12a   : > { %2186 = vrot.lane.b32.xlu1 %v12572_v27, %s11978_s20  ;;  %v12827_v61 = vadd.f32 %v12430_v5, %v950_v29  ;;  %11536 = vmatmul.mubr.msk.bf16.gmra.mxu0 %vm2444_vm6, %v12824_v23  ;;  %v1414_v27 = vpack.c.bf16 %v17535_v32, %v17439_v31  ;;  %v1541_v9 = vor.u32 %v1539_v50, %v1538_v49  ;;  %v12842_v29 = vsel %vm12074_vm2, %v1538_v49, 0 }
 0x12b   : > { %v980_v34 = vpop.f32.mrf.mxu0  ;;  %v12848_v31 = vsel %vm1712_vm5, %v1827_v20, %v1831_v41  ;;  %v1834_v50 = vshrl.u32 %v12636_v38, 16  ;;  %v12864_v20 = vadd.f32 %v12749_v3, %v12430_v5 }
 0x12c   : > { %17534 = vst [vmem:[#allocation34_spill] sm:$0xff] %v12827_v61  ;;  %v17442_v4 = vmax.f32 %v12827_v61, 0.0  ;;  %v1543_v59 = vshrl.u32 %v1414_v27, 16  ;;  %v1546_v17 = vshll.u32 %v1414_v27, 16  ;;  %v2147_v34 = vrot.slane %v12842_v29, 1 }
 0x12d   : > { %2348 = vrot.lane.b32.xlu0 %v12636_v38, %s11978_s20  ;;  %v11497_v46 = vpop.f32.mrf.mxu0  ;;  %17536 = vst [vmem:[#allocation35_spill] sm:$0xff] %v12864_v20  ;;  %v1838_v61 = vrot.slane %v1836_v56, 1  ;;  %v17449_v1 = vmax.f32 %v12864_v20, 0.0 }
 0x12e   : > { %2235 = vrot.lane.b32.xlu1 %v12595_v57, %s11977_s15  ;;  %v12852_v46 = vsel %vm12074_vm2, 0, %v1541_v9  ;;  %v1415_v49 = vpack.c.bf16 %v17441_v24, %v17442_v4  ;;  %v1545_v27 = vrot.slane %v1543_v59, 7  ;;  %v1841_v9 = vshll.u32 %v12627_v48, 16 }
 0x12f   : > { %v990_v32 = vpop.f32.mrf.mxu0  ;;  %v12871_v4 = vadd.f32 %v12430_v5, %v12766_v47 }
 0x130   : > { %v2146_v32 = vrot.slane %v12852_v46, 1  ;;  %v1550_v15 = vshrl.u32 %v1415_v49, 16  ;;  %v1553_v24 = vshll.u32 %v1415_v49, 16  ;;  %v1548_v59 = vor.u32 %v1546_v17, %v1545_v27 }
 0x131   : > { %2406 = vrot.lane.b32.xlu0 %v12848_v31, %s11977_s15  ;;  %v11500_v41 = vpop.f32.mrf.mxu0  ;;  %17537 = vst [vmem:[#allocation36_spill] sm:$0xff] %v12871_v4  ;;  %v12875_v45 = vsel %vm12074_vm2, %v1545_v27, 0  ;;  %v17450_v47 = vmax.f32 %v12871_v4, 0.0  ;;  %v1843_v7 = vrot.slane %v1841_v9, 1 }
 0x132   : > { %2017 = vrot.lane.b32.xlu1 %v12761_v39, %s11979_s21  ;;  %v12878_v3 = vsel %vm2097_vm3, %v2146_v32, %v2147_v34  ;;  %v1552_v48 = vrot.slane %v1550_v15, 7  ;;  %v2150_v49 = vrot.slane %v12875_v45, 1  ;;  %v12889_v56 = vsel %vm12074_vm2, 0, %v1548_v59 }
 0x133   : > { %v1000_v41 = vpop.f32.mrf.mxu0  ;;  %11539 = vmatprep.mubr.msk.bf16.mxu0 %vm2444_vm6, %v12878_v3  ;;  %v2149_v27 = vrot.slane %v12889_v56, 1  ;;  %v1416_v32 = vpack.c.bf16 %v17449_v1, %v17450_v47 }
 0x134   : > { %v1555_v34 = vor.u32 %v1553_v24, %v1552_v48  ;;  %v12895_v15 = vsel %vm12074_vm2, %v1552_v48, 0  ;;  %v1839_v41 = vor.u32 %v1838_v61, %v1834_v50 }
 0x135   : > { %2301 = vrot.lane.b32.xlu0 %v12661_v13, %s11979_s21  ;;  %v11503_v17 = vpop.f32.mrf.mxu0  ;;  %v2153_v59 = vrot.slane %v12895_v15, 1  ;;  %v12912_v48 = vsel %vm2097_vm3, %v2149_v27, %v2150_v49  ;;  %v1557_v4 = vshrl.u32 %v1416_v32, 16  ;;  %v1560_v10 = vshll.u32 %v1416_v32, 16 }
 0x136   : > { %2188 = vrot.lane.b32.xlu1 %v12614_v53, %s11978_s20  ;;  %v12905_v17 = vadd.f32 %v12780_v35, %v12430_v5  ;;  %v12909_v24 = vsel %vm12074_vm2, 0, %v1555_v34  ;;  %11540 = vmatmul.mubr.msk.bf16.gmra.mxu0 %vm2444_vm6, %v12912_v48  ;;  %v12924_v49 = vadd.f32 %v12430_v5, %v12796_v40  ;;  %v1848_v34 = vshll.u32 %v12651_v0, 16 }
 0x137   : > { %v1010_v53 = vpop.f32.mrf.mxu0  ;;  %v2152_v61 = vrot.slane %v12909_v24, 1  ;;  %v1559_v50 = vrot.slane %v1557_v4, 7  ;;  %v1846_v4 = vshrl.u32 %v12651_v0, 16 }
 0x138   : > { %17538 = vst [vmem:[#allocation37_spill] sm:$0xff] %v12905_v17  ;;  %v17451_v9 = vmax.f32 %v12905_v17, 0.0  ;;  %17539 = vst [vmem:[#allocation38_spill] sm:$0xff] %v12924_v49  ;;  %v12931_v53 = vsel %vm1712_vm5, %v1839_v41, %v1843_v7  ;;  %v17452_v5 = vmax.f32 %v12924_v49, 0.0  ;;  %v11822_v17 = vunpack.i.h.bf16 %v12418_v54 }
 0x139   : > { %2350 = vrot.lane.b32.xlu0 %v12651_v0, %s11978_s20  ;;  %v11506_v35 = vpop.f32.mrf.mxu0  ;;  %v12928_v27 = vsel %vm2097_vm3, %v2152_v61, %v2153_v59  ;;  %v12935_v1 = vsel %vm12074_vm2, %v1559_v50, 0  ;;  %v1850_v59 = vrot.slane %v1848_v34, 1  ;;  %v1853_v61 = vshll.u32 %v12640_v22, 16 }
 0x13a   : > { %2237 = vrot.lane.b32.xlu1 %v12636_v38, %s11977_s15  ;;  %v1562_v35 = vor.u32 %v1560_v10, %v1559_v50  ;;  %11543 = vmatprep.mubr.msk.bf16.mxu0 %vm2444_vm6, %v12928_v27  ;;  %v2156_v40 = vrot.slane %v12935_v1, 1  ;;  %v1417_v10 = vpack.c.bf16 %v17451_v9, %v17452_v5 }
 0x13b   : > { %v1020_v32 = vpop.f32.mrf.mxu0  ;;  %v1851_v9 = vor.u32 %v1850_v59, %v1846_v4  ;;  %v1855_v5 = vrot.slane %v1853_v61, 1  ;;  %v1865_v59 = vshll.u32 %v12691_v14, 16 }
 0x13c   : > { %v12947_v7 = vsel %vm12074_vm2, 0, %v1562_v35  ;;  %v1564_v50 = vshrl.u32 %v1417_v10, 16  ;;  %v1567_v32 = vshll.u32 %v1417_v10, 16 }
 0x13d   : > { %2408 = vrot.lane.b32.xlu0 %v12931_v53, %s11977_s15  ;;  %v2155_v41 = vrot.slane %v12947_v7, 1  ;;  %v12980_v4 = vsel %vm1712_vm5, %v1851_v9, %v1855_v5  ;;  %v1858_v9 = vshrl.u32 %v12704_v52, 16 }
 0x13e   : > { %2019 = vrot.lane.b32.xlu1 %v12848_v31, %s11979_s21  ;;  %v1566_v47 = vrot.slane %v1564_v50, 7  ;;  %v1867_v50 = vrot.slane %v1865_v59, 1 }
 0x13f   : > { %v12959_v35 = vsel %vm2097_vm3, %v2155_v41, %v2156_v40 }
 0x140   : > { %11544 = vmatmul.mubr.msk.bf16.gmra.mxu0 %vm2444_vm6, %v12959_v35  ;;  %v1569_v34 = vor.u32 %v1567_v32, %v1566_v47  ;;  %v12967_v22 = vsel %vm12074_vm2, %v1566_v47, 0  ;;  %v1860_v47 = vshll.u32 %v12704_v52, 16 }
 0x141   : > { %2303 = vrot.lane.b32.xlu0 %v12674_v19, %s11979_s21  ;;  %v2159_v40 = vrot.slane %v12967_v22, 1 }
 0x142   : > { %2190 = vrot.lane.b32.xlu1 %v12661_v13, %s11978_s20  ;;  %v12976_v13 = vsel %vm12074_vm2, 0, %v1569_v34  ;;  %v1862_v5 = vrot.slane %v1860_v47, 1  ;;  %v1870_v47 = vshrl.u32 %v12735_v58, 16 }
 0x143   : > { %v2158_v10 = vrot.slane %v12976_v13, 1 }
 0x144   : > { %v1863_v61 = vor.u32 %v1862_v5, %v1858_v9  ;;  %v1877_v5 = vshll.u32 %v12723_v51, 16 }
 0x145   : > { %2352 = vrot.lane.b32.xlu0 %v12704_v52, %s11978_s20  ;;  %v12986_v41 = vsel %vm2097_vm3, %v2158_v10, %v2159_v40  ;;  %v1872_v40 = vshll.u32 %v12735_v58, 16 }
 0x146   : > { %2239 = vrot.lane.b32.xlu1 %v12651_v0, %s11977_s15  ;;  %11547 = vmatprep.mubr.msk.bf16.mxu0 %vm2444_vm6, %v12986_v41  ;;  %v13009_v14 = vsel %vm1712_vm5, %v1863_v61, %v1867_v50 }
 0x147   : > { %v1874_v9 = vrot.slane %v1872_v40, 1 }
 0x148   : > { %11548 = vmatmul.mubr.msk.bf16.gmra.mxu0 %vm2444_vm6, %v12118_v18 }
 0x149   : > { %2410 = vrot.lane.b32.xlu0 %v12980_v4, %s11977_s15  ;;  %11551 = vmatprep.mubr.msk.bf16.mxu0 %vm2444_vm6, %v12118_v18  ;;  %v1875_v50 = vor.u32 %v1874_v9, %v1870_v47  ;;  %v1882_v9 = vshrl.u32 %v12771_v6, 16 }
 0x14a   : > { %2021 = vrot.lane.b32.xlu1 %v12931_v53, %s11979_s21 }
 0x14d   : > { %2305 = vrot.lane.b32.xlu0 %v12726_v55, %s11979_s21 }
 0x14e   : > { %2192 = vrot.lane.b32.xlu1 %v12674_v19, %s11978_s20 }
 0x150   : > { %11552 = vmatmul.mubr.msk.bf16.gmra.mxu0 %vm2444_vm6, %v12118_v18 }
 0x151   : > { %v2974_v32 = vpop.f32.mrf.mxu0  ;;  %2354 = vrot.lane.b32.xlu0 %v12735_v58, %s11978_s20  ;;  %11555 = vmatprep.mubr.msk.bf16.mxu0 %vm2444_vm6, %v12118_v18 }
 0x152   : > { %2241 = vrot.lane.b32.xlu1 %v12704_v52, %s11977_s15  ;;  %v1879_v32 = vrot.slane %v1877_v5, 1 }
 0x153   : > { %v2976_v34 = vpop.f32.mrf.mxu0 }
 0x154   : > { %v13031_v40 = vsel %vm1712_vm5, %v1875_v50, %v1879_v32 }
 0x155   : > { %v2977_v10 = vpop.f32.mrf.mxu0  ;;  %2412 = vrot.lane.b32.xlu0 %v13009_v14, %s11977_s15 }
 0x156   : > { %2023 = vrot.lane.b32.xlu1 %v12980_v4, %s11979_s21  ;;  %v1884_v10 = vshll.u32 %v12771_v6, 16 }
 0x157   : > { %v2979_v19 = vpop.f32.mrf.mxu0 }
 0x158   : > { %11556 = vmatmul.mubr.msk.bf16.gmra.mxu0 %vm2444_vm6, %v12118_v18  ;;  %v2008_v19 = vpop.permute.xlu1 %2007  ;;  %v1886_v5 = vrot.slane %v1884_v10, 1 }
 0x159   : > { %v2982_v59 = vpop.f32.mrf.mxu0  ;;  %2307 = vrot.lane.b32.xlu0 %v12758_v30, %s11979_s21 }
 0x15a   : > { %2194 = vrot.lane.b32.xlu1 %v12726_v55, %s11978_s20  ;;  %v1889_v59 = vshll.u32 %v12755_v25, 16 }
 0x15b   : > { %v2984_v61 = vpop.f32.mrf.mxu0 }
 0x15c   : > { %v11825_v32 = vpop.permute.xlu1 %11824 }
 0x15d   : > { %v2985_v34 = vpop.f32.mrf.mxu0  ;;  %2356 = vrot.lane.b32.xlu0 %v12771_v6, %s11978_s20 }
 0x15e   : > { %2243 = vrot.lane.b32.xlu1 %v12735_v58, %s11977_s15  ;;  %v1887_v34 = vor.u32 %v1886_v5, %v1882_v9  ;;  %v11826_v9 = vunpack.i.l.bf16 %v11825_v32  ;;  %v2452_v5 = vsel %vm2444_vm6, %v12090_v8, %v2008_v19 }
 0x15f   : > { %v2987_v51 = vpop.f32.mrf.mxu0 }
 0x160   : > { %v1891_v51 = vrot.slane %v1889_v59, 1  ;;  %v2501_v19 = vsel %vm2493_vm7, %v2452_v5, %v11826_v9  ;;  %v1908_v5 = vshll.u32 %v12852_v46, 16 }
 0x161   : > { %v11513_v55 = vpop.f32.mrf.mxu0  ;;  %2414 = vrot.lane.b32.xlu0 %v13031_v40, %s11977_s15  ;;  %v2553_v54 = vsel %vm2542_vm8, %v2501_v19, %v11822_v17 }
 0x162   : > { %2025 = vrot.lane.b32.xlu1 %v13009_v14, %s11979_s21  ;;  %v2010_v55 = vpop.permute.xlu0 %2009  ;;  %v13049_v25 = vsel %vm1712_vm5, %v1887_v34, %v1891_v51  ;;  %v1901_v51 = vshll.u32 %v12791_v11, 16 }
 0x163   : > { %v3199_v47 = vpop.f32.mrf.mxu0  ;;  %v2454_v17 = vsel %vm2444_vm6, %v12090_v8, %v2010_v55 }
 0x164   : > { %v1896_v47 = vshll.u32 %v12810_v21, 16 }
 0x165   : > { %v11514_v61 = vpop.f32.mrf.mxu0  ;;  %2309 = vrot.lane.b32.xlu0 %v12794_v16, %s11979_s21 }
 0x166   : > { %2196 = vrot.lane.b32.xlu1 %v12758_v30, %s11978_s20  ;;  %v11812_v30 = vunpack.i.h.bf16 %v12413_v43  ;;  %v1898_v34 = vrot.slane %v1896_v47, 1 }
 0x167   : > { %v3202_v50 = vpop.f32.mrf.mxu0 }
 0x168   : > { %v1894_v50 = vshrl.u32 %v12810_v21, 16  ;;  %v2626_v43 = vsel %vm2444_vm6, %v12147_v33, %v11812_v30 }
 0x169   : > { %2358 = vrot.lane.b32.xlu0 %v12810_v21, %s11978_s20 }
 0x16a   : > { %2245 = vrot.lane.b32.xlu1 %v12771_v6, %s11977_s15  ;;  %v1899_v11 = vor.u32 %v1898_v34, %v1894_v50  ;;  %v1903_v6 = vrot.slane %v1901_v51, 1  ;;  %v1906_v50 = vshrl.u32 %v12852_v46, 16  ;;  %v1910_v34 = vrot.slane %v1908_v5, 1 }
 0x16b   : > { %v2228_v10 = vpop.permute.xlu1 %2227  ;;  %v2339_v59 = vpop.permute.xlu0 %2338 }
 0x16c   : > { %v2694_v49 = vsel %vm2493_vm7, %v2626_v43, %v2339_v59  ;;  %v13077_v9 = vsel %vm1712_vm5, %v1899_v11, %v1903_v6  ;;  %v1913_v6 = vshll.u32 %v12842_v29, 16  ;;  %v1911_v11 = vor.u32 %v1910_v34, %v1906_v50 }
 0x16d   : > { %2416 = vrot.lane.b32.xlu0 %v13049_v25, %s11977_s15  ;;  %v1925_v34 = vshll.u32 %v12875_v45, 16 }
 0x16e   : > { %2027 = vrot.lane.b32.xlu1 %v13031_v40, %s11979_s21 }
 0x16f   : > { %v2292_v61 = vpop.permute.xlu1 %2291 }
 0x170   : > { %v2629_v51 = vsel %vm2444_vm6, %v12523_v37, %v2292_v61 }
 0x171   : > { %2311 = vrot.lane.b32.xlu0 %v12824_v23, %s11979_s21 }
 0x172   : > { %2198 = vrot.lane.b32.xlu1 %v12794_v16, %s11978_s20 }
 0x173   : > { %v2399_v20 = vpop.permute.xlu0 %2398  ;;  %v2181_v2 = vpop.permute.xlu1 %2180 }
 0x174   : > { %v2745_v47 = vsel %vm2542_vm8, %v2694_v49, %v2399_v20  ;;  %v11827_v20 = vunpack.i.h.bf16 %v11825_v32 }
 0x175   : > { %2360 = vrot.lane.b32.xlu0 %v12852_v46, %s11978_s20  ;;  %2996 = vmatprep.mubr.bf16.mxu1 %v2745_v47 }
 0x176   : > { %2247 = vrot.lane.b32.xlu1 %v12810_v21, %s11977_s15  ;;  %2997 = vmatmul.mubr.bf16.gmra.mxu1 %v2553_v54  ;;  %v2503_v32 = vsel %vm2493_vm7, %v2454_v17, %v11827_v20  ;;  %v1915_v54 = vrot.slane %v1913_v6, 1  ;;  %v1918_v17 = vshrl.u32 %v12889_v56, 16 }
 0x177   : > { %v2294_v16 = vpop.permute.xlu0 %2293  ;;  %v2556_v29 = vsel %vm2542_vm8, %v2503_v32, %v2228_v10 }
 0x178   : > { %v2341_v30 = vpop.permute.xlu1 %2340  ;;  %v13103_v61 = vsel %vm1712_vm5, %v1911_v11, %v1915_v54  ;;  %v2632_v6 = vsel %vm2444_vm6, %v12605_v36, %v2294_v16  ;;  %v1932_v16 = vshll.u32 %v12909_v24, 16  ;;  %v1930_v54 = vshrl.u32 %v12909_v24, 16 }
 0x179   : > { %2418 = vrot.lane.b32.xlu0 %v13077_v9, %s11977_s15  ;;  %v2696_v55 = vsel %vm2493_vm7, %v2629_v51, %v2341_v30  ;;  %v1920_v30 = vshll.u32 %v12889_v56, 16 }
 0x17a   : > { %2029 = vrot.lane.b32.xlu1 %v13049_v25, %s11979_s21 }
 0x17b   : > { %v2343_v49 = vpop.permute.xlu0 %2342  ;;  %v1922_v50 = vrot.slane %v1920_v30, 1  ;;  %v1937_v30 = vshll.u32 %v12895_v15, 16 }
 0x17c   : > { %v2230_v59 = vpop.permute.xlu1 %2229 }
 0x17d   : > { %2313 = vrot.lane.b32.xlu0 %v12878_v3, %s11979_s21 }
 0x17e   : > { %2200 = vrot.lane.b32.xlu1 %v12824_v23, %s11978_s20 }
 0x17f   : > { %v2401_v43 = vpop.permute.xlu0 %2400 }
 0x180   : > { %v2012_v19 = vpop.permute.xlu1 %2011  ;;  %v2748_v47 = vsel %vm2542_vm8, %v2696_v55, %v2401_v43 }
 0x181   : > { %2362 = vrot.lane.b32.xlu0 %v12889_v56, %s11978_s20  ;;  %3004 = vmatprep.mubr.bf16.mxu1 %v2748_v47  ;;  %v2456_v10 = vsel %vm2444_vm6, %v12471_v44, %v2012_v19  ;;  %v2698_v44 = vsel %vm2493_vm7, %v2632_v6, %v2343_v49  ;;  %v1923_v19 = vor.u32 %v1922_v50, %v1918_v17  ;;  %v1927_v47 = vrot.slane %v1925_v34, 1 }
 0x182   : > { %2249 = vrot.lane.b32.xlu1 %v12852_v46, %s11977_s15  ;;  %3005 = vmatmul.mubr.bf16.gmra.mxu1 %v2556_v29  ;;  %v2505_v51 = vsel %vm2493_vm7, %v2456_v10, %v2181_v2  ;;  %v1934_v29 = vrot.slane %v1932_v16, 1  ;;  %v2990_v16 = vpop.f32.mrf.mxu1 }
 0x183   : > { %v2296_v37 = vpop.permute.xlu0 %2295  ;;  %v2559_v45 = vsel %vm2542_vm8, %v2505_v51, %v2230_v59 }
 0x184   : > { %v2183_v23 = vpop.permute.xlu1 %2182  ;;  %v2635_v10 = vsel %vm2444_vm6, %v12687_v63, %v2296_v37  ;;  %v1935_v51 = vor.u32 %v1934_v29, %v1930_v54 }
 0x185   : > { %2420 = vrot.lane.b32.xlu0 %v13103_v61, %s11977_s15 }
 0x186   : > { %2031 = vrot.lane.b32.xlu1 %v13077_v9, %s11979_s21 }
 0x187   : > { %v2345_v5 = vpop.permute.xlu0 %2344 }
 0x188   : > { %v2232_v20 = vpop.permute.xlu1 %2231 }
 0x189   : > { %2315 = vrot.lane.b32.xlu0 %v12912_v48, %s11979_s21 }
 0x18a   : > { %2202 = vrot.lane.b32.xlu1 %v12878_v3, %s11978_s20  ;;  %v13129_v3 = vsel %vm1712_vm5, %v1923_v19, %v1927_v47  ;;  %v1949_v19 = vshll.u32 %v12935_v1, 16 }
 0x18b   : > { %v2403_v32 = vpop.permute.xlu0 %2402 }
 0x18c   : > { %v2014_v55 = vpop.permute.xlu1 %2013  ;;  %v2751_v43 = vsel %vm2542_vm8, %v2698_v44, %v2403_v32  ;;  %v1939_v44 = vrot.slane %v1937_v30, 1  ;;  %v1951_v1 = vrot.slane %v1949_v19, 1 }
 0x18d   : > { %2364 = vrot.lane.b32.xlu0 %v12909_v24, %s11978_s20  ;;  %3012 = vmatprep.mubr.bf16.mxu1 %v2751_v43  ;;  %v2458_v49 = vsel %vm2444_vm6, %v12496_v62, %v2014_v55  ;;  %v2700_v62 = vsel %vm2493_vm7, %v2635_v10, %v2345_v5  ;;  %v1942_v55 = vshrl.u32 %v12947_v7, 16  ;;  %v1956_v10 = vshll.u32 %v12976_v13, 16 }
 0x18e   : > { %2251 = vrot.lane.b32.xlu1 %v12889_v56, %s11977_s15  ;;  %3013 = vmatmul.mubr.bf16.gmra.mxu1 %v2559_v45  ;;  %v2507_v17 = vsel %vm2493_vm7, %v2458_v49, %v2183_v23  ;;  %v13155_v37 = vsel %vm1712_vm5, %v1935_v51, %v1939_v44  ;;  %v1944_v23 = vshll.u32 %v12947_v7, 16  ;;  %v5006_v51 = vld [vmem:[%s17383_s5 + $0x118] sm:$0xff] }
 0x18f   : > { %v2298_v36 = vpop.permute.xlu0 %2297  ;;  %v2562_v15 = vsel %vm2542_vm8, %v2507_v17, %v2232_v20  ;;  %v2992_v17 = vpop.f32.mrf.mxu1 }
 0x190   : > { %v2185_v2 = vpop.permute.xlu1 %2184  ;;  %v1946_v43 = vrot.slane %v1944_v23, 1  ;;  %v2638_v47 = vsel %vm2444_vm6, %v12761_v39, %v2298_v36 }
 0x191   : > { %2422 = vrot.lane.b32.xlu0 %v13129_v3, %s11977_s15 }
 0x192   : > { %2033 = vrot.lane.b32.xlu1 %v13103_v61, %s11979_s21  ;;  %v1947_v30 = vor.u32 %v1946_v43, %v1942_v55 }
 0x193   : > { %v2347_v59 = vpop.permute.xlu0 %2346 }
 0x194   : > { %v2234_v11 = vpop.permute.xlu1 %2233 }
 0x195   : > { %2317 = vrot.lane.b32.xlu0 %v12928_v27, %s11979_s21 }
 0x196   : > { %2204 = vrot.lane.b32.xlu1 %v12912_v48, %s11978_s20 }
 0x197   : > { %v2405_v50 = vpop.permute.xlu0 %2404 }
 0x198   : > { %v2016_v34 = vpop.permute.xlu1 %2015  ;;  %v2754_v6 = vsel %vm2542_vm8, %v2700_v62, %v2405_v50  ;;  %v1954_v62 = vshrl.u32 %v12976_v13, 16  ;;  %v1958_v50 = vrot.slane %v1956_v10, 1 }
 0x199   : > { %2366 = vrot.lane.b32.xlu0 %v12947_v7, %s11978_s20  ;;  %3020 = vmatprep.mubr.bf16.mxu1 %v2754_v6  ;;  %v2460_v5 = vsel %vm2444_vm6, %v12529_v42, %v2016_v34  ;;  %v2702_v42 = vsel %vm2493_vm7, %v2638_v47, %v2347_v59  ;;  %v13182_v59 = vsel %vm1712_vm5, %v1947_v30, %v1951_v1  ;;  %v1961_v34 = vshll.u32 %v12967_v22, 16 }
 0x19a   : > { %2253 = vrot.lane.b32.xlu1 %v12909_v24, %s11977_s15  ;;  %3021 = vmatmul.mubr.bf16.gmra.mxu1 %v2562_v15  ;;  %v2509_v45 = vsel %vm2493_vm7, %v2460_v5, %v2185_v2  ;;  %v1959_v5 = vor.u32 %v1958_v50, %v1954_v62 }
 0x19b   : > { %v2300_v63 = vpop.permute.xlu0 %2299  ;;  %v2565_v39 = vsel %vm2542_vm8, %v2509_v45, %v2234_v11  ;;  %v5005_v11 = vld [vmem:[%s17383_s5 + $0x110] sm:$0xff]  ;;  %v1963_v55 = vrot.slane %v1961_v34, 1 }
 0x19c   : > { %v2187_v48 = vpop.permute.xlu1 %2186  ;;  %v5024_v44 = vpack.c.bf16 %v5006_v51, %v5005_v11  ;;  %v2641_v43 = vsel %vm2444_vm6, %v12848_v31, %v2300_v63 }
 0x19d   : > { %2424 = vrot.lane.b32.xlu0 %v13155_v37, %s11977_s15  ;;  %v13207_v16 = vsel %vm1712_vm5, %v1959_v5, %v1963_v55 }
 0x19e   : > { %2035 = vrot.lane.b32.xlu1 %v13129_v3, %s11979_s21  ;;  %11559 = vmatprep.subr.bf16.mxu1 %v5024_v44 }
 0x19f   : > { %v2349_v20 = vpop.permute.xlu0 %2348  ;;  %11560 = vmatpush3.bf16.msra.mxu1 %v5024_v44 }
 0x1a0   : > { %v2236_v32 = vpop.permute.xlu1 %2235  ;;  %v2704_v47 = vsel %vm2493_vm7, %v2641_v43, %v2349_v20 }
 0x1a1   : > { %2319 = vrot.lane.b32.xlu0 %v12959_v35, %s11979_s21 }
 0x1a2   : > { %2206 = vrot.lane.b32.xlu1 %v12928_v27, %s11978_s20  ;;  %v2993_v27 = vpop.f32.mrf.mxu1 }
 0x1a3   : > { %v2407_v49 = vpop.permute.xlu0 %2406 }
 0x1a4   : > { %v2018_v54 = vpop.permute.xlu1 %2017  ;;  %v2757_v29 = vsel %vm2542_vm8, %v2702_v42, %v2407_v49  ;;  %v2995_v6 = vpop.f32.mrf.mxu1 }
 0x1a5   : > { %2368 = vrot.lane.b32.xlu0 %v12976_v13, %s11978_s20  ;;  %3028 = vmatprep.mubr.bf16.mxu1 %v2757_v29  ;;  %v2462_v15 = vsel %vm2444_vm6, %v12550_v60, %v2018_v54 }
 0x1a6   : > { %2255 = vrot.lane.b32.xlu1 %v12947_v7, %s11977_s15  ;;  %3029 = vmatmul.mubr.bf16.gmra.mxu1 %v2565_v39  ;;  %v2511_v19 = vsel %vm2493_vm7, %v2462_v15, %v2187_v48 }
 0x1a7   : > { %v2302_v36 = vpop.permute.xlu0 %2301  ;;  %v2568_v31 = vsel %vm2542_vm8, %v2511_v19, %v2236_v32  ;;  %v17541_v19 = vmov 0  }
 0x1a8   : > { %v2189_v2 = vpop.permute.xlu1 %2188 }
 0x1a9   : > { %2426 = vrot.lane.b32.xlu0 %v13182_v59, %s11977_s15 }
 0x1aa   : > { %2037 = vrot.lane.b32.xlu1 %v13155_v37, %s11979_s21 }
 0x1ab   : > { %v2351_v22 = vpop.permute.xlu0 %2350 }
 0x1ac   : > { %v2238_v23 = vpop.permute.xlu1 %2237 }
 0x1ad   : > { %2321 = vrot.lane.b32.xlu0 %v12986_v41, %s11979_s21 }
 0x1ae   : > { %2039 = vrot.lane.b32.xlu1 %v13182_v59, %s11979_s21 }
 0x1af   : > { %v2409_v60 = vpop.permute.xlu0 %2408 }
 0x1b0   : > { %v2020_v45 = vpop.permute.xlu1 %2019  ;;  %v2760_v42 = vsel %vm2542_vm8, %v2704_v47, %v2409_v60  ;;  %v4983_v47 = vld [vmem:[%s17383_s5 + $0x60] sm:$0xff]  ;;  %v4984_v60 = vld [vmem:[%s17383_s5 + $0x68] sm:$0xff] }
 0x1b1   : > { %2428 = vrot.lane.b32.xlu0 %v13207_v16, %s11977_s15  ;;  %3036 = vmatprep.mubr.bf16.mxu1 %v2760_v42  ;;  %v2464_v20 = vsel %vm2444_vm6, %v12595_v57, %v2020_v45  ;;  %v5013_v45 = vpack.c.bf16 %v4984_v60, %v4983_v47  ;;  %v4971_v47 = vld [vmem:[%s17383_s5] sm:$0xff]  ;;  %v4972_v60 = vld [vmem:[%s17383_s5 + $0x8] sm:$0xff] }
 0x1b2   : > { %2208 = vrot.lane.b32.xlu1 %v12959_v35, %s11978_s20  ;;  %3037 = vmatmul.mubr.bf16.gmra.mxu1 %v2568_v31  ;;  %v2644_v35 = vsel %vm2444_vm6, %v12931_v53, %v2302_v36  ;;  %v2513_v32 = vsel %vm2493_vm7, %v2464_v20, %v2189_v2  ;;  %v4982_v20 = vld [vmem:[%s17383_s5 + $0x58] sm:$0xff] }
 0x1b3   : > { %v2304_v63 = vpop.permute.xlu0 %2303  ;;  %v2706_v29 = vsel %vm2493_vm7, %v2644_v35, %v2351_v22  ;;  %v2571_v17 = vsel %vm2542_vm8, %v2513_v32, %v2238_v23  ;;  %v4986_v23 = vld [vmem:[%s17383_s5 + $0x78] sm:$0xff] }
 0x1b4   : > { %v2191_v48 = vpop.permute.xlu1 %2190  ;;  %v2647_v6 = vsel %vm2444_vm6, %v12980_v4, %v2304_v63  ;;  %v4985_v4 = vld [vmem:[%s17383_s5 + $0x70] sm:$0xff] }
 0x1b5   : > { %2370 = vrot.lane.b32.xlu0 %v12090_v8, %s11978_s20  ;;  %v5014_v5 = vpack.c.bf16 %v4986_v23, %v4985_v4  ;;  %v4974_v23 = vld [vmem:[%s17383_s5 + $0x18] sm:$0xff] }
 0x1b6   : > { %2257 = vrot.lane.b32.xlu1 %v12976_v13, %s11977_s15 }
 0x1b7   : > { %v2353_v49 = vpop.permute.xlu0 %2352  ;;  %5099 = vmatpush1.bf16.msra.mxu0 %v5014_v5 }
 0x1b8   : > { %v2240_v54 = vpop.permute.xlu1 %2239  ;;  %v2708_v51 = vsel %vm2493_vm7, %v2647_v6, %v2353_v49  ;;  %5100 = vmatprep.subr.bf16.mxu0 %v17541_v19  ;;  %v4976_v6 = vld [vmem:[%s17383_s5 + $0x28] sm:$0xff] }
 0x1b9   : > { %2430 = vrot.lane.b32.xlu0 %v12147_v33, %s11977_s15 }
 0x1ba   : > { %2210 = vrot.lane.b32.xlu1 %v12986_v41, %s11978_s20  ;;  %v13237_v41 = vpack.i.bf16 %v12090_v8, %v12118_v18 }
 0x1bb   : > { %v2411_v30 = vpop.permute.xlu0 %2410  ;;  %5101 = vmatpush1.bf16.msra.mxu0 %v5013_v45  ;;  %v5007_v45 = vpack.c.bf16 %v4972_v60, %v4971_v47 }
 0x1bc   : > { %v2022_v1 = vpop.permute.xlu1 %2021  ;;  %v2763_v10 = vsel %vm2542_vm8, %v2706_v29, %v2411_v30  ;;  %v11517_v57 = vpop.f32.mrf.mxu0  ;;  %17540 = vst [vmem:[#allocation39_spill] sm:$0xff] %v13237_v41  ;;  %5102 = vmatprep.subr.bf16.mxu0 %v17541_v19 }
 0x1bd   : > { %3044 = vmatprep.mubr.bf16.mxu1 %v2763_v10  ;;  %11829 = vrot.lane.b32.xlu0 %v12131_v26, %s11979_s21  ;;  %v2466_v62 = vsel %vm2444_vm6, %v12636_v38, %v2022_v1  ;;  %v4980_v10 = vld [vmem:[%s17383_s5 + $0x48] sm:$0xff] }
 0x1be   : > { %11839 = vrot.lane.b32.xlu1 %v12103_v12, %s11977_s15  ;;  %3045 = vmatmul.mubr.bf16.gmra.mxu1 %v2571_v17  ;;  %v3215_v53 = vpop.f32.mrf.mxu0  ;;  %v2515_v11 = vsel %vm2493_vm7, %v2466_v62, %v2191_v48  ;;  %v4981_v48 = vld [vmem:[%s17383_s5 + $0x50] sm:$0xff] }
 0x1bf   : > { %v2306_v39 = vpop.permute.xlu0 %2305  ;;  %v2574_v38 = vsel %vm2542_vm8, %v2515_v11, %v2240_v54  ;;  %v5012_v54 = vpack.c.bf16 %v4982_v20, %v4981_v48  ;;  %v5001_v48 = vld [vmem:[%s17383_s5 + $0xf0] sm:$0xff]  ;;  %v5002_v20 = vld [vmem:[%s17383_s5 + $0xf8] sm:$0xff] }
 0x1c0   : > { %v2193_v27 = vpop.permute.xlu1 %2192  ;;  %v11518_v36 = vpop.f32.mrf.mxu0  ;;  %v2650_v49 = vsel %vm2444_vm6, %v13009_v14, %v2306_v39  ;;  %v4979_v14 = vld [vmem:[%s17383_s5 + $0x40] sm:$0xff]  ;;  %v4977_v39 = vld [vmem:[%s17383_s5 + $0x30] sm:$0xff] }
 0x1c1   : > { %11834 = vrot.lane.b32.xlu0 %v12103_v12, %s11978_s20  ;;  %5103 = vmatpush1.bf16.msra.mxu0 %v5012_v54  ;;  %v5011_v57 = vpack.c.bf16 %v4980_v10, %v4979_v14 }
 0x1c2   : > { %11844 = vrot.lane.b32.xlu1 %v13237_v41, %s11978_s20  ;;  %v3218_v2 = vpop.f32.mrf.mxu0  ;;  %5104 = vmatprep.subr.bf16.mxu0 %v17541_v19 }
 0x1c3   : > { %v2355_v50 = vpop.permute.xlu0 %2354 }
 0x1c4   : > { %v2242_v34 = vpop.permute.xlu1 %2241  ;;  %v2710_v35 = vsel %vm2493_vm7, %v2650_v49, %v2355_v50 }
 0x1c5   : > { %2432 = vrot.lane.b32.xlu0 %v12147_v33, %s11977_s15  ;;  %5105 = vmatpush1.bf16.msra.mxu0 %v5011_v57 }
 0x1c6   : > { %11849 = vrot.lane.b32.xlu1 %v12131_v26, %s11979_s21  ;;  %5106 = vmatprep.subr.bf16.mxu0 %v17541_v19 }
 0x1c7   : > { %v2413_v44 = vpop.permute.xlu0 %2412 }
 0x1c8   : > { %v2024_v15 = vpop.permute.xlu1 %2023  ;;  %v2766_v22 = vsel %vm2542_vm8, %v2708_v51, %v2413_v44 }
 0x1c9   : > { %3052 = vmatprep.mubr.bf16.mxu1 %v2766_v22  ;;  %2043 = vrot.lane.b32.xlu0 %v12147_v33, %s11979_s21  ;;  %v2468_v42 = vsel %vm2444_vm6, %v12651_v0, %v2024_v15 }
 0x1ca   : > { %4233 = vrot.lane.b32.xlu1 %v12147_v33, %s11979_s21  ;;  %3053 = vmatmul.mubr.bf16.gmra.mxu1 %v2574_v38  ;;  %v2517_v0 = vsel %vm2493_vm7, %v2468_v42, %v2193_v27  ;;  %v4978_v27 = vld [vmem:[%s17383_s5 + $0x38] sm:$0xff] }
 0x1cb   : > { %v2308_v55 = vpop.permute.xlu0 %2307  ;;  %v2577_v1 = vsel %vm2542_vm8, %v2517_v0, %v2242_v34  ;;  %v5010_v36 = vpack.c.bf16 %v4978_v27, %v4977_v39  ;;  %v4975_v34 = vld [vmem:[%s17383_s5 + $0x20] sm:$0xff]  ;;  %v5022_v0 = vpack.c.bf16 %v5002_v20, %v5001_v48  ;;  %v17542_v27 = vld [vmem:[#allocation29_spill] sm:$0xff] }
 0x1cc   : > { %v2195_v43 = vpop.permute.xlu1 %2194  ;;  %v2653_v11 = vsel %vm2444_vm6, %v13031_v40, %v2308_v55  ;;  %v5009_v51 = vpack.c.bf16 %v4976_v6, %v4975_v34  ;;  %v4973_v40 = vld [vmem:[%s17383_s5 + $0x10] sm:$0xff]  ;;  %v4996_v34 = vld [vmem:[%s17383_s5 + $0xc8] sm:$0xff] }
 0x1cd   : > { %2434 = vrot.lane.b32.xlu0 %v12147_v33, %s11977_s15  ;;  %5107 = vmatpush1.bf16.msra.mxu0 %v5010_v36  ;;  %v5008_v5 = vpack.c.bf16 %v4974_v23, %v4973_v40 }
 0x1ce   : > { %2436 = vrot.lane.b32.xlu1 %v12147_v33, %s11977_s15  ;;  %5108 = vmatprep.subr.bf16.mxu0 %v17541_v19 }
 0x1cf   : > { %v2357_v31 = vpop.permute.xlu0 %2356 }
 0x1d0   : > { %v2244_v63 = vpop.permute.xlu1 %2243  ;;  %v2712_v44 = vsel %vm2493_vm7, %v2653_v11, %v2357_v31 }
 0x1d1   : > { %2045 = vrot.lane.b32.xlu0 %v12147_v33, %s11979_s21  ;;  %5109 = vmatpush1.bf16.msra.mxu0 %v5009_v51 }
 0x1d2   : > { %4593 = vrot.lane.b32.xlu1 %v12147_v33, %s11977_s15  ;;  %5110 = vmatprep.subr.bf16.mxu0 %v17541_v19 }
 0x1d3   : > { %v2415_v32 = vpop.permute.xlu0 %2414 }
 0x1d4   : > { %v2026_v29 = vpop.permute.xlu1 %2025  ;;  %v2769_v30 = vsel %vm2542_vm8, %v2710_v35, %v2415_v32 }
 0x1d5   : > { %3060 = vmatprep.mubr.bf16.mxu1 %v2769_v30  ;;  %11854 = vrot.lane.b32.xlu0 %v12135_v28, %s11978_s20  ;;  %v2470_v2 = vsel %vm2444_vm6, %v12704_v52, %v2026_v29 }
 0x1d6   : > { %11869 = vrot.lane.b32.xlu1 %v12131_v26, %s11979_s21  ;;  %3061 = vmatmul.mubr.bf16.gmra.mxu1 %v2577_v1  ;;  %v2519_v52 = vsel %vm2493_vm7, %v2470_v2, %v2195_v43  ;;  %v5000_v1 = vld [vmem:[%s17383_s5 + $0xe8] sm:$0xff] }
 0x1d7   : > { %v2310_v17 = vpop.permute.xlu0 %2309  ;;  %v2580_v4 = vsel %vm2542_vm8, %v2519_v52, %v2244_v63  ;;  %5111 = vmatpush1.bf16.msra.mxu0 %v5008_v5 }
 0x1d8   : > { %v2197_v53 = vpop.permute.xlu1 %2196  ;;  %5112 = vmatprep.subr.bf16.mxu0 %v17541_v19  ;;  %v2656_v49 = vsel %vm2444_vm6, %v13049_v25, %v2310_v17  ;;  %v4999_v25 = vld [vmem:[%s17383_s5 + $0xe0] sm:$0xff]  ;;  %v4997_v17 = vld [vmem:[%s17383_s5 + $0xd0] sm:$0xff] }
 0x1d9   : > { %11859 = vrot.lane.b32.xlu0 %v13237_v41, %s11978_s20  ;;  %v5021_v14 = vpack.c.bf16 %v5000_v1, %v4999_v25  ;;  %v4987_v25 = vld [vmem:[%s17383_s5 + $0x80] sm:$0xff]  ;;  %v4988_v1 = vld [vmem:[%s17383_s5 + $0x88] sm:$0xff] }
 0x1da   : > { %4235 = vrot.lane.b32.xlu1 %v12147_v33, %s11979_s21 }
 0x1db   : > { %v2359_v62 = vpop.permute.xlu0 %2358  ;;  %5113 = vmatpush1.bf16.msra.mxu0 %v5007_v45 }
 0x1dc   : > { %v2246_v50 = vpop.permute.xlu1 %2245  ;;  %5114 = vmatprep.subr.bf16.mxu0 %v17541_v19  ;;  %v2714_v54 = vsel %vm2493_vm7, %v2656_v49, %v2359_v62 }
 0x1dd   : > { %11864 = vrot.lane.b32.xlu0 %v12103_v12, %s11977_s15 }
 0x1de   : > { %2438 = vrot.lane.b32.xlu1 %v12147_v33, %s11977_s15 }
 0x1df   : > { %v2417_v15 = vpop.permute.xlu0 %2416  ;;  %5115 = vmatpush2.bf16.msra.mxu0 %v5022_v0  ;;  %v5003_v0 = vld [vmem:[%s17383_s5 + $0x100] sm:$0xff] }
 0x1e0   : > { %v2028_v22 = vpop.permute.xlu1 %2027  ;;  %v2772_v38 = vsel %vm2542_vm8, %v2712_v44, %v2417_v15  ;;  %5116 = vmatprep.subr.bf16.mxu0 %v17541_v19 }
 0x1e1   : > { %3068 = vmatprep.mubr.bf16.mxu1 %v2772_v38  ;;  %2047 = vrot.lane.b32.xlu0 %v12147_v33, %s11979_s21  ;;  %v2472_v42 = vsel %vm2444_vm6, %v12735_v58, %v2028_v22 }
 0x1e2   : > { %4595 = vrot.lane.b32.xlu1 %v12147_v33, %s11977_s15  ;;  %3069 = vmatmul.mubr.bf16.gmra.mxu1 %v2580_v4  ;;  %v2521_v58 = vsel %vm2493_vm7, %v2472_v42, %v2197_v53  ;;  %v4998_v53 = vld [vmem:[%s17383_s5 + $0xd8] sm:$0xff] }
 0x1e3   : > { %v2312_v55 = vpop.permute.xlu0 %2311  ;;  %v2583_v30 = vsel %vm2542_vm8, %v2521_v58, %v2246_v50  ;;  %5117 = vmatpush2.bf16.msra.mxu0 %v5021_v14  ;;  %v5020_v39 = vpack.c.bf16 %v4998_v53, %v4997_v17  ;;  %v4995_v50 = vld [vmem:[%s17383_s5 + $0xc0] sm:$0xff]  ;;  %v4994_v4 = vld [vmem:[%s17383_s5 + $0xb8] sm:$0xff]  ;;  %v5015_v14 = vpack.c.bf16 %v4988_v1, %v4987_v25 }
 0x1e4   : > { %v2199_v43 = vpop.permute.xlu1 %2198  ;;  %5118 = vmatprep.subr.bf16.mxu0 %v17541_v19  ;;  %v2659_v6 = vsel %vm2444_vm6, %v13077_v9, %v2312_v55  ;;  %v5019_v52 = vpack.c.bf16 %v4996_v34, %v4995_v50  ;;  %v4993_v9 = vld [vmem:[%s17383_s5 + $0xb0] sm:$0xff]  ;;  %v4991_v55 = vld [vmem:[%s17383_s5 + $0xa0] sm:$0xff] }
 0x1e5   : > { %11874 = vrot.lane.b32.xlu0 %v12135_v28, %s11978_s20  ;;  %v5018_v40 = vpack.c.bf16 %v4994_v4, %v4993_v9 }
 0x1e6   : > { %4496 = vrot.lane.b32.xlu1 %v12118_v18, %s11979_s21 }
 0x1e7   : > { %v2361_v31 = vpop.permute.xlu0 %2360  ;;  %5119 = vmatpush2.bf16.msra.mxu0 %v5020_v39 }
 0x1e8   : > { %v2248_v63 = vpop.permute.xlu1 %2247  ;;  %5120 = vmatprep.subr.bf16.mxu0 %v17541_v19  ;;  %v2716_v51 = vsel %vm2493_vm7, %v2659_v6, %v2361_v31  ;;  %v4989_v31 = vld [vmem:[%s17383_s5 + $0x90] sm:$0xff] }
 0x1e9   : > { %11879 = vrot.lane.b32.xlu0 %v12131_v26, %s11978_s20 }
 0x1ea   : > { %4436 = vrot.lane.b32.xlu1 %v12090_v8, %s11977_s15 }
 0x1eb   : > { %v2419_v35 = vpop.permute.xlu0 %2418  ;;  %5121 = vmatpush2.bf16.msra.mxu0 %v5019_v52 }
 0x1ec   : > { %v2030_v32 = vpop.permute.xlu1 %2029  ;;  %v2775_v29 = vsel %vm2542_vm8, %v2714_v54, %v2419_v35  ;;  %5122 = vmatprep.subr.bf16.mxu0 %v17541_v19  ;;  %v5004_v54 = vld [vmem:[%s17383_s5 + $0x108] sm:$0xff] }
 0x1ed   : > { %3076 = vmatprep.mubr.bf16.mxu1 %v2775_v29  ;;  %11884 = vrot.lane.b32.xlu0 %v12103_v12, %s11977_s15  ;;  %v2474_v36 = vsel %vm2444_vm6, %v17542_v27, %v2030_v32  ;;  %v5023_v29 = vpack.c.bf16 %v5004_v54, %v5003_v0 }
 0x1ee   : > { %4239 = vrot.lane.b32.xlu1 %v12147_v33, %s11979_s21  ;;  %3077 = vmatmul.mubr.bf16.gmra.mxu1 %v2583_v30  ;;  %v2523_v11 = vsel %vm2493_vm7, %v2474_v36, %v2199_v43  ;;  %v4992_v43 = vld [vmem:[%s17383_s5 + $0xa8] sm:$0xff] }
 0x1ef   : > { %v2314_v10 = vpop.permute.xlu0 %2313  ;;  %v2586_v38 = vsel %vm2542_vm8, %v2523_v11, %v2248_v63  ;;  %5123 = vmatpush2.bf16.msra.mxu0 %v5018_v40  ;;  %v5017_v47 = vpack.c.bf16 %v4992_v43, %v4991_v55  ;;  %v4990_v63 = vld [vmem:[%s17383_s5 + $0x98] sm:$0xff]  ;;  %11561 = vmatprep.subr.bf16.mxu1 %v5023_v29 }
 0x1f0   : > { %v2201_v57 = vpop.permute.xlu1 %2200  ;;  %5124 = vmatprep.subr.bf16.mxu0 %v17541_v19  ;;  %v2662_v48 = vsel %vm2444_vm6, %v13103_v61, %v2314_v10  ;;  %v5016_v49 = vpack.c.bf16 %v4990_v63, %v4989_v31  ;;  %v13450_v61 = vpop.f32.mrf.mxu0  ;;  %11562 = vmatpush3.bf16.msra.mxu1 %v5023_v29 }
 0x1f1   : > { %4237 = vrot.lane.b32.xlu0 %v12147_v33, %s11979_s21  ;;  %7082 = vmatprep.subr.bf16.mxu1 %v17541_v19 }
 0x1f2   : > { %4393 = vrot.lane.b32.xlu1 %v12118_v18, %s11978_s20  ;;  %v13461_v17 = vpop.f32.mrf.mxu0 }
 0x1f3   : > { %v2363_v2 = vpop.permute.xlu0 %2362  ;;  %5125 = vmatpush2.bf16.msra.mxu0 %v5017_v47 }
 0x1f4   : > { %v2250_v62 = vpop.permute.xlu1 %2249  ;;  %5126 = vmatprep.subr.bf16.mxu0 %v17541_v19  ;;  %v13465_v36 = vpop.f32.mrf.mxu0 }
 0x1f6   : > { %2041 = vrot.lane.b32.xlu1 %v13207_v16, %s11979_s21  ;;  %v13472_v52 = vpop.f32.mrf.mxu0 }
 0x1f7   : > { %v2421_v44 = vpop.permute.xlu0 %2420  ;;  %5127 = vmatpush2.bf16.msra.mxu0 %v5016_v49 }
 0x1f8   : > { %v2032_v15 = vpop.permute.xlu1 %2031  ;;  %v2778_v22 = vsel %vm2542_vm8, %v2716_v51, %v2421_v44  ;;  %5128 = vmatprep.subr.bf16.mxu0 %v17541_v19  ;;  %v13475_v51 = vpop.f32.mrf.mxu0 }
 0x1f9   : > { %3084 = vmatprep.mubr.bf16.mxu1 %v2778_v22  ;;  %v2476_v60 = vsel %vm2444_vm6, %v12810_v21, %v2032_v15  ;;  %v2718_v21 = vsel %vm2493_vm7, %v2662_v48, %v2363_v2 }
 0x1fa   : > { %3085 = vmatmul.mubr.bf16.gmra.mxu1 %v2586_v38  ;;  %v2525_v20 = vsel %vm2493_vm7, %v2476_v60, %v2201_v57  ;;  %v13477_v22 = vpop.f32.mrf.mxu0 }
 0x1fb   : > { %v2316_v23 = vpop.permute.xlu0 %2315  ;;  %v2589_v30 = vsel %vm2542_vm8, %v2525_v20, %v2250_v62  ;;  %5129 = vmatpush2.bf16.msra.mxu0 %v5015_v14 }
 0x1fc   : > { %v2203_v5 = vpop.permute.xlu1 %2202  ;;  %v2665_v2 = vsel %vm2444_vm6, %v13129_v3, %v2316_v23  ;;  %v13484_v23 = vpop.f32.mrf.mxu0 }
 0x1ff   : > { %v2365_v45 = vpop.permute.xlu0 %2364 }
 0x200   : > { %v2252_v42 = vpop.permute.xlu1 %2251  ;;  %v2720_v50 = vsel %vm2493_vm7, %v2665_v2, %v2365_v45 }
 0x203   : > { %v2423_v58 = vpop.permute.xlu0 %2422 }
 0x204   : > { %v2034_v35 = vpop.permute.xlu1 %2033  ;;  %v2781_v32 = vsel %vm2542_vm8, %v2718_v21, %v2423_v58 }
 0x205   : > { %3092 = vmatprep.mubr.bf16.mxu1 %v2781_v32  ;;  %v2478_v53 = vsel %vm2444_vm6, %v12852_v46, %v2034_v35 }
 0x206   : > { %3093 = vmatmul.mubr.bf16.gmra.mxu1 %v2589_v30  ;;  %v2527_v62 = vsel %vm2493_vm7, %v2478_v53, %v2203_v5 }
 0x207   : > { %v2318_v10 = vpop.permute.xlu0 %2317  ;;  %v2592_v46 = vsel %vm2542_vm8, %v2527_v62, %v2252_v42 }
 0x208   : > { %v2205_v57 = vpop.permute.xlu1 %2204  ;;  %v2668_v4 = vsel %vm2444_vm6, %v13155_v37, %v2318_v10 }
 0x20b   : > { %v2367_v39 = vpop.permute.xlu0 %2366 }
 0x20c   : > { %v2254_v27 = vpop.permute.xlu1 %2253  ;;  %v2722_v5 = vsel %vm2493_vm7, %v2668_v4, %v2367_v39 }
 0x20f   : > { %v2425_v34 = vpop.permute.xlu0 %2424 }
 0x210   : > { %v2036_v6 = vpop.permute.xlu1 %2035  ;;  %v2784_v11 = vsel %vm2542_vm8, %v2720_v50, %v2425_v34 }
 0x211   : > { %3100 = vmatprep.mubr.bf16.mxu1 %v2784_v11  ;;  %v2480_v3 = vsel %vm2444_vm6, %v12889_v56, %v2036_v6  ;;  %v13489_v56 = vpop.f32.mrf.mxu0 }
 0x212   : > { %3101 = vmatmul.mubr.bf16.gmra.mxu1 %v2592_v46  ;;  %v2529_v40 = vsel %vm2493_vm7, %v2480_v3, %v2205_v57 }
 0x213   : > { %v2320_v44 = vpop.permute.xlu0 %2319  ;;  %v2595_v60 = vsel %vm2542_vm8, %v2529_v40, %v2254_v27  ;;  %v13493_v31 = vpop.f32.mrf.mxu0 }
 0x214   : > { %v2207_v15 = vpop.permute.xlu1 %2206  ;;  %v2671_v63 = vsel %vm2444_vm6, %v13182_v59, %v2320_v44 }
 0x215   : > { %v13500_v0 = vpop.f32.mrf.mxu0 }
 0x217   : > { %v2369_v38 = vpop.permute.xlu0 %2368  ;;  %v13503_v32 = vpop.f32.mrf.mxu0 }
 0x218   : > { %v2256_v9 = vpop.permute.xlu1 %2255  ;;  %v2724_v20 = vsel %vm2493_vm7, %v2671_v63, %v2369_v38 }
 0x219   : > { %v13514_v57 = vpop.f32.mrf.mxu0 }
 0x21b   : > { %v2427_v55 = vpop.permute.xlu0 %2426  ;;  %v13517_v39 = vpop.f32.mrf.mxu0 }
 0x21c   : > { %v2038_v43 = vpop.permute.xlu1 %2037  ;;  %v2787_v47 = vsel %vm2542_vm8, %v2722_v5, %v2427_v55 }
 0x21d   : > { %3108 = vmatprep.mubr.bf16.mxu1 %v2787_v47  ;;  %v2482_v45 = vsel %vm2444_vm6, %v12909_v24, %v2038_v43  ;;  %v13524_v2 = vpop.f32.mrf.mxu0 }
 0x21e   : > { %3109 = vmatmul.mubr.bf16.gmra.mxu1 %v2595_v60  ;;  %v2531_v48 = vsel %vm2493_vm7, %v2482_v45, %v2207_v15 }
 0x21f   : > { %v2322_v37 = vpop.permute.xlu0 %2321  ;;  %v2598_v24 = vsel %vm2542_vm8, %v2531_v48, %v2256_v9  ;;  %v13534_v44 = vpop.f32.mrf.mxu0 }
 0x220   : > { %v2040_v42 = vpop.permute.xlu1 %2039  ;;  %v2674_v59 = vsel %vm2444_vm6, %v13207_v16, %v2322_v37  ;;  %v13552_v37 = vld [vmem:[%s17382_s4] ss:$0 sm:$0xff] }
 0x221   : > { %v2484_v29 = vsel %vm2444_vm6, %v12947_v7, %v2040_v42  ;;  %v13539_v40 = vpop.f32.mrf.mxu0 }
 0x223   : > { %v2429_v49 = vpop.permute.xlu0 %2428  ;;  %v13543_v47 = vpop.f32.mrf.mxu0 }
 0x224   : > { %v2209_v21 = vpop.permute.xlu1 %2208  ;;  %v2790_v58 = vsel %vm2542_vm8, %v2724_v20, %v2429_v49 }
 0x225   : > { %3116 = vmatprep.mubr.bf16.mxu1 %v2790_v58  ;;  %v2533_v1 = vsel %vm2493_vm7, %v2484_v29, %v2209_v21  ;;  %v13554_v42 = vpop.f32.mrf.mxu0 }
 0x226   : > { %3117 = vmatmul.mubr.bf16.gmra.mxu1 %v2598_v24 }
 0x227   : > { %v2371_v54 = vpop.permute.xlu0 %2370  ;;  %v13560_v24 = vpop.f32.mrf.mxu0 }
 0x228   : > { %v2258_v35 = vpop.permute.xlu1 %2257  ;;  %v2726_v30 = vsel %vm2493_vm7, %v2674_v59, %v2371_v54 }
 0x229   : > { %v2601_v53 = vsel %vm2542_vm8, %v2533_v1, %v2258_v35 }
 0x22b   : > { %v2431_v25 = vpop.permute.xlu0 %2430 }
 0x22c   : > { %v13511_v14 = vpop.permute.xlu1 %2210  ;;  %v2793_v10 = vsel %vm2542_vm8, %v2726_v30, %v2431_v25 }
 0x22d   : > { %3124 = vmatprep.mubr.bf16.mxu1 %v2793_v10 }
 0x22e   : > { %3125 = vmatmul.mubr.bf16.gmra.mxu1 %v2601_v53  ;;  %v13571_v53 = vpop.f32.mrf.mxu0 }
 0x22f   : > { %v13519_v16 = vpop.permute.xlu0 %11829 }
 0x230   : > { %v13521_v7 = vpop.permute.xlu1 %11839  ;;  %v11831_v27 = vunpack.i.l.bf16 %v13519_v16 }
 0x232   : > { %v2677_v50 = vsel %vm2444_vm6, %v12147_v33, %v11831_v27 }
 0x233   : > { %v13526_v62 = vpop.permute.xlu0 %11834 }
 0x234   : > { %v13530_v34 = vpop.permute.xlu1 %11844  ;;  %v11836_v6 = vunpack.i.l.bf16 %v13526_v62 }
 0x236   : > { %v2998_v11 = vpop.f32.mrf.mxu1  ;;  %v2728_v46 = vsel %vm2493_vm7, %v2677_v50, %v11836_v6  ;;  %v13575_v6 = vpop.f32.mrf.mxu0 }
 0x237   : > { %v2433_v15 = vpop.permute.xlu0 %2432 }
 0x238   : > { %v13536_v3 = vpop.permute.xlu1 %11849  ;;  %v3000_v38 = vpop.f32.mrf.mxu1  ;;  %v2796_v9 = vsel %vm2542_vm8, %v2728_v46, %v2433_v15 }
 0x239   : > { %3132 = vmatprep.mubr.bf16.mxu1 %v2796_v9  ;;  %v11852_v48 = vunpack.i.h.bf16 %v13536_v3 }
 0x23a   : > { %v3001_v4 = vpop.f32.mrf.mxu1 }
 0x23b   : > { %v13541_v5 = vpop.permute.xlu0 %2043  ;;  %v4797_v30 = vsel %vm2444_vm6, %v12147_v33, %v11852_v48 }
 0x23c   : > { %v4234_v55 = vpop.permute.xlu1 %4233  ;;  %v3003_v43 = vpop.f32.mrf.mxu1 }
 0x23d   : > { %v4642_v38 = vsel %vm2444_vm6, %v12090_v8, %v4234_v55 }
 0x23f   : > { %v13545_v60 = vpop.permute.xlu0 %2434 }
 0x240   : > { %v13547_v45 = vpop.permute.xlu1 %2436 }
 0x242   : > { %v3006_v63 = vpop.f32.mrf.mxu1 }
 0x243   : > { %v3007_v20 = vadd.f32 %v13552_v37, %v3006_v63  ;;  %v13558_v49 = vpop.permute.xlu0 %2045 }
 0x244   : > { %v4594_v21 = vpop.permute.xlu1 %4593  ;;  %v3008_v58 = vpop.f32.mrf.mxu1 }
 0x245   : > { %v3232_v35 = vadd.f32 %v13461_v17, %v3007_v20 }
 0x246   : > { %v3009_v54 = vpop.f32.mrf.mxu1 }
 0x247   : > { %v3010_v59 = vadd.f32 %v13552_v37, %v3009_v54  ;;  %v13564_v29 = vpop.permute.xlu0 %11854  ;;  %v3398_v17 = vmax.f32 %v3232_v35, 0.0 }
 0x248   : > { %v13568_v25 = vpop.permute.xlu1 %11869  ;;  %v3011_v1 = vpop.f32.mrf.mxu1  ;;  %v11856_v10 = vunpack.i.l.bf16 %v13564_v29 }
 0x249   : > { %v3235_v27 = vadd.f32 %v13472_v52, %v3010_v59  ;;  %v13583_v52 = vpop.f32.mrf.mxu0  ;;  %v11872_v1 = vunpack.i.h.bf16 %v13568_v25 }
 0x24a   : > { %v4862_v50 = vsel %vm2493_vm7, %v4797_v30, %v11856_v10 }
 0x24b   : > { %v3399_v11 = vmax.f32 %v3235_v27, 0.0  ;;  %v13577_v46 = vpop.permute.xlu0 %11859  ;;  %v4906_v15 = vsel %vm2542_vm8, %v4862_v50, %v4594_v21  ;;  %v13594_v50 = vpop.f32.mrf.mxu0 }
 0x24c   : > { %v4236_v9 = vpop.permute.xlu1 %4235  ;;  %v11861_v4 = vunpack.i.l.bf16 %v13577_v46  ;;  %5130 = vmatprep.mubr.bf16.mxu0 %v4906_v15  ;;  %17543 = vst [vmem:[#allocation29_spill] sm:$0xff] %v13594_v50 }
 0x24d   : > { %v3685_v43 = vpack.c.bf16 %v3399_v11, %v3398_v17 }
 0x24e   : > { %v3014_v63 = vpop.f32.mrf.mxu1  ;;  %v4686_v54 = vsel %vm2493_vm7, %v4642_v38, %v11861_v4 }
 0x24f   : > { %v3734_v48 = vshrl.u32 %v3685_v43, 16  ;;  %v3015_v20 = vadd.f32 %v13552_v37, %v3014_v63  ;;  %v13586_v58 = vpop.permute.xlu0 %11864  ;;  %v3737_v30 = vshll.u32 %v3685_v43, 16 }
 0x250   : > { %v13589_v35 = vpop.permute.xlu1 %2438  ;;  %v3016_v21 = vpop.f32.mrf.mxu1  ;;  %v11867_v55 = vunpack.i.h.bf16 %v13586_v58 }
 0x251   : > { %v3736_v59 = vrot.slane %v3734_v48, 7  ;;  %v3240_v11 = vadd.f32 %v13450_v61, %v3015_v20 }
 0x252   : > { %v3017_v10 = vpop.f32.mrf.mxu1  ;;  %v4730_v27 = vsel %vm2542_vm8, %v4686_v54, %v11867_v55 }
 0x253   : > { %v3739_v17 = vor.u32 %v3737_v30, %v3736_v59  ;;  %v3018_v15 = vadd.f32 %v13552_v37, %v3017_v10  ;;  %v3949_v4 = vsel %vm12074_vm2, %v3736_v59, 0  ;;  %v13600_v63 = vpop.permute.xlu0 %2047  ;;  %5131 = vmatmul.mubr.bf16.vlgmr.msra.gmra.mxu0 %v4730_v27  ;;  %v13611_v30 = vpop.f32.mrf.mxu0  ;;  %v3400_v10 = vmax.f32 %v3240_v11, 0.0 }
 0x254   : > { %v4596_v48 = vpop.permute.xlu1 %4595  ;;  %v3019_v43 = vpop.f32.mrf.mxu1  ;;  %v4334_v20 = vrot.slane %v3949_v4, 1  ;;  %v4025_v59 = vshll.u32 %v3949_v4, 16 }
 0x255   : > { %v3243_v21 = vadd.f32 %v13465_v36, %v3018_v15  ;;  %v13605_v54 = vsel %vm12074_vm2, 0, %v3739_v17  ;;  %v4800_v36 = vsel %vm2444_vm6, %v12147_v33, %v11872_v1  ;;  %v13624_v41 = vpop.f32.mrf.mxu0 }
 0x256   : > { %17545 = vst [vmem:[#allocation2_spill] sm:$0xff] %v13605_v54  ;;  %4541 = vrot.lane.b32.xlu1 %v13605_v54, %s11978_s20  ;;  %v4333_v61 = vrot.slane %v13605_v54, 1  ;;  %v4020_v55 = vshll.u32 %v13605_v54, 16  ;;  %v4018_v19 = vshrl.u32 %v13605_v54, 16  ;;  %17547 = vst [vmem:[#allocation41_spill] sm:$0xff] %v13624_v41 }
 0x257   : > { %v3401_v27 = vmax.f32 %v3243_v21, 0.0  ;;  %v13613_v43 = vpop.permute.xlu0 %11874  ;;  %v4027_v21 = vrot.slane %v4025_v59, 1  ;;  %v13643_v59 = vpop.f32.mrf.mxu0 }
 0x258   : > { %v13617_v17 = vpop.permute.xlu1 %4496  ;;  %v13620_v15 = vsel %vm2097_vm3, %v4333_v61, %v4334_v20  ;;  %v4022_v28 = vrot.slane %v4020_v55, 1  ;;  %v11876_v26 = vunpack.i.l.bf16 %v13613_v43  ;;  %17549 = vst [vmem:[#allocation43_spill] sm:$0xff] %v13643_v59 }
 0x259   : > { %17546 = vst [vmem:[#allocation40_spill] sm:$0xff] %v13617_v17  ;;  %v3686_v4 = vpack.c.bf16 %v3401_v27, %v3400_v10  ;;  %4498 = vrot.lane.b32.xlu0 %v13620_v15, %s11979_s21 }
 0x25a   : > { %v3022_v11 = vpop.f32.mrf.mxu1  ;;  %4438 = vrot.lane.b32.xlu1 %v13605_v54, %s11977_s15  ;;  %v4023_v1 = vor.u32 %v4022_v28, %v4018_v19  ;;  %v4864_v61 = vsel %vm2493_vm7, %v4800_v36, %v11876_v26  ;;  %v4644_v28 = vsel %vm2444_vm6, %v12090_v8, %v4236_v9  ;;  %v13660_v54 = vpop.f32.mrf.mxu0 }
 0x25b   : > { %v3741_v20 = vshrl.u32 %v3686_v4, 16  ;;  %v3023_v12 = vadd.f32 %v13552_v37, %v3022_v11  ;;  %v13632_v55 = vpop.permute.xlu0 %11879  ;;  %v4909_v10 = vsel %vm2542_vm8, %v4864_v61, %v4596_v48  ;;  %v3744_v19 = vshll.u32 %v3686_v4, 16  ;;  %17551 = vst [vmem:[#allocation45_spill] sm:$0xff] %v13660_v54 }
 0x25c   : > { %v13635_v27 = vpop.permute.xlu1 %4436  ;;  %v3024_v41 = vpop.f32.mrf.mxu1  ;;  %v13638_v50 = vsel %vm1712_vm5, %v4023_v1, %v4027_v21  ;;  %v11881_v17 = vunpack.i.l.bf16 %v13632_v55  ;;  %5138 = vmatprep.mubr.bf16.mxu0 %v4909_v10  ;;  %v11832_v4 = vunpack.i.h.bf16 %v13519_v16 }
 0x25d   : > { %17548 = vst [vmem:[#allocation42_spill] sm:$0xff] %v13638_v50  ;;  %v3743_v26 = vrot.slane %v3741_v20, 7  ;;  %4597 = vrot.lane.b32.xlu0 %v13638_v50, %s11977_s15  ;;  %v3248_v36 = vadd.f32 %v13477_v22, %v3023_v12  ;;  %v13684_v59 = vpop.f32.mrf.mxu0 }
 0x25e   : > { %v3025_v48 = vpop.f32.mrf.mxu1  ;;  %4395 = vrot.lane.b32.xlu1 %v13620_v15, %s11978_s20  ;;  %v4688_v10 = vsel %vm2493_vm7, %v4644_v28, %v11881_v17  ;;  %v11837_v28 = vunpack.i.h.bf16 %v13526_v62 }
 0x25f   : > { %v3746_v41 = vor.u32 %v3744_v19, %v3743_v26  ;;  %v3026_v11 = vadd.f32 %v13552_v37, %v3025_v48  ;;  %v3950_v1 = vsel %vm12074_vm2, %v3743_v26, 0  ;;  %v13653_v9 = vpop.permute.xlu0 %11884  ;;  %v3402_v48 = vmax.f32 %v3248_v36, 0.0 }
 0x260   : > { %v13656_v21 = vpop.permute.xlu1 %4239  ;;  %v3027_v61 = vpop.f32.mrf.mxu1  ;;  %v11887_v20 = vunpack.i.h.bf16 %v13653_v9  ;;  %v4337_v26 = vrot.slane %v3950_v1, 1  ;;  %v4037_v17 = vshll.u32 %v3950_v1, 16  ;;  %v11851_v1 = vunpack.i.l.bf16 %v13536_v3 }
 0x261   : > { %17550 = vst [vmem:[#allocation44_spill] sm:$0xff] %v13656_v21  ;;  %v3251_v12 = vadd.f32 %v13489_v56, %v3026_v11  ;;  %v13665_v22 = vsel %vm12074_vm2, 0, %v3746_v41  ;;  %v2680_v21 = vsel %vm2444_vm6, %v12147_v33, %v11832_v4  ;;  %v13693_v3 = vpop.f32.mrf.mxu0 }
 0x262   : > { %17552 = vst [vmem:[#allocation46_spill] sm:$0xff] %v13665_v22  ;;  %4241 = vrot.lane.b32.xlu1 %v13638_v50, %s11979_s21  ;;  %4543 = vrot.lane.b32.xlu0 %v13665_v22, %s11978_s20  ;;  %v4336_v16 = vrot.slane %v13665_v22, 1  ;;  %v4032_v19 = vshll.u32 %v13665_v22, 16  ;;  %v4733_v11 = vsel %vm2542_vm8, %v4688_v10, %v11887_v20  ;;  %v4030_v54 = vshrl.u32 %v13665_v22, 16  ;;  %17553 = vst [vmem:[#allocation47_spill] sm:$0xff] %v13693_v3 }
 0x263   : > { %v3403_v56 = vmax.f32 %v3251_v12, 0.0  ;;  %5139 = vmatmul.mubr.bf16.gmra.mxu0 %v4733_v11  ;;  %v4039_v10 = vrot.slane %v4037_v17, 1  ;;  %v11841_v12 = vunpack.i.l.bf16 %v13521_v7 }
 0x264   : > { %v13675_v41 = vpop.permute.xlu1 %4393  ;;  %v13678_v61 = vsel %vm2097_vm3, %v4336_v16, %v4337_v26  ;;  %v4034_v50 = vrot.slane %v4032_v19, 1  ;;  %v2730_v26 = vsel %vm2493_vm7, %v2680_v21, %v11837_v28  ;;  %v11847_v19 = vunpack.i.h.bf16 %v13530_v34  ;;  %v13704_v21 = vpop.f32.mrf.mxu0 }
 0x265   : > { %v3687_v62 = vpack.c.bf16 %v3403_v56, %v3402_v48  ;;  %v11846_v48 = vunpack.i.l.bf16 %v13530_v34  ;;  %v2488_v28 = vsel %vm2444_vm6, %v12090_v8, %v13541_v5 }
 0x266   : > { %v3030_v36 = vpop.f32.mrf.mxu1  ;;  %4440 = vrot.lane.b32.xlu1 %v13665_v22, %s11977_s15  ;;  %4500 = vrot.lane.b32.xlu0 %v13678_v61, %s11979_s21  ;;  %v4035_v20 = vor.u32 %v4034_v50, %v4030_v54 }
 0x267   : > { %v3748_v16 = vshrl.u32 %v3687_v62, 16  ;;  %v3031_v4 = vadd.f32 %v13552_v37, %v3030_v36  ;;  %v3751_v54 = vshll.u32 %v3687_v62, 16  ;;  %v2683_v36 = vsel %vm2444_vm6, %v12147_v33, %v11851_v1 }
 0x268   : > { %v2042_v56 = vpop.permute.xlu1 %2041  ;;  %v3032_v11 = vpop.f32.mrf.mxu1  ;;  %v13698_v22 = vsel %vm1712_vm5, %v4035_v20, %v4039_v10 }
 0x269   : > { %v3750_v50 = vrot.slane %v3748_v16, 7  ;;  %v2486_v17 = vsel %vm2444_vm6, %v12976_v13, %v2042_v56  ;;  %v2799_v13 = vsel %vm2542_vm8, %v2730_v26, %v13545_v60  ;;  %v3256_v20 = vadd.f32 %v13475_v51, %v3031_v4  ;;  %v13720_v16 = vpop.f32.mrf.mxu0 }
 0x26a   : > { %v3033_v34 = vpop.f32.mrf.mxu1  ;;  %4397 = vrot.lane.b32.xlu1 %v13678_v61, %s11978_s20  ;;  %4599 = vrot.lane.b32.xlu0 %v13698_v22, %s11977_s15  ;;  %v2535_v62 = vsel %vm2493_vm7, %v2486_v17, %v13511_v14  ;;  %v11842_v56 = vunpack.i.h.bf16 %v13521_v7  ;;  %v2732_v14 = vsel %vm2493_vm7, %v2683_v36, %v11847_v19  ;;  %v11871_v60 = vunpack.i.l.bf16 %v13568_v25 }
 0x26b   : > { %v3753_v1 = vor.u32 %v3751_v54, %v3750_v50  ;;  %v3034_v10 = vadd.f32 %v13552_v37, %v3033_v34  ;;  %v2604_v5 = vsel %vm2542_vm8, %v2535_v62, %v11841_v12  ;;  %v3951_v3 = vsel %vm12074_vm2, %v3750_v50, 0  ;;  %v13733_v4 = vpop.f32.mrf.mxu0 }
 0x26c   : > { %v3035_v11 = vpop.f32.mrf.mxu1  ;;  %3133 = vmatmul.mubr.bf16.gmra.mxu1 %v2604_v5  ;;  %v2537_v12 = vsel %vm2493_vm7, %v2488_v28, %v11846_v48  ;;  %v4340_v25 = vrot.slane %v3951_v3, 1  ;;  %v4049_v19 = vshll.u32 %v3951_v3, 16  ;;  %v3404_v50 = vmax.f32 %v3256_v20, 0.0 }
 0x26d   : > { %v3259_v26 = vadd.f32 %v13484_v23, %v3034_v10  ;;  %v13730_v51 = vsel %vm12074_vm2, 0, %v3753_v1  ;;  %3140 = vmatprep.mubr.bf16.mxu1 %v2799_v13  ;;  %v11553_v17 = vpop.f32.mrf.mxu0  ;;  %v11862_v62 = vunpack.i.h.bf16 %v13577_v46  ;;  %v2607_v13 = vsel %vm2542_vm8, %v2537_v12, %v11842_v56 }
 0x26e   : > { %4243 = vrot.lane.b32.xlu1 %v13698_v22, %s11979_s21  ;;  %4545 = vrot.lane.b32.xlu0 %v13730_v51, %s11978_s20  ;;  %v4339_v7 = vrot.slane %v13730_v51, 1  ;;  %v4044_v23 = vshll.u32 %v13730_v51, 16  ;;  %v4042_v48 = vshrl.u32 %v13730_v51, 16  ;;  %v2802_v1 = vsel %vm2542_vm8, %v2732_v14, %v13547_v45 }
 0x26f   : > { %v3405_v54 = vmax.f32 %v3259_v26, 0.0  ;;  %v3359_v10 = vpop.f32.mrf.mxu0  ;;  %v11857_v3 = vunpack.i.h.bf16 %v13564_v29  ;;  %v4051_v11 = vrot.slane %v4049_v19, 1  ;;  %v2686_v46 = vsel %vm2444_vm6, %v12147_v33, %v11871_v60 }
 0x270   : > { %v13742_v36 = vsel %vm2097_vm3, %v4339_v7, %v4340_v25  ;;  %v4046_v28 = vrot.slane %v4044_v23, 1  ;;  %v2490_v56 = vsel %vm2444_vm6, %v12090_v8, %v13558_v49  ;;  %v11866_v23 = vunpack.i.l.bf16 %v13586_v58 }
 0x271   : > { %v3688_v34 = vpack.c.bf16 %v3405_v54, %v3404_v50  ;;  %v11554_v29 = vpop.f32.mrf.mxu0  ;;  %v2734_v60 = vsel %vm2493_vm7, %v2686_v46, %v11862_v62  ;;  %v2539_v49 = vsel %vm2493_vm7, %v2490_v56, %v11857_v3 }
 0x272   : > { %v3038_v20 = vpop.f32.mrf.mxu1  ;;  %4442 = vrot.lane.b32.xlu1 %v13730_v51, %s11977_s15  ;;  %4502 = vrot.lane.b32.xlu0 %v13742_v36, %s11979_s21  ;;  %v4047_v5 = vor.u32 %v4046_v28, %v4042_v48  ;;  %v2805_v62 = vsel %vm2542_vm8, %v2734_v60, %v13589_v35 }
 0x273   : > { %v3755_v45 = vshrl.u32 %v3688_v34, 16  ;;  %v3039_v14 = vadd.f32 %v13552_v37, %v3038_v20  ;;  %v3758_v25 = vshll.u32 %v3688_v34, 16  ;;  %v3362_v19 = vpop.f32.mrf.mxu0 }
 0x274   : > { %v3040_v26 = vpop.f32.mrf.mxu1  ;;  %3141 = vmatmul.mubr.bf16.gmra.mxu1 %v2607_v13  ;;  %v13761_v12 = vsel %vm1712_vm5, %v4047_v5, %v4051_v11  ;;  %v2492_v11 = vsel %vm2444_vm6, %v12090_v8, %v13600_v63 }
 0x275   : > { %v3757_v7 = vrot.slane %v3755_v45, 7  ;;  %3148 = vmatprep.mubr.bf16.mxu1 %v2802_v1  ;;  %v3264_v17 = vadd.f32 %v13500_v0, %v3039_v14  ;;  %v11557_v28 = vpop.f32.mrf.mxu0  ;;  %v11877_v1 = vunpack.i.h.bf16 %v13613_v43  ;;  %v2610_v0 = vsel %vm2542_vm8, %v2539_v49, %v11866_v23 }
 0x276   : > { %v3041_v50 = vpop.f32.mrf.mxu1  ;;  %4399 = vrot.lane.b32.xlu1 %v13742_v36, %s11978_s20  ;;  %4601 = vrot.lane.b32.xlu0 %v13761_v12, %s11977_s15 }
 0x277   : > { %v3760_v54 = vor.u32 %v3758_v25, %v3757_v7  ;;  %v3042_v48 = vadd.f32 %v13552_v37, %v3041_v50  ;;  %v3952_v58 = vsel %vm12074_vm2, %v3757_v7, 0  ;;  %v3375_v3 = vpop.f32.mrf.mxu0  ;;  %v3406_v43 = vmax.f32 %v3264_v17, 0.0 }
 0x278   : > { %v3043_v34 = vpop.f32.mrf.mxu1  ;;  %v4343_v35 = vrot.slane %v3952_v58, 1  ;;  %v4061_v5 = vshll.u32 %v3952_v58, 16  ;;  %v11886_v7 = vunpack.i.l.bf16 %v13653_v9  ;;  %v2541_v19 = vsel %vm2493_vm7, %v2492_v11, %v11877_v1 }
 0x279   : > { %v3267_v13 = vadd.f32 %v13514_v57, %v3042_v48  ;;  %v13780_v10 = vsel %vm12074_vm2, 0, %v3760_v54  ;;  %v11558_v56 = vpop.f32.mrf.mxu0 }
 0x27a   : > { %4245 = vrot.lane.b32.xlu1 %v13761_v12, %s11979_s21  ;;  %4547 = vrot.lane.b32.xlu0 %v13780_v10, %s11978_s20  ;;  %v4342_v20 = vrot.slane %v13780_v10, 1  ;;  %v4056_v57 = vshll.u32 %v13780_v10, 16  ;;  %v4054_v14 = vshrl.u32 %v13780_v10, 16  ;;  %v4063_v60 = vrot.slane %v4061_v5, 1 }
 0x27b   : > { %v3407_v46 = vmax.f32 %v3267_v13, 0.0  ;;  %v3378_v25 = vpop.f32.mrf.mxu0  ;;  %v2613_v58 = vsel %vm2542_vm8, %v2541_v19, %v11886_v7 }
 0x27c   : > { %3149 = vmatmul.mubr.bf16.gmra.mxu1 %v2610_v0  ;;  %v13793_v45 = vsel %vm2097_vm3, %v4342_v20, %v4343_v35  ;;  %v4058_v29 = vrot.slane %v4056_v57, 1 }
 0x27d   : > { %v3689_v26 = vpack.c.bf16 %v3407_v46, %v3406_v43  ;;  %3156 = vmatprep.mubr.bf16.mxu1 %v2805_v62 }
 0x27e   : > { %v3046_v23 = vpop.f32.mrf.mxu1  ;;  %4444 = vrot.lane.b32.xlu1 %v13780_v10, %s11977_s15  ;;  %4504 = vrot.lane.b32.xlu0 %v13793_v45, %s11979_s21  ;;  %v4059_v63 = vor.u32 %v4058_v29, %v4054_v14 }
 0x27f   : > { %v3762_v50 = vshrl.u32 %v3689_v26, 16  ;;  %v3047_v49 = vadd.f32 %v13552_v37, %v3046_v23  ;;  %v3765_v48 = vshll.u32 %v3689_v26, 16 }
 0x280   : > { %v3048_v54 = vpop.f32.mrf.mxu1  ;;  %v13804_v17 = vsel %vm1712_vm5, %v4059_v63, %v4063_v60 }
 0x281   : > { %v3764_v9 = vrot.slane %v3762_v50, 7  ;;  %v3272_v62 = vadd.f32 %v13493_v31, %v3047_v49 }
 0x282   : > { %v3049_v28 = vpop.f32.mrf.mxu1  ;;  %4401 = vrot.lane.b32.xlu1 %v13793_v45, %s11978_s20  ;;  %4603 = vrot.lane.b32.xlu0 %v13804_v17, %s11977_s15 }
 0x283   : > { %v3767_v34 = vor.u32 %v3765_v48, %v3764_v9  ;;  %v3050_v13 = vadd.f32 %v13552_v37, %v3049_v28  ;;  %v3953_v1 = vsel %vm12074_vm2, %v3764_v9, 0 }
 0x284   : > { %v3051_v0 = vpop.f32.mrf.mxu1  ;;  %3157 = vmatmul.mubr.bf16.gmra.mxu1 %v2613_v58  ;;  %v4346_v35 = vrot.slane %v3953_v1, 1  ;;  %v4073_v5 = vshll.u32 %v3953_v1, 16 }
 0x285   : > { %v3275_v3 = vadd.f32 %v13503_v32, %v3050_v13  ;;  %v13818_v20 = vsel %vm12074_vm2, 0, %v3767_v34  ;;  %11563 = vmatprep.mubr.msk.bf16.mxu1 %vm2444_vm6, %v12118_v18  ;;  %v3408_v32 = vmax.f32 %v3272_v62, 0.0 }
 0x286   : > { %4247 = vrot.lane.b32.xlu1 %v13804_v17, %s11979_s21  ;;  %4549 = vrot.lane.b32.xlu0 %v13818_v20, %s11978_s20  ;;  %v4345_v31 = vrot.slane %v13818_v20, 1  ;;  %v4068_v57 = vshll.u32 %v13818_v20, 16  ;;  %v4066_v46 = vshrl.u32 %v13818_v20, 16  ;;  %v4075_v7 = vrot.slane %v4073_v5, 1 }
 0x287   : > { %v3409_v43 = vmax.f32 %v3275_v3, 0.0 }
 0x288   : > { %v4347_v11 = vsel %vm2097_vm3, %v4345_v31, %v4346_v35  ;;  %v4070_v56 = vrot.slane %v4068_v57, 1 }
 0x289   : > { %v3690_v14 = vpack.c.bf16 %v3409_v43, %v3408_v32 }
 0x28a   : > { %v3054_v29 = vpop.f32.mrf.mxu1  ;;  %4446 = vrot.lane.b32.xlu1 %v13818_v20, %s11977_s15  ;;  %4506 = vrot.lane.b32.xlu0 %v4347_v11, %s11979_s21  ;;  %v4071_v26 = vor.u32 %v4070_v56, %v4066_v46 }
 0x28b   : > { %v3769_v25 = vshrl.u32 %v3690_v14, 16  ;;  %v3055_v23 = vadd.f32 %v13552_v37, %v3054_v29  ;;  %v3772_v50 = vshll.u32 %v3690_v14, 16 }
 0x28c   : > { %v3056_v63 = vpop.f32.mrf.mxu1  ;;  %11564 = vmatmul.mubr.msk.bf16.vlgmr.msra.gmra.mxu1 %vm2444_vm6, %v12118_v18  ;;  %v13837_v60 = vsel %vm1712_vm5, %v4071_v26, %v4075_v7 }
 0x28d   : > { %v3771_v19 = vrot.slane %v3769_v25, 7  ;;  %11567 = vmatprep.mubr.msk.bf16.mxu1 %vm2444_vm6, %v13620_v15  ;;  %v3280_v9 = vadd.f32 %v13524_v2, %v3055_v23 }
 0x28e   : > { %v3057_v49 = vpop.f32.mrf.mxu1  ;;  %4403 = vrot.lane.b32.xlu1 %v4347_v11, %s11978_s20  ;;  %4605 = vrot.lane.b32.xlu0 %v13837_v60, %s11977_s15 }
 0x28f   : > { %v3774_v54 = vor.u32 %v3772_v50, %v3771_v19  ;;  %v3058_v48 = vadd.f32 %v13552_v37, %v3057_v49  ;;  %v3954_v58 = vsel %vm12074_vm2, %v3771_v19, 0  ;;  %v3410_v0 = vmax.f32 %v3280_v9, 0.0 }
 0x290   : > { %v3059_v28 = vpop.f32.mrf.mxu1  ;;  %v4349_v62 = vrot.slane %v3954_v58, 1  ;;  %v4085_v1 = vshll.u32 %v3954_v58, 16 }
 0x291   : > { %v3283_v34 = vadd.f32 %v13539_v40, %v3058_v48  ;;  %v13851_v15 = vsel %vm12074_vm2, 0, %v3774_v54 }
 0x292   : > { %4249 = vrot.lane.b32.xlu1 %v13837_v60, %s11979_s21  ;;  %4551 = vrot.lane.b32.xlu0 %v13851_v15, %s11978_s20  ;;  %v4348_v2 = vrot.slane %v13851_v15, 1  ;;  %v4080_v13 = vshll.u32 %v13851_v15, 16  ;;  %v4078_v31 = vshrl.u32 %v13851_v15, 16  ;;  %v4087_v43 = vrot.slane %v4085_v1, 1 }
 0x293   : > { %v3411_v3 = vmax.f32 %v3283_v34, 0.0 }
 0x294   : > { %11568 = vmatmul.mubr.msk.bf16.gmra.mxu1 %vm2444_vm6, %v13678_v61  ;;  %v4350_v40 = vsel %vm2097_vm3, %v4348_v2, %v4349_v62  ;;  %v4082_v35 = vrot.slane %v4080_v13, 1 }
 0x295   : > { %v3691_v57 = vpack.c.bf16 %v3411_v3, %v3410_v0  ;;  %11571 = vmatprep.mubr.msk.bf16.mxu1 %vm2444_vm6, %v13742_v36 }
 0x296   : > { %v3062_v5 = vpop.f32.mrf.mxu1  ;;  %4448 = vrot.lane.b32.xlu1 %v13851_v15, %s11977_s15  ;;  %4508 = vrot.lane.b32.xlu0 %v4350_v40, %s11979_s21  ;;  %v4083_v32 = vor.u32 %v4082_v35, %v4078_v31 }
 0x297   : > { %v3776_v46 = vshrl.u32 %v3691_v57, 16  ;;  %v3063_v61 = vadd.f32 %v13552_v37, %v3062_v5  ;;  %v3779_v26 = vshll.u32 %v3691_v57, 16 }
 0x298   : > { %v3064_v56 = vpop.f32.mrf.mxu1  ;;  %v13870_v14 = vsel %vm1712_vm5, %v4083_v32, %v4087_v43 }
 0x299   : > { %v3778_v29 = vrot.slane %v3776_v46, 7  ;;  %v3288_v25 = vadd.f32 %v13517_v39, %v3063_v61 }
 0x29a   : > { %v3065_v7 = vpop.f32.mrf.mxu1  ;;  %4405 = vrot.lane.b32.xlu1 %v4350_v40, %s11978_s20  ;;  %4607 = vrot.lane.b32.xlu0 %v13870_v14, %s11977_s15 }
 0x29b   : > { %v3781_v36 = vor.u32 %v3779_v26, %v3778_v29  ;;  %v3066_v23 = vadd.f32 %v13552_v37, %v3065_v7  ;;  %v3955_v63 = vsel %vm12074_vm2, %v3778_v29, 0  ;;  %v3412_v48 = vmax.f32 %v3288_v25, 0.0 }
 0x29c   : > { %v3067_v19 = vpop.f32.mrf.mxu1  ;;  %11572 = vmatmul.mubr.msk.bf16.gmra.mxu1 %vm2444_vm6, %v13793_v45  ;;  %v4352_v54 = vrot.slane %v3955_v63, 1  ;;  %v4097_v45 = vshll.u32 %v3955_v63, 16 }
 0x29d   : > { %v3291_v50 = vadd.f32 %v13534_v44, %v3066_v23  ;;  %11575 = vmatprep.mubr.msk.bf16.mxu1 %vm2444_vm6, %v4347_v11  ;;  %v13885_v49 = vsel %vm12074_vm2, 0, %v3781_v36 }
 0x29e   : > { %4251 = vrot.lane.b32.xlu1 %v13870_v14, %s11979_s21  ;;  %4553 = vrot.lane.b32.xlu0 %v13885_v49, %s11978_s20  ;;  %v4351_v39 = vrot.slane %v13885_v49, 1  ;;  %v4092_v9 = vshll.u32 %v13885_v49, 16  ;;  %v4090_v58 = vshrl.u32 %v13885_v49, 16  ;;  %v4099_v13 = vrot.slane %v4097_v45, 1 }
 0x29f   : > { %v3413_v44 = vmax.f32 %v3291_v50, 0.0 }
 0x2a0   : > { %v4353_v11 = vsel %vm2097_vm3, %v4351_v39, %v4352_v54  ;;  %v4094_v28 = vrot.slane %v4092_v9, 1 }
 0x2a1   : > { %v3692_v34 = vpack.c.bf16 %v3413_v44, %v3412_v48 }
 0x2a2   : > { %v3070_v2 = vpop.f32.mrf.mxu1  ;;  %4450 = vrot.lane.b32.xlu1 %v13885_v49, %s11977_s15  ;;  %4510 = vrot.lane.b32.xlu0 %v4353_v11, %s11979_s21  ;;  %v4095_v62 = vor.u32 %v4094_v28, %v4090_v58 }
 0x2a3   : > { %v3783_v1 = vshrl.u32 %v3692_v34, 16  ;;  %v3071_v0 = vadd.f32 %v13552_v37, %v3070_v2  ;;  %v3786_v57 = vshll.u32 %v3692_v34, 16 }
 0x2a4   : > { %v3072_v3 = vpop.f32.mrf.mxu1  ;;  %11576 = vmatmul.mubr.msk.bf16.gmra.mxu1 %vm2444_vm6, %v4350_v40  ;;  %v13901_v31 = vsel %vm1712_vm5, %v4095_v62, %v4099_v13 }
 0x2a5   : > { %v3785_v35 = vrot.slane %v3783_v1, 7  ;;  %11579 = vmatprep.mubr.msk.bf16.mxu1 %vm2444_vm6, %v4353_v11  ;;  %v3296_v43 = vadd.f32 %v13554_v42, %v3071_v0 }
 0x2a6   : > { %v3073_v5 = vpop.f32.mrf.mxu1  ;;  %4407 = vrot.lane.b32.xlu1 %v4353_v11, %s11978_s20  ;;  %4609 = vrot.lane.b32.xlu0 %v13901_v31, %s11977_s15 }
 0x2a7   : > { %v3788_v32 = vor.u32 %v3786_v57, %v3785_v35  ;;  %v3074_v46 = vadd.f32 %v13552_v37, %v3073_v5  ;;  %v3956_v40 = vsel %vm12074_vm2, %v3785_v35, 0  ;;  %v3414_v25 = vmax.f32 %v3296_v43, 0.0 }
 0x2a8   : > { %v3075_v61 = vpop.f32.mrf.mxu1  ;;  %v4355_v26 = vrot.slane %v3956_v40, 1  ;;  %v4109_v36 = vshll.u32 %v3956_v40, 16 }
 0x2a9   : > { %v3299_v56 = vadd.f32 %v13571_v53, %v3074_v46  ;;  %v13914_v29 = vsel %vm12074_vm2, 0, %v3788_v32 }
 0x2aa   : > { %4253 = vrot.lane.b32.xlu1 %v13901_v31, %s11979_s21  ;;  %4555 = vrot.lane.b32.xlu0 %v13914_v29, %s11978_s20  ;;  %v4354_v42 = vrot.slane %v13914_v29, 1  ;;  %v4104_v7 = vshll.u32 %v13914_v29, 16  ;;  %v4102_v63 = vshrl.u32 %v13914_v29, 16  ;;  %v4111_v9 = vrot.slane %v4109_v36, 1 }
 0x2ab   : > { %v3415_v23 = vmax.f32 %v3299_v56, 0.0 }
 0x2ac   : > { %v4356_v53 = vsel %vm2097_vm3, %v4354_v42, %v4355_v26  ;;  %v4106_v19 = vrot.slane %v4104_v7, 1 }
 0x2ad   : > { %v3693_v50 = vpack.c.bf16 %v3415_v23, %v3414_v25  ;;  %11580 = vmatmul.mubr.msk.bf16.gmra.mxu1 %vm2444_vm6, %v4356_v53 }
 0x2ae   : > { %v3078_v39 = vpop.f32.mrf.mxu1  ;;  %4452 = vrot.lane.b32.xlu1 %v13914_v29, %s11977_s15  ;;  %4512 = vrot.lane.b32.xlu0 %v4356_v53, %s11979_s21  ;;  %v4107_v54 = vor.u32 %v4106_v19, %v4102_v63 }
 0x2af   : > { %v3790_v45 = vshrl.u32 %v3693_v50, 16  ;;  %v3079_v48 = vadd.f32 %v13552_v37, %v3078_v39  ;;  %v3793_v28 = vshll.u32 %v3693_v50, 16 }
 0x2b0   : > { %v3080_v44 = vpop.f32.mrf.mxu1  ;;  %v13930_v11 = vsel %vm1712_vm5, %v4107_v54, %v4111_v9 }
 0x2b1   : > { %v3792_v58 = vrot.slane %v3790_v45, 7  ;;  %v3304_v62 = vadd.f32 %v13543_v47, %v3079_v48 }
 0x2b2   : > { %v3081_v34 = vpop.f32.mrf.mxu1  ;;  %4409 = vrot.lane.b32.xlu1 %v4356_v53, %s11978_s20  ;;  %4611 = vrot.lane.b32.xlu0 %v13930_v11, %s11977_s15 }
 0x2b3   : > { %v3795_v2 = vor.u32 %v3793_v28, %v3792_v58  ;;  %v3082_v13 = vadd.f32 %v13552_v37, %v3081_v34  ;;  %v3957_v1 = vsel %vm12074_vm2, %v3792_v58, 0  ;;  %v3416_v43 = vmax.f32 %v3304_v62, 0.0 }
 0x2b4   : > { %v3083_v0 = vpop.f32.mrf.mxu1  ;;  %v4358_v57 = vrot.slane %v3957_v1, 1  ;;  %v4121_v32 = vshll.u32 %v3957_v1, 16 }
 0x2b5   : > { %v3307_v3 = vadd.f32 %v13560_v24, %v3082_v13  ;;  %v13942_v35 = vsel %vm12074_vm2, 0, %v3795_v2 }
 0x2b6   : > { %4255 = vrot.lane.b32.xlu1 %v13930_v11, %s11979_s21  ;;  %4557 = vrot.lane.b32.xlu0 %v13942_v35, %s11978_s20  ;;  %v4357_v47 = vrot.slane %v13942_v35, 1  ;;  %v4116_v5 = vshll.u32 %v13942_v35, 16  ;;  %v4114_v40 = vshrl.u32 %v13942_v35, 16  ;;  %v4123_v7 = vrot.slane %v4121_v32, 1  ;;  %v4238_v32 = vpop.permute.xlu0 %4237 }
 0x2b7   : > { %v3417_v46 = vmax.f32 %v3307_v3, 0.0 }
 0x2b8   : > { %v4359_v24 = vsel %vm2097_vm3, %v4357_v47, %v4358_v57  ;;  %v4118_v61 = vrot.slane %v4116_v5, 1 }
 0x2b9   : > { %v3694_v56 = vpack.c.bf16 %v3417_v46, %v3416_v43  ;;  %11583 = vmatprep.mubr.msk.bf16.mxu1 %vm2444_vm6, %v4359_v24 }
 0x2ba   : > { %v3086_v42 = vpop.f32.mrf.mxu1  ;;  %4454 = vrot.lane.b32.xlu1 %v13942_v35, %s11977_s15  ;;  %4514 = vrot.lane.b32.xlu0 %v4359_v24, %s11979_s21  ;;  %v4119_v26 = vor.u32 %v4118_v61, %v4114_v40 }
 0x2bb   : > { %v3797_v36 = vshrl.u32 %v3694_v56, 16  ;;  %v3087_v25 = vadd.f32 %v13552_v37, %v3086_v42  ;;  %v3800_v19 = vshll.u32 %v3694_v56, 16 }
 0x2bc   : > { %v3088_v23 = vpop.f32.mrf.mxu1  ;;  %v13958_v53 = vsel %vm1712_vm5, %v4119_v26, %v4123_v7  ;;  %v11882_v26 = vunpack.i.h.bf16 %v13632_v55 }
 0x2bd   : > { %v3799_v63 = vrot.slane %v3797_v36, 7  ;;  %v3312_v54 = vadd.f32 %v13583_v52, %v3087_v25 }
 0x2be   : > { %v3089_v50 = vpop.f32.mrf.mxu1  ;;  %4411 = vrot.lane.b32.xlu1 %v4359_v24, %s11978_s20  ;;  %4613 = vrot.lane.b32.xlu0 %v13958_v53, %s11977_s15 }
 0x2bf   : > { %v3802_v39 = vor.u32 %v3800_v19, %v3799_v63  ;;  %v3090_v9 = vadd.f32 %v13552_v37, %v3089_v50  ;;  %v3958_v45 = vsel %vm12074_vm2, %v3799_v63, 0  ;;  %v3418_v62 = vmax.f32 %v3312_v54, 0.0  ;;  %v17554_v54 = vld [vmem:[#allocation40_spill] sm:$0xff] }
 0x2c0   : > { %v3091_v48 = vpop.f32.mrf.mxu1  ;;  %v4361_v28 = vrot.slane %v3958_v45, 1  ;;  %v4133_v2 = vshll.u32 %v3958_v45, 16  ;;  %v4646_v50 = vsel %vm2444_vm6, %v12090_v8, %v4238_v32  ;;  %v17555_v45 = vld [vmem:[#allocation29_spill] sm:$0xff] }
 0x2c1   : > { %v3315_v44 = vadd.f32 %v13611_v30, %v3090_v9  ;;  %v13970_v58 = vsel %vm12074_vm2, 0, %v3802_v39  ;;  %v4803_v9 = vsel %vm2444_vm6, %v12147_v33, %v17554_v54 }
 0x2c2   : > { %4257 = vrot.lane.b32.xlu1 %v13958_v53, %s11979_s21  ;;  %4559 = vrot.lane.b32.xlu0 %v13970_v58, %s11978_s20  ;;  %v4360_v52 = vrot.slane %v13970_v58, 1  ;;  %v4128_v34 = vshll.u32 %v13970_v58, 16  ;;  %v4126_v1 = vshrl.u32 %v13970_v58, 16  ;;  %v4135_v5 = vrot.slane %v4133_v2, 1 }
 0x2c3   : > { %v3419_v13 = vmax.f32 %v3315_v44, 0.0  ;;  %v4690_v2 = vsel %vm2493_vm7, %v4646_v50, %v11882_v26 }
 0x2c4   : > { %v4362_v30 = vsel %vm2097_vm3, %v4360_v52, %v4361_v28  ;;  %v4130_v0 = vrot.slane %v4128_v34, 1 }
 0x2c5   : > { %v3695_v3 = vpack.c.bf16 %v3419_v13, %v3418_v62  ;;  %11584 = vmatmul.mubr.msk.bf16.gmra.mxu1 %vm2444_vm6, %v4362_v30 }
 0x2c6   : > { %v3094_v47 = vpop.f32.mrf.mxu1  ;;  %4456 = vrot.lane.b32.xlu1 %v13970_v58, %s11977_s15  ;;  %4516 = vrot.lane.b32.xlu0 %v4362_v30, %s11979_s21  ;;  %v4131_v57 = vor.u32 %v4130_v0, %v4126_v1 }
 0x2c7   : > { %v3804_v43 = vshrl.u32 %v3695_v3, 16  ;;  %v3095_v46 = vadd.f32 %v13552_v37, %v3094_v47  ;;  %v3807_v42 = vshll.u32 %v3695_v3, 16 }
 0x2c8   : > { %v3096_v24 = vpop.f32.mrf.mxu1  ;;  %v4542_v40 = vpop.permute.xlu1 %4541  ;;  %v13986_v61 = vsel %vm1712_vm5, %v4131_v57, %v4135_v5 }
 0x2c9   : > { %v3806_v56 = vrot.slane %v3804_v43, 7  ;;  %v3320_v25 = vadd.f32 %v13575_v6, %v3095_v46  ;;  %v4866_v13 = vsel %vm2493_vm7, %v4803_v9, %v4542_v40  ;;  %v4736_v46 = vsel %vm2542_vm8, %v4690_v2, %v13635_v27  ;;  %v14044_v9 = vld [vmem:[%s17382_s4] ss:$0 sm:$0xff] }
 0x2ca   : > { %v3097_v7 = vpop.f32.mrf.mxu1  ;;  %4413 = vrot.lane.b32.xlu1 %v4362_v30, %s11978_s20  ;;  %4615 = vrot.lane.b32.xlu0 %v13986_v61, %s11977_s15 }
 0x2cb   : > { %v3809_v36 = vor.u32 %v3807_v42, %v3806_v56  ;;  %v3098_v23 = vadd.f32 %v13552_v37, %v3097_v7  ;;  %v13994_v63 = vpop.permute.xlu0 %4498  ;;  %v3959_v19 = vsel %vm12074_vm2, %v3806_v56, 0  ;;  %v3420_v62 = vmax.f32 %v3320_v25, 0.0 }
 0x2cc   : > { %v3099_v55 = vpop.f32.mrf.mxu1  ;;  %v14000_v39 = vpop.permute.xlu1 %4438  ;;  %v4364_v52 = vrot.slane %v3959_v19, 1  ;;  %v4145_v34 = vshll.u32 %v3959_v19, 16 }
 0x2cd   : > { %v3323_v48 = vadd.f32 %v17555_v45, %v3098_v23  ;;  %v14008_v6 = vsel %vm12074_vm2, 0, %v3809_v36  ;;  %v17556_v55 = vld [vmem:[#allocation43_spill] sm:$0xff] }
 0x2ce   : > { %4259 = vrot.lane.b32.xlu1 %v13986_v61, %s11979_s21  ;;  %4561 = vrot.lane.b32.xlu0 %v14008_v6, %s11978_s20  ;;  %v4363_v44 = vrot.slane %v14008_v6, 1  ;;  %v4140_v28 = vshll.u32 %v14008_v6, 16  ;;  %v4138_v57 = vshrl.u32 %v14008_v6, 16  ;;  %v4147_v40 = vrot.slane %v4145_v34, 1 }
 0x2cf   : > { %v3421_v30 = vmax.f32 %v3323_v48, 0.0  ;;  %v4598_v1 = vpop.permute.xlu0 %4597 }
 0x2d0   : > { %v14018_v0 = vpop.permute.xlu1 %4395  ;;  %v4912_v3 = vsel %vm2542_vm8, %v4866_v13, %v4598_v1  ;;  %v4365_v47 = vsel %vm2097_vm3, %v4363_v44, %v4364_v52  ;;  %v4142_v5 = vrot.slane %v4140_v28, 1  ;;  %v17557_v1 = vld [vmem:[#allocation44_spill] sm:$0xff] }
 0x2d1   : > { %v3696_v32 = vpack.c.bf16 %v3421_v30, %v3420_v62  ;;  %5146 = vmatprep.mubr.bf16.mxu0 %v4912_v3  ;;  %11587 = vmatprep.mubr.msk.bf16.mxu1 %vm2444_vm6, %v4365_v47 }
 0x2d2   : > { %v3102_v43 = vpop.f32.mrf.mxu1  ;;  %4458 = vrot.lane.b32.xlu1 %v14008_v6, %s11977_s15  ;;  %4518 = vrot.lane.b32.xlu0 %v4365_v47, %s11979_s21  ;;  %v4143_v24 = vor.u32 %v4142_v5, %v4138_v57  ;;  %v17558_v57 = vld [vmem:[#allocation42_spill] sm:$0xff] }
 0x2d3   : > { %v3811_v56 = vshrl.u32 %v3696_v32, 16  ;;  %v3103_v42 = vadd.f32 %v13552_v37, %v3102_v43  ;;  %5147 = vmatmul.mubr.bf16.gmra.mxu0 %v4736_v46  ;;  %v3814_v23 = vshll.u32 %v3696_v32, 16  ;;  %v4806_v5 = vsel %vm2444_vm6, %v17558_v57, %v13994_v63 }
 0x2d4   : > { %v3104_v26 = vpop.f32.mrf.mxu1  ;;  %v14030_v7 = vpop.permute.xlu1 %4241  ;;  %v14033_v36 = vsel %vm1712_vm5, %v4143_v24, %v4147_v40 }
 0x2d5   : > { %v3813_v25 = vrot.slane %v3811_v56, 7  ;;  %v4544_v19 = vpop.permute.xlu0 %4543  ;;  %v3328_v54 = vadd.f32 %v17556_v55, %v3103_v42 }
 0x2d6   : > { %v3105_v50 = vpop.f32.mrf.mxu1  ;;  %4415 = vrot.lane.b32.xlu1 %v4365_v47, %s11978_s20  ;;  %4617 = vrot.lane.b32.xlu0 %v14033_v36, %s11977_s15  ;;  %v4868_v40 = vsel %vm2493_vm7, %v4806_v5, %v4544_v19  ;;  %v17561_v5 = vld [vmem:[#allocation45_spill] sm:$0xff] }
 0x2d7   : > { %v3816_v27 = vor.u32 %v3814_v23, %v3813_v25  ;;  %v3960_v37 = vsel %vm12074_vm2, %v3813_v25, 0  ;;  %v3106_v45 = vadd.f32 %v14044_v9, %v3105_v50  ;;  %v3422_v3 = vmax.f32 %v3328_v54, 0.0 }
 0x2d8   : > { %v3107_v48 = vpop.f32.mrf.mxu1  ;;  %v14047_v44 = vpop.permute.xlu1 %4440  ;;  %v4367_v62 = vrot.slane %v3960_v37, 1  ;;  %v4157_v30 = vshll.u32 %v3960_v37, 16 }
 0x2d9   : > { %v3331_v52 = vadd.f32 %v13684_v59, %v3106_v45  ;;  %v4501_v28 = vpop.permute.xlu0 %4500  ;;  %v14052_v34 = vsel %vm12074_vm2, 0, %v3816_v27  ;;  %v4648_v59 = vsel %vm2444_vm6, %v12090_v8, %v17557_v1 }
 0x2da   : > { %4261 = vrot.lane.b32.xlu1 %v14033_v36, %s11979_s21  ;;  %4563 = vrot.lane.b32.xlu0 %v14052_v34, %s11978_s20  ;;  %v4366_v2 = vrot.slane %v14052_v34, 1  ;;  %v4152_v13 = vshll.u32 %v14052_v34, 16  ;;  %v4150_v46 = vshrl.u32 %v14052_v34, 16  ;;  %v4692_v26 = vsel %vm2493_vm7, %v4648_v59, %v13675_v41 }
 0x2db   : > { %v3423_v47 = vmax.f32 %v3331_v52, 0.0  ;;  %v4159_v50 = vrot.slane %v4157_v30, 1  ;;  %v4739_v19 = vsel %vm2542_vm8, %v4692_v26, %v14000_v39 }
 0x2dc   : > { %v14066_v32 = vpop.permute.xlu1 %4397  ;;  %v4368_v43 = vsel %vm2097_vm3, %v4366_v2, %v4367_v62  ;;  %v4154_v24 = vrot.slane %v4152_v13, 1  ;;  %v17559_v62 = vld [vmem:[#allocation41_spill] sm:$0xff] }
 0x2dd   : > { %v3697_v56 = vpack.c.bf16 %v3423_v47, %v3422_v3  ;;  %v4600_v42 = vpop.permute.xlu0 %4599  ;;  %11588 = vmatmul.mubr.msk.bf16.gmra.mxu1 %vm2444_vm6, %v4368_v43  ;;  %v17560_v47 = vld [vmem:[#allocation2_spill] sm:$0xff] }
 0x2de   : > { %v3110_v25 = vpop.f32.mrf.mxu1  ;;  %4460 = vrot.lane.b32.xlu1 %v14052_v34, %s11977_s15  ;;  %4520 = vrot.lane.b32.xlu0 %v4368_v43, %s11979_s21  ;;  %v4915_v63 = vsel %vm2542_vm8, %v4868_v40, %v4600_v42  ;;  %v4155_v23 = vor.u32 %v4154_v24, %v4150_v46  ;;  %v4650_v57 = vsel %vm2444_vm6, %v17560_v47, %v14030_v7 }
 0x2df   : > { %v3818_v27 = vshrl.u32 %v3697_v56, 16  ;;  %v3111_v37 = vadd.f32 %v14044_v9, %v3110_v25  ;;  %5154 = vmatprep.mubr.bf16.mxu0 %v4915_v63  ;;  %v3821_v48 = vshll.u32 %v3697_v56, 16 }
 0x2e0   : > { %5155 = vmatmul.mubr.bf16.gmra.mxu0 %v4739_v19  ;;  %v3112_v55 = vpop.f32.mrf.mxu1  ;;  %v14081_v41 = vpop.permute.xlu1 %4243  ;;  %v14084_v54 = vsel %vm1712_vm5, %v4155_v23, %v4159_v50  ;;  %v4809_v50 = vsel %vm2444_vm6, %v13698_v22, %v4501_v28 }
 0x2e1   : > { %v3820_v45 = vrot.slane %v3818_v27, 7  ;;  %v4546_v52 = vpop.permute.xlu0 %4545  ;;  %v3336_v13 = vadd.f32 %v17559_v62, %v3111_v37 }
 0x2e2   : > { %v3113_v2 = vpop.f32.mrf.mxu1  ;;  %4417 = vrot.lane.b32.xlu1 %v4368_v43, %s11978_s20  ;;  %4619 = vrot.lane.b32.xlu0 %v14084_v54, %s11977_s15 }
 0x2e3   : > { %v3823_v39 = vor.u32 %v3821_v48, %v3820_v45  ;;  %v3114_v30 = vadd.f32 %v14044_v9, %v3113_v2  ;;  %v3961_v1 = vsel %vm12074_vm2, %v3820_v45, 0  ;;  %v3424_v25 = vmax.f32 %v3336_v13, 0.0 }
 0x2e4   : > { %v3115_v59 = vpop.f32.mrf.mxu1  ;;  %v14093_v3 = vpop.permute.xlu1 %4442  ;;  %v4370_v42 = vrot.slane %v3961_v1, 1  ;;  %v4169_v26 = vshll.u32 %v3961_v1, 16  ;;  %v4694_v48 = vsel %vm2493_vm7, %v4650_v57, %v14018_v0  ;;  %v4870_v2 = vsel %vm2493_vm7, %v4809_v50, %v4546_v52 }
 0x2e5   : > { %v3339_v43 = vadd.f32 %v17561_v5, %v3114_v30  ;;  %v14099_v46 = vpop.permute.xlu0 %4502  ;;  %v14103_v24 = vsel %vm12074_vm2, 0, %v3823_v39  ;;  %v4742_v0 = vsel %vm2542_vm8, %v4694_v48, %v14047_v44 }
 0x2e6   : > { %v3118_v40 = vpop.f32.mrf.mxu1  ;;  %4263 = vrot.lane.b32.xlu1 %v14084_v54, %s11979_s21  ;;  %4565 = vrot.lane.b32.xlu0 %v14103_v24, %s11978_s20  ;;  %v4369_v56 = vrot.slane %v14103_v24, 1  ;;  %v4164_v7 = vshll.u32 %v14103_v24, 16  ;;  %v4162_v55 = vshrl.u32 %v14103_v24, 16  ;;  %v4171_v1 = vrot.slane %v4169_v26, 1 }
 0x2e7   : > { %v3425_v63 = vmax.f32 %v3339_v43, 0.0  ;;  %v3119_v23 = vadd.f32 %v14044_v9, %v3118_v40 }
 0x2e8   : > { %v3120_v19 = vpop.f32.mrf.mxu1  ;;  %v14114_v27 = vpop.permute.xlu1 %4399  ;;  %v4371_v37 = vsel %vm2097_vm3, %v4369_v56, %v4370_v42  ;;  %v4166_v45 = vrot.slane %v4164_v7, 1 }
 0x2e9   : > { %v3698_v39 = vpack.c.bf16 %v3425_v63, %v3424_v25  ;;  %v4602_v62 = vpop.permute.xlu0 %4601  ;;  %11591 = vmatprep.mubr.msk.bf16.mxu1 %vm2444_vm6, %v4371_v37  ;;  %v3344_v13 = vadd.f32 %v13704_v21, %v3119_v23  ;;  %v17562_v23 = vld [vmem:[#allocation46_spill] sm:$0xff] }
 0x2ea   : > { %v3121_v22 = vpop.f32.mrf.mxu1  ;;  %4462 = vrot.lane.b32.xlu1 %v14103_v24, %s11977_s15  ;;  %4522 = vrot.lane.b32.xlu0 %v4371_v37, %s11979_s21  ;;  %v4918_v28 = vsel %vm2542_vm8, %v4870_v2, %v4602_v62  ;;  %v4167_v30 = vor.u32 %v4166_v45, %v4162_v55  ;;  %v4652_v50 = vsel %vm2444_vm6, %v17562_v23, %v14081_v41 }
 0x2eb   : > { %v3825_v52 = vshrl.u32 %v3698_v39, 16  ;;  %v3122_v59 = vadd.f32 %v14044_v9, %v3121_v22  ;;  %5162 = vmatprep.mubr.bf16.mxu0 %v4918_v28  ;;  %v3828_v43 = vshll.u32 %v3698_v39, 16  ;;  %v3426_v42 = vmax.f32 %v3344_v13, 0.0  ;;  %v17563_v28 = vld [vmem:[#allocation47_spill] sm:$0xff] }
 0x2ec   : > { %5163 = vmatmul.mubr.bf16.gmra.mxu0 %v4742_v0  ;;  %v3123_v47 = vpop.f32.mrf.mxu1  ;;  %v14130_v21 = vpop.permute.xlu1 %4245  ;;  %v14133_v57 = vsel %vm1712_vm5, %v4167_v30, %v4171_v1  ;;  %v4696_v13 = vsel %vm2493_vm7, %v4652_v50, %v14066_v32  ;;  %v4812_v0 = vsel %vm2444_vm6, %v13761_v12, %v14099_v46 }
 0x2ed   : > { %v3827_v5 = vrot.slane %v3825_v52, 7  ;;  %v3347_v40 = vadd.f32 %v13733_v4, %v3122_v59  ;;  %v4548_v56 = vpop.permute.xlu0 %4547  ;;  %v4745_v12 = vsel %vm2542_vm8, %v4696_v13, %v14093_v3 }
 0x2ee   : > { %v3126_v7 = vpop.f32.mrf.mxu1  ;;  %4419 = vrot.lane.b32.xlu1 %v4371_v37, %s11978_s20  ;;  %4621 = vrot.lane.b32.xlu0 %v14133_v57, %s11977_s15  ;;  %v4872_v32 = vsel %vm2493_vm7, %v4812_v0, %v4548_v56  ;;  %v4654_v0 = vsel %vm2444_vm6, %v13730_v51, %v14130_v21 }
 0x2ef   : > { %v3830_v44 = vor.u32 %v3828_v43, %v3827_v5  ;;  %v3962_v26 = vsel %vm12074_vm2, %v3827_v5, 0  ;;  %v3427_v25 = vmax.f32 %v3347_v40, 0.0  ;;  %v3127_v63 = vadd.f32 %v14044_v9, %v3126_v7 }
 0x2f0   : > { %v3128_v4 = vpop.f32.mrf.mxu1  ;;  %v14145_v19 = vpop.permute.xlu1 %4444  ;;  %v4373_v41 = vrot.slane %v3962_v26, 1  ;;  %v4181_v62 = vshll.u32 %v3962_v26, 16 }
 0x2f1   : > { %v3699_v55 = vpack.c.bf16 %v3427_v25, %v3426_v42  ;;  %v14147_v45 = vpop.permute.xlu0 %4504  ;;  %v14151_v37 = vsel %vm12074_vm2, 0, %v3830_v44  ;;  %v3352_v30 = vadd.f32 %v17563_v28, %v3127_v63 }
 0x2f2   : > { %v3129_v48 = vpop.f32.mrf.mxu1  ;;  %4265 = vrot.lane.b32.xlu1 %v14133_v57, %s11979_s21  ;;  %4567 = vrot.lane.b32.xlu0 %v14151_v37, %s11978_s20  ;;  %v4372_v2 = vrot.slane %v14151_v37, 1  ;;  %v4176_v39 = vshll.u32 %v14151_v37, 16  ;;  %v4174_v5 = vshrl.u32 %v14151_v37, 16  ;;  %v4183_v26 = vrot.slane %v4181_v62, 1 }
 0x2f3   : > { %v3832_v22 = vshrl.u32 %v3699_v55, 16  ;;  %v3130_v1 = vadd.f32 %v14044_v9, %v3129_v48  ;;  %v3835_v42 = vshll.u32 %v3699_v55, 16 }
 0x2f4   : > { %v3131_v52 = vpop.f32.mrf.mxu1  ;;  %v14166_v59 = vpop.permute.xlu1 %4401  ;;  %v4374_v47 = vsel %vm2097_vm3, %v4372_v2, %v4373_v41  ;;  %v4178_v43 = vrot.slane %v4176_v39, 1 }
 0x2f5   : > { %v3834_v40 = vrot.slane %v3832_v22, 7  ;;  %v3355_v7 = vadd.f32 %v13720_v16, %v3130_v1  ;;  %v4604_v44 = vpop.permute.xlu0 %4603  ;;  %11592 = vmatmul.mubr.msk.bf16.gmra.mxu1 %vm2444_vm6, %v4374_v47  ;;  %v3428_v16 = vmax.f32 %v3352_v30, 0.0 }
 0x2f6   : > { %4464 = vrot.lane.b32.xlu1 %v14151_v37, %s11977_s15  ;;  %4524 = vrot.lane.b32.xlu0 %v4374_v47, %s11979_s21  ;;  %v4921_v9 = vsel %vm2542_vm8, %v4872_v32, %v4604_v44  ;;  %v4179_v46 = vor.u32 %v4178_v43, %v4174_v5  ;;  %v4698_v44 = vsel %vm2493_vm7, %v4654_v0, %v14114_v27 }
 0x2f7   : > { %v3837_v25 = vor.u32 %v3835_v42, %v3834_v40  ;;  %v3963_v56 = vsel %vm12074_vm2, %v3834_v40, 0  ;;  %v3429_v63 = vmax.f32 %v3355_v7, 0.0  ;;  %5170 = vmatprep.mubr.bf16.mxu0 %v4921_v9  ;;  %v4815_v40 = vsel %vm2444_vm6, %v13804_v17, %v14147_v45  ;;  %v6995_v9 = vld [vmem:[%s17385_s7 + $0x110] sm:$0xff] }
 0x2f8   : > { %5171 = vmatmul.mubr.bf16.gmra.mxu0 %v4745_v12  ;;  %v4248_v23 = vpop.permute.xlu1 %4247  ;;  %v14182_v3 = vsel %vm1712_vm5, %v4179_v46, %v4183_v26  ;;  %v4376_v2 = vrot.slane %v3963_v56, 1  ;;  %v4193_v43 = vshll.u32 %v3963_v56, 16  ;;  %v6996_v46 = vld [vmem:[%s17385_s7 + $0x118] sm:$0xff]  ;;  %v4748_v27 = vsel %vm2542_vm8, %v4698_v44, %v14145_v19 }
 0x2f9   : > { %v14186_v50 = vsel %vm12074_vm2, 0, %v3837_v25  ;;  %v3700_v4 = vpack.c.bf16 %v3429_v63, %v3428_v16  ;;  %v4550_v55 = vpop.permute.xlu0 %4549  ;;  %v7014_v25 = vpack.c.bf16 %v6996_v46, %v6995_v9 }
 0x2fa   : > { %4421 = vrot.lane.b32.xlu1 %v4374_v47, %s11978_s20  ;;  %4623 = vrot.lane.b32.xlu0 %v14182_v3, %s11977_s15  ;;  %v4375_v48 = vrot.slane %v14186_v50, 1  ;;  %v4188_v39 = vshll.u32 %v14186_v50, 16  ;;  %v4186_v5 = vshrl.u32 %v14186_v50, 16  ;;  %v4874_v21 = vsel %vm2493_vm7, %v4815_v40, %v4550_v55 }
 0x2fb   : > { %v3839_v41 = vshrl.u32 %v3700_v4, 16  ;;  %v3842_v28 = vshll.u32 %v3700_v4, 16  ;;  %v4195_v26 = vrot.slane %v4193_v43, 1  ;;  %11607 = vmatprep.subr.bf16.mxu0 %v7014_v25 }
 0x2fc   : > { %v14193_v62 = vpop.permute.xlu1 %4446  ;;  %v4377_v13 = vsel %vm2097_vm3, %v4375_v48, %v4376_v2  ;;  %v4190_v1 = vrot.slane %v4188_v39, 1  ;;  %11608 = vmatpush3.bf16.msra.mxu0 %v7014_v25 }
 0x2fd   : > { %v3841_v22 = vrot.slane %v3839_v41, 7  ;;  %v4507_v30 = vpop.permute.xlu0 %4506  ;;  %11595 = vmatprep.mubr.msk.bf16.mxu1 %vm2444_vm6, %v4377_v13  ;;  %v4656_v41 = vsel %vm2444_vm6, %v13780_v10, %v4248_v23 }
 0x2fe   : > { %4267 = vrot.lane.b32.xlu1 %v14182_v3, %s11979_s21  ;;  %4569 = vrot.lane.b32.xlu0 %v14186_v50, %s11978_s20  ;;  %v4191_v7 = vor.u32 %v4190_v1, %v4186_v5 }
 0x2ff   : > { %v3844_v52 = vor.u32 %v3842_v28, %v3841_v22  ;;  %v3964_v47 = vsel %vm12074_vm2, %v3841_v22, 0  ;;  %v4818_v28 = vsel %vm2444_vm6, %v13837_v60, %v4507_v30 }
 0x300   : > { %v14210_v42 = vpop.permute.xlu1 %4403  ;;  %v4379_v12 = vrot.slane %v3964_v47, 1  ;;  %v14235_v4 = vsel %vm1712_vm5, %v4191_v7, %v4195_v26  ;;  %v4205_v22 = vshll.u32 %v3964_v47, 16  ;;  %v17565_v26 = vld [vmem:[#allocation39_spill] sm:$0xff] }
 0x301   : > { %v14214_v51 = vsel %vm12074_vm2, 0, %v3844_v52  ;;  %v4606_v32 = vpop.permute.xlu0 %4605 }
 0x302   : > { %4466 = vrot.lane.b32.xlu1 %v14186_v50, %s11977_s15  ;;  %4526 = vrot.lane.b32.xlu0 %v4377_v13, %s11979_s21  ;;  %v4924_v17 = vsel %vm2542_vm8, %v4874_v21, %v4606_v32  ;;  %v4378_v45 = vrot.slane %v14214_v51, 1  ;;  %v4200_v55 = vshll.u32 %v14214_v51, 16  ;;  %v4198_v39 = vshrl.u32 %v14214_v51, 16  ;;  %v17564_v32 = vld [vmem:[#allocation3_spill] sm:$0xff] }
 0x303   : > { %5178 = vmatprep.mubr.bf16.mxu0 %v4924_v17  ;;  %v4207_v23 = vrot.slane %v4205_v22, 1 }
 0x304   : > { %5179 = vmatmul.mubr.bf16.gmra.mxu0 %v4748_v27  ;;  %v4250_v56 = vpop.permute.xlu1 %4249  ;;  %v4380_v16 = vsel %vm2097_vm3, %v4378_v45, %v4379_v12  ;;  %v4202_v2 = vrot.slane %v4200_v55, 1 }
 0x305   : > { %v4552_v63 = vpop.permute.xlu0 %4551  ;;  %11596 = vmatmul.mubr.msk.bf16.gmra.mxu1 %vm2444_vm6, %v4380_v16  ;;  %v4658_v7 = vsel %vm2444_vm6, %v13818_v20, %v4250_v56 }
 0x306   : > { %4269 = vrot.lane.b32.xlu1 %v14235_v4, %s11979_s21  ;;  %4625 = vrot.lane.b32.xlu0 %v14235_v4, %s11977_s15  ;;  %v4876_v0 = vsel %vm2493_vm7, %v4818_v28, %v4552_v63  ;;  %v4203_v5 = vor.u32 %v4202_v2, %v4198_v39  ;;  %v4702_v27 = vsel %vm2493_vm7, %v4658_v7, %v14210_v42 }
 0x307   : > { %11599 = vmatprep.mubr.msk.bf16.mxu1 %vm2444_vm6, %v12118_v18 }
 0x308   : > { %v4449_v19 = vpop.permute.xlu1 %4448 }
 0x309   : > { %v4509_v48 = vpop.permute.xlu0 %4508  ;;  %v4754_v25 = vsel %vm2542_vm8, %v4702_v27, %v4449_v19 }
 0x30a   : > { %4423 = vrot.lane.b32.xlu1 %v4377_v13, %s11978_s20  ;;  %4571 = vrot.lane.b32.xlu0 %v14214_v51, %s11978_s20  ;;  %v4700_v13 = vsel %vm2493_vm7, %v4656_v41, %v14166_v59  ;;  %v14266_v59 = vsel %vm1712_vm5, %v4203_v5, %v4207_v23  ;;  %v4821_v17 = vsel %vm2444_vm6, %v13870_v14, %v4509_v48 }
 0x30b   : > { %v4751_v60 = vsel %vm2542_vm8, %v4700_v13, %v14193_v62 }
 0x30c   : > { %v4406_v1 = vpop.permute.xlu1 %4405 }
 0x30d   : > { %v4608_v52 = vpop.permute.xlu0 %4607  ;;  %11600 = vmatmul.mubr.msk.bf16.gmra.mxu1 %vm2444_vm6, %v12118_v18 }
 0x30e   : > { %4468 = vrot.lane.b32.xlu1 %v14214_v51, %s11977_s15  ;;  %4528 = vrot.lane.b32.xlu0 %v4380_v16, %s11979_s21  ;;  %v4927_v10 = vsel %vm2542_vm8, %v4876_v0, %v4608_v52 }
 0x30f   : > { %5186 = vmatprep.mubr.bf16.mxu0 %v4927_v10  ;;  %11603 = vmatprep.mubr.msk.bf16.mxu1 %vm2444_vm6, %v12118_v18 }
 0x310   : > { %5187 = vmatmul.mubr.bf16.gmra.mxu0 %v4751_v60  ;;  %v4252_v30 = vpop.permute.xlu1 %4251 }
 0x311   : > { %v4554_v47 = vpop.permute.xlu0 %4553  ;;  %v4660_v55 = vsel %vm2444_vm6, %v13851_v15, %v4252_v30 }
 0x312   : > { %4425 = vrot.lane.b32.xlu1 %v4380_v16, %s11978_s20  ;;  %4627 = vrot.lane.b32.xlu0 %v14266_v59, %s11977_s15  ;;  %v4878_v12 = vsel %vm2493_vm7, %v4821_v17, %v4554_v47  ;;  %v17566_v16 = vld [vmem:[#allocation4_spill] sm:$0xff]  ;;  %v4704_v22 = vsel %vm2493_vm7, %v4660_v55, %v4406_v1 }
 0x313   : > { %v5132_v43 = vpop.f32.mrf.mxu0  ;;  %v6975_v55 = vld [vmem:[%s17385_s7 + $0x70] sm:$0xff] }
 0x314   : > { %v4451_v40 = vpop.permute.xlu1 %4450 }
 0x315   : > { %v4511_v21 = vpop.permute.xlu0 %4510  ;;  %v5134_v62 = vpop.f32.mrf.mxu0  ;;  %11604 = vmatmul.mubr.msk.bf16.gmra.mxu1 %vm2444_vm6, %v12118_v18  ;;  %v4757_v15 = vsel %vm2542_vm8, %v4704_v22, %v4451_v40 }
 0x316   : > { %11899 = vrot.lane.b32.xlu1 %v17564_v32, %s11977_s15  ;;  %4573 = vrot.lane.b32.xlu0 %v12090_v8, %s11978_s20  ;;  %v4824_v19 = vsel %vm2444_vm6, %v13901_v31, %v4511_v21 }
 0x317   : > { %v5135_v44 = vpop.f32.mrf.mxu0 }
 0x318   : > { %v4408_v45 = vpop.permute.xlu1 %4407 }
 0x319   : > { %v4610_v9 = vpop.permute.xlu0 %4609  ;;  %v5137_v46 = vpop.f32.mrf.mxu0 }
 0x31a   : > { %11904 = vrot.lane.b32.xlu1 %v17565_v26, %s11978_s20  ;;  %4629 = vrot.lane.b32.xlu0 %v12147_v33, %s11977_s15  ;;  %v4930_v20 = vsel %vm2542_vm8, %v4878_v12, %v4610_v9 }
 0x31b   : > { %5194 = vmatprep.mubr.bf16.mxu0 %v4930_v20 }
 0x31c   : > { %5195 = vmatmul.mubr.bf16.gmra.mxu0 %v4754_v25  ;;  %v4254_v14 = vpop.permute.xlu1 %4253 }
 0x31d   : > { %v4556_v56 = vpop.permute.xlu0 %4555  ;;  %v4662_v30 = vsel %vm2444_vm6, %v13885_v49, %v4254_v14 }
 0x31e   : > { %11909 = vrot.lane.b32.xlu1 %v17566_v16, %s11979_s21  ;;  %11889 = vrot.lane.b32.xlu0 %v17566_v16, %s11979_s21  ;;  %v4880_v41 = vsel %vm2493_vm7, %v4824_v19, %v4556_v56  ;;  %v4706_v7 = vsel %vm2493_vm7, %v4662_v30, %v4408_v45  ;;  %v17567_v45 = vld [vmem:[#allocation5_spill] sm:$0xff] }
 0x31f   : > { %v6976_v19 = vld [vmem:[%s17385_s7 + $0x78] sm:$0xff] }
 0x320   : > { %v4453_v42 = vpop.permute.xlu1 %4452  ;;  %v6972_v30 = vld [vmem:[%s17385_s7 + $0x58] sm:$0xff] }
 0x321   : > { %v4513_v63 = vpop.permute.xlu0 %4512  ;;  %v4760_v49 = vsel %vm2542_vm8, %v4706_v7, %v4453_v42 }
 0x322   : > { %6287 = vrot.lane.b32.xlu1 %v12147_v33, %s11979_s21  ;;  %11894 = vrot.lane.b32.xlu0 %v17564_v32, %s11978_s20  ;;  %v4827_v47 = vsel %vm2444_vm6, %v13930_v11, %v4513_v63 }
 0x323   : > { %v5140_v2 = vpop.f32.mrf.mxu0 }
 0x324   : > { %v4410_v48 = vpop.permute.xlu1 %4409 }
 0x325   : > { %v4612_v39 = vpop.permute.xlu0 %4611  ;;  %v5142_v0 = vpop.f32.mrf.mxu0 }
 0x326   : > { %4635 = vrot.lane.b32.xlu1 %v12147_v33, %s11977_s15  ;;  %v4933_v28 = vsel %vm2542_vm8, %v4880_v41, %v4612_v39  ;;  %4631 = vrot.lane.b32.xlu0 %v12147_v33, %s11977_s15  ;;  %v7004_v39 = vpack.c.bf16 %v6976_v19, %v6975_v55  ;;  %v6967_v55 = vld [vmem:[%s17385_s7 + $0x30] sm:$0xff] }
 0x327   : > { %5202 = vmatprep.mubr.bf16.mxu0 %v4933_v28  ;;  %v5143_v52 = vpop.f32.mrf.mxu0 }
 0x328   : > { %5203 = vmatmul.mubr.bf16.gmra.mxu0 %v4757_v15  ;;  %v4256_v31 = vpop.permute.xlu1 %4255  ;;  %7083 = vmatpush1.bf16.msra.mxu1 %v7004_v39  ;;  %v6974_v52 = vld [vmem:[%s17385_s7 + $0x68] sm:$0xff] }
 0x329   : > { %v4558_v5 = vpop.permute.xlu0 %4557  ;;  %v5145_v1 = vpop.f32.mrf.mxu0  ;;  %v4664_v14 = vsel %vm2444_vm6, %v13914_v29, %v4256_v31  ;;  %v17568_v31 = vmov 0  }
 0x32a   : > { %6617 = vrot.lane.b32.xlu1 %v12147_v33, %s11977_s15  ;;  %4273 = vrot.lane.b32.xlu0 %v12147_v33, %s11979_s21  ;;  %v4882_v21 = vsel %vm2493_vm7, %v4827_v47, %v4558_v5  ;;  %v4708_v29 = vsel %vm2493_vm7, %v4664_v14, %v4410_v48  ;;  %v6973_v48 = vld [vmem:[%s17385_s7 + $0x60] sm:$0xff] }
 0x32b   : > { %7084 = vmatprep.subr.bf16.mxu1 %v17568_v31  ;;  %v7003_v1 = vpack.c.bf16 %v6974_v52, %v6973_v48 }
 0x32c   : > { %v3134_v13 = vpop.f32.mrf.mxu1  ;;  %v4455_v10 = vpop.permute.xlu1 %4454 }
 0x32d   : > { %v4515_v60 = vpop.permute.xlu0 %4514  ;;  %v4763_v28 = vsel %vm2542_vm8, %v4708_v29, %v4455_v10  ;;  %7085 = vmatpush1.bf16.msra.mxu1 %v7003_v1  ;;  %v6965_v29 = vld [vmem:[%s17385_s7 + $0x20] sm:$0xff] }
 0x32e   : > { %v3136_v23 = vpop.f32.mrf.mxu1  ;;  %6526 = vrot.lane.b32.xlu1 %v12118_v18, %s11979_s21  ;;  %4633 = vrot.lane.b32.xlu0 %v12147_v33, %s11977_s15  ;;  %v4830_v56 = vsel %vm2444_vm6, %v13958_v53, %v4515_v60 }
 0x32f   : > { %7086 = vmatprep.subr.bf16.mxu1 %v17568_v31  ;;  %v6971_v23 = vld [vmem:[%s17385_s7 + $0x50] sm:$0xff] }
 0x330   : > { %v3137_v43 = vpop.f32.mrf.mxu1  ;;  %v14322_v40 = vpop.permute.xlu1 %4411 }
 0x331   : > { %v4614_v62 = vpop.permute.xlu0 %4613  ;;  %v7002_v43 = vpack.c.bf16 %v6972_v30, %v6971_v23 }
 0x332   : > { %v3139_v44 = vpop.f32.mrf.mxu1  ;;  %6470 = vrot.lane.b32.xlu1 %v12090_v8, %s11977_s15  ;;  %v4936_v17 = vsel %vm2542_vm8, %v4882_v21, %v4614_v62  ;;  %4275 = vrot.lane.b32.xlu0 %v12147_v33, %s11979_s21 }
 0x333   : > { %5210 = vmatprep.mubr.bf16.mxu0 %v4936_v17  ;;  %7087 = vmatpush1.bf16.msra.mxu1 %v7002_v43 }
 0x334   : > { %5211 = vmatmul.mubr.bf16.gmra.mxu0 %v4760_v49  ;;  %v3142_v11 = vpop.f32.mrf.mxu1  ;;  %v4258_v12 = vpop.permute.xlu1 %4257  ;;  %7088 = vmatprep.subr.bf16.mxu1 %v17568_v31  ;;  %v6969_v49 = vld [vmem:[%s17385_s7 + $0x40] sm:$0xff] }
 0x335   : > { %v4560_v9 = vpop.permute.xlu0 %4559  ;;  %v4666_v62 = vsel %vm2444_vm6, %v13942_v35, %v4258_v12  ;;  %v6970_v11 = vld [vmem:[%s17385_s7 + $0x48] sm:$0xff]  ;;  %v6993_v35 = vld [vmem:[%s17385_s7 + $0x100] sm:$0xff] }
 0x336   : > { %v3144_v46 = vpop.f32.mrf.mxu1  ;;  %6291 = vrot.lane.b32.xlu1 %v12147_v33, %s11979_s21  ;;  %11914 = vrot.lane.b32.xlu0 %v17567_v45, %s11978_s20  ;;  %v4884_v2 = vsel %vm2493_vm7, %v4830_v56, %v4560_v9  ;;  %v7001_v9 = vpack.c.bf16 %v6970_v11, %v6969_v49  ;;  %v4710_v45 = vsel %vm2493_vm7, %v4666_v62, %v14322_v40  ;;  %v6968_v40 = vld [vmem:[%s17385_s7 + $0x38] sm:$0xff] }
 0x337   : > { %v6994_v46 = vld [vmem:[%s17385_s7 + $0x108] sm:$0xff] }
 0x338   : > { %v3145_v27 = vpop.f32.mrf.mxu1  ;;  %v4457_v26 = vpop.permute.xlu1 %4456  ;;  %7089 = vmatpush1.bf16.msra.mxu1 %v7001_v9 }
 0x339   : > { %v4517_v20 = vpop.permute.xlu0 %4516  ;;  %v4766_v14 = vsel %vm2542_vm8, %v4710_v45, %v4457_v26  ;;  %7090 = vmatprep.subr.bf16.mxu1 %v17568_v31 }
 0x33a   : > { %v3147_v25 = vpop.f32.mrf.mxu1  ;;  %6431 = vrot.lane.b32.xlu1 %v12118_v18, %s11978_s20  ;;  %11919 = vrot.lane.b32.xlu0 %v17566_v16, %s11978_s20  ;;  %v4833_v7 = vsel %vm2444_vm6, %v13986_v61, %v4517_v20 }
 0x33b   : > { %v7013_v25 = vpack.c.bf16 %v6994_v46, %v6993_v35  ;;  %v6991_v35 = vld [vmem:[%s17385_s7 + $0xf0] sm:$0xff] }
 0x33c   : > { %v3150_v42 = vpop.f32.mrf.mxu1  ;;  %v14344_v63 = vpop.permute.xlu1 %4413 }
 0x33d   : > { %v4616_v41 = vpop.permute.xlu0 %4615  ;;  %11609 = vmatprep.subr.bf16.mxu0 %v7013_v25 }
 0x33e   : > { %v3152_v22 = vpop.f32.mrf.mxu1  ;;  %4271 = vrot.lane.b32.xlu1 %v14266_v59, %s11979_s21  ;;  %v4939_v53 = vsel %vm2542_vm8, %v4884_v2, %v4616_v41  ;;  %11924 = vrot.lane.b32.xlu0 %v17564_v32, %s11977_s15  ;;  %v7000_v2 = vpack.c.bf16 %v6968_v40, %v6967_v55 }
 0x33f   : > { %5218 = vmatprep.mubr.bf16.mxu0 %v4939_v53  ;;  %11610 = vmatpush3.bf16.msra.mxu0 %v7013_v25  ;;  %v6966_v22 = vld [vmem:[%s17385_s7 + $0x28] sm:$0xff] }
 0x340   : > { %5219 = vmatmul.mubr.bf16.gmra.mxu0 %v4763_v28  ;;  %v3153_v0 = vpop.f32.mrf.mxu1  ;;  %v4260_v15 = vpop.permute.xlu1 %4259  ;;  %8892 = vmatprep.subr.bf16.mxu0 %v17568_v31  ;;  %v6999_v28 = vpack.c.bf16 %v6966_v22, %v6965_v29  ;;  %v6990_v25 = vld [vmem:[%s17385_s7 + $0xe8] sm:$0xff] }
 0x341   : > { %v4562_v5 = vpop.permute.xlu0 %4561  ;;  %7091 = vmatpush1.bf16.msra.mxu1 %v7000_v2  ;;  %v4668_v48 = vsel %vm2444_vm6, %v13970_v58, %v4260_v15  ;;  %v6988_v2 = vld [vmem:[%s17385_s7 + $0xd8] sm:$0xff]  ;;  %v6986_v29 = vld [vmem:[%s17385_s7 + $0xc8] sm:$0xff] }
 0x342   : > { %v3155_v13 = vpop.f32.mrf.mxu1  ;;  %6289 = vrot.lane.b32.xlu0 %v12147_v33, %s11979_s21  ;;  %v4886_v12 = vsel %vm2493_vm7, %v4833_v7, %v4562_v5  ;;  %7092 = vmatprep.subr.bf16.mxu1 %v17568_v31  ;;  %v6961_v7 = vld [vmem:[%s17385_s7] sm:$0xff] }
 0x343   : > { %v6963_v13 = vld [vmem:[%s17385_s7 + $0x10] sm:$0xff] }
 0x344   : > { %v3158_v10 = vpop.f32.mrf.mxu1  ;;  %v14369_v60 = vpop.permute.xlu1 %4458 }
 0x345   : > { %v4519_v47 = vpop.permute.xlu0 %4518  ;;  %7093 = vmatpush1.bf16.msra.mxu1 %v6999_v28  ;;  %v6964_v10 = vld [vmem:[%s17385_s7 + $0x18] sm:$0xff] }
 0x346   : > { %v3160_v21 = vpop.f32.mrf.mxu1  ;;  %v4836_v52 = vsel %vm2444_vm6, %v14033_v36, %v4519_v47  ;;  %7094 = vmatprep.subr.bf16.mxu1 %v17568_v31  ;;  %v6998_v23 = vpack.c.bf16 %v6964_v10, %v6963_v13  ;;  %v4712_v36 = vsel %vm2493_vm7, %v4668_v48, %v14344_v63  ;;  %v6962_v63 = vld [vmem:[%s17385_s7 + $0x8] sm:$0xff]  ;;  %v6983_v13 = vld [vmem:[%s17385_s7 + $0xb0] sm:$0xff]  ;;  %v6984_v10 = vld [vmem:[%s17385_s7 + $0xb8] sm:$0xff] }
 0x347   : > { %v4769_v43 = vsel %vm2542_vm8, %v4712_v36, %v14369_v60  ;;  %v6997_v49 = vpack.c.bf16 %v6962_v63, %v6961_v7 }
 0x348   : > { %v3161_v44 = vpop.f32.mrf.mxu1  ;;  %v14382_v17 = vpop.permute.xlu1 %4415 }
 0x349   : > { %v4618_v61 = vpop.permute.xlu0 %4617  ;;  %7095 = vmatpush1.bf16.msra.mxu1 %v6998_v23 }
 0x34a   : > { %v3163_v27 = vpop.f32.mrf.mxu1  ;;  %v4942_v20 = vsel %vm2542_vm8, %v4886_v12, %v4618_v61  ;;  %7096 = vmatprep.subr.bf16.mxu1 %v17568_v31  ;;  %v6992_v12 = vld [vmem:[%s17385_s7 + $0xf8] sm:$0xff] }
 0x34b   : > { %5226 = vmatprep.mubr.bf16.mxu0 %v4942_v20  ;;  %v7012_v9 = vpack.c.bf16 %v6992_v12, %v6991_v35  ;;  %v6989_v20 = vld [vmem:[%s17385_s7 + $0xe0] sm:$0xff] }
 0x34c   : > { %5227 = vmatmul.mubr.bf16.gmra.mxu0 %v4766_v14  ;;  %v11565_v56 = vpop.f32.mrf.mxu1  ;;  %v4262_v42 = vpop.permute.xlu1 %4261 }
 0x34d   : > { %v4564_v19 = vpop.permute.xlu0 %4563  ;;  %7097 = vmatpush1.bf16.msra.mxu1 %v6997_v49  ;;  %v4670_v46 = vsel %vm2444_vm6, %v14008_v6, %v4262_v42  ;;  %v7011_v6 = vpack.c.bf16 %v6990_v25, %v6989_v20  ;;  %v6979_v49 = vld [vmem:[%s17385_s7 + $0x90] sm:$0xff]  ;;  %v6978_v20 = vld [vmem:[%s17385_s7 + $0x88] sm:$0xff] }
 0x34e   : > { %v5341_v26 = vpop.f32.mrf.mxu1  ;;  %v4888_v58 = vsel %vm2493_vm7, %v4836_v52, %v4564_v19  ;;  %7098 = vmatprep.subr.bf16.mxu1 %v17568_v31  ;;  %v4714_v42 = vsel %vm2493_vm7, %v4670_v46, %v14382_v17  ;;  %v6987_v19 = vld [vmem:[%s17385_s7 + $0xd0] sm:$0xff] }
 0x34f   : > { %v7010_v17 = vpack.c.bf16 %v6988_v2, %v6987_v19 }
 0x350   : > { %v11566_v41 = vpop.f32.mrf.mxu1  ;;  %v4461_v39 = vpop.permute.xlu1 %4460 }
 0x351   : > { %v4521_v53 = vpop.permute.xlu0 %4520  ;;  %7099 = vmatpush2.bf16.msra.mxu1 %v7012_v9  ;;  %v4772_v55 = vsel %vm2542_vm8, %v4714_v42, %v4461_v39  ;;  %v6985_v39 = vld [vmem:[%s17385_s7 + $0xc0] sm:$0xff] }
 0x352   : > { %v5344_v0 = vpop.f32.mrf.mxu1  ;;  %v4839_v45 = vsel %vm2444_vm6, %v14084_v54, %v4521_v53  ;;  %7100 = vmatprep.subr.bf16.mxu1 %v17568_v31  ;;  %v7009_v53 = vpack.c.bf16 %v6986_v29, %v6985_v39 }
 0x354   : > { %v14421_v5 = vpop.f32.mrf.mxu1  ;;  %v14423_v1 = vpop.permute.xlu1 %4417 }
 0x355   : > { %v4620_v15 = vpop.permute.xlu0 %4619  ;;  %7101 = vmatpush2.bf16.msra.mxu1 %v7011_v6 }
 0x356   : > { %v4945_v30 = vsel %vm2542_vm8, %v4888_v58, %v4620_v15  ;;  %v5357_v47 = vpop.f32.mrf.mxu1  ;;  %7102 = vmatprep.subr.bf16.mxu1 %v17568_v31  ;;  %v7008_v15 = vpack.c.bf16 %v6984_v10, %v6983_v13 }
 0x357   : > { %5234 = vmatprep.mubr.bf16.mxu0 %v4945_v30 }
 0x358   : > { %5235 = vmatmul.mubr.bf16.gmra.mxu0 %v4769_v43  ;;  %v14438_v21 = vpop.f32.mrf.mxu1  ;;  %v4264_v62 = vpop.permute.xlu1 %4263  ;;  %v6981_v43 = vld [vmem:[%s17385_s7 + $0xa0] sm:$0xff] }
 0x359   : > { %v4566_v44 = vpop.permute.xlu0 %4565  ;;  %7103 = vmatpush2.bf16.msra.mxu1 %v7010_v17  ;;  %v4672_v28 = vsel %vm2444_vm6, %v14052_v34, %v4264_v62 }
 0x35a   : > { %v5360_v11 = vpop.f32.mrf.mxu1  ;;  %v4890_v14 = vsel %vm2493_vm7, %v4839_v45, %v4566_v44  ;;  %7104 = vmatprep.subr.bf16.mxu1 %v17568_v31  ;;  %v4716_v23 = vsel %vm2493_vm7, %v4672_v28, %v14423_v1  ;;  %v6982_v1 = vld [vmem:[%s17385_s7 + $0xa8] sm:$0xff]  ;;  %v6977_v45 = vld [vmem:[%s17385_s7 + $0x80] sm:$0xff] }
 0x35b   : > { %v7007_v7 = vpack.c.bf16 %v6982_v1, %v6981_v43  ;;  %v6980_v11 = vld [vmem:[%s17385_s7 + $0x98] sm:$0xff] }
 0x35c   : > { %v4463_v60 = vpop.permute.xlu1 %4462  ;;  %v14488_v0 = vpop.f32.mrf.mxu1  ;;  %v7006_v35 = vpack.c.bf16 %v6980_v11, %v6979_v49 }
 0x35d   : > { %v4523_v61 = vpop.permute.xlu0 %4522  ;;  %7105 = vmatpush2.bf16.msra.mxu1 %v7009_v53  ;;  %v4775_v36 = vsel %vm2542_vm8, %v4716_v23, %v4463_v60 }
 0x35e   : > { %v4842_v48 = vsel %vm2444_vm6, %v14133_v57, %v4523_v61  ;;  %7106 = vmatprep.subr.bf16.mxu1 %v17568_v31  ;;  %v14504_v30 = vpop.f32.mrf.mxu1 }
 0x360   : > { %v14458_v27 = vpop.permute.xlu1 %4419  ;;  %v14513_v63 = vpop.f32.mrf.mxu1 }
 0x361   : > { %v4622_v56 = vpop.permute.xlu0 %4621  ;;  %7107 = vmatpush2.bf16.msra.mxu1 %v7008_v15 }
 0x362   : > { %v4948_v54 = vsel %vm2542_vm8, %v4890_v14, %v4622_v56  ;;  %7108 = vmatprep.subr.bf16.mxu1 %v17568_v31  ;;  %v14524_v61 = vpop.f32.mrf.mxu1  ;;  %v7005_v14 = vpack.c.bf16 %v6978_v20, %v6977_v45 }
 0x363   : > { %5242 = vmatprep.mubr.bf16.mxu0 %v4948_v54 }
 0x364   : > { %5243 = vmatmul.mubr.bf16.gmra.mxu0 %v4772_v55  ;;  %v4266_v40 = vpop.permute.xlu1 %4265  ;;  %v14540_v42 = vpop.f32.mrf.mxu1 }
 0x365   : > { %v4568_v26 = vpop.permute.xlu0 %4567  ;;  %7109 = vmatpush2.bf16.msra.mxu1 %v7007_v7  ;;  %v4674_v12 = vsel %vm2444_vm6, %v14103_v24, %v4266_v40 }
 0x366   : > { %v4892_v58 = vsel %vm2493_vm7, %v4842_v48, %v4568_v26  ;;  %7110 = vmatprep.subr.bf16.mxu1 %v17568_v31  ;;  %v4718_v56 = vsel %vm2493_vm7, %v4674_v12, %v14458_v27  ;;  %v14542_v40 = vpop.f32.mrf.mxu1 }
 0x368   : > { %v4465_v41 = vpop.permute.xlu1 %4464  ;;  %v14546_v17 = vpop.f32.mrf.mxu1 }
 0x369   : > { %v4525_v22 = vpop.permute.xlu0 %4524  ;;  %7111 = vmatpush2.bf16.msra.mxu1 %v7006_v35  ;;  %v4778_v6 = vsel %vm2542_vm8, %v4718_v56, %v4465_v41 }
 0x36a   : > { %v4845_v9 = vsel %vm2444_vm6, %v14182_v3, %v4525_v22  ;;  %7112 = vmatprep.subr.bf16.mxu1 %v17568_v31  ;;  %v14556_v48 = vpop.f32.mrf.mxu1 }
 0x36c   : > { %v4422_v52 = vpop.permute.xlu1 %4421 }
 0x36d   : > { %v4624_v34 = vpop.permute.xlu0 %4623  ;;  %7113 = vmatpush2.bf16.msra.mxu1 %v7005_v14  ;;  %v14560_v10 = vpop.f32.mrf.mxu1 }
 0x36e   : > { %v4951_v57 = vsel %vm2542_vm8, %v4892_v58, %v4624_v34 }
 0x36f   : > { %5250 = vmatprep.mubr.bf16.mxu0 %v4951_v57 }
 0x370   : > { %5251 = vmatmul.mubr.bf16.gmra.mxu0 %v4775_v36  ;;  %v4268_v47 = vpop.permute.xlu1 %4267 }
 0x371   : > { %v4570_v62 = vpop.permute.xlu0 %4569  ;;  %v4676_v26 = vsel %vm2444_vm6, %v14151_v37, %v4268_v47  ;;  %v14572_v47 = vpop.f32.mrf.mxu1 }
 0x372   : > { %v4894_v25 = vsel %vm2493_vm7, %v4845_v9, %v4570_v62  ;;  %v4720_v22 = vsel %vm2493_vm7, %v4676_v26, %v4422_v52 }
 0x373   : > { %v14576_v7 = vpop.f32.mrf.mxu1 }
 0x374   : > { %v4467_v44 = vpop.permute.xlu1 %4466 }
 0x375   : > { %v4527_v60 = vpop.permute.xlu0 %4526  ;;  %v4781_v28 = vsel %vm2542_vm8, %v4720_v22, %v4467_v44  ;;  %v14580_v12 = vpop.f32.mrf.mxu1 }
 0x376   : > { %v4848_v27 = vsel %vm2444_vm6, %v14235_v4, %v4527_v60 }
 0x378   : > { %v4270_v46 = vpop.permute.xlu1 %4269 }
 0x379   : > { %v4626_v24 = vpop.permute.xlu0 %4625  ;;  %v4678_v52 = vsel %vm2444_vm6, %v14186_v50, %v4270_v46 }
 0x37a   : > { %v4954_v3 = vsel %vm2542_vm8, %v4894_v25, %v4626_v24 }
 0x37b   : > { %5258 = vmatprep.mubr.bf16.mxu0 %v4954_v3  ;;  %v14593_v3 = vld [vmem:[%s17384_s6] ss:$0 sm:$0xff] }
 0x37c   : > { %5259 = vmatmul.mubr.bf16.gmra.mxu0 %v4778_v6  ;;  %v4424_v54 = vpop.permute.xlu1 %4423 }
 0x37d   : > { %v4572_v55 = vpop.permute.xlu0 %4571  ;;  %v4722_v23 = vsel %vm2493_vm7, %v4678_v52, %v4424_v54 }
 0x37e   : > { %v4896_v39 = vsel %vm2493_vm7, %v4848_v27, %v4572_v55 }
 0x380   : > { %v4469_v19 = vpop.permute.xlu1 %4468 }
 0x381   : > { %v4529_v2 = vpop.permute.xlu0 %4528  ;;  %v4784_v36 = vsel %vm2542_vm8, %v4722_v23, %v4469_v19 }
 0x382   : > { %v4851_v4 = vsel %vm2444_vm6, %v14266_v59, %v4529_v2 }
 0x384   : > { %v14550_v41 = vpop.permute.xlu1 %4425 }
 0x385   : > { %v4628_v29 = vpop.permute.xlu0 %4627  ;;  %v14586_v24 = vpop.f32.mrf.mxu1 }
 0x386   : > { %v4957_v53 = vsel %vm2542_vm8, %v4896_v39, %v4628_v29 }
 0x387   : > { %5266 = vmatprep.mubr.bf16.mxu0 %v4957_v53  ;;  %v14595_v6 = vpop.f32.mrf.mxu1 }
 0x388   : > { %5267 = vmatmul.mubr.bf16.gmra.mxu0 %v4781_v28  ;;  %v14558_v37 = vpop.permute.xlu1 %11899 }
 0x389   : > { %v4574_v13 = vpop.permute.xlu0 %4573  ;;  %v14600_v27 = vpop.f32.mrf.mxu1 }
 0x38a   : > { %v4898_v34 = vsel %vm2493_vm7, %v4851_v4, %v4574_v13 }
 0x38c   : > { %v14564_v58 = vpop.permute.xlu1 %11904 }
 0x38d   : > { %v4630_v15 = vpop.permute.xlu0 %4629 }
 0x38e   : > { %v4960_v57 = vsel %vm2542_vm8, %v4898_v34, %v4630_v15  ;;  %v14609_v34 = vpop.f32.mrf.mxu1 }
 0x38f   : > { %5274 = vmatprep.mubr.bf16.mxu0 %v4960_v57 }
 0x390   : > { %5275 = vmatmul.mubr.bf16.gmra.mxu0 %v4784_v36  ;;  %v14574_v43 = vpop.permute.xlu1 %11909  ;;  %v17569_v36 = vld [vmem:[#allocation7_spill] sm:$0xff] }
 0x391   : > { %v11890_v59 = vpop.permute.xlu0 %11889  ;;  %v11912_v22 = vunpack.i.h.bf16 %v14574_v43 }
 0x392   : > { %v11891_v1 = vunpack.i.l.bf16 %v11890_v59  ;;  %v11892_v4 = vunpack.i.h.bf16 %v11890_v59 }
 0x393   : > { %v5148_v62 = vpop.f32.mrf.mxu0  ;;  %v6803_v59 = vsel %vm2444_vm6, %v12147_v33, %v11912_v22 }
 0x394   : > { %v6288_v50 = vpop.permute.xlu1 %6287  ;;  %v4854_v11 = vsel %vm2444_vm6, %v12147_v33, %v11891_v1  ;;  %v17570_v1 = vmax.f32 %v17569_v36, 0.0 }
 0x395   : > { %v5150_v44 = vpop.f32.mrf.mxu0  ;;  %v11895_v49 = vpop.permute.xlu0 %11894 }
 0x396   : > { %v11896_v60 = vunpack.i.l.bf16 %v11895_v49  ;;  %v17572_v44 = vld [vmem:[#allocation6_spill] sm:$0xff] }
 0x397   : > { %v5151_v35 = vpop.f32.mrf.mxu0 }
 0x398   : > { %v14582_v9 = vpop.permute.xlu1 %4635  ;;  %v4900_v46 = vsel %vm2493_vm7, %v4854_v11, %v11896_v60  ;;  %v11897_v60 = vunpack.i.h.bf16 %v11895_v49 }
 0x399   : > { %v5153_v45 = vpop.f32.mrf.mxu0  ;;  %v4632_v20 = vpop.permute.xlu0 %4631 }
 0x39a   : > { %v4963_v25 = vsel %vm2542_vm8, %v4900_v46, %v4632_v20  ;;  %v4857_v46 = vsel %vm2444_vm6, %v12147_v33, %v11892_v4  ;;  %v11911_v20 = vunpack.i.l.bf16 %v14574_v43  ;;  %v11901_v43 = vunpack.i.l.bf16 %v14558_v37 }
 0x39b   : > { %5282 = vmatprep.mubr.bf16.mxu0 %v4963_v25  ;;  %v4902_v22 = vsel %vm2493_vm7, %v4857_v46, %v11897_v60 }
 0x39c   : > { %v6618_v14 = vpop.permute.xlu1 %6617  ;;  %v4860_v46 = vsel %vm2444_vm6, %v12147_v33, %v11911_v20 }
 0x39d   : > { %v14588_v56 = vpop.permute.xlu0 %4273  ;;  %v14614_v57 = vpop.f32.mrf.mxu1 }
 0x3a0   : > { %v5156_v54 = vpop.f32.mrf.mxu0  ;;  %v14597_v55 = vpop.permute.xlu1 %6526 }
 0x3a1   : > { %v5157_v19 = vadd.f32 %v14593_v3, %v5156_v54  ;;  %v4634_v2 = vpop.permute.xlu0 %4633 }
 0x3a2   : > { %v5158_v26 = vpop.f32.mrf.mxu0 }
 0x3a3   : > { %v5366_v53 = vadd.f32 %v14421_v5, %v5157_v19  ;;  %v17573_v5 = vmax.f32 %v17572_v44, 0.0  ;;  %v14637_v19 = vpop.f32.mrf.mxu1  ;;  %v11907_v44 = vunpack.i.h.bf16 %v14564_v58 }
 0x3a4   : > { %v5159_v39 = vpop.f32.mrf.mxu0  ;;  %v14602_v29 = vpop.permute.xlu1 %6470 }
 0x3a5   : > { %v5160_v28 = vadd.f32 %v14593_v3, %v5159_v39  ;;  %v14607_v13 = vpop.permute.xlu0 %4275  ;;  %v14618_v62 = vadd.f32 %v5366_v53, %v17570_v1 }
 0x3a6   : > { %v5161_v52 = vpop.f32.mrf.mxu0 }
 0x3a7   : > { %v5369_v15 = vadd.f32 %v14438_v21, %v5160_v28  ;;  %17571 = vst [vmem:[#allocation40_spill] sm:$0xff] %v14618_v62 }
 0x3a8   : > { %v14612_v23 = vpop.permute.xlu1 %6291 }
 0x3a9   : > { %v14622_v11 = vadd.f32 %v5369_v15, %v17573_v5  ;;  %v14624_v35 = vpop.permute.xlu0 %11914  ;;  %v6662_v15 = vsel %vm2444_vm6, %v12090_v8, %v6288_v50  ;;  %v11906_v5 = vunpack.i.l.bf16 %v14564_v58 }
 0x3aa   : > { %v11916_v21 = vunpack.i.l.bf16 %v14624_v35 }
 0x3ab   : > { %17574 = vst [vmem:[#allocation29_spill] sm:$0xff] %v14622_v11  ;;  %v5786_v45 = vpack.c.bf16 %v14622_v11, %v14618_v62 }
 0x3ac   : > { %v5164_v25 = vpop.f32.mrf.mxu0  ;;  %v14634_v54 = vpop.permute.xlu1 %6431  ;;  %v6862_v49 = vsel %vm2493_vm7, %v6803_v59, %v11916_v21  ;;  %v4966_v21 = vsel %vm2542_vm8, %v4902_v22, %v4634_v2 }
 0x3ad   : > { %v5827_v26 = vshrl.u32 %v5786_v45, 16  ;;  %v5165_v39 = vadd.f32 %v14593_v3, %v5164_v25  ;;  %v14641_v53 = vpop.permute.xlu0 %11919  ;;  %v6902_v52 = vsel %vm2542_vm8, %v6862_v49, %v6618_v14  ;;  %v5830_v1 = vshll.u32 %v5786_v45, 16  ;;  %v14653_v14 = vpop.f32.mrf.mxu1 }
 0x3ae   : > { %v5166_v28 = vpop.f32.mrf.mxu0  ;;  %v11921_v4 = vunpack.i.l.bf16 %v14641_v53  ;;  %7114 = vmatprep.mubr.bf16.mxu1 %v6902_v52 }
 0x3af   : > { %v5829_v36 = vrot.slane %v5827_v26, 7  ;;  %v5374_v25 = vadd.f32 %v14504_v30, %v5165_v39  ;;  %v4682_v30 = vsel %vm2444_vm6, %v12090_v8, %v14588_v56  ;;  %v11902_v56 = vunpack.i.h.bf16 %v14558_v37 }
 0x3b0   : > { %v5167_v60 = vpop.f32.mrf.mxu0  ;;  %v4272_v59 = vpop.permute.xlu1 %4271  ;;  %v6702_v20 = vsel %vm2493_vm7, %v6662_v15, %v11921_v4 }
 0x3b1   : > { %v5168_v50 = vadd.f32 %v14593_v3, %v5167_v60  ;;  %v4680_v45 = vsel %vm2444_vm6, %v14214_v51, %v4272_v59  ;;  %v5832_v49 = vor.u32 %v5830_v1, %v5829_v36  ;;  %v14659_v26 = vpop.permute.xlu0 %11924  ;;  %v6028_v2 = vsel %vm12074_vm2, %v5829_v36, 0  ;;  %v14681_v1 = vpop.f32.mrf.mxu1 }
 0x3b2   : > { %v4724_v58 = vsel %vm2493_vm7, %v4680_v45, %v14550_v41  ;;  %v5169_v28 = vpop.f32.mrf.mxu0  ;;  %v11927_v22 = vunpack.i.h.bf16 %v14659_v26  ;;  %v6377_v52 = vrot.slane %v6028_v2, 1  ;;  %v6091_v36 = vshll.u32 %v6028_v2, 16 }
 0x3b3   : > { %v5377_v51 = vadd.f32 %v14524_v61, %v5168_v50  ;;  %v14673_v39 = vsel %vm12074_vm2, 0, %v5832_v49  ;;  %v4787_v41 = vsel %vm2542_vm8, %v4724_v58, %v11901_v43  ;;  %v17575_v61 = vld [vmem:[#allocation9_spill] sm:$0xff]  ;;  %v17578_v50 = vld [vmem:[#allocation8_spill] sm:$0xff]  ;;  %v4726_v58 = vsel %vm2493_vm7, %v4682_v30, %v11906_v5 }
 0x3b4   : > { %6567 = vrot.lane.b32.xlu1 %v14673_v39, %s11978_s20  ;;  %5283 = vmatmul.mubr.bf16.gmra.mxu0 %v4787_v41  ;;  %v6376_v4 = vrot.slane %v14673_v39, 1  ;;  %v6086_v15 = vshll.u32 %v14673_v39, 16  ;;  %v17576_v60 = vmax.f32 %v17575_v61, 0.0  ;;  %v17579_v43 = vmax.f32 %v17578_v50, 0.0 }
 0x3b5   : > { %5290 = vmatprep.mubr.bf16.mxu0 %v4966_v21  ;;  %v6742_v49 = vsel %vm2542_vm8, %v6702_v20, %v11927_v22  ;;  %v6084_v37 = vshrl.u32 %v14673_v39, 16  ;;  %v14699_v41 = vpop.f32.mrf.mxu1  ;;  %v4904_v21 = vsel %vm2493_vm7, %v4860_v46, %v11907_v44  ;;  %v6093_v22 = vrot.slane %v6091_v36, 1 }
 0x3b6   : > { %v14685_v59 = vadd.f32 %v5374_v25, %v17576_v60  ;;  %v14689_v45 = vadd.f32 %v5377_v51, %v17579_v43  ;;  %v14694_v28 = vsel %vm2097_vm3, %v6376_v4, %v6377_v52  ;;  %v6088_v2 = vrot.slane %v6086_v15, 1  ;;  %7115 = vmatmul.mubr.bf16.vlgmr.msra.gmra.mxu1 %v6742_v49 }
 0x3b7   : > { %6528 = vrot.lane.b32.xlu0 %v14694_v28, %s11979_s21  ;;  %v4790_v4 = vsel %vm2542_vm8, %v4726_v58, %v11902_v56  ;;  %v4969_v61 = vsel %vm2542_vm8, %v4904_v21, %v14582_v9  ;;  %v14713_v46 = vpop.f32.mrf.mxu1  ;;  %v11917_v50 = vunpack.i.h.bf16 %v14624_v35  ;;  %v4684_v36 = vsel %vm2444_vm6, %v12090_v8, %v14607_v13 }
 0x3b8   : > { %17577 = vst [vmem:[#allocation43_spill] sm:$0xff] %v14685_v59  ;;  %17580 = vst [vmem:[#allocation44_spill] sm:$0xff] %v14689_v45  ;;  %v5787_v25 = vpack.c.bf16 %v14689_v45, %v14685_v59  ;;  %v5172_v20 = vpop.f32.mrf.mxu0  ;;  %6472 = vrot.lane.b32.xlu1 %v14673_v39, %s11977_s15  ;;  %v6089_v5 = vor.u32 %v6088_v2, %v6084_v37  ;;  %v11926_v37 = vunpack.i.l.bf16 %v14659_v26 }
 0x3b9   : > { %v5173_v51 = vadd.f32 %v14593_v3, %v5172_v20  ;;  %v14728_v2 = vpop.f32.mrf.mxu1 }
 0x3ba   : > { %v5834_v30 = vshrl.u32 %v5787_v25, 16  ;;  %v5174_v52 = vpop.f32.mrf.mxu0  ;;  %v14709_v15 = vsel %vm1712_vm5, %v6089_v5, %v6093_v22  ;;  %v5837_v44 = vshll.u32 %v5787_v25, 16  ;;  %v17581_v22 = vld [vmem:[#allocation11_spill] sm:$0xff] }
 0x3bb   : > { %6619 = vrot.lane.b32.xlu0 %v14709_v15, %s11977_s15  ;;  %v5382_v9 = vadd.f32 %v14488_v0, %v5173_v51  ;;  %v4728_v0 = vsel %vm2493_vm7, %v4684_v36, %v11917_v50  ;;  %v17584_v51 = vld [vmem:[#allocation10_spill] sm:$0xff] }
 0x3bc   : > { %v5836_v60 = vrot.slane %v5834_v30, 7  ;;  %v5175_v56 = vpop.f32.mrf.mxu0  ;;  %6433 = vrot.lane.b32.xlu1 %v14694_v28, %s11978_s20  ;;  %5291 = vmatmul.mubr.bf16.gmra.mxu0 %v4790_v4  ;;  %v17585_v4 = vmax.f32 %v17584_v51, 0.0 }
 0x3bd   : > { %v5176_v43 = vadd.f32 %v14593_v3, %v5175_v56  ;;  %5298 = vmatprep.mubr.bf16.mxu0 %v4969_v61  ;;  %v14755_v56 = vpop.f32.mrf.mxu1 }
 0x3be   : > { %v5839_v49 = vor.u32 %v5837_v44, %v5836_v60  ;;  %v6029_v35 = vsel %vm12074_vm2, %v5836_v60, 0  ;;  %v5177_v58 = vpop.f32.mrf.mxu0  ;;  %v4793_v60 = vsel %vm2542_vm8, %v4728_v0, %v11926_v37 }
 0x3bf   : > { %v5385_v13 = vadd.f32 %v14513_v63, %v5176_v43  ;;  %v6380_v20 = vrot.slane %v6029_v35, 1  ;;  %v6103_v5 = vshll.u32 %v6029_v35, 16  ;;  %v17582_v63 = vmax.f32 %v17581_v22, 0.0 }
 0x3c0   : > { %v14733_v25 = vsel %vm12074_vm2, 0, %v5839_v49  ;;  %6293 = vrot.lane.b32.xlu1 %v14709_v15, %s11979_s21 }
 0x3c1   : > { %6569 = vrot.lane.b32.xlu0 %v14733_v25, %s11978_s20  ;;  %v6379_v21 = vrot.slane %v14733_v25, 1  ;;  %v6098_v26 = vshll.u32 %v14733_v25, 16  ;;  %v14744_v30 = vadd.f32 %v5382_v9, %v17582_v63  ;;  %v14748_v52 = vadd.f32 %v5385_v13, %v17585_v4 }
 0x3c2   : > { %v6096_v44 = vshrl.u32 %v14733_v25, 16  ;;  %v6105_v49 = vrot.slane %v6103_v5, 1 }
 0x3c3   : > { %17583 = vst [vmem:[#allocation42_spill] sm:$0xff] %v14744_v30  ;;  %17586 = vst [vmem:[#allocation41_spill] sm:$0xff] %v14748_v52  ;;  %v6381_v61 = vsel %vm2097_vm3, %v6379_v21, %v6380_v20  ;;  %v6100_v50 = vrot.slane %v6098_v26, 1  ;;  %v5788_v36 = vpack.c.bf16 %v14748_v52, %v14744_v30 }
 0x3c4   : > { %v5180_v43 = vpop.f32.mrf.mxu0  ;;  %6474 = vrot.lane.b32.xlu1 %v14733_v25, %s11977_s15  ;;  %5299 = vmatmul.mubr.bf16.gmra.mxu0 %v4793_v60 }
 0x3c5   : > { %6530 = vrot.lane.b32.xlu0 %v6381_v61, %s11979_s21  ;;  %v6101_v9 = vor.u32 %v6100_v50, %v6096_v44  ;;  %v5841_v35 = vshrl.u32 %v5788_v36, 16  ;;  %v5181_v58 = vadd.f32 %v14593_v3, %v5180_v43  ;;  %v14761_v37 = vpop.f32.mrf.mxu1  ;;  %11611 = vmatprep.mubr.msk.bf16.mxu0 %vm2444_vm6, %v12118_v18  ;;  %v5844_v20 = vshll.u32 %v5788_v36, 16 }
 0x3c6   : > { %v5182_v13 = vpop.f32.mrf.mxu0 }
 0x3c7   : > { %v14764_v0 = vsel %vm1712_vm5, %v6101_v9, %v6105_v49  ;;  %v5843_v21 = vrot.slane %v5841_v35, 7  ;;  %v14768_v26 = vpop.f32.mrf.mxu1  ;;  %v5390_v5 = vadd.f32 %v14542_v40, %v5181_v58  ;;  %v17587_v58 = vld [vmem:[#allocation13_spill] sm:$0xff] }
 0x3c8   : > { %v5183_v22 = vpop.f32.mrf.mxu0  ;;  %6435 = vrot.lane.b32.xlu1 %v6381_v61, %s11978_s20 }
 0x3c9   : > { %6621 = vrot.lane.b32.xlu0 %v14764_v0, %s11977_s15  ;;  %v5184_v63 = vadd.f32 %v14593_v3, %v5183_v22  ;;  %v14775_v51 = vpop.f32.mrf.mxu1  ;;  %v5846_v4 = vor.u32 %v5844_v20, %v5843_v21  ;;  %v6030_v60 = vsel %vm12074_vm2, %v5843_v21, 0  ;;  %v17590_v21 = vld [vmem:[#allocation12_spill] sm:$0xff] }
 0x3ca   : > { %v5185_v44 = vpop.f32.mrf.mxu0  ;;  %v6383_v9 = vrot.slane %v6030_v60, 1  ;;  %v6115_v35 = vshll.u32 %v6030_v60, 16  ;;  %v17591_v20 = vmax.f32 %v17590_v21, 0.0 }
 0x3cb   : > { %v5393_v50 = vadd.f32 %v14556_v48, %v5184_v63  ;;  %v14780_v36 = vpop.f32.mrf.mxu1  ;;  %v14784_v43 = vsel %vm12074_vm2, 0, %v5846_v4  ;;  %v17588_v48 = vmax.f32 %v17587_v58, 0.0 }
 0x3cc   : > { %6295 = vrot.lane.b32.xlu1 %v14764_v0, %s11979_s21  ;;  %v6382_v40 = vrot.slane %v14784_v43, 1  ;;  %v6110_v49 = vshll.u32 %v14784_v43, 16  ;;  %11612 = vmatmul.mubr.msk.bf16.vlgmr.msra.gmra.mxu0 %vm2444_vm6, %v14694_v28  ;;  %v6108_v44 = vshrl.u32 %v14784_v43, 16  ;;  %v6117_v58 = vrot.slane %v6115_v35, 1 }
 0x3cd   : > { %6571 = vrot.lane.b32.xlu0 %v14784_v43, %s11978_s20  ;;  %v14794_v13 = vadd.f32 %v5390_v5, %v17588_v48  ;;  %v14798_v22 = vadd.f32 %v5393_v50, %v17591_v20  ;;  %v11601_v63 = vpop.f32.mrf.mxu1  ;;  %11615 = vmatprep.mubr.msk.bf16.mxu0 %vm2444_vm6, %v6381_v61 }
 0x3ce   : > { %v6384_v4 = vsel %vm2097_vm3, %v6382_v40, %v6383_v9  ;;  %v6112_v52 = vrot.slane %v6110_v49, 1 }
 0x3cf   : > { %17589 = vst [vmem:[#allocation2_spill] sm:$0xff] %v14794_v13  ;;  %17592 = vst [vmem:[#allocation45_spill] sm:$0xff] %v14798_v22  ;;  %v5789_v60 = vpack.c.bf16 %v14798_v22, %v14794_v13  ;;  %v14814_v9 = vpop.f32.mrf.mxu1 }
 0x3d0   : > { %v5188_v5 = vpop.f32.mrf.mxu0  ;;  %6476 = vrot.lane.b32.xlu1 %v14784_v43, %s11977_s15  ;;  %v6113_v50 = vor.u32 %v6112_v52, %v6108_v44 }
 0x3d1   : > { %6532 = vrot.lane.b32.xlu0 %v6384_v4, %s11979_s21  ;;  %v5848_v28 = vshrl.u32 %v5789_v60, 16  ;;  %v5189_v48 = vadd.f32 %v14593_v3, %v5188_v5  ;;  %v5851_v21 = vshll.u32 %v5789_v60, 16  ;;  %v11602_v63 = vpop.f32.mrf.mxu1 }
 0x3d2   : > { %v5190_v61 = vpop.f32.mrf.mxu0  ;;  %v14812_v40 = vsel %vm1712_vm5, %v6113_v50, %v6117_v58  ;;  %v17596_v63 = vld [vmem:[#allocation14_spill] sm:$0xff] }
 0x3d3   : > { %v5850_v49 = vrot.slane %v5848_v28, 7  ;;  %v5398_v52 = vadd.f32 %v14540_v42, %v5189_v48  ;;  %v14824_v58 = vpop.f32.mrf.mxu1 }
 0x3d4   : > { %v5191_v20 = vpop.f32.mrf.mxu0  ;;  %6437 = vrot.lane.b32.xlu1 %v6384_v4, %s11978_s20  ;;  %11616 = vmatmul.mubr.msk.bf16.gmra.mxu0 %vm2444_vm6, %v6384_v4 }
 0x3d5   : > { %6623 = vrot.lane.b32.xlu0 %v14812_v40, %s11977_s15  ;;  %v5192_v35 = vadd.f32 %v14593_v3, %v5191_v20  ;;  %v5853_v44 = vor.u32 %v5851_v21, %v5850_v49  ;;  %v6031_v5 = vsel %vm12074_vm2, %v5850_v49, 0  ;;  %v11605_v49 = vpop.f32.mrf.mxu1  ;;  %v17593_v21 = vld [vmem:[#allocation15_spill] sm:$0xff] }
 0x3d6   : > { %v5193_v50 = vpop.f32.mrf.mxu0  ;;  %v6386_v4 = vrot.slane %v6031_v5, 1  ;;  %v6127_v61 = vshll.u32 %v6031_v5, 16  ;;  %v17594_v20 = vmax.f32 %v17593_v21, 0.0 }
 0x3d7   : > { %v5401_v60 = vadd.f32 %v14546_v17, %v5192_v35  ;;  %v14829_v28 = vsel %vm12074_vm2, 0, %v5853_v44  ;;  %v17597_v35 = vmax.f32 %v17596_v63, 0.0  ;;  %v5501_v30 = vpop.f32.mrf.mxu1 }
 0x3d8   : > { %6297 = vrot.lane.b32.xlu1 %v14812_v40, %s11979_s21  ;;  %v6385_v42 = vrot.slane %v14829_v28, 1  ;;  %v6122_v48 = vshll.u32 %v14829_v28, 16  ;;  %v14839_v17 = vadd.f32 %v5398_v52, %v17594_v20  ;;  %v6120_v22 = vshrl.u32 %v14829_v28, 16 }
 0x3d9   : > { %6573 = vrot.lane.b32.xlu0 %v14829_v28, %s11978_s20  ;;  %v14843_v44 = vadd.f32 %v5401_v60, %v17597_v35  ;;  %v6129_v60 = vrot.slane %v6127_v61, 1  ;;  %v11606_v49 = vpop.f32.mrf.mxu1 }
 0x3da   : > { %17595 = vst [vmem:[#allocation46_spill] sm:$0xff] %v14839_v17  ;;  %v6387_v50 = vsel %vm2097_vm3, %v6385_v42, %v6386_v4  ;;  %v6124_v13 = vrot.slane %v6122_v48, 1 }
 0x3db   : > { %17598 = vst [vmem:[#allocation47_spill] sm:$0xff] %v14843_v44  ;;  %v5790_v45 = vpack.c.bf16 %v14843_v44, %v14839_v17  ;;  %11619 = vmatprep.mubr.msk.bf16.mxu0 %vm2444_vm6, %v6387_v50  ;;  %v5504_v48 = vpop.f32.mrf.mxu1 }
 0x3dc   : > { %v5196_v5 = vpop.f32.mrf.mxu0  ;;  %6478 = vrot.lane.b32.xlu1 %v14829_v28, %s11977_s15  ;;  %v6125_v52 = vor.u32 %v6124_v13, %v6120_v22 }
 0x3dd   : > { %6534 = vrot.lane.b32.xlu0 %v6387_v50, %s11979_s21  ;;  %v5855_v21 = vshrl.u32 %v5790_v45, 16  ;;  %v5197_v42 = vadd.f32 %v14593_v3, %v5196_v5  ;;  %v5858_v63 = vshll.u32 %v5790_v45, 16 }
 0x3de   : > { %v5198_v4 = vpop.f32.mrf.mxu0  ;;  %v14855_v30 = vsel %vm1712_vm5, %v6125_v52, %v6129_v60 }
 0x3df   : > { %v5857_v20 = vrot.slane %v5855_v21, 7  ;;  %v5406_v22 = vadd.f32 %v14572_v47, %v5197_v42  ;;  %v17599_v42 = vld [vmem:[#allocation17_spill] sm:$0xff] }
 0x3e0   : > { %v5199_v35 = vpop.f32.mrf.mxu0  ;;  %6439 = vrot.lane.b32.xlu1 %v6387_v50, %s11978_s20  ;;  %v17600_v4 = vmax.f32 %v17599_v42, 0.0 }
 0x3e1   : > { %6625 = vrot.lane.b32.xlu0 %v14855_v30, %s11977_s15  ;;  %v6032_v13 = vsel %vm12074_vm2, %v5857_v20, 0  ;;  %v5200_v61 = vadd.f32 %v14593_v3, %v5199_v35  ;;  %v5860_v5 = vor.u32 %v5858_v63, %v5857_v20 }
 0x3e2   : > { %v5201_v49 = vpop.f32.mrf.mxu0  ;;  %v6389_v60 = vrot.slane %v6032_v13, 1  ;;  %v6139_v21 = vshll.u32 %v6032_v13, 16  ;;  %v14877_v48 = vadd.f32 %v5406_v22, %v17600_v4 }
 0x3e3   : > { %v5409_v52 = vadd.f32 %v14580_v12, %v5200_v61  ;;  %v14867_v45 = vsel %vm12074_vm2, 0, %v5860_v5  ;;  %v17602_v12 = vld [vmem:[#allocation16_spill] sm:$0xff] }
 0x3e4   : > { %6299 = vrot.lane.b32.xlu1 %v14855_v30, %s11979_s21  ;;  %v6388_v50 = vrot.slane %v14867_v45, 1  ;;  %v6134_v47 = vshll.u32 %v14867_v45, 16  ;;  %17601 = vst [vmem:[#allocation3_spill] sm:$0xff] %v14877_v48  ;;  %v17603_v20 = vmax.f32 %v17602_v12, 0.0  ;;  %v6132_v61 = vshrl.u32 %v14867_v45, 16 }
 0x3e5   : > { %6575 = vrot.lane.b32.xlu0 %v14867_v45, %s11978_s20  ;;  %v6141_v22 = vrot.slane %v6139_v21, 1 }
 0x3e6   : > { %v14881_v63 = vadd.f32 %v5409_v52, %v17603_v20  ;;  %v6390_v35 = vsel %vm2097_vm3, %v6388_v50, %v6389_v60  ;;  %v6136_v5 = vrot.slane %v6134_v47, 1 }
 0x3e7   : > { %11620 = vmatmul.mubr.msk.bf16.gmra.mxu0 %vm2444_vm6, %v6390_v35 }
 0x3e8   : > { %17604 = vst [vmem:[#allocation39_spill] sm:$0xff] %v14881_v63  ;;  %v5791_v49 = vpack.c.bf16 %v14881_v63, %v14877_v48  ;;  %v5204_v44 = vpop.f32.mrf.mxu0  ;;  %6480 = vrot.lane.b32.xlu1 %v14867_v45, %s11977_s15  ;;  %v6137_v13 = vor.u32 %v6136_v5, %v6132_v61 }
 0x3e9   : > { %6536 = vrot.lane.b32.xlu0 %v6390_v35, %s11979_s21  ;;  %v5205_v42 = vadd.f32 %v14593_v3, %v5204_v44 }
 0x3ea   : > { %v5862_v52 = vshrl.u32 %v5791_v49, 16  ;;  %v5206_v50 = vpop.f32.mrf.mxu0  ;;  %v14893_v60 = vsel %vm1712_vm5, %v6137_v13, %v6141_v22  ;;  %v5865_v4 = vshll.u32 %v5791_v49, 16 }
 0x3eb   : > { %v5414_v20 = vadd.f32 %v14560_v10, %v5205_v42  ;;  %v17605_v42 = vld [vmem:[#allocation19_spill] sm:$0xff] }
 0x3ec   : > { %v5864_v47 = vrot.slane %v5862_v52, 7  ;;  %v5207_v12 = vpop.f32.mrf.mxu0  ;;  %6441 = vrot.lane.b32.xlu1 %v6390_v35, %s11978_s20  ;;  %v17606_v50 = vmax.f32 %v17605_v42, 0.0 }
 0x3ed   : > { %6627 = vrot.lane.b32.xlu0 %v14893_v60, %s11977_s15  ;;  %v5208_v61 = vadd.f32 %v14593_v3, %v5207_v12 }
 0x3ee   : > { %v5867_v21 = vor.u32 %v5865_v4, %v5864_v47  ;;  %v6033_v44 = vsel %vm12074_vm2, %v5864_v47, 0  ;;  %v5209_v5 = vpop.f32.mrf.mxu0  ;;  %v14915_v47 = vadd.f32 %v5414_v20, %v17606_v50 }
 0x3ef   : > { %v5417_v13 = vadd.f32 %v14576_v7, %v5208_v61  ;;  %v6392_v35 = vrot.slane %v6033_v44, 1  ;;  %v6151_v52 = vshll.u32 %v6033_v44, 16  ;;  %v17608_v7 = vld [vmem:[#allocation18_spill] sm:$0xff] }
 0x3f0   : > { %v14905_v49 = vsel %vm12074_vm2, 0, %v5867_v21  ;;  %6301 = vrot.lane.b32.xlu1 %v14893_v60, %s11979_s21  ;;  %17607 = vst [vmem:[#allocation4_spill] sm:$0xff] %v14915_v47  ;;  %v17609_v4 = vmax.f32 %v17608_v7, 0.0 }
 0x3f1   : > { %6577 = vrot.lane.b32.xlu0 %v14905_v49, %s11978_s20  ;;  %v6391_v10 = vrot.slane %v14905_v49, 1  ;;  %v6146_v22 = vshll.u32 %v14905_v49, 16  ;;  %v6144_v21 = vshrl.u32 %v14905_v49, 16  ;;  %v6153_v44 = vrot.slane %v6151_v52, 1 }
 0x3f2   : > { %v14919_v12 = vadd.f32 %v5417_v13, %v17609_v4 }
 0x3f3   : > { %v6393_v61 = vsel %vm2097_vm3, %v6391_v10, %v6392_v35  ;;  %v6148_v5 = vrot.slane %v6146_v22, 1 }
 0x3f4   : > { %17610 = vst [vmem:[#allocation5_spill] sm:$0xff] %v14919_v12  ;;  %v5792_v63 = vpack.c.bf16 %v14919_v12, %v14915_v47  ;;  %11623 = vmatprep.mubr.msk.bf16.mxu0 %vm2444_vm6, %v6393_v61  ;;  %v5212_v48 = vpop.f32.mrf.mxu0  ;;  %6482 = vrot.lane.b32.xlu1 %v14905_v49, %s11977_s15 }
 0x3f5   : > { %6538 = vrot.lane.b32.xlu0 %v6393_v61, %s11979_s21  ;;  %v6149_v20 = vor.u32 %v6148_v5, %v6144_v21  ;;  %v5213_v42 = vadd.f32 %v14593_v3, %v5212_v48 }
 0x3f6   : > { %v5869_v13 = vshrl.u32 %v5792_v63, 16  ;;  %v5214_v10 = vpop.f32.mrf.mxu0  ;;  %v5872_v50 = vshll.u32 %v5792_v63, 16 }
 0x3f7   : > { %v14931_v35 = vsel %vm1712_vm5, %v6149_v20, %v6153_v44  ;;  %v5422_v52 = vadd.f32 %v14595_v6, %v5213_v42  ;;  %v17611_v42 = vld [vmem:[#allocation21_spill] sm:$0xff] }
 0x3f8   : > { %v5871_v22 = vrot.slane %v5869_v13, 7  ;;  %v5215_v7 = vpop.f32.mrf.mxu0  ;;  %6443 = vrot.lane.b32.xlu1 %v6393_v61, %s11978_s20  ;;  %v17612_v10 = vmax.f32 %v17611_v42, 0.0 }
 0x3f9   : > { %6629 = vrot.lane.b32.xlu0 %v14931_v35, %s11977_s15  ;;  %v5216_v21 = vadd.f32 %v14593_v3, %v5215_v7 }
 0x3fa   : > { %v6034_v4 = vsel %vm12074_vm2, %v5871_v22, 0  ;;  %v5874_v48 = vor.u32 %v5872_v50, %v5871_v22  ;;  %v5217_v5 = vpop.f32.mrf.mxu0  ;;  %v14953_v22 = vadd.f32 %v5422_v52, %v17612_v10 }
 0x3fb   : > { %v5425_v20 = vadd.f32 %v14609_v34, %v5216_v21  ;;  %v6395_v44 = vrot.slane %v6034_v4, 1  ;;  %v6163_v13 = vshll.u32 %v6034_v4, 16  ;;  %v17614_v34 = vld [vmem:[#allocation20_spill] sm:$0xff] }
 0x3fc   : > { %v14943_v63 = vsel %vm12074_vm2, 0, %v5874_v48  ;;  %6303 = vrot.lane.b32.xlu1 %v14931_v35, %s11979_s21  ;;  %17613 = vst [vmem:[#allocation7_spill] sm:$0xff] %v14953_v22  ;;  %v17615_v50 = vmax.f32 %v17614_v34, 0.0 }
 0x3fd   : > { %6579 = vrot.lane.b32.xlu0 %v14943_v63, %s11978_s20  ;;  %v6394_v61 = vrot.slane %v14943_v63, 1  ;;  %v6158_v6 = vshll.u32 %v14943_v63, 16  ;;  %v6156_v48 = vshrl.u32 %v14943_v63, 16  ;;  %v6165_v52 = vrot.slane %v6163_v13, 1 }
 0x3fe   : > { %v14957_v7 = vadd.f32 %v5425_v20, %v17615_v50 }
 0x3ff   : > { %v6396_v21 = vsel %vm2097_vm3, %v6394_v61, %v6395_v44  ;;  %v6160_v5 = vrot.slane %v6158_v6, 1 }
 0x400   : > { %17616 = vst [vmem:[#allocation6_spill] sm:$0xff] %v14957_v7  ;;  %v5793_v12 = vpack.c.bf16 %v14957_v7, %v14953_v22  ;;  %11624 = vmatmul.mubr.msk.bf16.gmra.mxu0 %vm2444_vm6, %v6396_v21  ;;  %v5220_v47 = vpop.f32.mrf.mxu0  ;;  %6484 = vrot.lane.b32.xlu1 %v14943_v63, %s11977_s15 }
 0x401   : > { %6540 = vrot.lane.b32.xlu0 %v6396_v21, %s11979_s21  ;;  %v6161_v4 = vor.u32 %v6160_v5, %v6156_v48  ;;  %v5221_v42 = vadd.f32 %v14593_v3, %v5220_v47 }
 0x402   : > { %v5876_v20 = vshrl.u32 %v5793_v12, 16  ;;  %v5222_v61 = vpop.f32.mrf.mxu0  ;;  %v5879_v10 = vshll.u32 %v5793_v12, 16 }
 0x403   : > { %v14969_v44 = vsel %vm1712_vm5, %v6161_v4, %v6165_v52  ;;  %v5430_v50 = vadd.f32 %v14586_v24, %v5221_v42  ;;  %v17617_v42 = vld [vmem:[#allocation23_spill] sm:$0xff] }
 0x404   : > { %v5878_v6 = vrot.slane %v5876_v20, 7  ;;  %v5223_v34 = vpop.f32.mrf.mxu0  ;;  %6445 = vrot.lane.b32.xlu1 %v6396_v21, %s11978_s20  ;;  %v17618_v61 = vmax.f32 %v17617_v42, 0.0 }
 0x405   : > { %6631 = vrot.lane.b32.xlu0 %v14969_v44, %s11977_s15  ;;  %v5224_v48 = vadd.f32 %v14593_v3, %v5223_v34 }
 0x406   : > { %v5881_v13 = vor.u32 %v5879_v10, %v5878_v6  ;;  %v6035_v47 = vsel %vm12074_vm2, %v5878_v6, 0  ;;  %v5225_v5 = vpop.f32.mrf.mxu0  ;;  %v14991_v6 = vadd.f32 %v5430_v50, %v17618_v61 }
 0x407   : > { %v5433_v4 = vadd.f32 %v14600_v27, %v5224_v48  ;;  %v6398_v21 = vrot.slane %v6035_v47, 1  ;;  %v6175_v20 = vshll.u32 %v6035_v47, 16  ;;  %v17620_v27 = vld [vmem:[#allocation22_spill] sm:$0xff] }
 0x408   : > { %v14981_v12 = vsel %vm12074_vm2, 0, %v5881_v13  ;;  %6305 = vrot.lane.b32.xlu1 %v14969_v44, %s11979_s21  ;;  %17619 = vst [vmem:[#allocation9_spill] sm:$0xff] %v14991_v6  ;;  %v17621_v10 = vmax.f32 %v17620_v27, 0.0 }
 0x409   : > { %6581 = vrot.lane.b32.xlu0 %v14981_v12, %s11978_s20  ;;  %v6397_v24 = vrot.slane %v14981_v12, 1  ;;  %v6170_v52 = vshll.u32 %v14981_v12, 16  ;;  %v6168_v13 = vshrl.u32 %v14981_v12, 16  ;;  %v6177_v47 = vrot.slane %v6175_v20, 1 }
 0x40a   : > { %v14995_v34 = vadd.f32 %v5433_v4, %v17621_v10 }
 0x40b   : > { %v6399_v48 = vsel %vm2097_vm3, %v6397_v24, %v6398_v21  ;;  %v6172_v5 = vrot.slane %v6170_v52, 1 }
 0x40c   : > { %17622 = vst [vmem:[#allocation8_spill] sm:$0xff] %v14995_v34  ;;  %v5794_v7 = vpack.c.bf16 %v14995_v34, %v14991_v6  ;;  %11627 = vmatprep.mubr.msk.bf16.mxu0 %vm2444_vm6, %v6399_v48  ;;  %v5228_v22 = vpop.f32.mrf.mxu0  ;;  %6486 = vrot.lane.b32.xlu1 %v14981_v12, %s11977_s15 }
 0x40d   : > { %6542 = vrot.lane.b32.xlu0 %v6399_v48, %s11979_s21  ;;  %v6173_v50 = vor.u32 %v6172_v5, %v6168_v13  ;;  %v5229_v42 = vadd.f32 %v14593_v3, %v5228_v22 }
 0x40e   : > { %v5883_v4 = vshrl.u32 %v5794_v7, 16  ;;  %v5230_v24 = vpop.f32.mrf.mxu0  ;;  %v5886_v61 = vshll.u32 %v5794_v7, 16 }
 0x40f   : > { %v15007_v21 = vsel %vm1712_vm5, %v6173_v50, %v6177_v47  ;;  %v5438_v20 = vadd.f32 %v14637_v19, %v5229_v42  ;;  %v17623_v42 = vld [vmem:[#allocation25_spill] sm:$0xff] }
 0x410   : > { %v5885_v52 = vrot.slane %v5883_v4, 7  ;;  %v5231_v27 = vpop.f32.mrf.mxu0  ;;  %6447 = vrot.lane.b32.xlu1 %v6399_v48, %s11978_s20  ;;  %v17624_v24 = vmax.f32 %v17623_v42, 0.0 }
 0x411   : > { %6633 = vrot.lane.b32.xlu0 %v15007_v21, %s11977_s15  ;;  %v5232_v13 = vadd.f32 %v14593_v3, %v5231_v27 }
 0x412   : > { %v6036_v10 = vsel %vm12074_vm2, %v5885_v52, 0  ;;  %v5888_v22 = vor.u32 %v5886_v61, %v5885_v52  ;;  %v5233_v5 = vpop.f32.mrf.mxu0  ;;  %v15029_v52 = vadd.f32 %v5438_v20, %v17624_v24 }
 0x413   : > { %v5441_v50 = vadd.f32 %v14681_v1, %v5232_v13  ;;  %v6401_v47 = vrot.slane %v6036_v10, 1  ;;  %v6187_v4 = vshll.u32 %v6036_v10, 16  ;;  %v17626_v1 = vld [vmem:[#allocation24_spill] sm:$0xff] }
 0x414   : > { %v15019_v7 = vsel %vm12074_vm2, 0, %v5888_v22  ;;  %6307 = vrot.lane.b32.xlu1 %v15007_v21, %s11979_s21  ;;  %17625 = vst [vmem:[#allocation11_spill] sm:$0xff] %v15029_v52  ;;  %v17627_v61 = vmax.f32 %v17626_v1, 0.0 }
 0x415   : > { %6583 = vrot.lane.b32.xlu0 %v15019_v7, %s11978_s20  ;;  %v6400_v48 = vrot.slane %v15019_v7, 1  ;;  %v6182_v19 = vshll.u32 %v15019_v7, 16  ;;  %v6180_v22 = vshrl.u32 %v15019_v7, 16  ;;  %v6189_v20 = vrot.slane %v6187_v4, 1 }
 0x416   : > { %v15033_v27 = vadd.f32 %v5441_v50, %v17627_v61 }
 0x417   : > { %v6402_v13 = vsel %vm2097_vm3, %v6400_v48, %v6401_v47  ;;  %v6184_v5 = vrot.slane %v6182_v19, 1 }
 0x418   : > { %17628 = vst [vmem:[#allocation10_spill] sm:$0xff] %v15033_v27  ;;  %v5795_v34 = vpack.c.bf16 %v15033_v27, %v15029_v52  ;;  %11628 = vmatmul.mubr.msk.bf16.gmra.mxu0 %vm2444_vm6, %v6402_v13  ;;  %v5236_v6 = vpop.f32.mrf.mxu0  ;;  %6488 = vrot.lane.b32.xlu1 %v15019_v7, %s11977_s15 }
 0x419   : > { %6544 = vrot.lane.b32.xlu0 %v6402_v13, %s11979_s21  ;;  %v6185_v10 = vor.u32 %v6184_v5, %v6180_v22  ;;  %v5237_v42 = vadd.f32 %v14593_v3, %v5236_v6 }
 0x41a   : > { %v5890_v50 = vshrl.u32 %v5795_v34, 16  ;;  %v5238_v48 = vpop.f32.mrf.mxu0  ;;  %v5893_v24 = vshll.u32 %v5795_v34, 16 }
 0x41b   : > { %v15045_v47 = vsel %vm1712_vm5, %v6185_v10, %v6189_v20  ;;  %v5446_v61 = vadd.f32 %v14614_v57, %v5237_v42  ;;  %v17629_v42 = vld [vmem:[#allocation27_spill] sm:$0xff] }
 0x41c   : > { %v5892_v19 = vrot.slane %v5890_v50, 7  ;;  %v5239_v1 = vpop.f32.mrf.mxu0  ;;  %6449 = vrot.lane.b32.xlu1 %v6402_v13, %s11978_s20  ;;  %v17630_v48 = vmax.f32 %v17629_v42, 0.0 }
 0x41d   : > { %6635 = vrot.lane.b32.xlu0 %v15045_v47, %s11977_s15  ;;  %v5240_v22 = vadd.f32 %v14593_v3, %v5239_v1 }
 0x41e   : > { %v5895_v4 = vor.u32 %v5893_v24, %v5892_v19  ;;  %v6037_v6 = vsel %vm12074_vm2, %v5892_v19, 0  ;;  %v5241_v5 = vpop.f32.mrf.mxu0  ;;  %v15067_v19 = vadd.f32 %v5446_v61, %v17630_v48 }
 0x41f   : > { %v5449_v10 = vadd.f32 %v14653_v14, %v5240_v22  ;;  %v6404_v13 = vrot.slane %v6037_v6, 1  ;;  %v6199_v50 = vshll.u32 %v6037_v6, 16  ;;  %v17632_v14 = vld [vmem:[#allocation26_spill] sm:$0xff] }
 0x420   : > { %v15057_v34 = vsel %vm12074_vm2, 0, %v5895_v4  ;;  %6309 = vrot.lane.b32.xlu1 %v15045_v47, %s11979_s21  ;;  %17631 = vst [vmem:[#allocation13_spill] sm:$0xff] %v15067_v19  ;;  %v17633_v24 = vmax.f32 %v17632_v14, 0.0 }
 0x421   : > { %6585 = vrot.lane.b32.xlu0 %v15057_v34, %s11978_s20  ;;  %v6403_v57 = vrot.slane %v15057_v34, 1  ;;  %v6194_v20 = vshll.u32 %v15057_v34, 16  ;;  %v6192_v4 = vshrl.u32 %v15057_v34, 16  ;;  %v6201_v6 = vrot.slane %v6199_v50, 1 }
 0x422   : > { %v15071_v1 = vadd.f32 %v5449_v10, %v17633_v24  ;;  %v6290_v10 = vpop.permute.xlu0 %6289 }
 0x423   : > { %v6405_v22 = vsel %vm2097_vm3, %v6403_v57, %v6404_v13  ;;  %v6196_v5 = vrot.slane %v6194_v20, 1 }
 0x424   : > { %17634 = vst [vmem:[#allocation12_spill] sm:$0xff] %v15071_v1  ;;  %v5796_v27 = vpack.c.bf16 %v15071_v1, %v15067_v19  ;;  %11631 = vmatprep.mubr.msk.bf16.mxu0 %vm2444_vm6, %v6405_v22  ;;  %v5244_v52 = vpop.f32.mrf.mxu0  ;;  %6490 = vrot.lane.b32.xlu1 %v15057_v34, %s11977_s15  ;;  %v11922_v1 = vunpack.i.h.bf16 %v14641_v53 }
 0x425   : > { %6546 = vrot.lane.b32.xlu0 %v6405_v22, %s11979_s21  ;;  %v6197_v61 = vor.u32 %v6196_v5, %v6192_v4  ;;  %v5245_v57 = vadd.f32 %v14593_v3, %v5244_v52 }
 0x426   : > { %v5897_v42 = vshrl.u32 %v5796_v27, 16  ;;  %v5246_v13 = vpop.f32.mrf.mxu0  ;;  %v6568_v48 = vpop.permute.xlu1 %6567  ;;  %v5900_v24 = vshll.u32 %v5796_v27, 16  ;;  %v6664_v27 = vsel %vm2444_vm6, %v12090_v8, %v6290_v10 }
 0x427   : > { %v15083_v20 = vsel %vm1712_vm5, %v6197_v61, %v6201_v6  ;;  %v5454_v52 = vadd.f32 %v14713_v46, %v5245_v57 }
 0x428   : > { %v5899_v14 = vrot.slane %v5897_v42, 7  ;;  %v5247_v19 = vpop.f32.mrf.mxu0  ;;  %6451 = vrot.lane.b32.xlu1 %v6405_v22, %s11978_s20  ;;  %v6806_v22 = vsel %vm2444_vm6, %v12147_v33, %v14597_v55  ;;  %v6704_v55 = vsel %vm2493_vm7, %v6664_v27, %v11922_v1 }
 0x429   : > { %6637 = vrot.lane.b32.xlu0 %v15083_v20, %s11977_s15  ;;  %v5248_v4 = vadd.f32 %v14593_v3, %v5247_v19  ;;  %v15093_v5 = vpop.permute.xlu0 %6528 }
 0x42a   : > { %v6038_v50 = vsel %vm12074_vm2, %v5899_v14, 0  ;;  %v5902_v61 = vor.u32 %v5900_v24, %v5899_v14  ;;  %v5249_v53 = vpop.f32.mrf.mxu0  ;;  %v15097_v6 = vpop.permute.xlu1 %6472  ;;  %v17635_v14 = vld [vmem:[#allocation30_spill] sm:$0xff] }
 0x42b   : > { %v5457_v42 = vadd.f32 %v14755_v56, %v5248_v4  ;;  %v6407_v10 = vrot.slane %v6038_v50, 1  ;;  %v6211_v13 = vshll.u32 %v6038_v50, 16  ;;  %v17636_v56 = vmax.f32 %v17635_v14, 0.0 }
 0x42c   : > { %v15105_v46 = vsel %vm12074_vm2, 0, %v5902_v61  ;;  %6311 = vrot.lane.b32.xlu1 %v15083_v20, %s11979_s21  ;;  %v6864_v4 = vsel %vm2493_vm7, %v6806_v22, %v6568_v48  ;;  %v17637_v61 = vld [vmem:[#allocation28_spill] sm:$0xff] }
 0x42d   : > { %6587 = vrot.lane.b32.xlu0 %v15105_v46, %s11978_s20  ;;  %v6406_v19 = vrot.slane %v15105_v46, 1  ;;  %v6206_v57 = vshll.u32 %v15105_v46, 16  ;;  %v15116_v24 = vadd.f32 %v5454_v52, %v17636_v56  ;;  %v17638_v53 = vmax.f32 %v17637_v61, 0.0  ;;  %v6620_v59 = vpop.permute.xlu0 %6619 }
 0x42e   : > { %v15123_v11 = vpop.permute.xlu1 %6433  ;;  %v6905_v62 = vsel %vm2542_vm8, %v6864_v4, %v6620_v59  ;;  %v6204_v50 = vshrl.u32 %v15105_v46, 16  ;;  %v6745_v59 = vsel %vm2542_vm8, %v6704_v55, %v14602_v29  ;;  %v6213_v22 = vrot.slane %v6211_v13, 1 }
 0x42f   : > { %v15121_v17 = vadd.f32 %v5457_v42, %v17638_v53  ;;  %v6408_v31 = vsel %vm2097_vm3, %v6406_v19, %v6407_v10  ;;  %v6208_v1 = vrot.slane %v6206_v57, 1  ;;  %7122 = vmatprep.mubr.bf16.mxu1 %v6905_v62 }
 0x430   : > { %11632 = vmatmul.mubr.msk.bf16.gmra.mxu0 %vm2444_vm6, %v6408_v31  ;;  %v5252_v48 = vpop.f32.mrf.mxu0  ;;  %6492 = vrot.lane.b32.xlu1 %v15105_v46, %s11977_s15 }
 0x431   : > { %v5797_v52 = vpack.c.bf16 %v15121_v17, %v15116_v24  ;;  %6548 = vrot.lane.b32.xlu0 %v6408_v31, %s11979_s21  ;;  %v6209_v27 = vor.u32 %v6208_v1, %v6204_v50  ;;  %v5253_v19 = vadd.f32 %v14593_v3, %v5252_v48  ;;  %7123 = vmatmul.mubr.bf16.gmra.mxu1 %v6745_v59 }
 0x432   : > { %v5254_v10 = vpop.f32.mrf.mxu0  ;;  %v15137_v57 = vpop.permute.xlu1 %6293 }
 0x433   : > { %v5904_v42 = vshrl.u32 %v5797_v52, 16  ;;  %v15140_v62 = vsel %vm1712_vm5, %v6209_v27, %v6213_v22  ;;  %v5907_v56 = vshll.u32 %v5797_v52, 16  ;;  %v6570_v4 = vpop.permute.xlu0 %6569  ;;  %v5462_v29 = vadd.f32 %v14699_v41, %v5253_v19  ;;  %v17639_v22 = vld [vmem:[#allocation32_spill] sm:$0xff]  ;;  %v17642_v10 = vld [vmem:[#allocation31_spill] sm:$0xff] }
 0x434   : > { %v5255_v61 = vpop.f32.mrf.mxu0  ;;  %6453 = vrot.lane.b32.xlu1 %v6408_v31, %s11978_s20 }
 0x435   : > { %v5906_v14 = vrot.slane %v5904_v42, 7  ;;  %6639 = vrot.lane.b32.xlu0 %v15140_v62, %s11977_s15  ;;  %v5256_v13 = vadd.f32 %v14593_v3, %v5255_v61  ;;  %v17640_v42 = vmax.f32 %v17639_v22, 0.0  ;;  %v6809_v61 = vsel %vm2444_vm6, %v14709_v15, %v15093_v5 }
 0x436   : > { %v5257_v50 = vpop.f32.mrf.mxu0  ;;  %v15149_v1 = vpop.permute.xlu1 %6474 }
 0x437   : > { %v5909_v55 = vor.u32 %v5907_v56, %v5906_v14  ;;  %v6039_v53 = vsel %vm12074_vm2, %v5906_v14, 0  ;;  %v5465_v52 = vadd.f32 %v14728_v2, %v5256_v13  ;;  %v6531_v48 = vpop.permute.xlu0 %6530  ;;  %v6666_v2 = vsel %vm2444_vm6, %v12090_v8, %v14612_v23 }
 0x438   : > { %6313 = vrot.lane.b32.xlu1 %v15140_v62, %s11979_s21  ;;  %v6410_v41 = vrot.slane %v6039_v53, 1  ;;  %v6223_v27 = vshll.u32 %v6039_v53, 16  ;;  %v15167_v19 = vadd.f32 %v5462_v29, %v17640_v42  ;;  %v17643_v14 = vmax.f32 %v17642_v10, 0.0 }
 0x439   : > { %v15154_v31 = vsel %vm12074_vm2, 0, %v5909_v55  ;;  %v6866_v23 = vsel %vm2493_vm7, %v6809_v61, %v6570_v4 }
 0x43a   : > { %6589 = vrot.lane.b32.xlu0 %v15154_v31, %s11978_s20  ;;  %v6409_v3 = vrot.slane %v15154_v31, 1  ;;  %v6218_v59 = vshll.u32 %v15154_v31, 16  ;;  %17641 = vst [vmem:[#allocation15_spill] sm:$0xff] %v15167_v19  ;;  %v15171_v56 = vadd.f32 %v5465_v52, %v17643_v14  ;;  %v15176_v13 = vpop.permute.xlu1 %6435  ;;  %v6216_v53 = vshrl.u32 %v15154_v31, 16 }
 0x43b   : > { %v6622_v22 = vpop.permute.xlu0 %6621  ;;  %v6706_v52 = vsel %vm2493_vm7, %v6666_v2, %v14634_v54 }
 0x43c   : > { %17644 = vst [vmem:[#allocation14_spill] sm:$0xff] %v15171_v56  ;;  %v6411_v55 = vsel %vm2097_vm3, %v6409_v3, %v6410_v41  ;;  %v6220_v50 = vrot.slane %v6218_v59, 1  ;;  %v5798_v29 = vpack.c.bf16 %v15171_v56, %v15167_v19  ;;  %v5260_v42 = vpop.f32.mrf.mxu0  ;;  %6494 = vrot.lane.b32.xlu1 %v15154_v31, %s11977_s15  ;;  %v6908_v15 = vsel %vm2542_vm8, %v6866_v23, %v6622_v22  ;;  %v15195_v59 = vld [vmem:[%s17384_s6] ss:$0 sm:$0xff] }
 0x43d   : > { %11635 = vmatprep.mubr.msk.bf16.mxu0 %vm2444_vm6, %v6411_v55  ;;  %v6225_v3 = vrot.slane %v6223_v27, 1  ;;  %v6748_v4 = vsel %vm2542_vm8, %v6706_v52, %v15097_v6  ;;  %v5261_v54 = vadd.f32 %v15195_v59, %v5260_v42  ;;  %7130 = vmatprep.mubr.bf16.mxu1 %v6908_v15 }
 0x43e   : > { %6550 = vrot.lane.b32.xlu0 %v6411_v55, %s11979_s21  ;;  %v6221_v5 = vor.u32 %v6220_v50, %v6216_v53  ;;  %v5911_v41 = vshrl.u32 %v5798_v29, 16  ;;  %7131 = vmatmul.mubr.bf16.gmra.mxu1 %v6748_v4  ;;  %v5262_v2 = vpop.f32.mrf.mxu0  ;;  %v15198_v10 = vpop.permute.xlu1 %6295  ;;  %v5914_v61 = vshll.u32 %v5798_v29, 16 }
 0x43f   : > { %v6572_v53 = vpop.permute.xlu0 %6571  ;;  %v5470_v23 = vadd.f32 %v14768_v26, %v5261_v54  ;;  %v17645_v54 = vld [vmem:[#allocation34_spill] sm:$0xff] }
 0x440   : > { %v15201_v14 = vsel %vm1712_vm5, %v6221_v5, %v6225_v3  ;;  %v5913_v27 = vrot.slane %v5911_v41, 7  ;;  %v5263_v6 = vpop.f32.mrf.mxu0  ;;  %6455 = vrot.lane.b32.xlu1 %v6411_v55, %s11978_s20  ;;  %v17646_v2 = vmax.f32 %v17645_v54, 0.0 }
 0x441   : > { %v5264_v22 = vadd.f32 %v15195_v59, %v5263_v6 }
 0x442   : > { %6641 = vrot.lane.b32.xlu0 %v15201_v14, %s11977_s15  ;;  %v6040_v50 = vsel %vm12074_vm2, %v5913_v27, 0  ;;  %v5916_v52 = vor.u32 %v5914_v61, %v5913_v27  ;;  %v5265_v42 = vpop.f32.mrf.mxu0  ;;  %v15210_v15 = vpop.permute.xlu1 %6476  ;;  %v15228_v27 = vadd.f32 %v5470_v23, %v17646_v2  ;;  %v17647_v61 = vld [vmem:[#allocation33_spill] sm:$0xff] }
 0x443   : > { %v5473_v29 = vadd.f32 %v14780_v36, %v5264_v22  ;;  %v6533_v5 = vpop.permute.xlu0 %6532  ;;  %v6413_v3 = vrot.slane %v6040_v50, 1  ;;  %v6235_v41 = vshll.u32 %v6040_v50, 16  ;;  %v6668_v36 = vsel %vm2444_vm6, %v14673_v39, %v15137_v57 }
 0x444   : > { %v15215_v55 = vsel %vm12074_vm2, 0, %v5916_v52  ;;  %6315 = vrot.lane.b32.xlu1 %v15201_v14, %s11979_s21  ;;  %v17648_v6 = vmax.f32 %v17647_v61, 0.0  ;;  %v6812_v52 = vsel %vm2444_vm6, %v14764_v0, %v6531_v48 }
 0x445   : > { %v6412_v26 = vrot.slane %v15215_v55, 1  ;;  %v6230_v4 = vshll.u32 %v15215_v55, 16  ;;  %v6228_v50 = vshrl.u32 %v15215_v55, 16  ;;  %v6868_v39 = vsel %vm2493_vm7, %v6812_v52, %v6572_v53 }
 0x446   : > { %6591 = vrot.lane.b32.xlu0 %v15215_v55, %s11978_s20  ;;  %v15232_v22 = vadd.f32 %v5473_v29, %v17648_v6  ;;  %v15236_v42 = vpop.permute.xlu1 %6437  ;;  %v6708_v29 = vsel %vm2493_vm7, %v6668_v36, %v15123_v11 }
 0x447   : > { %v6414_v56 = vsel %vm2097_vm3, %v6412_v26, %v6413_v3  ;;  %v6232_v19 = vrot.slane %v6230_v4, 1  ;;  %v6624_v23 = vpop.permute.xlu0 %6623  ;;  %v6237_v26 = vrot.slane %v6235_v41, 1  ;;  %v6751_v53 = vsel %vm2542_vm8, %v6708_v29, %v15149_v1 }
 0x448   : > { %17649 = vst [vmem:[#allocation17_spill] sm:$0xff] %v15232_v22  ;;  %v5799_v57 = vpack.c.bf16 %v15232_v22, %v15228_v27  ;;  %11636 = vmatmul.mubr.msk.bf16.gmra.mxu0 %vm2444_vm6, %v6414_v56  ;;  %v5268_v54 = vpop.f32.mrf.mxu0  ;;  %6496 = vrot.lane.b32.xlu1 %v15215_v55, %s11977_s15  ;;  %v6911_v0 = vsel %vm2542_vm8, %v6868_v39, %v6624_v23 }
 0x449   : > { %v6233_v48 = vor.u32 %v6232_v19, %v6228_v50  ;;  %v5269_v4 = vadd.f32 %v15195_v59, %v5268_v54  ;;  %7138 = vmatprep.mubr.bf16.mxu1 %v6911_v0 }
 0x44a   : > { %6552 = vrot.lane.b32.xlu0 %v6414_v56, %s11979_s21  ;;  %v5918_v3 = vshrl.u32 %v5799_v57, 16  ;;  %7139 = vmatmul.mubr.bf16.gmra.mxu1 %v6751_v53  ;;  %v5270_v2 = vpop.f32.mrf.mxu0  ;;  %v15253_v11 = vpop.permute.xlu1 %6297  ;;  %v5921_v6 = vshll.u32 %v5799_v57, 16 }
 0x44b   : > { %v15256_v36 = vsel %vm1712_vm5, %v6233_v48, %v6237_v26  ;;  %v6574_v52 = vpop.permute.xlu0 %6573  ;;  %v5478_v1 = vadd.f32 %v14761_v37, %v5269_v4 }
 0x44c   : > { %v5920_v61 = vrot.slane %v5918_v3, 7  ;;  %v5271_v39 = vpop.f32.mrf.mxu0  ;;  %6457 = vrot.lane.b32.xlu1 %v6414_v56, %s11978_s20  ;;  %v17650_v3 = vld [vmem:[#allocation36_spill] sm:$0xff] }
 0x44d   : > { %v5272_v19 = vadd.f32 %v15195_v59, %v5271_v39  ;;  %v17651_v4 = vmax.f32 %v17650_v3, 0.0 }
 0x44e   : > { %6643 = vrot.lane.b32.xlu0 %v15256_v36, %s11977_s15  ;;  %v5923_v41 = vor.u32 %v5921_v6, %v5920_v61  ;;  %v6041_v50 = vsel %vm12074_vm2, %v5920_v61, 0  ;;  %v5273_v23 = vpop.f32.mrf.mxu0  ;;  %v15265_v29 = vpop.permute.xlu1 %6478  ;;  %v17653_v61 = vld [vmem:[#allocation35_spill] sm:$0xff] }
 0x44f   : > { %v5481_v57 = vadd.f32 %v14775_v51, %v5272_v19  ;;  %v6535_v54 = vpop.permute.xlu0 %6534  ;;  %v6416_v48 = vrot.slane %v6041_v50, 1  ;;  %v6247_v53 = vshll.u32 %v6041_v50, 16  ;;  %v6670_v51 = vsel %vm2444_vm6, %v14733_v25, %v15198_v10 }
 0x450   : > { %v15270_v56 = vsel %vm12074_vm2, 0, %v5923_v41  ;;  %v5276_v0 = vpop.f32.mrf.mxu0  ;;  %6317 = vrot.lane.b32.xlu1 %v15256_v36, %s11979_s21  ;;  %v15283_v2 = vadd.f32 %v5478_v1, %v17651_v4  ;;  %v17654_v6 = vmax.f32 %v17653_v61, 0.0  ;;  %v6815_v41 = vsel %vm2444_vm6, %v14812_v40, %v6533_v5 }
 0x451   : > { %v6415_v37 = vrot.slane %v15270_v56, 1  ;;  %v6242_v26 = vshll.u32 %v15270_v56, 16  ;;  %v5277_v19 = vadd.f32 %v15195_v59, %v5276_v0  ;;  %v6240_v25 = vshrl.u32 %v15270_v56, 16 }
 0x452   : > { %6593 = vrot.lane.b32.xlu0 %v15270_v56, %s11978_s20  ;;  %17652 = vst [vmem:[#allocation16_spill] sm:$0xff] %v15283_v2  ;;  %v15287_v39 = vadd.f32 %v5481_v57, %v17654_v6  ;;  %v5278_v23 = vpop.f32.mrf.mxu0  ;;  %v15292_v22 = vpop.permute.xlu1 %6439  ;;  %v6870_v1 = vsel %vm2493_vm7, %v6815_v41, %v6574_v52  ;;  %v6710_v0 = vsel %vm2493_vm7, %v6670_v51, %v15176_v13 }
 0x453   : > { %v6417_v50 = vsel %vm2097_vm3, %v6415_v37, %v6416_v48  ;;  %v6244_v10 = vrot.slane %v6242_v26, 1  ;;  %v6626_v57 = vpop.permute.xlu0 %6625  ;;  %v6249_v48 = vrot.slane %v6247_v53, 1  ;;  %v6754_v52 = vsel %vm2542_vm8, %v6710_v0, %v15210_v15 }
 0x454   : > { %17655 = vst [vmem:[#allocation19_spill] sm:$0xff] %v15287_v39  ;;  %v5800_v3 = vpack.c.bf16 %v15287_v39, %v15283_v2  ;;  %11639 = vmatprep.mubr.msk.bf16.mxu0 %vm2444_vm6, %v6417_v50  ;;  %v5279_v40 = vpop.f32.mrf.mxu0  ;;  %6498 = vrot.lane.b32.xlu1 %v15270_v56, %s11977_s15  ;;  %v6914_v5 = vsel %vm2542_vm8, %v6870_v1, %v6626_v57 }
 0x455   : > { %v6245_v37 = vor.u32 %v6244_v10, %v6240_v25  ;;  %v5486_v4 = vadd.f32 %v14814_v9, %v5277_v19  ;;  %v5280_v61 = vadd.f32 %v15195_v59, %v5279_v40  ;;  %7146 = vmatprep.mubr.bf16.mxu1 %v6914_v5  ;;  %v17656_v59 = vld [vmem:[#allocation38_spill] sm:$0xff]  ;;  %v17659_v10 = vld [vmem:[#allocation37_spill] sm:$0xff] }
 0x456   : > { %6554 = vrot.lane.b32.xlu0 %v6417_v50, %s11979_s21  ;;  %v5925_v26 = vshrl.u32 %v5800_v3, 16  ;;  %7147 = vmatmul.mubr.bf16.gmra.mxu1 %v6754_v52  ;;  %v5281_v13 = vpop.f32.mrf.mxu0  ;;  %v6300_v51 = vpop.permute.xlu1 %6299  ;;  %v5928_v23 = vshll.u32 %v5800_v3, 16  ;;  %v17657_v15 = vmax.f32 %v17656_v59, 0.0  ;;  %v17660_v1 = vmax.f32 %v17659_v10, 0.0 }
 0x457   : > { %v15311_v6 = vsel %vm1712_vm5, %v6245_v37, %v6249_v48  ;;  %v5489_v25 = vadd.f32 %v14824_v58, %v5280_v61  ;;  %v6576_v53 = vpop.permute.xlu0 %6575  ;;  %v6818_v61 = vsel %vm2444_vm6, %v14855_v30, %v6535_v54 }
 0x458   : > { %v5927_v41 = vrot.slane %v5925_v26, 7  ;;  %6459 = vrot.lane.b32.xlu1 %v6417_v50, %s11978_s20  ;;  %v15321_v19 = vadd.f32 %v5486_v4, %v17657_v15  ;;  %v6672_v26 = vsel %vm2444_vm6, %v14784_v43, %v15253_v11  ;;  %v6872_v10 = vsel %vm2493_vm7, %v6818_v61, %v6576_v53 }
 0x459   : > { %v15325_v57 = vadd.f32 %v5489_v25, %v17660_v1  ;;  %v6712_v43 = vsel %vm2493_vm7, %v6672_v26, %v15236_v42 }
 0x45a   : > { %6645 = vrot.lane.b32.xlu0 %v15311_v6, %s11977_s15  ;;  %v6042_v9 = vsel %vm12074_vm2, %v5927_v41, 0  ;;  %17658 = vst [vmem:[#allocation18_spill] sm:$0xff] %v15321_v19  ;;  %v5930_v3 = vor.u32 %v5928_v23, %v5927_v41  ;;  %v15327_v0 = vpop.permute.xlu1 %6480  ;;  %v6757_v1 = vsel %vm2542_vm8, %v6712_v43, %v15265_v29 }
 0x45b   : > { %17661 = vst [vmem:[#allocation21_spill] sm:$0xff] %v15325_v57  ;;  %v5801_v58 = vpack.c.bf16 %v15325_v57, %v15321_v19  ;;  %v6537_v50 = vpop.permute.xlu0 %6536  ;;  %v6419_v37 = vrot.slane %v6042_v9, 1  ;;  %v6259_v52 = vshll.u32 %v6042_v9, 16 }
 0x45c   : > { %v15333_v40 = vsel %vm12074_vm2, 0, %v5930_v3  ;;  %6319 = vrot.lane.b32.xlu1 %v15311_v6, %s11979_s21 }
 0x45d   : > { %v6418_v5 = vrot.slane %v15333_v40, 1  ;;  %v6254_v48 = vshll.u32 %v15333_v40, 16  ;;  %v5932_v4 = vshrl.u32 %v5801_v58, 16  ;;  %v6252_v23 = vshrl.u32 %v15333_v40, 16 }
 0x45e   : > { %6595 = vrot.lane.b32.xlu0 %v15333_v40, %s11978_s20  ;;  %v15346_v13 = vpop.permute.xlu1 %6441  ;;  %v5935_v15 = vshll.u32 %v5801_v58, 16  ;;  %v6261_v54 = vrot.slane %v6259_v52, 1 }
 0x45f   : > { %v6420_v41 = vsel %vm2097_vm3, %v6418_v5, %v6419_v37  ;;  %v6256_v25 = vrot.slane %v6254_v48, 1  ;;  %v5934_v59 = vrot.slane %v5932_v4, 7  ;;  %v6628_v9 = vpop.permute.xlu0 %6627 }
 0x460   : > { %11640 = vmatmul.mubr.msk.bf16.gmra.mxu0 %vm2444_vm6, %v6420_v41  ;;  %6500 = vrot.lane.b32.xlu1 %v15333_v40, %s11977_s15  ;;  %v6917_v30 = vsel %vm2542_vm8, %v6872_v10, %v6628_v9  ;;  %v6821_v10 = vsel %vm2444_vm6, %v14893_v60, %v6537_v50 }
 0x461   : > { %v6257_v11 = vor.u32 %v6256_v25, %v6252_v23  ;;  %v5937_v3 = vor.u32 %v5935_v15, %v5934_v59  ;;  %7154 = vmatprep.mubr.bf16.mxu1 %v6917_v30  ;;  %v6043_v53 = vsel %vm12074_vm2, %v5934_v59, 0  ;;  %v6674_v25 = vsel %vm2444_vm6, %v14829_v28, %v6300_v51 }
 0x462   : > { %6556 = vrot.lane.b32.xlu0 %v6420_v41, %s11979_s21  ;;  %7155 = vmatmul.mubr.bf16.gmra.mxu1 %v6757_v1  ;;  %v6302_v58 = vpop.permute.xlu1 %6301  ;;  %v6422_v48 = vrot.slane %v6043_v53, 1  ;;  %v6271_v15 = vshll.u32 %v6043_v53, 16  ;;  %v6714_v28 = vsel %vm2493_vm7, %v6674_v25, %v15292_v22 }
 0x463   : > { %v15363_v42 = vsel %vm1712_vm5, %v6257_v11, %v6261_v54  ;;  %v15367_v5 = vsel %vm12074_vm2, 0, %v5937_v3  ;;  %v6578_v37 = vpop.permute.xlu0 %6577  ;;  %v6760_v60 = vsel %vm2542_vm8, %v6714_v28, %v15327_v0  ;;  %v6676_v53 = vsel %vm2444_vm6, %v14867_v45, %v6302_v58 }
 0x464   : > { %6321 = vrot.lane.b32.xlu1 %v15363_v42, %s11979_s21  ;;  %v6421_v29 = vrot.slane %v15367_v5, 1  ;;  %v6266_v52 = vshll.u32 %v15367_v5, 16  ;;  %v6264_v59 = vshrl.u32 %v15367_v5, 16  ;;  %v6273_v50 = vrot.slane %v6271_v15, 1 }
 0x465   : > { %v6716_v25 = vsel %vm2493_vm7, %v6676_v53, %v15346_v13 }
 0x466   : > { %6647 = vrot.lane.b32.xlu0 %v15363_v42, %s11977_s15  ;;  %v6483_v26 = vpop.permute.xlu1 %6482  ;;  %v6423_v4 = vsel %vm2097_vm3, %v6421_v29, %v6422_v48  ;;  %v6268_v23 = vrot.slane %v6266_v52, 1 }
 0x467   : > { %v6539_v61 = vpop.permute.xlu0 %6538  ;;  %11643 = vmatprep.mubr.msk.bf16.mxu0 %vm2444_vm6, %v6423_v4 }
 0x468   : > { %6461 = vrot.lane.b32.xlu1 %v6420_v41, %s11978_s20  ;;  %11644 = vmatmul.mubr.msk.bf16.gmra.mxu0 %vm2444_vm6, %v12118_v18  ;;  %v6874_v41 = vsel %vm2493_vm7, %v6821_v10, %v6578_v37  ;;  %v6269_v30 = vor.u32 %v6268_v23, %v6264_v59  ;;  %v6824_v37 = vsel %vm2444_vm6, %v14931_v35, %v6539_v61 }
 0x469   : > { %11647 = vmatprep.mubr.msk.bf16.mxu0 %vm2444_vm6, %v12118_v18  ;;  %v6763_v35 = vsel %vm2542_vm8, %v6716_v25, %v6483_v26 }
 0x46a   : > { %6597 = vrot.lane.b32.xlu0 %v15367_v5, %s11978_s20  ;;  %v15387_v9 = vpop.permute.xlu1 %6443  ;;  %v15401_v1 = vsel %vm1712_vm5, %v6269_v30, %v6273_v50 }
 0x46b   : > { %v6630_v43 = vpop.permute.xlu0 %6629 }
 0x46c   : > { %6502 = vrot.lane.b32.xlu1 %v15367_v5, %s11977_s15  ;;  %v6920_v51 = vsel %vm2542_vm8, %v6874_v41, %v6630_v43 }
 0x46d   : > { %7162 = vmatprep.mubr.bf16.mxu1 %v6920_v51 }
 0x46e   : > { %6558 = vrot.lane.b32.xlu0 %v6423_v4, %s11979_s21  ;;  %7163 = vmatmul.mubr.bf16.gmra.mxu1 %v6760_v60  ;;  %v6304_v11 = vpop.permute.xlu1 %6303 }
 0x46f   : > { %v6580_v54 = vpop.permute.xlu0 %6579  ;;  %v6678_v60 = vsel %vm2444_vm6, %v14905_v49, %v6304_v11 }
 0x470   : > { %6463 = vrot.lane.b32.xlu1 %v6423_v4, %s11978_s20  ;;  %11648 = vmatmul.mubr.msk.bf16.gmra.mxu0 %vm2444_vm6, %v12118_v18  ;;  %v6876_v52 = vsel %vm2493_vm7, %v6824_v37, %v6580_v54 }
 0x472   : > { %6649 = vrot.lane.b32.xlu0 %v15401_v1, %s11977_s15  ;;  %v6485_v22 = vpop.permute.xlu1 %6484 }
 0x473   : > { %v6541_v3 = vpop.permute.xlu0 %6540 }
 0x474   : > { %11939 = vrot.lane.b32.xlu1 %v17564_v32, %s11977_s15  ;;  %v5284_v0 = vpop.f32.mrf.mxu0  ;;  %v6827_v50 = vsel %vm2444_vm6, %v14969_v44, %v6541_v3 }
 0x476   : > { %6599 = vrot.lane.b32.xlu0 %v12090_v8, %s11978_s20  ;;  %v15416_v29 = vpop.permute.xlu1 %6445  ;;  %v5286_v48 = vpop.f32.mrf.mxu0 }
 0x477   : > { %v6632_v4 = vpop.permute.xlu0 %6631  ;;  %v7116_v23 = vpop.f32.mrf.mxu1  ;;  %v8811_v48 = vld [vmem:[%s17387_s9 + $0x110] sm:$0xff] }
 0x478   : > { %6325 = vrot.lane.b32.xlu1 %v12147_v33, %s11979_s21  ;;  %v6923_v45 = vsel %vm2542_vm8, %v6876_v52, %v6632_v4  ;;  %v5287_v58 = vpop.f32.mrf.mxu0  ;;  %v8812_v52 = vld [vmem:[%s17387_s9 + $0x118] sm:$0xff] }
 0x479   : > { %7170 = vmatprep.mubr.bf16.mxu1 %v6923_v45  ;;  %v7118_v61 = vpop.f32.mrf.mxu1  ;;  %v8830_v44 = vpack.c.bf16 %v8812_v52, %v8811_v48  ;;  %v8810_v52 = vld [vmem:[%s17387_s9 + $0x108] sm:$0xff] }
 0x47a   : > { %6651 = vrot.lane.b32.xlu0 %v12147_v33, %s11977_s15  ;;  %7171 = vmatmul.mubr.bf16.gmra.mxu1 %v6763_v35  ;;  %v6306_v59 = vpop.permute.xlu1 %6305  ;;  %v5289_v15 = vpop.f32.mrf.mxu0 }
 0x47b   : > { %v6582_v10 = vpop.permute.xlu0 %6581  ;;  %v7119_v41 = vpop.f32.mrf.mxu1  ;;  %11651 = vmatprep.subr.bf16.mxu1 %v8830_v44 }
 0x47c   : > { %6655 = vrot.lane.b32.xlu1 %v12147_v33, %s11977_s15  ;;  %v5292_v13 = vpop.f32.mrf.mxu0  ;;  %v6878_v53 = vsel %vm2493_vm7, %v6827_v50, %v6582_v10  ;;  %11652 = vmatpush3.bf16.msra.mxu1 %v8830_v44 }
 0x47d   : > { %v7121_v43 = vpop.f32.mrf.mxu1 }
 0x47e   : > { %11929 = vrot.lane.b32.xlu0 %v17566_v16, %s11979_s21  ;;  %v6487_v30 = vpop.permute.xlu1 %6486  ;;  %v5294_v28 = vpop.f32.mrf.mxu0 }
 0x47f   : > { %v6543_v51 = vpop.permute.xlu0 %6542 }
 0x480   : > { %8330 = vrot.lane.b32.xlu1 %v12090_v8, %s11977_s15  ;;  %v5295_v26 = vpop.f32.mrf.mxu0  ;;  %v6830_v15 = vsel %vm2444_vm6, %v15007_v21, %v6543_v51 }
 0x482   : > { %11934 = vrot.lane.b32.xlu0 %v17564_v32, %s11978_s20  ;;  %v6448_v54 = vpop.permute.xlu1 %6447  ;;  %v5297_v0 = vpop.f32.mrf.mxu0  ;;  %v6718_v32 = vsel %vm2493_vm7, %v6678_v60, %v15387_v9 }
 0x483   : > { %v6634_v37 = vpop.permute.xlu0 %6633  ;;  %v6766_v11 = vsel %vm2542_vm8, %v6718_v32, %v6485_v22  ;;  %v6680_v22 = vsel %vm2444_vm6, %v14943_v63, %v6306_v59 }
 0x484   : > { %8169 = vrot.lane.b32.xlu1 %v12147_v33, %s11979_s21  ;;  %v6926_v49 = vsel %vm2542_vm8, %v6878_v53, %v6634_v37  ;;  %v5300_v3 = vpop.f32.mrf.mxu0  ;;  %v6720_v28 = vsel %vm2493_vm7, %v6680_v22, %v15416_v29 }
 0x485   : > { %7178 = vmatprep.mubr.bf16.mxu1 %v6926_v49  ;;  %v6769_v60 = vsel %vm2542_vm8, %v6720_v28, %v6487_v30  ;;  %v8809_v30 = vld [vmem:[%s17387_s9 + $0x100] sm:$0xff] }
 0x486   : > { %6653 = vrot.lane.b32.xlu0 %v12147_v33, %s11977_s15  ;;  %7179 = vmatmul.mubr.bf16.gmra.mxu1 %v6766_v11  ;;  %v6308_v4 = vpop.permute.xlu1 %6307  ;;  %v5302_v25 = vpop.f32.mrf.mxu0 }
 0x487   : > { %v6584_v23 = vpop.permute.xlu0 %6583  ;;  %v6682_v53 = vsel %vm2444_vm6, %v14981_v12, %v6308_v4  ;;  %v8829_v12 = vpack.c.bf16 %v8810_v52, %v8809_v30 }
 0x488   : > { %8295 = vrot.lane.b32.xlu1 %v12118_v18, %s11978_s20  ;;  %v5303_v9 = vpop.f32.mrf.mxu0  ;;  %v6880_v41 = vsel %vm2493_vm7, %v6830_v15, %v6584_v23  ;;  %v6722_v32 = vsel %vm2493_vm7, %v6682_v53, %v6448_v54 }
 0x489   : > { %11653 = vmatprep.subr.bf16.mxu1 %v8829_v12 }
 0x48a   : > { %8382 = vrot.lane.b32.xlu0 %v12118_v18, %s11979_s21  ;;  %v6489_v45 = vpop.permute.xlu1 %6488  ;;  %v5305_v35 = vpop.f32.mrf.mxu0  ;;  %11654 = vmatpush3.bf16.msra.mxu1 %v8829_v12 }
 0x48b   : > { %v6545_v58 = vpop.permute.xlu0 %6544  ;;  %v6772_v44 = vsel %vm2542_vm8, %v6722_v32, %v6489_v45 }
 0x48c   : > { %6323 = vrot.lane.b32.xlu1 %v15401_v1, %s11979_s21  ;;  %v11613_v61 = vpop.f32.mrf.mxu0  ;;  %v6833_v29 = vsel %vm2444_vm6, %v15045_v47, %v6545_v58 }
 0x48e   : > { %8167 = vrot.lane.b32.xlu0 %v12147_v33, %s11979_s21  ;;  %v6450_v10 = vpop.permute.xlu1 %6449  ;;  %v7309_v43 = vpop.f32.mrf.mxu0 }
 0x48f   : > { %v6636_v13 = vpop.permute.xlu0 %6635 }
 0x490   : > { %v6929_v26 = vsel %vm2542_vm8, %v6880_v41, %v6636_v13  ;;  %v11614_v63 = vpop.f32.mrf.mxu0 }
 0x491   : > { %7186 = vmatprep.mubr.bf16.mxu1 %v6929_v26 }
 0x492   : > { %11944 = vrot.lane.b32.xlu0 %v17566_v16, %s11978_s20  ;;  %7187 = vmatmul.mubr.bf16.gmra.mxu1 %v6769_v60  ;;  %v6310_v59 = vpop.permute.xlu1 %6309  ;;  %v7312_v51 = vpop.f32.mrf.mxu0 }
 0x493   : > { %v6586_v21 = vpop.permute.xlu0 %6585  ;;  %v6684_v23 = vsel %vm2444_vm6, %v15019_v7, %v6310_v59 }
 0x494   : > { %v6882_v48 = vsel %vm2493_vm7, %v6833_v29, %v6586_v21  ;;  %v6724_v45 = vsel %vm2493_vm7, %v6684_v23, %v6450_v10 }
 0x496   : > { %v6491_v50 = vpop.permute.xlu1 %6490 }
 0x497   : > { %v6547_v0 = vpop.permute.xlu0 %6546  ;;  %v6775_v22 = vsel %vm2542_vm8, %v6724_v45, %v6491_v50  ;;  %v17662_v45 = vmov 0  }
 0x498   : > { %v6836_v25 = vsel %vm2444_vm6, %v15083_v20, %v6547_v0 }
 0x49a   : > { %v6452_v37 = vpop.permute.xlu1 %6451 }
 0x49b   : > { %v6638_v16 = vpop.permute.xlu0 %6637 }
 0x49c   : > { %v6932_v49 = vsel %vm2542_vm8, %v6882_v48, %v6638_v16 }
 0x49d   : > { %7194 = vmatprep.mubr.bf16.mxu1 %v6932_v49 }
 0x49e   : > { %7195 = vmatmul.mubr.bf16.gmra.mxu1 %v6772_v44  ;;  %v6312_v47 = vpop.permute.xlu1 %6311  ;;  %v15517_v44 = vpop.f32.mrf.mxu0 }
 0x49f   : > { %v6588_v11 = vpop.permute.xlu0 %6587  ;;  %v6686_v7 = vsel %vm2444_vm6, %v15057_v34, %v6312_v47 }
 0x4a0   : > { %v6884_v9 = vsel %vm2493_vm7, %v6836_v25, %v6588_v11  ;;  %v6726_v26 = vsel %vm2493_vm7, %v6686_v7, %v6452_v37 }
 0x4a2   : > { %v6493_v3 = vpop.permute.xlu1 %6492 }
 0x4a3   : > { %v6549_v4 = vpop.permute.xlu0 %6548  ;;  %v6778_v63 = vsel %vm2542_vm8, %v6726_v26, %v6493_v3  ;;  %v8791_v3 = vld [vmem:[%s17387_s9 + $0x70] sm:$0xff] }
 0x4a4   : > { %v6839_v20 = vsel %vm2444_vm6, %v15140_v62, %v6549_v4  ;;  %v8792_v4 = vld [vmem:[%s17387_s9 + $0x78] sm:$0xff] }
 0x4a6   : > { %v6454_v54 = vpop.permute.xlu1 %6453 }
 0x4a7   : > { %v6640_v58 = vpop.permute.xlu0 %6639 }
 0x4a8   : > { %v6935_v35 = vsel %vm2542_vm8, %v6884_v9, %v6640_v58  ;;  %v15529_v9 = vpop.f32.mrf.mxu0 }
 0x4a9   : > { %7202 = vmatprep.mubr.bf16.mxu1 %v6935_v35  ;;  %v8789_v35 = vld [vmem:[%s17387_s9 + $0x60] sm:$0xff] }
 0x4aa   : > { %7203 = vmatmul.mubr.bf16.gmra.mxu1 %v6775_v22  ;;  %v6314_v61 = vpop.permute.xlu1 %6313  ;;  %v8790_v22 = vld [vmem:[%s17387_s9 + $0x68] sm:$0xff] }
 0x4ab   : > { %v6688_v34 = vsel %vm2444_vm6, %v15105_v46, %v6314_v61 }
 0x4ac   : > { %v6590_v15 = vpop.permute.xlu0 %6589  ;;  %v6728_v37 = vsel %vm2493_vm7, %v6688_v34, %v6454_v54  ;;  %v8786_v34 = vld [vmem:[%s17387_s9 + $0x48] sm:$0xff] }
 0x4ad   : > { %v6886_v28 = vsel %vm2493_vm7, %v6839_v20, %v6590_v15  ;;  %v8819_v15 = vpack.c.bf16 %v8790_v22, %v8789_v35  ;;  %v8787_v20 = vld [vmem:[%s17387_s9 + $0x50] sm:$0xff] }
 0x4ae   : > { %v6495_v41 = vpop.permute.xlu1 %6494 }
 0x4af   : > { %v6781_v16 = vsel %vm2542_vm8, %v6728_v37, %v6495_v41  ;;  %v15538_v41 = vpop.f32.mrf.mxu0  ;;  %v8783_v37 = vld [vmem:[%s17387_s9 + $0x30] sm:$0xff] }
 0x4b0   : > { %v6551_v13 = vpop.permute.xlu0 %6550 }
 0x4b1   : > { %v6842_v62 = vsel %vm2444_vm6, %v15201_v14, %v6551_v13 }
 0x4b2   : > { %v6456_v43 = vpop.permute.xlu1 %6455 }
 0x4b4   : > { %v6642_v10 = vpop.permute.xlu0 %6641 }
 0x4b5   : > { %v6938_v60 = vsel %vm2542_vm8, %v6886_v28, %v6642_v10 }
 0x4b6   : > { %7210 = vmatprep.mubr.bf16.mxu1 %v6938_v60  ;;  %v6316_v59 = vpop.permute.xlu1 %6315  ;;  %v15551_v60 = vpop.f32.mrf.mxu0 }
 0x4b7   : > { %7211 = vmatmul.mubr.bf16.gmra.mxu1 %v6778_v63  ;;  %v6690_v46 = vsel %vm2444_vm6, %v15154_v31, %v6316_v59 }
 0x4b8   : > { %v6592_v21 = vpop.permute.xlu0 %6591  ;;  %v6730_v31 = vsel %vm2493_vm7, %v6690_v46, %v6456_v43  ;;  %v8788_v43 = vld [vmem:[%s17387_s9 + $0x58] sm:$0xff]  ;;  %v8781_v46 = vld [vmem:[%s17387_s9 + $0x20] sm:$0xff] }
 0x4b9   : > { %v6888_v53 = vsel %vm2493_vm7, %v6842_v62, %v6592_v21  ;;  %v8818_v26 = vpack.c.bf16 %v8788_v43, %v8787_v20 }
 0x4ba   : > { %v6497_v51 = vpop.permute.xlu1 %6496 }
 0x4bb   : > { %v6784_v25 = vsel %vm2542_vm8, %v6730_v31, %v6497_v51  ;;  %v15556_v51 = vpop.f32.mrf.mxu0 }
 0x4bc   : > { %v6553_v50 = vpop.permute.xlu0 %6552 }
 0x4bd   : > { %v6845_v14 = vsel %vm2444_vm6, %v15256_v36, %v6553_v50  ;;  %v8820_v36 = vpack.c.bf16 %v8792_v4, %v8791_v3 }
 0x4be   : > { %v6458_v0 = vpop.permute.xlu1 %6457 }
 0x4bf   : > { %8893 = vmatpush1.bf16.msra.mxu0 %v8820_v36 }
 0x4c0   : > { %v6644_v29 = vpop.permute.xlu0 %6643  ;;  %8894 = vmatprep.subr.bf16.mxu0 %v17662_v45 }
 0x4c1   : > { %v6941_v48 = vsel %vm2542_vm8, %v6888_v53, %v6644_v29  ;;  %v15566_v29 = vpop.f32.mrf.mxu0 }
 0x4c2   : > { %7218 = vmatprep.mubr.bf16.mxu1 %v6941_v48  ;;  %v6318_v30 = vpop.permute.xlu1 %6317  ;;  %v8784_v48 = vld [vmem:[%s17387_s9 + $0x38] sm:$0xff] }
 0x4c3   : > { %7219 = vmatmul.mubr.bf16.gmra.mxu1 %v6781_v16  ;;  %8895 = vmatpush1.bf16.msra.mxu0 %v8819_v15  ;;  %v6692_v7 = vsel %vm2444_vm6, %v15215_v55, %v6318_v30  ;;  %v8816_v30 = vpack.c.bf16 %v8784_v48, %v8783_v37  ;;  %v8778_v15 = vld [vmem:[%s17387_s9 + $0x8] sm:$0xff] }
 0x4c4   : > { %v6594_v52 = vpop.permute.xlu0 %6593  ;;  %8896 = vmatprep.subr.bf16.mxu0 %v17662_v45  ;;  %v6732_v59 = vsel %vm2493_vm7, %v6692_v7, %v6458_v0  ;;  %v8806_v37 = vld [vmem:[%s17387_s9 + $0xe8] sm:$0xff] }
 0x4c5   : > { %v6890_v47 = vsel %vm2493_vm7, %v6845_v14, %v6594_v52  ;;  %v8782_v14 = vld [vmem:[%s17387_s9 + $0x28] sm:$0xff] }
 0x4c6   : > { %v6499_v32 = vpop.permute.xlu1 %6498  ;;  %v8815_v3 = vpack.c.bf16 %v8782_v14, %v8781_v46 }
 0x4c7   : > { %8897 = vmatpush1.bf16.msra.mxu0 %v8818_v26  ;;  %v6787_v50 = vsel %vm2542_vm8, %v6732_v59, %v6499_v32  ;;  %v15575_v32 = vpop.f32.mrf.mxu0 }
 0x4c8   : > { %v6555_v49 = vpop.permute.xlu0 %6554  ;;  %8898 = vmatprep.subr.bf16.mxu0 %v17662_v45 }
 0x4c9   : > { %v6848_v28 = vsel %vm2444_vm6, %v15311_v6, %v6555_v49  ;;  %v8785_v6 = vld [vmem:[%s17387_s9 + $0x40] sm:$0xff]  ;;  %v15594_v36 = vpop.f32.mrf.mxu0 }
 0x4ca   : > { %v15515_v12 = vpop.permute.xlu1 %6459  ;;  %v8817_v0 = vpack.c.bf16 %v8786_v34, %v8785_v6 }
 0x4cb   : > { %v15606_v35 = vpop.f32.mrf.mxu0 }
 0x4cc   : > { %v6646_v11 = vpop.permute.xlu0 %6645  ;;  %8899 = vmatpush1.bf16.msra.mxu0 %v8817_v0 }
 0x4cd   : > { %v6944_v23 = vsel %vm2542_vm8, %v6890_v47, %v6646_v11  ;;  %8900 = vmatprep.subr.bf16.mxu0 %v17662_v45  ;;  %v15619_v43 = vpop.f32.mrf.mxu0 }
 0x4ce   : > { %7226 = vmatprep.mubr.bf16.mxu1 %v6944_v23  ;;  %v6320_v54 = vpop.permute.xlu1 %6319 }
 0x4cf   : > { %7227 = vmatmul.mubr.bf16.gmra.mxu1 %v6784_v25  ;;  %v6694_v49 = vsel %vm2444_vm6, %v15270_v56, %v6320_v54  ;;  %v8780_v54 = vld [vmem:[%s17387_s9 + $0x18] sm:$0xff]  ;;  %v15634_v6 = vpop.f32.mrf.mxu0 }
 0x4d0   : > { %v6596_v58 = vpop.permute.xlu0 %6595  ;;  %8901 = vmatpush1.bf16.msra.mxu0 %v8816_v30  ;;  %v6734_v56 = vsel %vm2493_vm7, %v6694_v49, %v15515_v12 }
 0x4d1   : > { %v6892_v63 = vsel %vm2493_vm7, %v6848_v28, %v6596_v58  ;;  %8902 = vmatprep.subr.bf16.mxu0 %v17662_v45  ;;  %v15645_v30 = vpop.f32.mrf.mxu0 }
 0x4d2   : > { %v6501_v61 = vpop.permute.xlu1 %6500 }
 0x4d3   : > { %v6790_v25 = vsel %vm2542_vm8, %v6734_v56, %v6501_v61  ;;  %v8777_v61 = vld [vmem:[%s17387_s9] sm:$0xff] }
 0x4d4   : > { %v6557_v13 = vpop.permute.xlu0 %6556  ;;  %8903 = vmatpush1.bf16.msra.mxu0 %v8815_v3  ;;  %v8813_v20 = vpack.c.bf16 %v8778_v15, %v8777_v61 }
 0x4d5   : > { %v6851_v47 = vsel %vm2444_vm6, %v15363_v42, %v6557_v13  ;;  %8904 = vmatprep.subr.bf16.mxu0 %v17662_v45  ;;  %v8779_v42 = vld [vmem:[%s17387_s9 + $0x10] sm:$0xff] }
 0x4d6   : > { %v6322_v10 = vpop.permute.xlu1 %6321  ;;  %v8814_v58 = vpack.c.bf16 %v8780_v54, %v8779_v42 }
 0x4d7   : > { %v6696_v28 = vsel %vm2444_vm6, %v15333_v40, %v6322_v10  ;;  %v8808_v40 = vld [vmem:[%s17387_s9 + $0xf8] sm:$0xff] }
 0x4d8   : > { %v6648_v55 = vpop.permute.xlu0 %6647  ;;  %8905 = vmatpush1.bf16.msra.mxu0 %v8814_v58  ;;  %v15649_v14 = vpop.f32.mrf.mxu0 }
 0x4d9   : > { %v6947_v21 = vsel %vm2542_vm8, %v6892_v63, %v6648_v55  ;;  %8906 = vmatprep.subr.bf16.mxu0 %v17662_v45 }
 0x4da   : > { %7234 = vmatprep.mubr.bf16.mxu1 %v6947_v21  ;;  %v6462_v62 = vpop.permute.xlu1 %6461 }
 0x4db   : > { %7235 = vmatmul.mubr.bf16.gmra.mxu1 %v6787_v50  ;;  %v6736_v55 = vsel %vm2493_vm7, %v6696_v28, %v6462_v62 }
 0x4dc   : > { %v6598_v53 = vpop.permute.xlu0 %6597  ;;  %8907 = vmatpush1.bf16.msra.mxu0 %v8813_v20  ;;  %v8802_v20 = vld [vmem:[%s17387_s9 + $0xc8] sm:$0xff] }
 0x4dd   : > { %v6894_v4 = vsel %vm2493_vm7, %v6851_v47, %v6598_v53  ;;  %8908 = vmatprep.subr.bf16.mxu0 %v17662_v45  ;;  %v8805_v53 = vld [vmem:[%s17387_s9 + $0xe0] sm:$0xff] }
 0x4de   : > { %v6503_v16 = vpop.permute.xlu1 %6502 }
 0x4df   : > { %v6793_v21 = vsel %vm2542_vm8, %v6736_v55, %v6503_v16  ;;  %v8827_v16 = vpack.c.bf16 %v8806_v37, %v8805_v53  ;;  %v15678_v55 = vld [vmem:[%s17386_s8] ss:$0 sm:$0xff] }
 0x4e0   : > { %v6559_v52 = vpop.permute.xlu0 %6558 }
 0x4e1   : > { %v6854_v13 = vsel %vm2444_vm6, %v15401_v1, %v6559_v52  ;;  %v8807_v1 = vld [vmem:[%s17387_s9 + $0xf0] sm:$0xff] }
 0x4e2   : > { %v15588_v11 = vpop.permute.xlu1 %6463  ;;  %v8828_v50 = vpack.c.bf16 %v8808_v40, %v8807_v1 }
 0x4e4   : > { %v6650_v31 = vpop.permute.xlu0 %6649  ;;  %8909 = vmatpush2.bf16.msra.mxu0 %v8828_v50  ;;  %v8799_v50 = vld [vmem:[%s17387_s9 + $0xb0] sm:$0xff] }
 0x4e5   : > { %v6950_v23 = vsel %vm2542_vm8, %v6894_v4, %v6650_v31  ;;  %8910 = vmatprep.subr.bf16.mxu0 %v17662_v45  ;;  %v8803_v4 = vld [vmem:[%s17387_s9 + $0xd0] sm:$0xff]  ;;  %v8804_v31 = vld [vmem:[%s17387_s9 + $0xd8] sm:$0xff] }
 0x4e6   : > { %7242 = vmatprep.mubr.bf16.mxu1 %v6950_v23  ;;  %v15604_v12 = vpop.permute.xlu1 %11939 }
 0x4e7   : > { %7243 = vmatmul.mubr.bf16.gmra.mxu1 %v6790_v25  ;;  %v8826_v25 = vpack.c.bf16 %v8804_v31, %v8803_v4  ;;  %v11941_v1 = vunpack.i.l.bf16 %v15604_v12  ;;  %v8797_v31 = vld [vmem:[%s17387_s9 + $0xa0] sm:$0xff] }
 0x4e8   : > { %v6600_v22 = vpop.permute.xlu0 %6599  ;;  %8911 = vmatpush2.bf16.msra.mxu0 %v8827_v16 }
 0x4e9   : > { %v6896_v26 = vsel %vm2493_vm7, %v6854_v13, %v6600_v22  ;;  %8912 = vmatprep.subr.bf16.mxu0 %v17662_v45  ;;  %v15661_v22 = vpop.f32.mrf.mxu0  ;;  %v8801_v13 = vld [vmem:[%s17387_s9 + $0xc0] sm:$0xff] }
 0x4ea   : > { %v15617_v7 = vpop.permute.xlu1 %6325 }
 0x4ec   : > { %v6652_v63 = vpop.permute.xlu0 %6651  ;;  %8913 = vmatpush2.bf16.msra.mxu0 %v8826_v25 }
 0x4ed   : > { %v6953_v59 = vsel %vm2542_vm8, %v6896_v26, %v6652_v63  ;;  %8914 = vmatprep.subr.bf16.mxu0 %v17662_v45  ;;  %v8825_v63 = vpack.c.bf16 %v8802_v20, %v8801_v13 }
 0x4ee   : > { %7250 = vmatprep.mubr.bf16.mxu1 %v6953_v59  ;;  %v6656_v10 = vpop.permute.xlu1 %6655 }
 0x4ef   : > { %7251 = vmatmul.mubr.bf16.gmra.mxu1 %v6793_v21  ;;  %v15682_v21 = vpop.f32.mrf.mxu0 }
 0x4f0   : > { %v11930_v34 = vpop.permute.xlu0 %11929  ;;  %8915 = vmatpush2.bf16.msra.mxu0 %v8825_v63 }
 0x4f1   : > { %v11931_v62 = vunpack.i.l.bf16 %v11930_v34  ;;  %v7124_v0 = vpop.f32.mrf.mxu1  ;;  %v11932_v23 = vunpack.i.h.bf16 %v11930_v34  ;;  %8916 = vmatprep.subr.bf16.mxu0 %v17662_v45  ;;  %v8800_v34 = vld [vmem:[%s17387_s9 + $0xb8] sm:$0xff] }
 0x4f2   : > { %v15643_v48 = vpop.permute.xlu1 %8330  ;;  %v8824_v53 = vpack.c.bf16 %v8800_v34, %v8799_v50  ;;  %v8793_v34 = vld [vmem:[%s17387_s9 + $0x80] sm:$0xff] }
 0x4f3   : > { %v7126_v52 = vpop.f32.mrf.mxu1  ;;  %v6857_v46 = vsel %vm2444_vm6, %v12147_v33, %v11931_v62  ;;  %v6860_v26 = vsel %vm2444_vm6, %v12147_v33, %v11932_v23 }
 0x4f4   : > { %v11935_v49 = vpop.permute.xlu0 %11934  ;;  %8917 = vmatpush2.bf16.msra.mxu0 %v8824_v53 }
 0x4f5   : > { %v7127_v47 = vpop.f32.mrf.mxu1  ;;  %v11936_v3 = vunpack.i.l.bf16 %v11935_v49  ;;  %v11937_v61 = vunpack.i.h.bf16 %v11935_v49  ;;  %8918 = vmatprep.subr.bf16.mxu0 %v17662_v45 }
 0x4f6   : > { %v15658_v56 = vpop.permute.xlu1 %8169 }
 0x4f7   : > { %v7129_v42 = vpop.f32.mrf.mxu1  ;;  %v6898_v54 = vsel %vm2493_vm7, %v6857_v46, %v11936_v3  ;;  %v6900_v40 = vsel %vm2493_vm7, %v6860_v26, %v11937_v61  ;;  %v15701_v3 = vpop.f32.mrf.mxu0 }
 0x4f8   : > { %v6654_v58 = vpop.permute.xlu0 %6653  ;;  %v6959_v47 = vsel %vm2542_vm8, %v6900_v40, %v6656_v10 }
 0x4f9   : > { %v6956_v15 = vsel %vm2542_vm8, %v6898_v54, %v6654_v58  ;;  %v15711_v25 = vpop.f32.mrf.mxu0  ;;  %v11942_v54 = vunpack.i.h.bf16 %v15604_v12  ;;  %v6700_v58 = vsel %vm2444_vm6, %v12090_v8, %v15617_v7  ;;  %v8796_v12 = vld [vmem:[%s17387_s9 + $0x98] sm:$0xff] }
 0x4fa   : > { %v15671_v28 = vpop.permute.xlu1 %8295  ;;  %7258 = vmatprep.mubr.bf16.mxu1 %v6956_v15 }
 0x4fb   : > { %v15730_v7 = vpop.f32.mrf.mxu0 }
 0x4fc   : > { %v15680_v59 = vpop.permute.xlu0 %8382 }
 0x4fe   : > { %v7132_v62 = vpop.f32.mrf.mxu1  ;;  %v6324_v0 = vpop.permute.xlu1 %6323 }
 0x4ff   : > { %v7133_v37 = vadd.f32 %v15678_v55, %v7132_v62  ;;  %v6698_v16 = vsel %vm2444_vm6, %v15367_v5, %v6324_v0  ;;  %v8798_v5 = vld [vmem:[%s17387_s9 + $0xa8] sm:$0xff] }
 0x500   : > { %v6738_v52 = vsel %vm2493_vm7, %v6698_v16, %v15588_v11  ;;  %v7134_v49 = vpop.f32.mrf.mxu1  ;;  %v15698_v46 = vpop.permute.xlu0 %8167  ;;  %v8823_v23 = vpack.c.bf16 %v8798_v5, %v8797_v31  ;;  %v8794_v62 = vld [vmem:[%s17387_s9 + $0x88] sm:$0xff] }
 0x501   : > { %v6796_v4 = vsel %vm2542_vm8, %v6738_v52, %v11941_v1  ;;  %v7326_v10 = vadd.f32 %v15529_v9, %v7133_v37  ;;  %v8795_v9 = vld [vmem:[%s17387_s9 + $0x90] sm:$0xff]  ;;  %v8821_v53 = vpack.c.bf16 %v8794_v62, %v8793_v34  ;;  %v15741_v37 = vpop.f32.mrf.mxu0 }
 0x502   : > { %v7135_v11 = vpop.f32.mrf.mxu1  ;;  %7259 = vmatmul.mubr.bf16.gmra.mxu1 %v6796_v4  ;;  %8919 = vmatpush2.bf16.msra.mxu0 %v8823_v23  ;;  %v8822_v26 = vpack.c.bf16 %v8796_v12, %v8795_v9 }
 0x503   : > { %v7136_v42 = vadd.f32 %v15678_v55, %v7135_v11  ;;  %7266 = vmatprep.mubr.bf16.mxu1 %v6959_v47  ;;  %8920 = vmatprep.subr.bf16.mxu0 %v17662_v45  ;;  %v7472_v63 = vmax.f32 %v7326_v10, 0.0  ;;  %v15744_v31 = vpop.f32.mrf.mxu0 }
 0x504   : > { %v7137_v61 = vpop.f32.mrf.mxu1  ;;  %v15719_v15 = vpop.permute.xlu0 %11944 }
 0x505   : > { %v7329_v13 = vadd.f32 %v15551_v60, %v7136_v42  ;;  %v11946_v20 = vunpack.i.l.bf16 %v15719_v15 }
 0x506   : > { %8921 = vmatpush2.bf16.msra.mxu0 %v8822_v26 }
 0x507   : > { %v7473_v1 = vmax.f32 %v7329_v13, 0.0  ;;  %v6740_v40 = vsel %vm2493_vm7, %v6700_v58, %v11946_v20  ;;  %8922 = vmatprep.subr.bf16.mxu0 %v17662_v45 }
 0x508   : > { %v6799_v60 = vsel %vm2542_vm8, %v6740_v40, %v11942_v54  ;;  %v15750_v54 = vpop.f32.mrf.mxu0 }
 0x509   : > { %v7713_v50 = vpack.c.bf16 %v7473_v1, %v7472_v63 }
 0x50a   : > { %v7140_v0 = vpop.f32.mrf.mxu1  ;;  %7267 = vmatmul.mubr.bf16.gmra.mxu1 %v6799_v60  ;;  %8923 = vmatpush2.bf16.msra.mxu0 %v8821_v53  ;;  %v15763_v40 = vpop.f32.mrf.mxu0 }
 0x50b   : > { %v7746_v16 = vshrl.u32 %v7713_v50, 16  ;;  %v7141_v52 = vadd.f32 %v15678_v55, %v7140_v0  ;;  %v7749_v45 = vshll.u32 %v7713_v50, 16 }
 0x50c   : > { %v7142_v49 = vpop.f32.mrf.mxu1 }
 0x50d   : > { %v7748_v47 = vrot.slane %v7746_v16, 7  ;;  %v7334_v11 = vadd.f32 %v15517_v44, %v7141_v52  ;;  %v15773_v49 = vpop.f32.mrf.mxu0 }
 0x50e   : > { %v7143_v4 = vpop.f32.mrf.mxu1 }
 0x50f   : > { %v7751_v5 = vor.u32 %v7749_v45, %v7748_v47  ;;  %v7144_v23 = vadd.f32 %v15678_v55, %v7143_v4  ;;  %v7933_v10 = vsel %vm12074_vm2, %v7748_v47, 0  ;;  %v7474_v12 = vmax.f32 %v7334_v11, 0.0 }
 0x510   : > { %v7145_v42 = vpop.f32.mrf.mxu1  ;;  %v8246_v44 = vrot.slane %v7933_v10, 1  ;;  %v7983_v9 = vshll.u32 %v7933_v10, 16 }
 0x511   : > { %v7337_v58 = vadd.f32 %v15538_v41, %v7144_v23  ;;  %v15755_v61 = vsel %vm12074_vm2, 0, %v7751_v5 }
 0x512   : > { %8419 = vrot.lane.b32.xlu1 %v15755_v61, %s11978_s20  ;;  %v8245_v13 = vrot.slane %v15755_v61, 1  ;;  %v7978_v20 = vshll.u32 %v15755_v61, 16  ;;  %v7976_v1 = vshrl.u32 %v15755_v61, 16  ;;  %v7985_v62 = vrot.slane %v7983_v9, 1 }
 0x513   : > { %v7475_v26 = vmax.f32 %v7337_v58, 0.0  ;;  %v15782_v58 = vpop.f32.mrf.mxu0 }
 0x514   : > { %v8247_v63 = vsel %vm2097_vm3, %v8245_v13, %v8246_v44  ;;  %v7980_v41 = vrot.slane %v7978_v20, 1 }
 0x515   : > { %v7714_v60 = vpack.c.bf16 %v7475_v26, %v7474_v12  ;;  %8384 = vrot.lane.b32.xlu0 %v8247_v63, %s11979_s21  ;;  %11655 = vmatprep.mubr.msk.bf16.mxu1 %vm2444_vm6, %v8247_v63 }
 0x516   : > { %v7148_v50 = vpop.f32.mrf.mxu1  ;;  %8332 = vrot.lane.b32.xlu1 %v15755_v61, %s11977_s15  ;;  %v7981_v34 = vor.u32 %v7980_v41, %v7976_v1 }
 0x517   : > { %v7753_v0 = vshrl.u32 %v7714_v60, 16  ;;  %v7149_v53 = vadd.f32 %v15678_v55, %v7148_v50  ;;  %v7756_v45 = vshll.u32 %v7714_v60, 16 }
 0x518   : > { %v7150_v16 = vpop.f32.mrf.mxu1  ;;  %v15771_v52 = vsel %vm1712_vm5, %v7981_v34, %v7985_v62 }
 0x519   : > { %v7755_v47 = vrot.slane %v7753_v0, 7  ;;  %8467 = vrot.lane.b32.xlu0 %v15771_v52, %s11977_s15  ;;  %v7342_v23 = vadd.f32 %v15566_v29, %v7149_v53 }
 0x51a   : > { %v7151_v4 = vpop.f32.mrf.mxu1  ;;  %8297 = vrot.lane.b32.xlu1 %v8247_v63, %s11978_s20 }
 0x51b   : > { %v7758_v5 = vor.u32 %v7756_v45, %v7755_v47  ;;  %v7934_v11 = vsel %vm12074_vm2, %v7755_v47, 0  ;;  %v7152_v10 = vadd.f32 %v15678_v55, %v7151_v4  ;;  %v7476_v26 = vmax.f32 %v7342_v23, 0.0 }
 0x51c   : > { %v7153_v42 = vpop.f32.mrf.mxu1  ;;  %v8249_v20 = vrot.slane %v7934_v11, 1  ;;  %v7995_v12 = vshll.u32 %v7934_v11, 16 }
 0x51d   : > { %v7345_v13 = vadd.f32 %v15594_v36, %v7152_v10  ;;  %v15787_v44 = vsel %vm12074_vm2, 0, %v7758_v5 }
 0x51e   : > { %8171 = vrot.lane.b32.xlu1 %v15771_v52, %s11979_s21  ;;  %8421 = vrot.lane.b32.xlu0 %v15787_v44, %s11978_s20  ;;  %v8248_v29 = vrot.slane %v15787_v44, 1  ;;  %v7990_v9 = vshll.u32 %v15787_v44, 16  ;;  %v7988_v41 = vshrl.u32 %v15787_v44, 16  ;;  %v7997_v53 = vrot.slane %v7995_v12, 1 }
 0x51f   : > { %v7477_v63 = vmax.f32 %v7345_v13, 0.0 }
 0x520   : > { %v15795_v1 = vpop.f32.mrf.mxu0  ;;  %v8250_v36 = vsel %vm2097_vm3, %v8248_v29, %v8249_v20  ;;  %v7992_v60 = vrot.slane %v7990_v9, 1 }
 0x521   : > { %v7715_v50 = vpack.c.bf16 %v7477_v63, %v7476_v26  ;;  %11656 = vmatmul.mubr.msk.bf16.vlgmr.msra.gmra.mxu1 %vm2444_vm6, %v8250_v36 }
 0x522   : > { %v15800_v34 = vpop.f32.mrf.mxu0  ;;  %v7156_v62 = vpop.f32.mrf.mxu1  ;;  %8334 = vrot.lane.b32.xlu1 %v15787_v44, %s11977_s15  ;;  %8386 = vrot.lane.b32.xlu0 %v8250_v36, %s11979_s21  ;;  %v7993_v0 = vor.u32 %v7992_v60, %v7988_v41 }
 0x523   : > { %v7760_v16 = vshrl.u32 %v7715_v50, 16  ;;  %v7157_v47 = vadd.f32 %v15678_v55, %v7156_v62  ;;  %v7763_v23 = vshll.u32 %v7715_v50, 16 }
 0x524   : > { %v15806_v45 = vpop.f32.mrf.mxu0  ;;  %v7158_v4 = vpop.f32.mrf.mxu1  ;;  %v15809_v5 = vsel %vm1712_vm5, %v7993_v0, %v7997_v53 }
 0x525   : > { %v7762_v11 = vrot.slane %v7760_v16, 7  ;;  %v7350_v13 = vadd.f32 %v15556_v51, %v7157_v47 }
 0x526   : > { %v7159_v10 = vpop.f32.mrf.mxu1  ;;  %8299 = vrot.lane.b32.xlu1 %v8250_v36, %s11978_s20  ;;  %8469 = vrot.lane.b32.xlu0 %v15809_v5, %s11977_s15  ;;  %v15816_v29 = vpop.f32.mrf.mxu0 }
 0x527   : > { %v7765_v42 = vor.u32 %v7763_v23, %v7762_v11  ;;  %v7160_v20 = vadd.f32 %v15678_v55, %v7159_v10  ;;  %v7935_v9 = vsel %vm12074_vm2, %v7762_v11, 0  ;;  %v7478_v62 = vmax.f32 %v7350_v13, 0.0 }
 0x528   : > { %v7161_v12 = vpop.f32.mrf.mxu1  ;;  %v15825_v36 = vpop.f32.mrf.mxu0  ;;  %v8252_v41 = vrot.slane %v7935_v9, 1  ;;  %v8007_v50 = vshll.u32 %v7935_v9, 16 }
 0x529   : > { %v7353_v26 = vadd.f32 %v15575_v32, %v7160_v20  ;;  %v15823_v63 = vsel %vm12074_vm2, 0, %v7765_v42 }
 0x52a   : > { %8173 = vrot.lane.b32.xlu1 %v15809_v5, %s11979_s21  ;;  %8423 = vrot.lane.b32.xlu0 %v15823_v63, %s11978_s20  ;;  %v8251_v51 = vrot.slane %v15823_v63, 1  ;;  %v8002_v60 = vshll.u32 %v15823_v63, 16  ;;  %v15833_v0 = vpop.f32.mrf.mxu0  ;;  %v8000_v16 = vshrl.u32 %v15823_v63, 16  ;;  %v8009_v42 = vrot.slane %v8007_v50, 1 }
 0x52b   : > { %v7479_v32 = vmax.f32 %v7353_v26, 0.0 }
 0x52c   : > { %v8253_v53 = vsel %vm2097_vm3, %v8251_v51, %v8252_v41  ;;  %v8004_v47 = vrot.slane %v8002_v60, 1  ;;  %v15838_v11 = vpop.f32.mrf.mxu0 }
 0x52d   : > { %v7716_v4 = vpack.c.bf16 %v7479_v32, %v7478_v62  ;;  %11659 = vmatprep.mubr.msk.bf16.mxu1 %vm2444_vm6, %v8253_v53 }
 0x52e   : > { %v7164_v23 = vpop.f32.mrf.mxu1  ;;  %8336 = vrot.lane.b32.xlu1 %v15823_v63, %s11977_s15  ;;  %8388 = vrot.lane.b32.xlu0 %v8253_v53, %s11979_s21  ;;  %v8005_v10 = vor.u32 %v8004_v47, %v8000_v16  ;;  %v15844_v9 = vpop.f32.mrf.mxu0 }
 0x52f   : > { %v7767_v13 = vshrl.u32 %v7716_v4, 16  ;;  %v7165_v20 = vadd.f32 %v15678_v55, %v7164_v23  ;;  %v7770_v41 = vshll.u32 %v7716_v4, 16 }
 0x530   : > { %v7166_v12 = vpop.f32.mrf.mxu1  ;;  %v15847_v26 = vsel %vm1712_vm5, %v8005_v10, %v8009_v42  ;;  %v11649_v60 = vpop.f32.mrf.mxu0 }
 0x531   : > { %v7769_v51 = vrot.slane %v7767_v13, 7  ;;  %v7358_v16 = vadd.f32 %v15619_v43, %v7165_v20 }
 0x532   : > { %v7167_v62 = vpop.f32.mrf.mxu1  ;;  %8301 = vrot.lane.b32.xlu1 %v8253_v53, %s11978_s20  ;;  %8471 = vrot.lane.b32.xlu0 %v15847_v26, %s11977_s15  ;;  %v7453_v23 = vpop.f32.mrf.mxu0 }
 0x533   : > { %v7772_v32 = vor.u32 %v7770_v41, %v7769_v51  ;;  %v7936_v50 = vsel %vm12074_vm2, %v7769_v51, 0  ;;  %v7168_v47 = vadd.f32 %v15678_v55, %v7167_v62  ;;  %v7480_v51 = vmax.f32 %v7358_v16, 0.0 }
 0x534   : > { %v7169_v10 = vpop.f32.mrf.mxu1  ;;  %v11650_v53 = vpop.f32.mrf.mxu0  ;;  %v8255_v43 = vrot.slane %v7936_v50, 1  ;;  %v8019_v12 = vshll.u32 %v7936_v50, 16 }
 0x535   : > { %v7361_v42 = vadd.f32 %v15645_v30, %v7168_v47  ;;  %v15859_v4 = vsel %vm12074_vm2, 0, %v7772_v32 }
 0x536   : > { %8175 = vrot.lane.b32.xlu1 %v15847_v26, %s11979_s21  ;;  %8425 = vrot.lane.b32.xlu0 %v15859_v4, %s11978_s20  ;;  %v8254_v13 = vrot.slane %v15859_v4, 1  ;;  %v8014_v20 = vshll.u32 %v15859_v4, 16  ;;  %v7456_v30 = vpop.f32.mrf.mxu0  ;;  %v8012_v62 = vshrl.u32 %v15859_v4, 16  ;;  %v8021_v53 = vrot.slane %v8019_v12, 1 }
 0x537   : > { %v7481_v41 = vmax.f32 %v7361_v42, 0.0 }
 0x538   : > { %v8256_v60 = vsel %vm2097_vm3, %v8254_v13, %v8255_v43  ;;  %v8016_v32 = vrot.slane %v8014_v20, 1 }
 0x539   : > { %v7717_v47 = vpack.c.bf16 %v7481_v41, %v7480_v51  ;;  %11660 = vmatmul.mubr.msk.bf16.gmra.mxu1 %vm2444_vm6, %v8256_v60 }
 0x53a   : > { %v7172_v23 = vpop.f32.mrf.mxu1  ;;  %8338 = vrot.lane.b32.xlu1 %v15859_v4, %s11977_s15  ;;  %8390 = vrot.lane.b32.xlu0 %v8256_v60, %s11979_s21  ;;  %v8017_v10 = vor.u32 %v8016_v32, %v8012_v62 }
 0x53b   : > { %v7774_v50 = vshrl.u32 %v7717_v47, 16  ;;  %v7173_v16 = vadd.f32 %v15678_v55, %v7172_v23  ;;  %v7777_v20 = vshll.u32 %v7717_v47, 16 }
 0x53c   : > { %v7174_v42 = vpop.f32.mrf.mxu1  ;;  %v15875_v13 = vsel %vm1712_vm5, %v8017_v10, %v8021_v53 }
 0x53d   : > { %v7776_v43 = vrot.slane %v7774_v50, 7  ;;  %v7366_v30 = vadd.f32 %v15606_v35, %v7173_v16 }
 0x53e   : > { %v7175_v51 = vpop.f32.mrf.mxu1  ;;  %8303 = vrot.lane.b32.xlu1 %v8256_v60, %s11978_s20  ;;  %8473 = vrot.lane.b32.xlu0 %v15875_v13, %s11977_s15 }
 0x53f   : > { %v7779_v41 = vor.u32 %v7777_v20, %v7776_v43  ;;  %v7176_v12 = vadd.f32 %v15678_v55, %v7175_v51  ;;  %v7937_v62 = vsel %vm12074_vm2, %v7776_v43, 0  ;;  %v7482_v50 = vmax.f32 %v7366_v30, 0.0 }
 0x540   : > { %v7177_v32 = vpop.f32.mrf.mxu1  ;;  %v8258_v60 = vrot.slane %v7937_v62, 1  ;;  %v8031_v53 = vshll.u32 %v7937_v62, 16 }
 0x541   : > { %v7369_v23 = vadd.f32 %v15634_v6, %v7176_v12  ;;  %v15887_v47 = vsel %vm12074_vm2, 0, %v7779_v41 }
 0x542   : > { %8177 = vrot.lane.b32.xlu1 %v15875_v13, %s11979_s21  ;;  %8427 = vrot.lane.b32.xlu0 %v15887_v47, %s11978_s20  ;;  %v8257_v35 = vrot.slane %v15887_v47, 1  ;;  %v8026_v10 = vshll.u32 %v15887_v47, 16  ;;  %v8024_v42 = vshrl.u32 %v15887_v47, 16  ;;  %v8033_v12 = vrot.slane %v8031_v53, 1 }
 0x543   : > { %v7483_v16 = vmax.f32 %v7369_v23, 0.0 }
 0x544   : > { %v8259_v6 = vsel %vm2097_vm3, %v8257_v35, %v8258_v60  ;;  %v8028_v43 = vrot.slane %v8026_v10, 1 }
 0x545   : > { %v7718_v20 = vpack.c.bf16 %v7483_v16, %v7482_v50  ;;  %11663 = vmatprep.mubr.msk.bf16.mxu1 %vm2444_vm6, %v8259_v6 }
 0x546   : > { %v7180_v51 = vpop.f32.mrf.mxu1  ;;  %8340 = vrot.lane.b32.xlu1 %v15887_v47, %s11977_s15  ;;  %8392 = vrot.lane.b32.xlu0 %v8259_v6, %s11979_s21  ;;  %v8029_v41 = vor.u32 %v8028_v43, %v8024_v42 }
 0x547   : > { %v7781_v32 = vshrl.u32 %v7718_v20, 16  ;;  %v7181_v30 = vadd.f32 %v15678_v55, %v7180_v51  ;;  %v7784_v60 = vshll.u32 %v7718_v20, 16 }
 0x548   : > { %v7182_v62 = vpop.f32.mrf.mxu1  ;;  %v15903_v23 = vsel %vm1712_vm5, %v8029_v41, %v8033_v12 }
 0x549   : > { %v7783_v35 = vrot.slane %v7781_v32, 7  ;;  %v7374_v53 = vadd.f32 %v15661_v22, %v7181_v30 }
 0x54a   : > { %v7183_v10 = vpop.f32.mrf.mxu1  ;;  %8305 = vrot.lane.b32.xlu1 %v8259_v6, %s11978_s20  ;;  %8475 = vrot.lane.b32.xlu0 %v15903_v23, %s11977_s15 }
 0x54b   : > { %v7786_v50 = vor.u32 %v7784_v60, %v7783_v35  ;;  %v7938_v16 = vsel %vm12074_vm2, %v7783_v35, 0  ;;  %v7184_v42 = vadd.f32 %v15678_v55, %v7183_v10  ;;  %v7484_v32 = vmax.f32 %v7374_v53, 0.0 }
 0x54c   : > { %v7185_v43 = vpop.f32.mrf.mxu1  ;;  %v8261_v41 = vrot.slane %v7938_v16, 1  ;;  %v8043_v12 = vshll.u32 %v7938_v16, 16 }
 0x54d   : > { %v7377_v51 = vadd.f32 %v15701_v3, %v7184_v42  ;;  %v15915_v20 = vsel %vm12074_vm2, 0, %v7786_v50 }
 0x54e   : > { %8179 = vrot.lane.b32.xlu1 %v15903_v23, %s11979_s21  ;;  %8429 = vrot.lane.b32.xlu0 %v15915_v20, %s11978_s20  ;;  %v8260_v6 = vrot.slane %v15915_v20, 1  ;;  %v8038_v22 = vshll.u32 %v15915_v20, 16  ;;  %v8036_v62 = vshrl.u32 %v15915_v20, 16  ;;  %v8045_v42 = vrot.slane %v8043_v12, 1 }
 0x54f   : > { %v7485_v30 = vmax.f32 %v7377_v51, 0.0 }
 0x550   : > { %v8262_v3 = vsel %vm2097_vm3, %v8260_v6, %v8261_v41  ;;  %v8040_v35 = vrot.slane %v8038_v22, 1 }
 0x551   : > { %v7719_v60 = vpack.c.bf16 %v7485_v30, %v7484_v32  ;;  %11664 = vmatmul.mubr.msk.bf16.gmra.mxu1 %vm2444_vm6, %v8262_v3 }
 0x552   : > { %v7188_v10 = vpop.f32.mrf.mxu1  ;;  %8342 = vrot.lane.b32.xlu1 %v15915_v20, %s11977_s15  ;;  %8394 = vrot.lane.b32.xlu0 %v8262_v3, %s11979_s21  ;;  %v8041_v50 = vor.u32 %v8040_v35, %v8036_v62 }
 0x553   : > { %v7788_v43 = vshrl.u32 %v7719_v60, 16  ;;  %v7189_v16 = vadd.f32 %v15678_v55, %v7188_v10  ;;  %v7791_v41 = vshll.u32 %v7719_v60, 16 }
 0x554   : > { %v7190_v53 = vpop.f32.mrf.mxu1  ;;  %v15931_v51 = vsel %vm1712_vm5, %v8041_v50, %v8045_v42 }
 0x555   : > { %v7790_v6 = vrot.slane %v7788_v43, 7  ;;  %v7382_v30 = vadd.f32 %v15649_v14, %v7189_v16 }
 0x556   : > { %v7191_v22 = vpop.f32.mrf.mxu1  ;;  %8307 = vrot.lane.b32.xlu1 %v8262_v3, %s11978_s20  ;;  %8477 = vrot.lane.b32.xlu0 %v15931_v51, %s11977_s15 }
 0x557   : > { %v7793_v32 = vor.u32 %v7791_v41, %v7790_v6  ;;  %v7192_v12 = vadd.f32 %v15678_v55, %v7191_v22  ;;  %v7939_v62 = vsel %vm12074_vm2, %v7790_v6, 0  ;;  %v7486_v43 = vmax.f32 %v7382_v30, 0.0 }
 0x558   : > { %v7193_v35 = vpop.f32.mrf.mxu1  ;;  %v8264_v3 = vrot.slane %v7939_v62, 1  ;;  %v8055_v42 = vshll.u32 %v7939_v62, 16 }
 0x559   : > { %v7385_v10 = vadd.f32 %v15682_v21, %v7192_v12  ;;  %v15943_v60 = vsel %vm12074_vm2, 0, %v7793_v32 }
 0x55a   : > { %8181 = vrot.lane.b32.xlu1 %v15931_v51, %s11979_s21  ;;  %8431 = vrot.lane.b32.xlu0 %v15943_v60, %s11978_s20  ;;  %v8263_v14 = vrot.slane %v15943_v60, 1  ;;  %v8050_v50 = vshll.u32 %v15943_v60, 16  ;;  %v8048_v53 = vshrl.u32 %v15943_v60, 16  ;;  %v8057_v12 = vrot.slane %v8055_v42, 1 }
 0x55b   : > { %v7487_v16 = vmax.f32 %v7385_v10, 0.0 }
 0x55c   : > { %v8265_v21 = vsel %vm2097_vm3, %v8263_v14, %v8264_v3  ;;  %v8052_v6 = vrot.slane %v8050_v50, 1 }
 0x55d   : > { %v7720_v41 = vpack.c.bf16 %v7487_v16, %v7486_v43  ;;  %11667 = vmatprep.mubr.msk.bf16.mxu1 %vm2444_vm6, %v8265_v21 }
 0x55e   : > { %v7196_v22 = vpop.f32.mrf.mxu1  ;;  %8344 = vrot.lane.b32.xlu1 %v15943_v60, %s11977_s15  ;;  %8396 = vrot.lane.b32.xlu0 %v8265_v21, %s11979_s21  ;;  %v8053_v32 = vor.u32 %v8052_v6, %v8048_v53 }
 0x55f   : > { %v7795_v35 = vshrl.u32 %v7720_v41, 16  ;;  %v7197_v30 = vadd.f32 %v15678_v55, %v7196_v22  ;;  %v7798_v3 = vshll.u32 %v7720_v41, 16 }
 0x560   : > { %v7198_v62 = vpop.f32.mrf.mxu1  ;;  %v15959_v10 = vsel %vm1712_vm5, %v8053_v32, %v8057_v12 }
 0x561   : > { %v7797_v14 = vrot.slane %v7795_v35, 7  ;;  %v7390_v42 = vadd.f32 %v15730_v7, %v7197_v30 }
 0x562   : > { %v7199_v50 = vpop.f32.mrf.mxu1  ;;  %8309 = vrot.lane.b32.xlu1 %v8265_v21, %s11978_s20  ;;  %8479 = vrot.lane.b32.xlu0 %v15959_v10, %s11977_s15 }
 0x563   : > { %v7800_v43 = vor.u32 %v7798_v3, %v7797_v14  ;;  %v7940_v16 = vsel %vm12074_vm2, %v7797_v14, 0  ;;  %v7200_v53 = vadd.f32 %v15678_v55, %v7199_v50  ;;  %v7488_v35 = vmax.f32 %v7390_v42, 0.0 }
 0x564   : > { %v7201_v6 = vpop.f32.mrf.mxu1  ;;  %v8267_v32 = vrot.slane %v7940_v16, 1  ;;  %v8067_v12 = vshll.u32 %v7940_v16, 16 }
 0x565   : > { %v7393_v22 = vadd.f32 %v15744_v31, %v7200_v53  ;;  %v15971_v41 = vsel %vm12074_vm2, 0, %v7800_v43 }
 0x566   : > { %8183 = vrot.lane.b32.xlu1 %v15959_v10, %s11979_s21  ;;  %8433 = vrot.lane.b32.xlu0 %v15971_v41, %s11978_s20  ;;  %v8266_v21 = vrot.slane %v15971_v41, 1  ;;  %v8062_v7 = vshll.u32 %v15971_v41, 16  ;;  %v8060_v62 = vshrl.u32 %v15971_v41, 16  ;;  %v8069_v53 = vrot.slane %v8067_v12, 1 }
 0x567   : > { %v7489_v30 = vmax.f32 %v7393_v22, 0.0 }
 0x568   : > { %v8268_v31 = vsel %vm2097_vm3, %v8266_v21, %v8267_v32  ;;  %v8064_v14 = vrot.slane %v8062_v7, 1 }
 0x569   : > { %v7721_v3 = vpack.c.bf16 %v7489_v30, %v7488_v35  ;;  %11668 = vmatmul.mubr.msk.bf16.gmra.mxu1 %vm2444_vm6, %v8268_v31 }
 0x56a   : > { %v7204_v50 = vpop.f32.mrf.mxu1  ;;  %8346 = vrot.lane.b32.xlu1 %v15971_v41, %s11977_s15  ;;  %8398 = vrot.lane.b32.xlu0 %v8268_v31, %s11979_s21  ;;  %v8065_v43 = vor.u32 %v8064_v14, %v8060_v62 }
 0x56b   : > { %v7802_v6 = vshrl.u32 %v7721_v3, 16  ;;  %v7205_v16 = vadd.f32 %v15678_v55, %v7204_v50  ;;  %v7805_v32 = vshll.u32 %v7721_v3, 16 }
 0x56c   : > { %v7206_v42 = vpop.f32.mrf.mxu1  ;;  %v15987_v22 = vsel %vm1712_vm5, %v8065_v43, %v8069_v53 }
 0x56d   : > { %v7804_v21 = vrot.slane %v7802_v6, 7  ;;  %v7398_v30 = vadd.f32 %v15711_v25, %v7205_v16 }
 0x56e   : > { %v7207_v7 = vpop.f32.mrf.mxu1  ;;  %8311 = vrot.lane.b32.xlu1 %v8268_v31, %s11978_s20  ;;  %8481 = vrot.lane.b32.xlu0 %v15987_v22, %s11977_s15 }
 0x56f   : > { %v7807_v35 = vor.u32 %v7805_v32, %v7804_v21  ;;  %v7208_v12 = vadd.f32 %v15678_v55, %v7207_v7  ;;  %v7941_v62 = vsel %vm12074_vm2, %v7804_v21, 0  ;;  %v7490_v6 = vmax.f32 %v7398_v30, 0.0 }
 0x570   : > { %v7209_v14 = vpop.f32.mrf.mxu1  ;;  %v8270_v31 = vrot.slane %v7941_v62, 1  ;;  %v8079_v53 = vshll.u32 %v7941_v62, 16 }
 0x571   : > { %v7401_v50 = vadd.f32 %v15741_v37, %v7208_v12  ;;  %v15999_v3 = vsel %vm12074_vm2, 0, %v7807_v35 }
 0x572   : > { %8185 = vrot.lane.b32.xlu1 %v15987_v22, %s11979_s21  ;;  %8435 = vrot.lane.b32.xlu0 %v15999_v3, %s11978_s20  ;;  %v8269_v25 = vrot.slane %v15999_v3, 1  ;;  %v8074_v43 = vshll.u32 %v15999_v3, 16  ;;  %v8072_v42 = vshrl.u32 %v15999_v3, 16  ;;  %v8081_v12 = vrot.slane %v8079_v53, 1 }
 0x573   : > { %v7491_v16 = vmax.f32 %v7401_v50, 0.0 }
 0x574   : > { %v8271_v37 = vsel %vm2097_vm3, %v8269_v25, %v8270_v31  ;;  %v8076_v21 = vrot.slane %v8074_v43, 1 }
 0x575   : > { %v7722_v32 = vpack.c.bf16 %v7491_v16, %v7490_v6  ;;  %11671 = vmatprep.mubr.msk.bf16.mxu1 %vm2444_vm6, %v8271_v37 }
 0x576   : > { %8348 = vrot.lane.b32.xlu1 %v15999_v3, %s11977_s15  ;;  %8400 = vrot.lane.b32.xlu0 %v8271_v37, %s11979_s21  ;;  %v8077_v35 = vor.u32 %v8076_v21, %v8072_v42 }
 0x577   : > { %v7212_v7 = vpop.f32.mrf.mxu1  ;;  %v7809_v14 = vshrl.u32 %v7722_v32, 16  ;;  %v7812_v31 = vshll.u32 %v7722_v32, 16 }
 0x578   : > { %v7213_v30 = vadd.f32 %v15678_v55, %v7212_v7  ;;  %v16015_v50 = vsel %vm1712_vm5, %v8077_v35, %v8081_v12 }
 0x579   : > { %v7214_v62 = vpop.f32.mrf.mxu1  ;;  %v7811_v25 = vrot.slane %v7809_v14, 7 }
 0x57a   : > { %8313 = vrot.lane.b32.xlu1 %v8271_v37, %s11978_s20  ;;  %8483 = vrot.lane.b32.xlu0 %v16015_v50, %s11977_s15  ;;  %v7406_v53 = vadd.f32 %v15763_v40, %v7213_v30 }
 0x57b   : > { %v7215_v43 = vpop.f32.mrf.mxu1  ;;  %v7814_v6 = vor.u32 %v7812_v31, %v7811_v25  ;;  %v7942_v16 = vsel %vm12074_vm2, %v7811_v25, 0 }
 0x57c   : > { %v7216_v42 = vadd.f32 %v15678_v55, %v7215_v43  ;;  %v8273_v35 = vrot.slane %v7942_v16, 1  ;;  %v8091_v12 = vshll.u32 %v7942_v16, 16  ;;  %v7492_v14 = vmax.f32 %v7406_v53, 0.0 }
 0x57d   : > { %v7217_v21 = vpop.f32.mrf.mxu1  ;;  %v16027_v32 = vsel %vm12074_vm2, 0, %v7814_v6 }
 0x57e   : > { %v7409_v7 = vadd.f32 %v15782_v58, %v7216_v42  ;;  %8187 = vrot.lane.b32.xlu1 %v16015_v50, %s11979_s21  ;;  %8437 = vrot.lane.b32.xlu0 %v16027_v32, %s11978_s20  ;;  %v8272_v37 = vrot.slane %v16027_v32, 1  ;;  %v8086_v40 = vshll.u32 %v16027_v32, 16  ;;  %v8084_v62 = vshrl.u32 %v16027_v32, 16 }
 0x57f   : > { %v8093_v42 = vrot.slane %v8091_v12, 1 }
 0x580   : > { %v7493_v30 = vmax.f32 %v7409_v7, 0.0  ;;  %v8274_v58 = vsel %vm2097_vm3, %v8272_v37, %v8273_v35  ;;  %v8088_v25 = vrot.slane %v8086_v40, 1 }
 0x581   : > { %11672 = vmatmul.mubr.msk.bf16.gmra.mxu1 %vm2444_vm6, %v8274_v58 }
 0x582   : > { %v7723_v31 = vpack.c.bf16 %v7493_v30, %v7492_v14  ;;  %8350 = vrot.lane.b32.xlu1 %v16027_v32, %s11977_s15  ;;  %8402 = vrot.lane.b32.xlu0 %v8274_v58, %s11979_s21  ;;  %v8089_v6 = vor.u32 %v8088_v25, %v8084_v62  ;;  %v11947_v14 = vunpack.i.h.bf16 %v15719_v15  ;;  %v8508_v15 = vsel %vm2444_vm6, %v12090_v8, %v15698_v46 }
 0x583   : > { %v7220_v43 = vpop.f32.mrf.mxu1 }
 0x584   : > { %v7816_v21 = vshrl.u32 %v7723_v31, 16  ;;  %v7221_v16 = vadd.f32 %v15678_v55, %v7220_v43  ;;  %v8420_v7 = vpop.permute.xlu1 %8419  ;;  %v16043_v37 = vsel %vm1712_vm5, %v8089_v6, %v8093_v42  ;;  %v7819_v40 = vshll.u32 %v7723_v31, 16 }
 0x585   : > { %v7222_v53 = vpop.f32.mrf.mxu1 }
 0x586   : > { %v7818_v35 = vrot.slane %v7816_v21, 7  ;;  %8315 = vrot.lane.b32.xlu1 %v8274_v58, %s11978_s20  ;;  %8485 = vrot.lane.b32.xlu0 %v16043_v37, %s11977_s15  ;;  %v7414_v12 = vadd.f32 %v15750_v54, %v7221_v16  ;;  %v8635_v58 = vsel %vm2444_vm6, %v12147_v33, %v15680_v59  ;;  %v8544_v59 = vsel %vm2493_vm7, %v8508_v15, %v11947_v14 }
 0x587   : > { %v7223_v30 = vpop.f32.mrf.mxu1  ;;  %v16051_v43 = vpop.permute.xlu0 %8384 }
 0x588   : > { %v7821_v62 = vor.u32 %v7819_v40, %v7818_v35  ;;  %v7224_v25 = vadd.f32 %v15678_v55, %v7223_v30  ;;  %v7943_v6 = vsel %vm12074_vm2, %v7818_v35, 0  ;;  %v16058_v42 = vpop.permute.xlu1 %8332  ;;  %v7494_v40 = vmax.f32 %v7414_v12, 0.0 }
 0x589   : > { %v7225_v31 = vpop.f32.mrf.mxu1  ;;  %v8276_v16 = vrot.slane %v7943_v6, 1  ;;  %v8103_v35 = vshll.u32 %v7943_v6, 16 }
 0x58a   : > { %v7417_v54 = vadd.f32 %v15773_v49, %v7224_v25  ;;  %v16066_v21 = vsel %vm12074_vm2, 0, %v7821_v62  ;;  %8189 = vrot.lane.b32.xlu1 %v16043_v37, %s11979_s21  ;;  %v8688_v49 = vsel %vm2493_vm7, %v8635_v58, %v8420_v7  ;;  %v8580_v7 = vsel %vm2542_vm8, %v8544_v59, %v15643_v48 }
 0x58b   : > { %8439 = vrot.lane.b32.xlu0 %v16066_v21, %s11978_s20  ;;  %v8275_v46 = vrot.slane %v16066_v21, 1  ;;  %v8098_v53 = vshll.u32 %v16066_v21, 16  ;;  %v8468_v62 = vpop.permute.xlu0 %8467  ;;  %v8096_v19 = vshrl.u32 %v16066_v21, 16  ;;  %v8105_v12 = vrot.slane %v8103_v35, 1 }
 0x58c   : > { %v7495_v30 = vmax.f32 %v7417_v54, 0.0  ;;  %v16076_v25 = vpop.permute.xlu1 %8297  ;;  %v8724_v31 = vsel %vm2542_vm8, %v8688_v49, %v8468_v62 }
 0x58d   : > { %v8277_v57 = vsel %vm2097_vm3, %v8275_v46, %v8276_v16  ;;  %v8100_v39 = vrot.slane %v8098_v53, 1  ;;  %8924 = vmatprep.mubr.bf16.mxu0 %v8724_v31 }
 0x58e   : > { %v7724_v2 = vpack.c.bf16 %v7495_v30, %v7494_v40  ;;  %11675 = vmatprep.mubr.msk.bf16.mxu1 %vm2444_vm6, %v8277_v57  ;;  %8352 = vrot.lane.b32.xlu1 %v16066_v21, %s11977_s15 }
 0x58f   : > { %v7228_v6 = vpop.f32.mrf.mxu1  ;;  %8404 = vrot.lane.b32.xlu0 %v8277_v57, %s11979_s21  ;;  %v8101_v14 = vor.u32 %v8100_v39, %v8096_v19  ;;  %8925 = vmatmul.mubr.bf16.vlgmr.msra.gmra.mxu0 %v8580_v7 }
 0x590   : > { %v7823_v15 = vshrl.u32 %v7724_v2, 16  ;;  %v7229_v58 = vadd.f32 %v15678_v55, %v7228_v6  ;;  %v16088_v46 = vpop.permute.xlu1 %8171  ;;  %v7826_v40 = vshll.u32 %v7724_v2, 16  ;;  %v8422_v49 = vpop.permute.xlu0 %8421 }
 0x591   : > { %v7230_v54 = vpop.f32.mrf.mxu1  ;;  %v16091_v16 = vsel %vm1712_vm5, %v8101_v14, %v8105_v12 }
 0x592   : > { %v7825_v53 = vrot.slane %v7823_v15, 7  ;;  %8317 = vrot.lane.b32.xlu1 %v8277_v57, %s11978_s20  ;;  %v7422_v48 = vadd.f32 %v15800_v34, %v7229_v58  ;;  %v8638_v58 = vsel %vm2444_vm6, %v15771_v52, %v16051_v43 }
 0x593   : > { %v7231_v30 = vpop.f32.mrf.mxu1  ;;  %8487 = vrot.lane.b32.xlu0 %v16091_v16, %s11977_s15 }
 0x594   : > { %v7828_v39 = vor.u32 %v7826_v40, %v7825_v53  ;;  %v7944_v19 = vsel %vm12074_vm2, %v7825_v53, 0  ;;  %v7232_v35 = vadd.f32 %v15678_v55, %v7231_v30  ;;  %v16100_v62 = vpop.permute.xlu1 %8334  ;;  %v8387_v31 = vpop.permute.xlu0 %8386  ;;  %v7496_v12 = vmax.f32 %v7422_v48, 0.0 }
 0x595   : > { %v7233_v59 = vpop.f32.mrf.mxu1  ;;  %v8279_v6 = vrot.slane %v7944_v19, 1  ;;  %v8115_v14 = vshll.u32 %v7944_v19, 16 }
 0x596   : > { %v7425_v2 = vadd.f32 %v15816_v29, %v7232_v35  ;;  %v16105_v57 = vsel %vm12074_vm2, 0, %v7828_v39  ;;  %8191 = vrot.lane.b32.xlu1 %v16091_v16, %s11979_s21  ;;  %v8510_v29 = vsel %vm2444_vm6, %v12090_v8, %v15658_v56  ;;  %v8690_v39 = vsel %vm2493_vm7, %v8638_v58, %v8422_v49 }
 0x597   : > { %8441 = vrot.lane.b32.xlu0 %v16105_v57, %s11978_s20  ;;  %v8278_v34 = vrot.slane %v16105_v57, 1  ;;  %v8110_v7 = vshll.u32 %v16105_v57, 16  ;;  %v8108_v40 = vshrl.u32 %v16105_v57, 16  ;;  %v8546_v56 = vsel %vm2493_vm7, %v8510_v29, %v15671_v28 }
 0x598   : > { %v7497_v15 = vmax.f32 %v7425_v2, 0.0  ;;  %v16119_v54 = vpop.permute.xlu1 %8299  ;;  %v8470_v35 = vpop.permute.xlu0 %8469  ;;  %v8117_v59 = vrot.slane %v8115_v14, 1  ;;  %v8583_v49 = vsel %vm2542_vm8, %v8546_v56, %v16058_v42  ;;  %v16146_v14 = vld [vmem:[%s17386_s8] ss:$0 sm:$0xff] }
 0x599   : > { %v8280_v53 = vsel %vm2097_vm3, %v8278_v34, %v8279_v6  ;;  %v8112_v30 = vrot.slane %v8110_v7, 1  ;;  %v8727_v52 = vsel %vm2542_vm8, %v8690_v39, %v8470_v35 }
 0x59a   : > { %v7725_v19 = vpack.c.bf16 %v7497_v15, %v7496_v12  ;;  %11676 = vmatmul.mubr.msk.bf16.gmra.mxu1 %vm2444_vm6, %v8280_v53  ;;  %8354 = vrot.lane.b32.xlu1 %v16105_v57, %s11977_s15 }
 0x59b   : > { %v7236_v48 = vpop.f32.mrf.mxu1  ;;  %8406 = vrot.lane.b32.xlu0 %v8280_v53, %s11979_s21  ;;  %v8113_v43 = vor.u32 %v8112_v30, %v8108_v40  ;;  %8932 = vmatprep.mubr.bf16.mxu0 %v8727_v52 }
 0x59c   : > { %v7830_v2 = vshrl.u32 %v7725_v19, 16  ;;  %v7237_v34 = vadd.f32 %v15678_v55, %v7236_v48  ;;  %8933 = vmatmul.mubr.bf16.gmra.mxu0 %v8583_v49  ;;  %v16134_v28 = vpop.permute.xlu1 %8173  ;;  %v7833_v12 = vshll.u32 %v7725_v19, 16  ;;  %v8424_v15 = vpop.permute.xlu0 %8423 }
 0x59d   : > { %v7238_v6 = vpop.f32.mrf.mxu1  ;;  %v16137_v7 = vsel %vm1712_vm5, %v8113_v43, %v8117_v59 }
 0x59e   : > { %v7832_v29 = vrot.slane %v7830_v2, 7  ;;  %8319 = vrot.lane.b32.xlu1 %v8280_v53, %s11978_s20  ;;  %v7430_v55 = vadd.f32 %v15795_v1, %v7237_v34  ;;  %v8641_v2 = vsel %vm2444_vm6, %v15809_v5, %v8387_v31 }
 0x59f   : > { %v7239_v58 = vpop.f32.mrf.mxu1  ;;  %8489 = vrot.lane.b32.xlu0 %v16137_v7, %s11977_s15 }
 0x5a0   : > { %v7835_v42 = vor.u32 %v7833_v12, %v7832_v29  ;;  %v7240_v40 = vadd.f32 %v16146_v14, %v7239_v58  ;;  %v7945_v30 = vsel %vm12074_vm2, %v7832_v29, 0  ;;  %v16151_v19 = vpop.permute.xlu1 %8336  ;;  %v8389_v35 = vpop.permute.xlu0 %8388  ;;  %v7498_v59 = vmax.f32 %v7430_v55, 0.0 }
 0x5a1   : > { %v7241_v39 = vpop.f32.mrf.mxu1  ;;  %v8282_v48 = vrot.slane %v7945_v30, 1  ;;  %v8127_v43 = vshll.u32 %v7945_v30, 16  ;;  %v8692_v58 = vsel %vm2493_vm7, %v8641_v2, %v8424_v15 }
 0x5a2   : > { %v7433_v53 = vadd.f32 %v15806_v45, %v7240_v40  ;;  %v16156_v56 = vsel %vm12074_vm2, 0, %v7835_v42  ;;  %8193 = vrot.lane.b32.xlu1 %v16137_v7, %s11979_s21  ;;  %v8512_v45 = vsel %vm2444_vm6, %v15755_v61, %v16088_v46 }
 0x5a3   : > { %8443 = vrot.lane.b32.xlu0 %v16156_v56, %s11978_s20  ;;  %v8281_v1 = vrot.slane %v16156_v56, 1  ;;  %v8122_v52 = vshll.u32 %v16156_v56, 16  ;;  %v8120_v29 = vshrl.u32 %v16156_v56, 16  ;;  %v8548_v61 = vsel %vm2493_vm7, %v8512_v45, %v16076_v25 }
 0x5a4   : > { %v7499_v49 = vmax.f32 %v7433_v53, 0.0  ;;  %v16169_v34 = vpop.permute.xlu1 %8301  ;;  %v8472_v40 = vpop.permute.xlu0 %8471  ;;  %v8129_v55 = vrot.slane %v8127_v43, 1  ;;  %v8586_v15 = vsel %vm2542_vm8, %v8548_v61, %v16100_v62 }
 0x5a5   : > { %v8283_v6 = vsel %vm2097_vm3, %v8281_v1, %v8282_v48  ;;  %v8124_v12 = vrot.slane %v8122_v52, 1  ;;  %v8730_v5 = vsel %vm2542_vm8, %v8692_v58, %v8472_v40 }
 0x5a6   : > { %v7726_v42 = vpack.c.bf16 %v7499_v49, %v7498_v59  ;;  %11679 = vmatprep.mubr.msk.bf16.mxu1 %vm2444_vm6, %v8283_v6  ;;  %8356 = vrot.lane.b32.xlu1 %v16156_v56, %s11977_s15 }
 0x5a7   : > { %v7244_v46 = vpop.f32.mrf.mxu1  ;;  %8408 = vrot.lane.b32.xlu0 %v8283_v6, %s11979_s21  ;;  %v8125_v31 = vor.u32 %v8124_v12, %v8120_v29  ;;  %8940 = vmatprep.mubr.bf16.mxu0 %v8730_v5 }
 0x5a8   : > { %v7837_v30 = vshrl.u32 %v7726_v42, 16  ;;  %v7245_v39 = vadd.f32 %v16146_v14, %v7244_v46  ;;  %8941 = vmatmul.mubr.bf16.gmra.mxu0 %v8586_v15  ;;  %v16184_v25 = vpop.permute.xlu1 %8175  ;;  %v7840_v52 = vshll.u32 %v7726_v42, 16  ;;  %v8426_v45 = vpop.permute.xlu0 %8425 }
 0x5a9   : > { %v7246_v53 = vpop.f32.mrf.mxu1  ;;  %v16187_v1 = vsel %vm1712_vm5, %v8125_v31, %v8129_v55 }
 0x5aa   : > { %v7839_v48 = vrot.slane %v7837_v30, 7  ;;  %8321 = vrot.lane.b32.xlu1 %v8283_v6, %s11978_s20  ;;  %v7438_v49 = vadd.f32 %v15833_v0, %v7245_v39  ;;  %v8644_v30 = vsel %vm2444_vm6, %v15847_v26, %v8389_v35 }
 0x5ab   : > { %v7247_v59 = vpop.f32.mrf.mxu1  ;;  %8491 = vrot.lane.b32.xlu0 %v16187_v1, %s11977_s15 }
 0x5ac   : > { %v7842_v62 = vor.u32 %v7840_v52, %v7839_v48  ;;  %v7946_v43 = vsel %vm12074_vm2, %v7839_v48, 0  ;;  %v7248_v2 = vadd.f32 %v16146_v14, %v7247_v59  ;;  %v16196_v12 = vpop.permute.xlu1 %8338  ;;  %v8391_v42 = vpop.permute.xlu0 %8390  ;;  %v7500_v31 = vmax.f32 %v7438_v49, 0.0 }
 0x5ad   : > { %v7249_v29 = vpop.f32.mrf.mxu1  ;;  %v8285_v61 = vrot.slane %v7946_v43, 1  ;;  %v8139_v5 = vshll.u32 %v7946_v43, 16 }
 0x5ae   : > { %v7441_v58 = vadd.f32 %v15844_v9, %v7248_v2  ;;  %v16201_v6 = vsel %vm12074_vm2, 0, %v7842_v62  ;;  %8195 = vrot.lane.b32.xlu1 %v16187_v1, %s11979_s21  ;;  %v8514_v9 = vsel %vm2444_vm6, %v15787_v44, %v16134_v28  ;;  %v8694_v62 = vsel %vm2493_vm7, %v8644_v30, %v8426_v45 }
 0x5af   : > { %v7252_v40 = vpop.f32.mrf.mxu1  ;;  %8445 = vrot.lane.b32.xlu0 %v16201_v6, %s11978_s20  ;;  %v8284_v0 = vrot.slane %v16201_v6, 1  ;;  %v8134_v46 = vshll.u32 %v16201_v6, 16  ;;  %v8132_v52 = vshrl.u32 %v16201_v6, 16  ;;  %v8550_v44 = vsel %vm2493_vm7, %v8514_v9, %v16119_v54 }
 0x5b0   : > { %v7501_v55 = vmax.f32 %v7441_v58, 0.0  ;;  %v7253_v15 = vadd.f32 %v16146_v14, %v7252_v40  ;;  %v16215_v53 = vpop.permute.xlu1 %8303  ;;  %v8474_v2 = vpop.permute.xlu0 %8473  ;;  %v8141_v49 = vrot.slane %v8139_v5, 1  ;;  %v8589_v45 = vsel %vm2542_vm8, %v8550_v44, %v16151_v19 }
 0x5b1   : > { %v7254_v39 = vpop.f32.mrf.mxu1  ;;  %v8286_v48 = vsel %vm2097_vm3, %v8284_v0, %v8285_v61  ;;  %v8136_v59 = vrot.slane %v8134_v46, 1  ;;  %v8733_v26 = vsel %vm2542_vm8, %v8694_v62, %v8474_v2  ;;  %v8647_v44 = vsel %vm2444_vm6, %v15875_v13, %v8391_v42 }
 0x5b2   : > { %v7727_v43 = vpack.c.bf16 %v7501_v55, %v7500_v31  ;;  %11680 = vmatmul.mubr.msk.bf16.gmra.mxu1 %vm2444_vm6, %v8286_v48  ;;  %8358 = vrot.lane.b32.xlu1 %v16201_v6, %s11977_s15  ;;  %v7446_v58 = vadd.f32 %v15825_v36, %v7253_v15 }
 0x5b3   : > { %v7255_v28 = vpop.f32.mrf.mxu1  ;;  %8410 = vrot.lane.b32.xlu0 %v8286_v48, %s11979_s21  ;;  %v8137_v35 = vor.u32 %v8136_v59, %v8132_v52  ;;  %8948 = vmatprep.mubr.bf16.mxu0 %v8733_v26 }
 0x5b4   : > { %v7844_v29 = vshrl.u32 %v7727_v43, 16  ;;  %v7256_v40 = vadd.f32 %v16146_v14, %v7255_v28  ;;  %8949 = vmatmul.mubr.bf16.gmra.mxu0 %v8589_v45  ;;  %v16231_v0 = vpop.permute.xlu1 %8177  ;;  %v7847_v9 = vshll.u32 %v7727_v43, 16  ;;  %v8428_v31 = vpop.permute.xlu0 %8427  ;;  %v7502_v14 = vmax.f32 %v7446_v58, 0.0 }
 0x5b5   : > { %v7257_v54 = vpop.f32.mrf.mxu1  ;;  %v16234_v61 = vsel %vm1712_vm5, %v8137_v35, %v8141_v49  ;;  %v8516_v43 = vsel %vm2444_vm6, %v15823_v63, %v16184_v25  ;;  %v8696_v58 = vsel %vm2493_vm7, %v8647_v44, %v8428_v31 }
 0x5b6   : > { %v7846_v46 = vrot.slane %v7844_v29, 7  ;;  %v7449_v5 = vadd.f32 %v15838_v11, %v7256_v40  ;;  %8323 = vrot.lane.b32.xlu1 %v8286_v48, %s11978_s20  ;;  %v8552_v63 = vsel %vm2493_vm7, %v8516_v43, %v16169_v34 }
 0x5b7   : > { %8493 = vrot.lane.b32.xlu0 %v16234_v61, %s11977_s15  ;;  %v8592_v54 = vsel %vm2542_vm8, %v8552_v63, %v16196_v12 }
 0x5b8   : > { %v7849_v36 = vor.u32 %v7847_v9, %v7846_v46  ;;  %v7503_v19 = vmax.f32 %v7449_v5, 0.0  ;;  %v7947_v55 = vsel %vm12074_vm2, %v7846_v46, 0  ;;  %v16242_v15 = vpop.permute.xlu1 %8340  ;;  %v8393_v39 = vpop.permute.xlu0 %8392 }
 0x5b9   : > { %v8288_v48 = vrot.slane %v7947_v55, 1  ;;  %v8151_v62 = vshll.u32 %v7947_v55, 16 }
 0x5ba   : > { %v7728_v30 = vpack.c.bf16 %v7503_v19, %v7502_v14  ;;  %v16246_v52 = vsel %vm12074_vm2, 0, %v7849_v36  ;;  %8197 = vrot.lane.b32.xlu1 %v16234_v61, %s11979_s21 }
 0x5bb   : > { %8447 = vrot.lane.b32.xlu0 %v16246_v52, %s11978_s20  ;;  %v8287_v11 = vrot.slane %v16246_v52, 1  ;;  %v8146_v59 = vshll.u32 %v16246_v52, 16  ;;  %v8144_v35 = vshrl.u32 %v16246_v52, 16  ;;  %v8153_v42 = vrot.slane %v8151_v62, 1 }
 0x5bc   : > { %v7851_v2 = vshrl.u32 %v7728_v30, 16  ;;  %v16259_v28 = vpop.permute.xlu1 %8305  ;;  %v7854_v29 = vshll.u32 %v7728_v30, 16  ;;  %v8476_v40 = vpop.permute.xlu0 %8475 }
 0x5bd   : > { %v8289_v26 = vsel %vm2097_vm3, %v8287_v11, %v8288_v48  ;;  %v8148_v49 = vrot.slane %v8146_v59, 1  ;;  %v8736_v13 = vsel %vm2542_vm8, %v8696_v58, %v8476_v40 }
 0x5be   : > { %v7853_v45 = vrot.slane %v7851_v2, 7  ;;  %11683 = vmatprep.mubr.msk.bf16.mxu1 %vm2444_vm6, %v8289_v26  ;;  %8360 = vrot.lane.b32.xlu1 %v16246_v52, %s11977_s15  ;;  %v8518_v2 = vsel %vm2444_vm6, %v15859_v4, %v16231_v0 }
 0x5bf   : > { %8412 = vrot.lane.b32.xlu0 %v8289_v26, %s11979_s21  ;;  %v8149_v25 = vor.u32 %v8148_v49, %v8144_v35  ;;  %8956 = vmatprep.mubr.bf16.mxu0 %v8736_v13  ;;  %v8650_v49 = vsel %vm2444_vm6, %v15903_v23, %v8393_v39  ;;  %v8554_v63 = vsel %vm2493_vm7, %v8518_v2, %v16215_v53 }
 0x5c0   : > { %v7856_v46 = vor.u32 %v7854_v29, %v7853_v45  ;;  %v7948_v9 = vsel %vm12074_vm2, %v7853_v45, 0  ;;  %8957 = vmatmul.mubr.bf16.gmra.mxu0 %v8592_v54  ;;  %v8180_v5 = vpop.permute.xlu1 %8179  ;;  %v8430_v36 = vpop.permute.xlu0 %8429  ;;  %v8595_v23 = vsel %vm2542_vm8, %v8554_v63, %v16242_v15 }
 0x5c1   : > { %v16276_v34 = vsel %vm1712_vm5, %v8149_v25, %v8153_v42  ;;  %v8291_v19 = vrot.slane %v7948_v9, 1  ;;  %v8163_v35 = vshll.u32 %v7948_v9, 16 }
 0x5c2   : > { %v16280_v31 = vsel %vm12074_vm2, 0, %v7856_v46  ;;  %8199 = vrot.lane.b32.xlu1 %v16276_v34, %s11979_s21  ;;  %v7260_v12 = vpop.f32.mrf.mxu1 }
 0x5c3   : > { %8495 = vrot.lane.b32.xlu0 %v16276_v34, %s11977_s15  ;;  %v8290_v14 = vrot.slane %v16280_v31, 1  ;;  %v8158_v55 = vshll.u32 %v16280_v31, 16  ;;  %v8156_v44 = vshrl.u32 %v16280_v31, 16  ;;  %v8165_v39 = vrot.slane %v8163_v35, 1 }
 0x5c4   : > { %v8343_v30 = vpop.permute.xlu1 %8342  ;;  %v7262_v11 = vpop.f32.mrf.mxu1 }
 0x5c5   : > { %v8292_v48 = vsel %vm2097_vm3, %v8290_v14, %v8291_v19  ;;  %v8395_v59 = vpop.permute.xlu0 %8394  ;;  %v8160_v62 = vrot.slane %v8158_v55, 1 }
 0x5c6   : > { %11684 = vmatmul.mubr.msk.bf16.gmra.mxu1 %vm2444_vm6, %v8292_v48  ;;  %8325 = vrot.lane.b32.xlu1 %v8289_v26, %s11978_s20  ;;  %v7263_v43 = vpop.f32.mrf.mxu1  ;;  %v8698_v26 = vsel %vm2493_vm7, %v8650_v49, %v8430_v36  ;;  %v8520_v36 = vsel %vm2444_vm6, %v15887_v47, %v8180_v5  ;;  %v8653_v12 = vsel %vm2444_vm6, %v15931_v51, %v8395_v59 }
 0x5c7   : > { %8449 = vrot.lane.b32.xlu0 %v16280_v31, %s11978_s20  ;;  %11687 = vmatprep.mubr.msk.bf16.mxu1 %vm2444_vm6, %v12118_v18  ;;  %v8161_v40 = vor.u32 %v8160_v62, %v8156_v44  ;;  %v8556_v11 = vsel %vm2493_vm7, %v8520_v36, %v16259_v28 }
 0x5c8   : > { %v8308_v45 = vpop.permute.xlu1 %8307  ;;  %v7265_v29 = vpop.f32.mrf.mxu1  ;;  %v8598_v43 = vsel %vm2542_vm8, %v8556_v11, %v8343_v30 }
 0x5c9   : > { %v8478_v58 = vpop.permute.xlu0 %8477  ;;  %v16311_v54 = vsel %vm1712_vm5, %v8161_v40, %v8165_v39 }
 0x5ca   : > { %8362 = vrot.lane.b32.xlu1 %v16280_v31, %s11977_s15  ;;  %v8739_v4 = vsel %vm2542_vm8, %v8698_v26, %v8478_v58  ;;  %v7268_v0 = vpop.f32.mrf.mxu1 }
 0x5cb   : > { %8414 = vrot.lane.b32.xlu0 %v8292_v48, %s11979_s21  ;;  %8964 = vmatprep.mubr.bf16.mxu0 %v8739_v4 }
 0x5cc   : > { %8965 = vmatmul.mubr.bf16.gmra.mxu0 %v8595_v23  ;;  %v8182_v13 = vpop.permute.xlu1 %8181  ;;  %v7270_v25 = vpop.f32.mrf.mxu1 }
 0x5cd   : > { %v8432_v42 = vpop.permute.xlu0 %8431  ;;  %v8522_v30 = vsel %vm2444_vm6, %v15915_v20, %v8182_v13 }
 0x5ce   : > { %11688 = vmatmul.mubr.msk.bf16.gmra.mxu1 %vm2444_vm6, %v12118_v18  ;;  %9873 = vrot.lane.b32.xlu1 %v12147_v33, %s11979_s21  ;;  %v7271_v53 = vpop.f32.mrf.mxu1  ;;  %v8700_v19 = vsel %vm2493_vm7, %v8653_v12, %v8432_v42  ;;  %v8558_v49 = vsel %vm2493_vm7, %v8522_v30, %v8308_v45 }
 0x5cf   : > { %8497 = vrot.lane.b32.xlu0 %v16311_v54, %s11977_s15 }
 0x5d0   : > { %v8345_v15 = vpop.permute.xlu1 %8344  ;;  %v7273_v46 = vpop.f32.mrf.mxu1 }
 0x5d1   : > { %v8397_v9 = vpop.permute.xlu0 %8396  ;;  %v8601_v26 = vsel %vm2542_vm8, %v8558_v49, %v8345_v15  ;;  %v10452_v49 = vld [vmem:[%s17389_s11 + $0x108] sm:$0xff] }
 0x5d2   : > { %9985 = vrot.lane.b32.xlu1 %v12118_v18, %s11978_s20 }
 0x5d3   : > { %8451 = vrot.lane.b32.xlu0 %v12090_v8, %s11978_s20 }
 0x5d4   : > { %v8310_v14 = vpop.permute.xlu1 %8309 }
 0x5d5   : > { %v8480_v55 = vpop.permute.xlu0 %8479 }
 0x5d6   : > { %8327 = vrot.lane.b32.xlu1 %v8292_v48, %s11978_s20  ;;  %v8742_v62 = vsel %vm2542_vm8, %v8700_v19, %v8480_v55  ;;  %v8656_v48 = vsel %vm2444_vm6, %v15959_v10, %v8397_v9 }
 0x5d7   : > { %8499 = vrot.lane.b32.xlu0 %v12147_v33, %s11977_s15  ;;  %8972 = vmatprep.mubr.bf16.mxu0 %v8742_v62 }
 0x5d8   : > { %8973 = vmatmul.mubr.bf16.gmra.mxu0 %v8598_v43  ;;  %v8184_v47 = vpop.permute.xlu1 %8183 }
 0x5d9   : > { %v8434_v51 = vpop.permute.xlu0 %8433  ;;  %v8524_v45 = vsel %vm2444_vm6, %v15943_v60, %v8184_v47 }
 0x5da   : > { %8364 = vrot.lane.b32.xlu1 %v12090_v8, %s11977_s15  ;;  %v8702_v2 = vsel %vm2493_vm7, %v8656_v48, %v8434_v51  ;;  %v8560_v42 = vsel %vm2493_vm7, %v8524_v45, %v8310_v14 }
 0x5db   : > { %8416 = vrot.lane.b32.xlu0 %v12118_v18, %s11979_s21 }
 0x5dc   : > { %v8347_v28 = vpop.permute.xlu1 %8346 }
 0x5dd   : > { %v8399_v5 = vpop.permute.xlu0 %8398  ;;  %v8604_v15 = vsel %vm2542_vm8, %v8560_v42, %v8347_v28 }
 0x5de   : > { %8201 = vrot.lane.b32.xlu1 %v16311_v54, %s11979_s21  ;;  %v8659_v23 = vsel %vm2444_vm6, %v15987_v22, %v8399_v5 }
 0x5df   : > { %8453 = vrot.lane.b32.xlu0 %v12090_v8, %s11978_s20 }
 0x5e0   : > { %v8312_v59 = vpop.permute.xlu1 %8311 }
 0x5e1   : > { %v8482_v44 = vpop.permute.xlu0 %8481  ;;  %v16348_v35 = vpop.f32.mrf.mxu1 }
 0x5e2   : > { %v8745_v29 = vsel %vm2542_vm8, %v8702_v2, %v8482_v44  ;;  %v10451_v44 = vld [vmem:[%s17389_s11 + $0x100] sm:$0xff] }
 0x5e3   : > { %8501 = vrot.lane.b32.xlu0 %v12147_v33, %s11977_s15  ;;  %8980 = vmatprep.mubr.bf16.mxu0 %v8745_v29  ;;  %v9103_v20 = vpop.f32.mrf.mxu1 }
 0x5e4   : > { %8981 = vmatmul.mubr.bf16.gmra.mxu0 %v8601_v26  ;;  %v8186_v58 = vpop.permute.xlu1 %8185  ;;  %v10471_v20 = vpack.c.bf16 %v10452_v49, %v10451_v44 }
 0x5e5   : > { %v8436_v10 = vpop.permute.xlu0 %8435  ;;  %v16355_v40 = vpop.f32.mrf.mxu1  ;;  %v8526_v60 = vsel %vm2444_vm6, %v15971_v41, %v8186_v58  ;;  %v10453_v41 = vld [vmem:[%s17389_s11 + $0x110] sm:$0xff] }
 0x5e6   : > { %v8704_v13 = vsel %vm2493_vm7, %v8659_v23, %v8436_v10  ;;  %v8562_v11 = vsel %vm2493_vm7, %v8526_v60, %v8312_v59 }
 0x5e7   : > { %v9106_v63 = vpop.f32.mrf.mxu1 }
 0x5e8   : > { %v8349_v4 = vpop.permute.xlu1 %8348 }
 0x5e9   : > { %v8401_v0 = vpop.permute.xlu0 %8400  ;;  %v8607_v43 = vsel %vm2542_vm8, %v8562_v11, %v8349_v4 }
 0x5ea   : > { %v8662_v22 = vsel %vm2444_vm6, %v16015_v50, %v8401_v0  ;;  %v10454_v50 = vld [vmem:[%s17389_s11 + $0x118] sm:$0xff] }
 0x5eb   : > { %v10472_v30 = vpack.c.bf16 %v10454_v50, %v10453_v41 }
 0x5ec   : > { %v8314_v39 = vpop.permute.xlu1 %8313 }
 0x5ed   : > { %v8484_v25 = vpop.permute.xlu0 %8483  ;;  %11691 = vmatprep.subr.bf16.mxu0 %v10472_v30 }
 0x5ee   : > { %v8748_v53 = vsel %vm2542_vm8, %v8704_v13, %v8484_v25  ;;  %11692 = vmatpush3.bf16.msra.mxu0 %v10472_v30 }
 0x5ef   : > { %8988 = vmatprep.mubr.bf16.mxu0 %v8748_v53  ;;  %11693 = vmatprep.subr.bf16.mxu0 %v10471_v20 }
 0x5f0   : > { %8989 = vmatmul.mubr.bf16.gmra.mxu0 %v8604_v15  ;;  %v8188_v46 = vpop.permute.xlu1 %8187 }
 0x5f1   : > { %v8438_v9 = vpop.permute.xlu0 %8437  ;;  %v8528_v48 = vsel %vm2444_vm6, %v15999_v3, %v8188_v46 }
 0x5f2   : > { %v8706_v55 = vsel %vm2493_vm7, %v8662_v22, %v8438_v9  ;;  %v8564_v3 = vsel %vm2493_vm7, %v8528_v48, %v8314_v39  ;;  %11694 = vmatpush3.bf16.msra.mxu0 %v10471_v20 }
 0x5f4   : > { %v8351_v36 = vpop.permute.xlu1 %8350 }
 0x5f5   : > { %v8403_v12 = vpop.permute.xlu0 %8402 }
 0x5f6   : > { %v8665_v59 = vsel %vm2444_vm6, %v16043_v37, %v8403_v12  ;;  %v8610_v37 = vsel %vm2542_vm8, %v8564_v3, %v8351_v36 }
 0x5f8   : > { %v8316_v19 = vpop.permute.xlu1 %8315 }
 0x5f9   : > { %v8486_v14 = vpop.permute.xlu0 %8485  ;;  %v16417_v44 = vpop.f32.mrf.mxu1 }
 0x5fa   : > { %v8751_v62 = vsel %vm2542_vm8, %v8706_v55, %v8486_v14 }
 0x5fb   : > { %8996 = vmatprep.mubr.bf16.mxu0 %v8751_v62 }
 0x5fc   : > { %8997 = vmatmul.mubr.bf16.gmra.mxu0 %v8607_v43  ;;  %v8190_v47 = vpop.permute.xlu1 %8189 }
 0x5fd   : > { %v8440_v51 = vpop.permute.xlu0 %8439  ;;  %v8530_v45 = vsel %vm2444_vm6, %v16027_v32, %v8190_v47 }
 0x5fe   : > { %v8708_v29 = vsel %vm2493_vm7, %v8665_v59, %v8440_v51  ;;  %v8566_v42 = vsel %vm2493_vm7, %v8530_v45, %v8316_v19 }
 0x600   : > { %v8353_v28 = vpop.permute.xlu1 %8352 }
 0x601   : > { %v8405_v5 = vpop.permute.xlu0 %8404  ;;  %v8613_v15 = vsel %vm2542_vm8, %v8566_v42, %v8353_v28 }
 0x602   : > { %v8668_v23 = vsel %vm2444_vm6, %v16091_v16, %v8405_v5 }
 0x604   : > { %v8318_v2 = vpop.permute.xlu1 %8317 }
 0x605   : > { %v8488_v26 = vpop.permute.xlu0 %8487 }
 0x606   : > { %v8754_v58 = vsel %vm2542_vm8, %v8708_v29, %v8488_v26  ;;  %v16421_v29 = vpop.f32.mrf.mxu1 }
 0x607   : > { %9004 = vmatprep.mubr.bf16.mxu0 %v8754_v58 }
 0x608   : > { %9005 = vmatmul.mubr.bf16.gmra.mxu0 %v8610_v37  ;;  %v8192_v10 = vpop.permute.xlu1 %8191 }
 0x609   : > { %v8442_v63 = vpop.permute.xlu0 %8441  ;;  %v8532_v32 = vsel %vm2444_vm6, %v16066_v21, %v8192_v10 }
 0x60a   : > { %v8710_v39 = vsel %vm2493_vm7, %v8668_v23, %v8442_v63  ;;  %v8568_v55 = vsel %vm2493_vm7, %v8532_v32, %v8318_v2 }
 0x60c   : > { %v8355_v4 = vpop.permute.xlu1 %8354 }
 0x60d   : > { %v8407_v0 = vpop.permute.xlu0 %8406  ;;  %v8616_v11 = vsel %vm2542_vm8, %v8568_v55, %v8355_v4  ;;  %v16429_v4 = vpop.f32.mrf.mxu1 }
 0x60e   : > { %v8671_v16 = vsel %vm2444_vm6, %v16137_v7, %v8407_v0 }
 0x60f   : > { %v16431_v45 = vpop.f32.mrf.mxu1 }
 0x610   : > { %v8320_v13 = vpop.permute.xlu1 %8319 }
 0x611   : > { %v8490_v25 = vpop.permute.xlu0 %8489 }
 0x612   : > { %v8757_v53 = vsel %vm2542_vm8, %v8710_v39, %v8490_v25 }
 0x613   : > { %9012 = vmatprep.mubr.bf16.mxu0 %v8757_v53 }
 0x614   : > { %9013 = vmatmul.mubr.bf16.gmra.mxu0 %v8613_v15  ;;  %v8194_v46 = vpop.permute.xlu1 %8193 }
 0x615   : > { %v8444_v9 = vpop.permute.xlu0 %8443  ;;  %v8534_v21 = vsel %vm2444_vm6, %v16105_v57, %v8194_v46 }
 0x616   : > { %v8712_v22 = vsel %vm2493_vm7, %v8671_v16, %v8444_v9  ;;  %v8570_v5 = vsel %vm2493_vm7, %v8534_v21, %v8320_v13  ;;  %v16433_v13 = vpop.f32.mrf.mxu1 }
 0x618   : > { %v8357_v36 = vpop.permute.xlu1 %8356  ;;  %v16442_v46 = vpop.f32.mrf.mxu1 }
 0x619   : > { %v8409_v12 = vpop.permute.xlu0 %8408  ;;  %v8619_v48 = vsel %vm2542_vm8, %v8570_v5, %v8357_v36 }
 0x61a   : > { %v8674_v7 = vsel %vm2444_vm6, %v16187_v1, %v8409_v12  ;;  %v16449_v16 = vpop.f32.mrf.mxu1 }
 0x61c   : > { %v8322_v60 = vpop.permute.xlu1 %8321 }
 0x61d   : > { %v8492_v19 = vpop.permute.xlu0 %8491 }
 0x61e   : > { %v8760_v14 = vsel %vm2542_vm8, %v8712_v22, %v8492_v19 }
 0x61f   : > { %9020 = vmatprep.mubr.bf16.mxu0 %v8760_v14  ;;  %v16456_v14 = vpop.f32.mrf.mxu1 }
 0x620   : > { %9021 = vmatmul.mubr.bf16.gmra.mxu0 %v8616_v11  ;;  %v8196_v62 = vpop.permute.xlu1 %8195 }
 0x621   : > { %v8446_v43 = vpop.permute.xlu0 %8445  ;;  %v8536_v1 = vsel %vm2444_vm6, %v16156_v56, %v8196_v62 }
 0x622   : > { %v8714_v41 = vsel %vm2493_vm7, %v8674_v7, %v8446_v43  ;;  %v8572_v37 = vsel %vm2493_vm7, %v8536_v1, %v8322_v60 }
 0x624   : > { %v8359_v47 = vpop.permute.xlu1 %8358 }
 0x625   : > { %v8411_v51 = vpop.permute.xlu0 %8410  ;;  %v8622_v63 = vsel %vm2542_vm8, %v8572_v37, %v8359_v47  ;;  %v10434_v37 = vld [vmem:[%s17389_s11 + $0x78] sm:$0xff] }
 0x626   : > { %v8677_v26 = vsel %vm2444_vm6, %v16234_v61, %v8411_v51 }
 0x628   : > { %v8324_v28 = vpop.permute.xlu1 %8323 }
 0x629   : > { %v8494_v50 = vpop.permute.xlu0 %8493  ;;  %v16461_v47 = vpop.f32.mrf.mxu1 }
 0x62a   : > { %v8763_v30 = vsel %vm2542_vm8, %v8714_v41, %v8494_v50 }
 0x62b   : > { %9028 = vmatprep.mubr.bf16.mxu0 %v8763_v30  ;;  %v16463_v7 = vpop.f32.mrf.mxu1 }
 0x62c   : > { %9029 = vmatmul.mubr.bf16.gmra.mxu0 %v8619_v48  ;;  %v8198_v59 = vpop.permute.xlu1 %8197 }
 0x62d   : > { %v8448_v2 = vpop.permute.xlu0 %8447  ;;  %v8538_v39 = vsel %vm2444_vm6, %v16201_v6, %v8198_v59  ;;  %v16470_v59 = vpop.f32.mrf.mxu1 }
 0x62e   : > { %v8716_v3 = vsel %vm2493_vm7, %v8677_v26, %v8448_v2  ;;  %v8574_v9 = vsel %vm2493_vm7, %v8538_v39, %v8324_v28  ;;  %v10449_v26 = vld [vmem:[%s17389_s11 + $0xf0] sm:$0xff] }
 0x630   : > { %v8361_v57 = vpop.permute.xlu1 %8360 }
 0x631   : > { %v8413_v49 = vpop.permute.xlu0 %8412  ;;  %v8625_v12 = vsel %vm2542_vm8, %v8574_v9, %v8361_v57 }
 0x632   : > { %v8680_v25 = vsel %vm2444_vm6, %v16276_v34, %v8413_v49 }
 0x634   : > { %v8200_v20 = vpop.permute.xlu1 %8199 }
 0x635   : > { %v8496_v58 = vpop.permute.xlu0 %8495  ;;  %v8540_v22 = vsel %vm2444_vm6, %v16246_v52, %v8200_v20 }
 0x636   : > { %v8766_v10 = vsel %vm2542_vm8, %v8716_v3, %v8496_v58  ;;  %v10433_v58 = vld [vmem:[%s17389_s11 + $0x70] sm:$0xff] }
 0x637   : > { %9036 = vmatprep.mubr.bf16.mxu0 %v8766_v10  ;;  %v10462_v10 = vpack.c.bf16 %v10434_v37, %v10433_v58  ;;  %v10426_v58 = vld [vmem:[%s17389_s11 + $0x38] sm:$0xff] }
 0x638   : > { %9037 = vmatmul.mubr.bf16.gmra.mxu0 %v8622_v63  ;;  %v8326_v56 = vpop.permute.xlu1 %8325  ;;  %v16487_v63 = vpop.f32.mrf.mxu1 }
 0x639   : > { %v8450_v0 = vpop.permute.xlu0 %8449  ;;  %v8576_v11 = vsel %vm2493_vm7, %v8540_v22, %v8326_v56  ;;  %v16492_v56 = vld [vmem:[%s17388_s10] ss:$0 sm:$0xff] }
 0x63a   : > { %v8718_v53 = vsel %vm2493_vm7, %v8680_v25, %v8450_v0  ;;  %v10447_v0 = vld [vmem:[%s17389_s11 + $0xe0] sm:$0xff] }
 0x63b   : > { %v10431_v25 = vld [vmem:[%s17389_s11 + $0x60] sm:$0xff] }
 0x63c   : > { %v8363_v23 = vpop.permute.xlu1 %8362 }
 0x63d   : > { %v8415_v61 = vpop.permute.xlu0 %8414  ;;  %v8628_v43 = vsel %vm2542_vm8, %v8576_v11, %v8363_v23  ;;  %v10448_v23 = vld [vmem:[%s17389_s11 + $0xe8] sm:$0xff] }
 0x63e   : > { %v8683_v34 = vsel %vm2444_vm6, %v16311_v54, %v8415_v61  ;;  %v10469_v39 = vpack.c.bf16 %v10448_v23, %v10447_v0 }
 0x640   : > { %v16439_v42 = vpop.permute.xlu1 %9873 }
 0x641   : > { %v8498_v15 = vpop.permute.xlu0 %8497  ;;  %v16500_v61 = vpop.f32.mrf.mxu1 }
 0x642   : > { %v8769_v36 = vsel %vm2542_vm8, %v8718_v53, %v8498_v15  ;;  %v10432_v53 = vld [vmem:[%s17389_s11 + $0x68] sm:$0xff] }
 0x643   : > { %9044 = vmatprep.mubr.bf16.mxu0 %v8769_v36  ;;  %v10461_v9 = vpack.c.bf16 %v10432_v53, %v10431_v25  ;;  %v10439_v53 = vld [vmem:[%s17389_s11 + $0xa0] sm:$0xff] }
 0x644   : > { %9045 = vmatmul.mubr.bf16.gmra.mxu0 %v8625_v12  ;;  %v16447_v32 = vpop.permute.xlu1 %9985 }
 0x645   : > { %v8452_v6 = vpop.permute.xlu0 %8451 }
 0x646   : > { %v8720_v19 = vsel %vm2493_vm7, %v8683_v34, %v8452_v6  ;;  %v10445_v6 = vld [vmem:[%s17389_s11 + $0xd0] sm:$0xff]  ;;  %v10446_v34 = vld [vmem:[%s17389_s11 + $0xd8] sm:$0xff] }
 0x647   : > { %v10468_v22 = vpack.c.bf16 %v10446_v34, %v10445_v6  ;;  %v10423_v6 = vld [vmem:[%s17389_s11 + $0x20] sm:$0xff]  ;;  %v10424_v34 = vld [vmem:[%s17389_s11 + $0x28] sm:$0xff] }
 0x648   : > { %v8328_v60 = vpop.permute.xlu1 %8327 }
 0x649   : > { %v8500_v55 = vpop.permute.xlu0 %8499 }
 0x64a   : > { %v8772_v62 = vsel %vm2542_vm8, %v8720_v19, %v8500_v55  ;;  %v10429_v19 = vld [vmem:[%s17389_s11 + $0x50] sm:$0xff]  ;;  %v10430_v55 = vld [vmem:[%s17389_s11 + $0x58] sm:$0xff] }
 0x64b   : > { %9052 = vmatprep.mubr.bf16.mxu0 %v8772_v62  ;;  %v10460_v62 = vpack.c.bf16 %v10430_v55, %v10429_v19  ;;  %v10457_v19 = vpack.c.bf16 %v10424_v34, %v10423_v6 }
 0x64c   : > { %9053 = vmatmul.mubr.bf16.gmra.mxu0 %v8628_v43  ;;  %v8365_v54 = vpop.permute.xlu1 %8364 }
 0x64d   : > { %v8417_v51 = vpop.permute.xlu0 %8416 }
 0x64e   : > { %v8686_v52 = vsel %vm2444_vm6, %v12147_v33, %v8417_v51 }
 0x64f   : > { %v8926_v21 = vpop.f32.mrf.mxu0 }
 0x650   : > { %v8202_v28 = vpop.permute.xlu1 %8201  ;;  %v10443_v21 = vld [vmem:[%s17389_s11 + $0xc0] sm:$0xff] }
 0x651   : > { %v8542_v41 = vsel %vm2444_vm6, %v16280_v31, %v8202_v28  ;;  %v8928_v50 = vpop.f32.mrf.mxu0  ;;  %v8454_v5 = vpop.permute.xlu0 %8453  ;;  %v10450_v31 = vld [vmem:[%s17389_s11 + $0xf8] sm:$0xff] }
 0x652   : > { %v8722_v30 = vsel %vm2493_vm7, %v8686_v52, %v8454_v5  ;;  %v8578_v2 = vsel %vm2493_vm7, %v8542_v41, %v8328_v60  ;;  %v10470_v3 = vpack.c.bf16 %v10450_v31, %v10449_v26  ;;  %v16515_v60 = vpop.f32.mrf.mxu1  ;;  %v10444_v52 = vld [vmem:[%s17389_s11 + $0xc8] sm:$0xff] }
 0x653   : > { %v8929_v48 = vpop.f32.mrf.mxu0  ;;  %v8631_v20 = vsel %vm2542_vm8, %v8578_v2, %v8365_v54  ;;  %v10467_v50 = vpack.c.bf16 %v10444_v52, %v10443_v21  ;;  %v10428_v5 = vld [vmem:[%s17389_s11 + $0x48] sm:$0xff] }
 0x654   : > { %11295 = vmatprep.subr.bf16.mxu1 %v10470_v3  ;;  %v16531_v28 = vpop.f32.mrf.mxu1  ;;  %v17663_v48 = vld [vmem:[#allocation40_spill] sm:$0xff] }
 0x655   : > { %v8931_v57 = vpop.f32.mrf.mxu0  ;;  %v8502_v49 = vpop.permute.xlu0 %8501  ;;  %11296 = vmatpush3.bf16.msra.mxu1 %v10462_v10  ;;  %v10425_v3 = vld [vmem:[%s17389_s11 + $0x30] sm:$0xff] }
 0x656   : > { %v8775_v1 = vsel %vm2542_vm8, %v8722_v30, %v8502_v49  ;;  %11297 = vmatprep.subr.bf16.mxu1 %v10469_v39  ;;  %v17664_v57 = vld [vmem:[#allocation29_spill] sm:$0xff]  ;;  %v16548_v26 = vpop.f32.mrf.mxu1  ;;  %v10458_v10 = vpack.c.bf16 %v10426_v58, %v10425_v3 }
 0x657   : > { %9060 = vmatprep.mubr.bf16.mxu0 %v8775_v1  ;;  %v10442_v1 = vld [vmem:[%s17389_s11 + $0xb8] sm:$0xff] }
 0x658   : > { %9061 = vmatmul.mubr.bf16.gmra.mxu0 %v8631_v20 }
 0x659   : > { %11298 = vmatpush3.bf16.msra.mxu1 %v10461_v9 }
 0x65a   : > { %11299 = vmatprep.subr.bf16.mxu1 %v10468_v22  ;;  %v16556_v0 = vpop.f32.mrf.mxu1 }
 0x65c   : > { %v8934_v15 = vpop.f32.mrf.mxu0  ;;  %v16571_v55 = vpop.f32.mrf.mxu1 }
 0x65d   : > { %v8935_v36 = vadd.f32 %v16492_v56, %v8934_v15  ;;  %11300 = vmatpush3.bf16.msra.mxu1 %v10460_v62  ;;  %v10440_v15 = vld [vmem:[%s17389_s11 + $0xa8] sm:$0xff] }
 0x65e   : > { %v8936_v12 = vpop.f32.mrf.mxu0  ;;  %11301 = vmatprep.subr.bf16.mxu1 %v10467_v50 }
 0x65f   : > { %v9112_v43 = vadd.f32 %v16348_v35, %v8935_v36  ;;  %v10427_v35 = vld [vmem:[%s17389_s11 + $0x40] sm:$0xff]  ;;  %v10465_v12 = vpack.c.bf16 %v10440_v15, %v10439_v53 }
 0x660   : > { %v8937_v11 = vpop.f32.mrf.mxu0  ;;  %v10459_v30 = vpack.c.bf16 %v10428_v5, %v10427_v35 }
 0x661   : > { %v8938_v54 = vadd.f32 %v16492_v56, %v8937_v11  ;;  %v9431_v2 = vadd.f32 %v9112_v43, %v17663_v48  ;;  %v10422_v48 = vld [vmem:[%s17389_s11 + $0x18] sm:$0xff] }
 0x662   : > { %v8939_v51 = vpop.f32.mrf.mxu0  ;;  %11302 = vmatpush3.bf16.msra.mxu1 %v10459_v30  ;;  %v10421_v30 = vld [vmem:[%s17389_s11 + $0x10] sm:$0xff] }
 0x663   : > { %v9115_v41 = vadd.f32 %v16355_v40, %v8938_v54  ;;  %v10441_v40 = vld [vmem:[%s17389_s11 + $0xb0] sm:$0xff] }
 0x664   : > { %v10466_v20 = vpack.c.bf16 %v10442_v1, %v10441_v40  ;;  %v17666_v40 = vld [vmem:[#allocation44_spill] sm:$0xff] }
 0x665   : > { %v9432_v49 = vadd.f32 %v9115_v41, %v17664_v57  ;;  %v10437_v41 = vld [vmem:[%s17389_s11 + $0x90] sm:$0xff]  ;;  %v17665_v57 = vld [vmem:[#allocation43_spill] sm:$0xff] }
 0x666   : > { %11303 = vmatprep.subr.bf16.mxu1 %v10466_v20  ;;  %v10456_v20 = vpack.c.bf16 %v10422_v48, %v10421_v30 }
 0x667   : > { %v9466_v31 = vpack.c.bf16 %v9432_v49, %v9431_v2  ;;  %11304 = vmatpush3.bf16.msra.mxu1 %v10458_v10  ;;  %v16598_v2 = vpop.f32.mrf.mxu1 }
 0x668   : > { %v8942_v37 = vpop.f32.mrf.mxu0  ;;  %11305 = vmatprep.subr.bf16.mxu1 %v10465_v12  ;;  %v10420_v12 = vld [vmem:[%s17389_s11 + $0x8] sm:$0xff] }
 0x669   : > { %v9491_v23 = vshrl.u32 %v9466_v31, 16  ;;  %v8943_v39 = vadd.f32 %v16492_v56, %v8942_v37  ;;  %v9494_v36 = vshll.u32 %v9466_v31, 16  ;;  %v16618_v6 = vpop.f32.mrf.mxu1 }
 0x66a   : > { %v8944_v25 = vpop.f32.mrf.mxu0 }
 0x66b   : > { %v9493_v9 = vrot.slane %v9491_v23, 7  ;;  %v9120_v11 = vadd.f32 %v16421_v29, %v8943_v39  ;;  %11306 = vmatpush3.bf16.msra.mxu1 %v10457_v19  ;;  %v10438_v29 = vld [vmem:[%s17389_s11 + $0x98] sm:$0xff]  ;;  %v10435_v23 = vld [vmem:[%s17389_s11 + $0x80] sm:$0xff]  ;;  %v10436_v39 = vld [vmem:[%s17389_s11 + $0x88] sm:$0xff] }
 0x66c   : > { %v8945_v22 = vpop.f32.mrf.mxu0  ;;  %v10464_v31 = vpack.c.bf16 %v10438_v29, %v10437_v41 }
 0x66d   : > { %v8946_v62 = vadd.f32 %v16492_v56, %v8945_v22  ;;  %v9496_v43 = vor.u32 %v9494_v36, %v9493_v9  ;;  %v9664_v54 = vsel %vm12074_vm2, %v9493_v9, 0  ;;  %v9433_v49 = vadd.f32 %v9120_v11, %v17665_v57  ;;  %v10419_v36 = vld [vmem:[%s17389_s11] sm:$0xff] }
 0x66e   : > { %v8947_v51 = vpop.f32.mrf.mxu0  ;;  %v9941_v35 = vrot.slane %v9664_v54, 1  ;;  %v9701_v5 = vshll.u32 %v9664_v54, 16  ;;  %11307 = vmatprep.subr.bf16.mxu1 %v10464_v31  ;;  %v10463_v9 = vpack.c.bf16 %v10436_v39, %v10435_v23  ;;  %v10455_v19 = vpack.c.bf16 %v10420_v12, %v10419_v36 }
 0x66f   : > { %v9123_v21 = vadd.f32 %v16431_v45, %v8946_v62  ;;  %v16580_v52 = vsel %vm12074_vm2, 0, %v9496_v43  ;;  %11308 = vmatpush3.bf16.msra.mxu1 %v10456_v20  ;;  %v17668_v20 = vld [vmem:[#allocation41_spill] sm:$0xff] }
 0x670   : > { %10018 = vrot.lane.b32.xlu1 %v16580_v52, %s11977_s15  ;;  %v9940_v50 = vrot.slane %v16580_v52, 1  ;;  %v9696_v45 = vshll.u32 %v16580_v52, 16  ;;  %v9694_v58 = vshrl.u32 %v16580_v52, 16  ;;  %v9703_v15 = vrot.slane %v9701_v5, 1  ;;  %11309 = vmatprep.subr.bf16.mxu1 %v10463_v9 }
 0x671   : > { %v9434_v1 = vadd.f32 %v9123_v21, %v17666_v40 }
 0x672   : > { %v9942_v3 = vsel %vm2097_vm3, %v9940_v50, %v9941_v35  ;;  %v9698_v37 = vrot.slane %v9696_v45, 1  ;;  %v16624_v51 = vpop.f32.mrf.mxu1 }
 0x673   : > { %v9467_v10 = vpack.c.bf16 %v9434_v1, %v9433_v49  ;;  %10066 = vrot.lane.b32.xlu0 %v9942_v3, %s11979_s21  ;;  %11310 = vmatpush3.bf16.msra.mxu1 %v10455_v19  ;;  %v17667_v1 = vld [vmem:[#allocation42_spill] sm:$0xff] }
 0x674   : > { %v8950_v25 = vpop.f32.mrf.mxu0  ;;  %9987 = vrot.lane.b32.xlu1 %v9942_v3, %s11978_s20  ;;  %v9699_v53 = vor.u32 %v9698_v37, %v9694_v58  ;;  %v16632_v5 = vpop.f32.mrf.mxu1 }
 0x675   : > { %v9498_v34 = vshrl.u32 %v9467_v10, 16  ;;  %v8951_v22 = vadd.f32 %v16492_v56, %v8950_v25  ;;  %v9501_v54 = vshll.u32 %v9467_v10, 16 }
 0x676   : > { %v8952_v11 = vpop.f32.mrf.mxu0  ;;  %v16622_v62 = vsel %vm1712_vm5, %v9699_v53, %v9703_v15  ;;  %v16649_v10 = vpop.f32.mrf.mxu1 }
 0x677   : > { %v9500_v43 = vrot.slane %v9498_v34, 7  ;;  %v9128_v41 = vadd.f32 %v16417_v44, %v8951_v22 }
 0x678   : > { %v8953_v21 = vpop.f32.mrf.mxu0  ;;  %9875 = vrot.lane.b32.xlu1 %v16622_v62, %s11979_s21  ;;  %v16658_v19 = vpop.f32.mrf.mxu1 }
 0x679   : > { %v8954_v29 = vadd.f32 %v16492_v56, %v8953_v21  ;;  %v9503_v50 = vor.u32 %v9501_v54, %v9500_v43  ;;  %v9665_v35 = vsel %vm12074_vm2, %v9500_v43, 0  ;;  %v9435_v31 = vadd.f32 %v9128_v41, %v17667_v1  ;;  %v17670_v1 = vld [vmem:[#allocation45_spill] sm:$0xff] }
 0x67a   : > { %v8955_v45 = vpop.f32.mrf.mxu0  ;;  %v9944_v57 = vrot.slane %v9665_v35, 1  ;;  %v9713_v40 = vshll.u32 %v9665_v35, 16 }
 0x67b   : > { %v9131_v30 = vadd.f32 %v16429_v4, %v8954_v29  ;;  %v16637_v48 = vsel %vm12074_vm2, 0, %v9503_v50 }
 0x67c   : > { %10099 = vrot.lane.b32.xlu0 %v16637_v48, %s11978_s20  ;;  %10020 = vrot.lane.b32.xlu1 %v16637_v48, %s11977_s15  ;;  %v9943_v44 = vrot.slane %v16637_v48, 1  ;;  %v9708_v49 = vshll.u32 %v16637_v48, 16  ;;  %v9706_v58 = vshrl.u32 %v16637_v48, 16  ;;  %v9715_v53 = vrot.slane %v9713_v40, 1  ;;  %v17669_v40 = vld [vmem:[#allocation2_spill] sm:$0xff] }
 0x67d   : > { %v9436_v4 = vadd.f32 %v9131_v30, %v17668_v20 }
 0x67e   : > { %v9945_v3 = vsel %vm2097_vm3, %v9943_v44, %v9944_v57  ;;  %v9710_v37 = vrot.slane %v9708_v49, 1 }
 0x67f   : > { %v9468_v23 = vpack.c.bf16 %v9436_v4, %v9435_v31  ;;  %11695 = vmatprep.mubr.msk.bf16.mxu0 %vm2444_vm6, %v9945_v3 }
 0x680   : > { %v8958_v39 = vpop.f32.mrf.mxu0  ;;  %10068 = vrot.lane.b32.xlu0 %v9945_v3, %s11979_s21  ;;  %9989 = vrot.lane.b32.xlu1 %v9945_v3, %s11978_s20  ;;  %v9711_v25 = vor.u32 %v9710_v37, %v9706_v58 }
 0x681   : > { %v9505_v15 = vshrl.u32 %v9468_v23, 16  ;;  %v8959_v9 = vadd.f32 %v16492_v56, %v8958_v39  ;;  %v9508_v22 = vshll.u32 %v9468_v23, 16 }
 0x682   : > { %v8960_v36 = vpop.f32.mrf.mxu0  ;;  %v16656_v12 = vsel %vm1712_vm5, %v9711_v25, %v9715_v53 }
 0x683   : > { %v9507_v34 = vrot.slane %v9505_v15, 7  ;;  %v9136_v54 = vadd.f32 %v16442_v46, %v8959_v9 }
 0x684   : > { %v8961_v11 = vpop.f32.mrf.mxu0  ;;  %10143 = vrot.lane.b32.xlu0 %v16656_v12, %s11977_s15  ;;  %9877 = vrot.lane.b32.xlu1 %v16656_v12, %s11979_s21 }
 0x685   : > { %v9666_v43 = vsel %vm12074_vm2, %v9507_v34, 0  ;;  %v8962_v21 = vadd.f32 %v16492_v56, %v8961_v11  ;;  %v9510_v29 = vor.u32 %v9508_v22, %v9507_v34 }
 0x686   : > { %v16668_v41 = vpop.f32.mrf.mxu1  ;;  %v8963_v50 = vpop.f32.mrf.mxu0  ;;  %v9947_v44 = vrot.slane %v9666_v43, 1  ;;  %v9725_v49 = vshll.u32 %v9666_v43, 16 }
 0x687   : > { %v9139_v35 = vadd.f32 %v16456_v14, %v8962_v21  ;;  %v16675_v30 = vsel %vm12074_vm2, 0, %v9510_v29  ;;  %v9437_v14 = vadd.f32 %v9136_v54, %v17669_v40 }
 0x688   : > { %v16671_v45 = vpop.f32.mrf.mxu1  ;;  %10101 = vrot.lane.b32.xlu0 %v16675_v30, %s11978_s20  ;;  %10022 = vrot.lane.b32.xlu1 %v16675_v30, %s11977_s15  ;;  %v9946_v46 = vrot.slane %v16675_v30, 1  ;;  %v9720_v57 = vshll.u32 %v16675_v30, 16  ;;  %v9718_v3 = vshrl.u32 %v16675_v30, 16  ;;  %v9727_v53 = vrot.slane %v9725_v49, 1 }
 0x689   : > { %v9438_v31 = vadd.f32 %v9139_v35, %v17670_v1 }
 0x68a   : > { %v16685_v20 = vpop.f32.mrf.mxu1  ;;  %v9948_v4 = vsel %vm2097_vm3, %v9946_v46, %v9947_v44  ;;  %v9722_v58 = vrot.slane %v9720_v57, 1 }
 0x68b   : > { %v9469_v37 = vpack.c.bf16 %v9438_v31, %v9437_v14  ;;  %11696 = vmatmul.mubr.msk.bf16.vlgmr.msra.gmra.mxu0 %vm2444_vm6, %v9948_v4 }
 0x68c   : > { %v16690_v23 = vpop.f32.mrf.mxu1  ;;  %v8966_v39 = vpop.f32.mrf.mxu0  ;;  %10070 = vrot.lane.b32.xlu0 %v9948_v4, %s11979_s21  ;;  %9991 = vrot.lane.b32.xlu1 %v9948_v4, %s11978_s20  ;;  %v9723_v25 = vor.u32 %v9722_v58, %v9718_v3  ;;  %v17671_v4 = vld [vmem:[#allocation46_spill] sm:$0xff]  ;;  %v17672_v58 = vld [vmem:[#allocation47_spill] sm:$0xff] }
 0x68d   : > { %v9512_v15 = vshrl.u32 %v9469_v37, 16  ;;  %v8967_v9 = vadd.f32 %v16492_v56, %v8966_v39  ;;  %v9515_v43 = vshll.u32 %v9469_v37, 16 }
 0x68e   : > { %v11689_v36 = vpop.f32.mrf.mxu1  ;;  %v8968_v34 = vpop.f32.mrf.mxu0  ;;  %v16696_v22 = vsel %vm1712_vm5, %v9723_v25, %v9727_v53 }
 0x68f   : > { %v9514_v11 = vrot.slane %v9512_v15, 7  ;;  %v9144_v29 = vadd.f32 %v16433_v13, %v8967_v9 }
 0x690   : > { %v16698_v54 = vpop.f32.mrf.mxu1  ;;  %v8969_v21 = vpop.f32.mrf.mxu0  ;;  %10145 = vrot.lane.b32.xlu0 %v16696_v22, %s11977_s15  ;;  %9879 = vrot.lane.b32.xlu1 %v16696_v22, %s11979_s21 }
 0x691   : > { %v8970_v50 = vadd.f32 %v16492_v56, %v8969_v21  ;;  %v9517_v35 = vor.u32 %v9515_v43, %v9514_v11  ;;  %v9667_v44 = vsel %vm12074_vm2, %v9514_v11, 0  ;;  %v9439_v3 = vadd.f32 %v9144_v29, %v17671_v4 }
 0x692   : > { %v11690_v46 = vpop.f32.mrf.mxu1  ;;  %v8971_v57 = vpop.f32.mrf.mxu0  ;;  %v9950_v14 = vrot.slane %v9667_v44, 1  ;;  %v9737_v31 = vshll.u32 %v9667_v44, 16 }
 0x693   : > { %v9147_v49 = vadd.f32 %v16449_v16, %v8970_v50  ;;  %v16711_v40 = vsel %vm12074_vm2, 0, %v9517_v35 }
 0x694   : > { %10103 = vrot.lane.b32.xlu0 %v16711_v40, %s11978_s20  ;;  %10024 = vrot.lane.b32.xlu1 %v16711_v40, %s11977_s15  ;;  %v9949_v13 = vrot.slane %v16711_v40, 1  ;;  %v9732_v1 = vshll.u32 %v16711_v40, 16  ;;  %v9730_v39 = vshrl.u32 %v16711_v40, 16  ;;  %v9739_v36 = vrot.slane %v9737_v31, 1 }
 0x695   : > { %v9440_v16 = vadd.f32 %v9147_v49, %v17672_v58  ;;  %v17673_v58 = vld [vmem:[#allocation3_spill] sm:$0xff] }
 0x696   : > { %v9951_v37 = vsel %vm2097_vm3, %v9949_v13, %v9950_v14  ;;  %v9734_v25 = vrot.slane %v9732_v1, 1 }
 0x697   : > { %v9470_v53 = vpack.c.bf16 %v9440_v16, %v9439_v3  ;;  %11699 = vmatprep.mubr.msk.bf16.mxu0 %vm2444_vm6, %v9951_v37 }
 0x698   : > { %v8974_v15 = vpop.f32.mrf.mxu0  ;;  %10072 = vrot.lane.b32.xlu0 %v9951_v37, %s11979_s21  ;;  %9993 = vrot.lane.b32.xlu1 %v9951_v37, %s11978_s20  ;;  %v9735_v9 = vor.u32 %v9734_v25, %v9730_v39  ;;  %v17674_v37 = vld [vmem:[#allocation39_spill] sm:$0xff] }
 0x699   : > { %v9519_v34 = vshrl.u32 %v9470_v53, 16  ;;  %v8975_v11 = vadd.f32 %v16492_v56, %v8974_v15  ;;  %v9522_v50 = vshll.u32 %v9470_v53, 16 }
 0x69a   : > { %v8976_v43 = vpop.f32.mrf.mxu0  ;;  %v16728_v21 = vsel %vm1712_vm5, %v9735_v9, %v9739_v36 }
 0x69b   : > { %v9521_v29 = vrot.slane %v9519_v34, 7  ;;  %v9152_v46 = vadd.f32 %v16463_v7, %v8975_v11 }
 0x69c   : > { %v8977_v35 = vpop.f32.mrf.mxu0  ;;  %10147 = vrot.lane.b32.xlu0 %v16728_v21, %s11977_s15  ;;  %9881 = vrot.lane.b32.xlu1 %v16728_v21, %s11979_s21 }
 0x69d   : > { %v9668_v44 = vsel %vm12074_vm2, %v9521_v29, 0  ;;  %v8978_v57 = vadd.f32 %v16492_v56, %v8977_v35  ;;  %v9524_v49 = vor.u32 %v9522_v50, %v9521_v29  ;;  %v9441_v16 = vadd.f32 %v9152_v46, %v17673_v58 }
 0x69e   : > { %v8979_v13 = vpop.f32.mrf.mxu0  ;;  %v9953_v4 = vrot.slane %v9668_v44, 1  ;;  %v9749_v3 = vshll.u32 %v9668_v44, 16 }
 0x69f   : > { %v9155_v14 = vadd.f32 %v16487_v63, %v8978_v57  ;;  %v16741_v1 = vsel %vm12074_vm2, 0, %v9524_v49 }
 0x6a0   : > { %10105 = vrot.lane.b32.xlu0 %v16741_v1, %s11978_s20  ;;  %10026 = vrot.lane.b32.xlu1 %v16741_v1, %s11977_s15  ;;  %v9952_v31 = vrot.slane %v16741_v1, 1  ;;  %v9744_v7 = vshll.u32 %v16741_v1, 16  ;;  %v9742_v25 = vshrl.u32 %v16741_v1, 16  ;;  %v9751_v34 = vrot.slane %v9749_v3, 1 }
 0x6a1   : > { %v9442_v63 = vadd.f32 %v9155_v14, %v17674_v37  ;;  %v17675_v37 = vld [vmem:[#allocation4_spill] sm:$0xff] }
 0x6a2   : > { %v9954_v39 = vsel %vm2097_vm3, %v9952_v31, %v9953_v4  ;;  %v9746_v53 = vrot.slane %v9744_v7, 1 }
 0x6a3   : > { %v9471_v15 = vpack.c.bf16 %v9442_v63, %v9441_v16  ;;  %11700 = vmatmul.mubr.msk.bf16.gmra.mxu0 %vm2444_vm6, %v9954_v39 }
 0x6a4   : > { %v8982_v9 = vpop.f32.mrf.mxu0  ;;  %10074 = vrot.lane.b32.xlu0 %v9954_v39, %s11979_s21  ;;  %9995 = vrot.lane.b32.xlu1 %v9954_v39, %s11978_s20  ;;  %v9747_v36 = vor.u32 %v9746_v53, %v9742_v25  ;;  %v17676_v39 = vld [vmem:[#allocation5_spill] sm:$0xff] }
 0x6a5   : > { %v9526_v11 = vshrl.u32 %v9471_v15, 16  ;;  %v8983_v43 = vadd.f32 %v16492_v56, %v8982_v9  ;;  %v9529_v44 = vshll.u32 %v9471_v15, 16 }
 0x6a6   : > { %v8984_v29 = vpop.f32.mrf.mxu0  ;;  %v16758_v50 = vsel %vm1712_vm5, %v9747_v36, %v9751_v34 }
 0x6a7   : > { %v9528_v35 = vrot.slane %v9526_v11, 7  ;;  %v9160_v57 = vadd.f32 %v16461_v47, %v8983_v43 }
 0x6a8   : > { %v8985_v46 = vpop.f32.mrf.mxu0  ;;  %10149 = vrot.lane.b32.xlu0 %v16758_v50, %s11977_s15  ;;  %9883 = vrot.lane.b32.xlu1 %v16758_v50, %s11979_s21 }
 0x6a9   : > { %v8986_v49 = vadd.f32 %v16492_v56, %v8985_v46  ;;  %v9531_v13 = vor.u32 %v9529_v44, %v9528_v35  ;;  %v9669_v14 = vsel %vm12074_vm2, %v9528_v35, 0  ;;  %v9443_v63 = vadd.f32 %v9160_v57, %v17675_v37 }
 0x6aa   : > { %v8987_v31 = vpop.f32.mrf.mxu0  ;;  %v9956_v3 = vrot.slane %v9669_v14, 1  ;;  %v9761_v16 = vshll.u32 %v9669_v14, 16 }
 0x6ab   : > { %v9163_v4 = vadd.f32 %v16470_v59, %v8986_v49  ;;  %v16771_v7 = vsel %vm12074_vm2, 0, %v9531_v13 }
 0x6ac   : > { %10107 = vrot.lane.b32.xlu0 %v16771_v7, %s11978_s20  ;;  %10028 = vrot.lane.b32.xlu1 %v16771_v7, %s11977_s15  ;;  %v9955_v47 = vrot.slane %v16771_v7, 1  ;;  %v9756_v58 = vshll.u32 %v16771_v7, 16  ;;  %v9754_v53 = vshrl.u32 %v16771_v7, 16  ;;  %v9763_v11 = vrot.slane %v9761_v16, 1 }
 0x6ad   : > { %v9444_v59 = vadd.f32 %v9163_v4, %v17676_v39  ;;  %v17677_v39 = vld [vmem:[#allocation7_spill] sm:$0xff] }
 0x6ae   : > { %v9957_v25 = vsel %vm2097_vm3, %v9955_v47, %v9956_v3  ;;  %v9758_v15 = vrot.slane %v9756_v58, 1 }
 0x6af   : > { %v9472_v9 = vpack.c.bf16 %v9444_v59, %v9443_v63  ;;  %11703 = vmatprep.mubr.msk.bf16.mxu0 %vm2444_vm6, %v9957_v25 }
 0x6b0   : > { %v8990_v36 = vpop.f32.mrf.mxu0  ;;  %10076 = vrot.lane.b32.xlu0 %v9957_v25, %s11979_s21  ;;  %9997 = vrot.lane.b32.xlu1 %v9957_v25, %s11978_s20  ;;  %v9759_v34 = vor.u32 %v9758_v15, %v9754_v53  ;;  %v17678_v25 = vld [vmem:[#allocation6_spill] sm:$0xff] }
 0x6b1   : > { %v9533_v43 = vshrl.u32 %v9472_v9, 16  ;;  %v8991_v29 = vadd.f32 %v16492_v56, %v8990_v36  ;;  %v9536_v57 = vshll.u32 %v9472_v9, 16 }
 0x6b2   : > { %v8992_v35 = vpop.f32.mrf.mxu0  ;;  %v16788_v44 = vsel %vm1712_vm5, %v9759_v34, %v9763_v11 }
 0x6b3   : > { %v9535_v46 = vrot.slane %v9533_v43, 7  ;;  %v9168_v14 = vadd.f32 %v16515_v60, %v8991_v29 }
 0x6b4   : > { %v8993_v49 = vpop.f32.mrf.mxu0  ;;  %10151 = vrot.lane.b32.xlu0 %v16788_v44, %s11977_s15  ;;  %9885 = vrot.lane.b32.xlu1 %v16788_v44, %s11979_s21 }
 0x6b5   : > { %v9670_v13 = vsel %vm12074_vm2, %v9535_v46, 0  ;;  %v8994_v31 = vadd.f32 %v16492_v56, %v8993_v49  ;;  %v9538_v4 = vor.u32 %v9536_v57, %v9535_v46  ;;  %v9445_v59 = vadd.f32 %v9168_v14, %v17677_v39 }
 0x6b6   : > { %v8995_v47 = vpop.f32.mrf.mxu0  ;;  %v9959_v37 = vrot.slane %v9670_v13, 1  ;;  %v9773_v63 = vshll.u32 %v9670_v13, 16 }
 0x6b7   : > { %v9171_v3 = vadd.f32 %v16548_v26, %v8994_v31  ;;  %v16801_v58 = vsel %vm12074_vm2, 0, %v9538_v4 }
 0x6b8   : > { %10109 = vrot.lane.b32.xlu0 %v16801_v58, %s11978_s20  ;;  %10030 = vrot.lane.b32.xlu1 %v16801_v58, %s11977_s15  ;;  %v9958_v16 = vrot.slane %v16801_v58, 1  ;;  %v9768_v60 = vshll.u32 %v16801_v58, 16  ;;  %v9766_v15 = vshrl.u32 %v16801_v58, 16  ;;  %v9775_v43 = vrot.slane %v9773_v63, 1 }
 0x6b9   : > { %v9446_v26 = vadd.f32 %v9171_v3, %v17678_v25  ;;  %v17679_v25 = vld [vmem:[#allocation9_spill] sm:$0xff] }
 0x6ba   : > { %v9960_v53 = vsel %vm2097_vm3, %v9958_v16, %v9959_v37  ;;  %v9770_v9 = vrot.slane %v9768_v60, 1 }
 0x6bb   : > { %v9473_v36 = vpack.c.bf16 %v9446_v26, %v9445_v59  ;;  %11704 = vmatmul.mubr.msk.bf16.gmra.mxu0 %vm2444_vm6, %v9960_v53 }
 0x6bc   : > { %v8998_v34 = vpop.f32.mrf.mxu0  ;;  %10078 = vrot.lane.b32.xlu0 %v9960_v53, %s11979_s21  ;;  %9999 = vrot.lane.b32.xlu1 %v9960_v53, %s11978_s20  ;;  %v9771_v11 = vor.u32 %v9770_v9, %v9766_v15  ;;  %v17680_v53 = vld [vmem:[#allocation8_spill] sm:$0xff] }
 0x6bd   : > { %v9540_v29 = vshrl.u32 %v9473_v36, 16  ;;  %v8999_v35 = vadd.f32 %v16492_v56, %v8998_v34  ;;  %v9543_v13 = vshll.u32 %v9473_v36, 16 }
 0x6be   : > { %v9000_v46 = vpop.f32.mrf.mxu0  ;;  %v16818_v57 = vsel %vm1712_vm5, %v9771_v11, %v9775_v43 }
 0x6bf   : > { %v9542_v49 = vrot.slane %v9540_v29, 7  ;;  %v9176_v31 = vadd.f32 %v16500_v61, %v8999_v35 }
 0x6c0   : > { %v9001_v14 = vpop.f32.mrf.mxu0  ;;  %10153 = vrot.lane.b32.xlu0 %v16818_v57, %s11977_s15  ;;  %9887 = vrot.lane.b32.xlu1 %v16818_v57, %s11979_s21 }
 0x6c1   : > { %v9002_v4 = vadd.f32 %v16492_v56, %v9001_v14  ;;  %v9545_v47 = vor.u32 %v9543_v13, %v9542_v49  ;;  %v9671_v3 = vsel %vm12074_vm2, %v9542_v49, 0  ;;  %v9447_v26 = vadd.f32 %v9176_v31, %v17679_v25 }
 0x6c2   : > { %v9003_v16 = vpop.f32.mrf.mxu0  ;;  %v9962_v63 = vrot.slane %v9671_v3, 1  ;;  %v9785_v59 = vshll.u32 %v9671_v3, 16 }
 0x6c3   : > { %v9179_v37 = vadd.f32 %v16531_v28, %v9002_v4  ;;  %v16831_v60 = vsel %vm12074_vm2, 0, %v9545_v47 }
 0x6c4   : > { %10111 = vrot.lane.b32.xlu0 %v16831_v60, %s11978_s20  ;;  %10032 = vrot.lane.b32.xlu1 %v16831_v60, %s11977_s15  ;;  %v9961_v61 = vrot.slane %v16831_v60, 1  ;;  %v9780_v39 = vshll.u32 %v16831_v60, 16  ;;  %v9778_v9 = vshrl.u32 %v16831_v60, 16  ;;  %v9787_v29 = vrot.slane %v9785_v59, 1 }
 0x6c5   : > { %v9448_v28 = vadd.f32 %v9179_v37, %v17680_v53  ;;  %v17681_v53 = vld [vmem:[#allocation11_spill] sm:$0xff] }
 0x6c6   : > { %v9963_v15 = vsel %vm2097_vm3, %v9961_v61, %v9962_v63  ;;  %v9782_v36 = vrot.slane %v9780_v39, 1 }
 0x6c7   : > { %v9474_v34 = vpack.c.bf16 %v9448_v28, %v9447_v26  ;;  %11707 = vmatprep.mubr.msk.bf16.mxu0 %vm2444_vm6, %v9963_v15 }
 0x6c8   : > { %v9006_v11 = vpop.f32.mrf.mxu0  ;;  %10080 = vrot.lane.b32.xlu0 %v9963_v15, %s11979_s21  ;;  %10001 = vrot.lane.b32.xlu1 %v9963_v15, %s11978_s20  ;;  %v9783_v43 = vor.u32 %v9782_v36, %v9778_v9  ;;  %v17682_v15 = vld [vmem:[#allocation10_spill] sm:$0xff] }
 0x6c9   : > { %v9547_v35 = vshrl.u32 %v9474_v34, 16  ;;  %v9007_v46 = vadd.f32 %v16492_v56, %v9006_v11  ;;  %v9550_v31 = vshll.u32 %v9474_v34, 16 }
 0x6ca   : > { %v9008_v49 = vpop.f32.mrf.mxu0  ;;  %v16848_v13 = vsel %vm1712_vm5, %v9783_v43, %v9787_v29 }
 0x6cb   : > { %v9549_v14 = vrot.slane %v9547_v35, 7  ;;  %v9184_v3 = vadd.f32 %v16571_v55, %v9007_v46 }
 0x6cc   : > { %v9009_v4 = vpop.f32.mrf.mxu0  ;;  %10155 = vrot.lane.b32.xlu0 %v16848_v13, %s11977_s15  ;;  %9889 = vrot.lane.b32.xlu1 %v16848_v13, %s11979_s21 }
 0x6cd   : > { %v9672_v47 = vsel %vm12074_vm2, %v9549_v14, 0  ;;  %v9010_v16 = vadd.f32 %v16492_v56, %v9009_v4  ;;  %v9552_v37 = vor.u32 %v9550_v31, %v9549_v14  ;;  %v9449_v28 = vadd.f32 %v9184_v3, %v17681_v53 }
 0x6ce   : > { %v9011_v61 = vpop.f32.mrf.mxu0  ;;  %v9965_v25 = vrot.slane %v9672_v47, 1  ;;  %v9797_v26 = vshll.u32 %v9672_v47, 16 }
 0x6cf   : > { %v9187_v63 = vadd.f32 %v16618_v6, %v9010_v16  ;;  %v16861_v39 = vsel %vm12074_vm2, 0, %v9552_v37 }
 0x6d0   : > { %10113 = vrot.lane.b32.xlu0 %v16861_v39, %s11978_s20  ;;  %10034 = vrot.lane.b32.xlu1 %v16861_v39, %s11977_s15  ;;  %v9964_v59 = vrot.slane %v16861_v39, 1  ;;  %v9792_v55 = vshll.u32 %v16861_v39, 16  ;;  %v9790_v36 = vshrl.u32 %v16861_v39, 16  ;;  %v9799_v35 = vrot.slane %v9797_v26, 1 }
 0x6d1   : > { %v9450_v6 = vadd.f32 %v9187_v63, %v17682_v15  ;;  %v17683_v15 = vld [vmem:[#allocation13_spill] sm:$0xff] }
 0x6d2   : > { %v9966_v9 = vsel %vm2097_vm3, %v9964_v59, %v9965_v25  ;;  %v9794_v34 = vrot.slane %v9792_v55, 1 }
 0x6d3   : > { %v9475_v11 = vpack.c.bf16 %v9450_v6, %v9449_v28  ;;  %11708 = vmatmul.mubr.msk.bf16.gmra.mxu0 %vm2444_vm6, %v9966_v9 }
 0x6d4   : > { %v9014_v43 = vpop.f32.mrf.mxu0  ;;  %10082 = vrot.lane.b32.xlu0 %v9966_v9, %s11979_s21  ;;  %10003 = vrot.lane.b32.xlu1 %v9966_v9, %s11978_s20  ;;  %v9795_v29 = vor.u32 %v9794_v34, %v9790_v36  ;;  %v17684_v9 = vld [vmem:[#allocation12_spill] sm:$0xff] }
 0x6d5   : > { %v9554_v46 = vshrl.u32 %v9475_v11, 16  ;;  %v9015_v49 = vadd.f32 %v16492_v56, %v9014_v43  ;;  %v9557_v47 = vshll.u32 %v9475_v11, 16 }
 0x6d6   : > { %v9016_v14 = vpop.f32.mrf.mxu0  ;;  %v16878_v31 = vsel %vm1712_vm5, %v9795_v29, %v9799_v35 }
 0x6d7   : > { %v9556_v4 = vrot.slane %v9554_v46, 7  ;;  %v9192_v16 = vadd.f32 %v16556_v0, %v9015_v49 }
 0x6d8   : > { %v9017_v3 = vpop.f32.mrf.mxu0  ;;  %10157 = vrot.lane.b32.xlu0 %v16878_v31, %s11977_s15  ;;  %9891 = vrot.lane.b32.xlu1 %v16878_v31, %s11979_s21 }
 0x6d9   : > { %v9018_v37 = vadd.f32 %v16492_v56, %v9017_v3  ;;  %v9559_v61 = vor.u32 %v9557_v47, %v9556_v4  ;;  %v9673_v63 = vsel %vm12074_vm2, %v9556_v4, 0  ;;  %v9451_v6 = vadd.f32 %v9192_v16, %v17683_v15 }
 0x6da   : > { %v9019_v59 = vpop.f32.mrf.mxu0  ;;  %v9968_v26 = vrot.slane %v9673_v63, 1  ;;  %v9809_v28 = vshll.u32 %v9673_v63, 16 }
 0x6db   : > { %v9195_v25 = vadd.f32 %v16598_v2, %v9018_v37  ;;  %v16891_v55 = vsel %vm12074_vm2, 0, %v9559_v61 }
 0x6dc   : > { %10115 = vrot.lane.b32.xlu0 %v16891_v55, %s11978_s20  ;;  %10036 = vrot.lane.b32.xlu1 %v16891_v55, %s11977_s15  ;;  %v9967_v0 = vrot.slane %v16891_v55, 1  ;;  %v9804_v53 = vshll.u32 %v16891_v55, 16  ;;  %v9802_v34 = vshrl.u32 %v16891_v55, 16  ;;  %v9811_v46 = vrot.slane %v9809_v28, 1 }
 0x6dd   : > { %v9452_v2 = vadd.f32 %v9195_v25, %v17684_v9 }
 0x6de   : > { %v9969_v36 = vsel %vm2097_vm3, %v9967_v0, %v9968_v26  ;;  %v9806_v11 = vrot.slane %v9804_v53, 1 }
 0x6df   : > { %v9476_v43 = vpack.c.bf16 %v9452_v2, %v9451_v6  ;;  %11711 = vmatprep.mubr.msk.bf16.mxu0 %vm2444_vm6, %v9969_v36 }
 0x6e0   : > { %v9022_v29 = vpop.f32.mrf.mxu0  ;;  %10084 = vrot.lane.b32.xlu0 %v9969_v36, %s11979_s21  ;;  %10005 = vrot.lane.b32.xlu1 %v9969_v36, %s11978_s20  ;;  %v9807_v35 = vor.u32 %v9806_v11, %v9802_v34 }
 0x6e1   : > { %v9561_v49 = vshrl.u32 %v9476_v43, 16  ;;  %v9023_v14 = vadd.f32 %v16492_v56, %v9022_v29  ;;  %v9564_v37 = vshll.u32 %v9476_v43, 16 }
 0x6e2   : > { %v9024_v4 = vpop.f32.mrf.mxu0  ;;  %v16907_v47 = vpop.permute.xlu1 %10018  ;;  %v16910_v3 = vsel %vm1712_vm5, %v9807_v35, %v9811_v46 }
 0x6e3   : > { %v9563_v16 = vrot.slane %v9561_v49, 7  ;;  %v9200_v59 = vadd.f32 %v16632_v5, %v9023_v14 }
 0x6e4   : > { %v9025_v61 = vpop.f32.mrf.mxu0  ;;  %10159 = vrot.lane.b32.xlu0 %v16910_v3, %s11977_s15  ;;  %9893 = vrot.lane.b32.xlu1 %v16910_v3, %s11979_s21 }
 0x6e5   : > { %v9674_v63 = vsel %vm12074_vm2, %v9563_v16, 0  ;;  %v9026_v25 = vadd.f32 %v16492_v56, %v9025_v61  ;;  %v9566_v0 = vor.u32 %v9564_v37, %v9563_v16  ;;  %v9453_v36 = vadd.f32 %v9200_v59, %v15116_v24  ;;  %v10067_v34 = vpop.permute.xlu0 %10066 }
 0x6e6   : > { %v9027_v26 = vpop.f32.mrf.mxu0  ;;  %v16920_v53 = vpop.permute.xlu1 %9987  ;;  %v9971_v6 = vrot.slane %v9674_v63, 1  ;;  %v9821_v2 = vshll.u32 %v9674_v63, 16 }
 0x6e7   : > { %v9203_v28 = vadd.f32 %v16658_v19, %v9026_v25  ;;  %v16925_v15 = vsel %vm12074_vm2, 0, %v9566_v0 }
 0x6e8   : > { %10117 = vrot.lane.b32.xlu0 %v16925_v15, %s11978_s20  ;;  %10038 = vrot.lane.b32.xlu1 %v16925_v15, %s11977_s15  ;;  %v9970_v5 = vrot.slane %v16925_v15, 1  ;;  %v9816_v9 = vshll.u32 %v16925_v15, 16  ;;  %v9814_v29 = vshrl.u32 %v16925_v15, 16  ;;  %v9823_v24 = vrot.slane %v9821_v2, 1 }
 0x6e9   : > { %v9454_v19 = vadd.f32 %v9203_v28, %v15121_v17 }
 0x6ea   : > { %v16935_v11 = vpop.permute.xlu1 %9875  ;;  %v9972_v43 = vsel %vm2097_vm3, %v9970_v5, %v9971_v6  ;;  %v9818_v35 = vrot.slane %v9816_v9, 1  ;;  %v10180_v9 = vsel %vm2444_vm6, %v12090_v8, %v16439_v42 }
 0x6eb   : > { %v9477_v46 = vpack.c.bf16 %v9454_v19, %v9453_v36  ;;  %11712 = vmatmul.mubr.msk.bf16.gmra.mxu0 %vm2444_vm6, %v9972_v43 }
 0x6ec   : > { %v9030_v49 = vpop.f32.mrf.mxu0  ;;  %10086 = vrot.lane.b32.xlu0 %v9972_v43, %s11979_s21  ;;  %10007 = vrot.lane.b32.xlu1 %v9972_v43, %s11978_s20  ;;  %v9819_v14 = vor.u32 %v9818_v35, %v9814_v29 }
 0x6ed   : > { %v9568_v4 = vshrl.u32 %v9477_v46, 16  ;;  %v9031_v17 = vadd.f32 %v16492_v56, %v9030_v49  ;;  %v9571_v59 = vshll.u32 %v9477_v46, 16  ;;  %v10293_v49 = vsel %vm2444_vm6, %v16622_v62, %v10067_v34 }
 0x6ee   : > { %v9032_v16 = vpop.f32.mrf.mxu0  ;;  %v10100_v37 = vpop.permute.xlu0 %10099  ;;  %v16944_v61 = vsel %vm1712_vm5, %v9819_v14, %v9823_v24  ;;  %v17685_v14 = vld [vmem:[#allocation15_spill] sm:$0xff] }
 0x6ef   : > { %v9570_v63 = vrot.slane %v9568_v4, 7  ;;  %v16946_v25 = vpop.permute.xlu1 %10020  ;;  %v9208_v26 = vadd.f32 %v16624_v51, %v9031_v17  ;;  %v17686_v4 = vld [vmem:[#allocation14_spill] sm:$0xff]  ;;  %v10340_v16 = vsel %vm2493_vm7, %v10293_v49, %v10100_v37 }
 0x6f0   : > { %v9033_v0 = vpop.f32.mrf.mxu0  ;;  %10161 = vrot.lane.b32.xlu0 %v16944_v61, %s11977_s15  ;;  %9895 = vrot.lane.b32.xlu1 %v16944_v61, %s11979_s21 }
 0x6f1   : > { %v9034_v28 = vadd.f32 %v16492_v56, %v9033_v0  ;;  %v9573_v5 = vor.u32 %v9571_v59, %v9570_v63  ;;  %v9675_v6 = vsel %vm12074_vm2, %v9570_v63, 0  ;;  %v9455_v24 = vadd.f32 %v9208_v26, %v17685_v14 }
 0x6f2   : > { %v9035_v2 = vpop.f32.mrf.mxu0  ;;  %v10069_v36 = vpop.permute.xlu0 %10068  ;;  %v9974_v35 = vrot.slane %v9675_v6, 1  ;;  %v9833_v46 = vshll.u32 %v9675_v6, 16 }
 0x6f3   : > { %v9211_v19 = vadd.f32 %v16649_v10, %v9034_v28  ;;  %v16960_v43 = vpop.permute.xlu1 %9989  ;;  %v16964_v29 = vsel %vm12074_vm2, 0, %v9573_v5  ;;  %v10212_v10 = vsel %vm2493_vm7, %v10180_v9, %v16447_v32 }
 0x6f4   : > { %10119 = vrot.lane.b32.xlu0 %v16964_v29, %s11978_s20  ;;  %10040 = vrot.lane.b32.xlu1 %v16964_v29, %s11977_s15  ;;  %v9973_v51 = vrot.slane %v16964_v29, 1  ;;  %v9828_v42 = vshll.u32 %v16964_v29, 16  ;;  %v9826_v0 = vshrl.u32 %v16964_v29, 16  ;;  %v9835_v37 = vrot.slane %v9833_v46, 1  ;;  %v17005_v46 = vld [vmem:[%s17388_s10] ss:$0 sm:$0xff] }
 0x6f5   : > { %v9456_v17 = vadd.f32 %v9211_v19, %v17686_v4  ;;  %v10244_v26 = vsel %vm2542_vm8, %v10212_v10, %v16907_v47 }
 0x6f6   : > { %v10144_v63 = vpop.permute.xlu0 %10143  ;;  %v9975_v59 = vsel %vm2097_vm3, %v9973_v51, %v9974_v35  ;;  %v9830_v28 = vrot.slane %v9828_v42, 1 }
 0x6f7   : > { %v9478_v5 = vpack.c.bf16 %v9456_v17, %v9455_v24  ;;  %v16981_v6 = vpop.permute.xlu1 %9877  ;;  %11715 = vmatprep.mubr.msk.bf16.mxu0 %vm2444_vm6, %v9975_v59  ;;  %v10372_v32 = vsel %vm2542_vm8, %v10340_v16, %v10144_v63 }
 0x6f8   : > { %v9038_v62 = vpop.f32.mrf.mxu0  ;;  %10088 = vrot.lane.b32.xlu0 %v9975_v59, %s11979_s21  ;;  %10009 = vrot.lane.b32.xlu1 %v9975_v59, %s11978_s20  ;;  %v9831_v34 = vor.u32 %v9830_v28, %v9826_v0 }
 0x6f9   : > { %v9575_v9 = vshrl.u32 %v9478_v5, 16  ;;  %v9039_v2 = vadd.f32 %v16492_v56, %v9038_v62  ;;  %10560 = vmatprep.mubr.bf16.mxu1 %v10372_v32  ;;  %v9578_v49 = vshll.u32 %v9478_v5, 16  ;;  %v10296_v62 = vsel %vm2444_vm6, %v16656_v12, %v10069_v36 }
 0x6fa   : > { %10561 = vmatmul.mubr.bf16.vlgmr.msra.gmra.mxu1 %v10244_v26  ;;  %v9040_v19 = vpop.f32.mrf.mxu0  ;;  %v10102_v51 = vpop.permute.xlu0 %10101  ;;  %v16991_v35 = vsel %vm1712_vm5, %v9831_v34, %v9835_v37  ;;  %v17687_v37 = vld [vmem:[#allocation17_spill] sm:$0xff] }
 0x6fb   : > { %v9577_v42 = vrot.slane %v9575_v9, 7  ;;  %v16993_v14 = vpop.permute.xlu1 %10022  ;;  %v9216_v47 = vadd.f32 %v16671_v45, %v9039_v2  ;;  %v10342_v9 = vsel %vm2493_vm7, %v10296_v62, %v10102_v51 }
 0x6fc   : > { %v9041_v24 = vpop.f32.mrf.mxu0  ;;  %10163 = vrot.lane.b32.xlu0 %v16991_v35, %s11977_s15  ;;  %9897 = vrot.lane.b32.xlu1 %v16991_v35, %s11979_s21 }
 0x6fd   : > { %v9676_v56 = vsel %vm12074_vm2, %v9577_v42, 0  ;;  %v9042_v10 = vadd.f32 %v17005_v46, %v9041_v24  ;;  %v9580_v4 = vor.u32 %v9578_v49, %v9577_v42  ;;  %v9457_v34 = vadd.f32 %v9216_v47, %v15228_v27 }
 0x6fe   : > { %v9043_v17 = vpop.f32.mrf.mxu0  ;;  %v10071_v16 = vpop.permute.xlu0 %10070  ;;  %v9977_v28 = vrot.slane %v9676_v56, 1  ;;  %v9845_v32 = vshll.u32 %v9676_v56, 16 }
 0x6ff   : > { %v9219_v63 = vadd.f32 %v16690_v23, %v9042_v10  ;;  %v17009_v59 = vpop.permute.xlu1 %9991  ;;  %v17013_v0 = vsel %vm12074_vm2, 0, %v9580_v4  ;;  %v10182_v23 = vsel %vm2444_vm6, %v16580_v52, %v16935_v11 }
 0x700   : > { %10121 = vrot.lane.b32.xlu0 %v17013_v0, %s11978_s20  ;;  %10042 = vrot.lane.b32.xlu1 %v17013_v0, %s11977_s15  ;;  %v9976_v45 = vrot.slane %v17013_v0, 1  ;;  %v9840_v5 = vshll.u32 %v17013_v0, 16  ;;  %v9838_v42 = vshrl.u32 %v17013_v0, 16  ;;  %v10214_v27 = vsel %vm2493_vm7, %v10182_v23, %v16920_v53 }
 0x701   : > { %v9458_v26 = vadd.f32 %v9219_v63, %v17687_v37  ;;  %v9847_v36 = vrot.slane %v9845_v32, 1  ;;  %v10247_v51 = vsel %vm2542_vm8, %v10214_v27, %v16946_v25  ;;  %v17689_v27 = vld [vmem:[#allocation19_spill] sm:$0xff] }
 0x702   : > { %v10146_v2 = vpop.permute.xlu0 %10145  ;;  %v9978_v19 = vsel %vm2097_vm3, %v9976_v45, %v9977_v28  ;;  %v9842_v49 = vrot.slane %v9840_v5, 1 }
 0x703   : > { %v9479_v24 = vpack.c.bf16 %v9458_v26, %v9457_v34  ;;  %v17031_v56 = vpop.permute.xlu1 %9879  ;;  %11716 = vmatmul.mubr.msk.bf16.gmra.mxu0 %vm2444_vm6, %v9978_v19  ;;  %v10375_v52 = vsel %vm2542_vm8, %v10342_v9, %v10146_v2  ;;  %v10184_v26 = vsel %vm2444_vm6, %v16637_v48, %v16981_v6 }
 0x704   : > { %v9046_v12 = vpop.f32.mrf.mxu0  ;;  %10090 = vrot.lane.b32.xlu0 %v9978_v19, %s11979_s21  ;;  %10011 = vrot.lane.b32.xlu1 %v9978_v19, %s11978_s20  ;;  %v9843_v11 = vor.u32 %v9842_v49, %v9838_v42 }
 0x705   : > { %v9582_v47 = vshrl.u32 %v9479_v24, 16  ;;  %v9047_v10 = vadd.f32 %v17005_v46, %v9046_v12  ;;  %10568 = vmatprep.mubr.bf16.mxu1 %v10375_v52  ;;  %v9585_v45 = vshll.u32 %v9479_v24, 16  ;;  %v17688_v24 = vld [vmem:[#allocation16_spill] sm:$0xff] }
 0x706   : > { %10569 = vmatmul.mubr.bf16.gmra.mxu1 %v10247_v51  ;;  %v9048_v4 = vpop.f32.mrf.mxu0  ;;  %v10104_v17 = vpop.permute.xlu0 %10103  ;;  %v17043_v63 = vsel %vm1712_vm5, %v9843_v11, %v9847_v36 }
 0x707   : > { %v9584_v53 = vrot.slane %v9582_v47, 7  ;;  %v17045_v28 = vpop.permute.xlu1 %10024  ;;  %v9224_v25 = vadd.f32 %v16668_v41, %v9047_v10 }
 0x708   : > { %v9049_v5 = vpop.f32.mrf.mxu0  ;;  %10165 = vrot.lane.b32.xlu0 %v17043_v63, %s11977_s15  ;;  %9899 = vrot.lane.b32.xlu1 %v17043_v63, %s11979_s21 }
 0x709   : > { %v9050_v32 = vadd.f32 %v17005_v46, %v9049_v5  ;;  %v9587_v23 = vor.u32 %v9585_v45, %v9584_v53  ;;  %v9677_v62 = vsel %vm12074_vm2, %v9584_v53, 0  ;;  %v9459_v52 = vadd.f32 %v9224_v25, %v17688_v24  ;;  %v17691_v24 = vld [vmem:[#allocation21_spill] sm:$0xff] }
 0x70a   : > { %v9051_v34 = vpop.f32.mrf.mxu0  ;;  %v17055_v37 = vpop.permute.xlu0 %10072  ;;  %v9980_v49 = vrot.slane %v9677_v62, 1  ;;  %v9857_v6 = vshll.u32 %v9677_v62, 16 }
 0x70b   : > { %v9227_v9 = vadd.f32 %v16685_v20, %v9050_v32  ;;  %v17061_v2 = vpop.permute.xlu1 %9993  ;;  %v17065_v41 = vsel %vm12074_vm2, 0, %v9587_v23  ;;  %v10299_v20 = vsel %vm2444_vm6, %v16696_v22, %v10071_v16  ;;  %v10216_v16 = vsel %vm2493_vm7, %v10184_v26, %v16960_v43 }
 0x70c   : > { %v9054_v19 = vpop.f32.mrf.mxu0  ;;  %10123 = vrot.lane.b32.xlu0 %v17065_v41, %s11978_s20  ;;  %10044 = vrot.lane.b32.xlu1 %v17065_v41, %s11977_s15  ;;  %v9979_v42 = vrot.slane %v17065_v41, 1  ;;  %v9852_v48 = vshll.u32 %v17065_v41, 16  ;;  %v10344_v36 = vsel %vm2493_vm7, %v10299_v20, %v10104_v17  ;;  %v9850_v4 = vshrl.u32 %v17065_v41, 16 }
 0x70d   : > { %v9460_v12 = vadd.f32 %v9227_v9, %v17689_v27  ;;  %v9055_v11 = vadd.f32 %v17005_v46, %v9054_v19  ;;  %v9859_v32 = vrot.slane %v9857_v6, 1  ;;  %v10250_v23 = vsel %vm2542_vm8, %v10216_v16, %v16993_v14  ;;  %v9234_v19 = vpop.f32.mrf.mxu1  ;;  %v17690_v14 = vld [vmem:[#allocation18_spill] sm:$0xff] }
 0x70e   : > { %v9056_v51 = vpop.f32.mrf.mxu0  ;;  %v10148_v47 = vpop.permute.xlu0 %10147  ;;  %v9981_v10 = vsel %vm2097_vm3, %v9979_v42, %v9980_v49  ;;  %v9854_v53 = vrot.slane %v9852_v48, 1 }
 0x70f   : > { %v9480_v45 = vpack.c.bf16 %v9460_v12, %v9459_v52  ;;  %v17081_v5 = vpop.permute.xlu1 %9881  ;;  %11719 = vmatprep.mubr.msk.bf16.mxu0 %vm2444_vm6, %v9981_v10  ;;  %v10378_v22 = vsel %vm2542_vm8, %v10344_v36, %v10148_v47  ;;  %v9232_v34 = vadd.f32 %v16698_v54, %v9055_v11  ;;  %v10186_v11 = vsel %vm2444_vm6, %v16675_v30, %v17031_v56 }
 0x710   : > { %v9057_v25 = vpop.f32.mrf.mxu0  ;;  %10092 = vrot.lane.b32.xlu0 %v9981_v10, %s11979_s21  ;;  %10013 = vrot.lane.b32.xlu1 %v9981_v10, %s11978_s20  ;;  %v9855_v17 = vor.u32 %v9854_v53, %v9850_v4  ;;  %v10302_v56 = vsel %vm2444_vm6, %v16728_v21, %v17055_v37 }
 0x711   : > { %v9589_v62 = vshrl.u32 %v9480_v45, 16  ;;  %v9058_v9 = vadd.f32 %v17005_v46, %v9057_v25  ;;  %10576 = vmatprep.mubr.bf16.mxu1 %v10378_v22  ;;  %v9592_v48 = vshll.u32 %v9480_v45, 16  ;;  %v9461_v46 = vadd.f32 %v9232_v34, %v17690_v14 }
 0x712   : > { %10577 = vmatmul.mubr.bf16.gmra.mxu1 %v10250_v23  ;;  %v9059_v42 = vpop.f32.mrf.mxu0  ;;  %v10106_v43 = vpop.permute.xlu0 %10105  ;;  %v17094_v26 = vsel %vm1712_vm5, %v9855_v17, %v9859_v32  ;;  %v10218_v34 = vsel %vm2493_vm7, %v10186_v11, %v17009_v59 }
 0x713   : > { %v9591_v49 = vrot.slane %v9589_v62, 7  ;;  %v9235_v20 = vadd.f32 %v9234_v19, %v9058_v9  ;;  %v17096_v6 = vpop.permute.xlu1 %10026  ;;  %v10346_v16 = vsel %vm2493_vm7, %v10302_v56, %v10106_v43  ;;  %v10253_v37 = vsel %vm2542_vm8, %v10218_v34, %v17045_v28 }
 0x714   : > { %10167 = vrot.lane.b32.xlu0 %v17094_v26, %s11977_s15  ;;  %9901 = vrot.lane.b32.xlu1 %v17094_v26, %s11979_s21 }
 0x715   : > { %v9678_v54 = vsel %vm12074_vm2, %v9591_v49, 0  ;;  %v9462_v52 = vadd.f32 %v9235_v20, %v17691_v24  ;;  %v9594_v27 = vor.u32 %v9592_v48, %v9591_v49 }
 0x716   : > { %v10075_v12 = vpop.permute.xlu0 %10074  ;;  %v9983_v53 = vrot.slane %v9678_v54, 1  ;;  %v9869_v30 = vshll.u32 %v9678_v54, 16 }
 0x717   : > { %v9481_v36 = vpack.c.bf16 %v9462_v52, %v9461_v46  ;;  %v17109_v51 = vpop.permute.xlu1 %9995  ;;  %v17113_v47 = vsel %vm12074_vm2, 0, %v9594_v27 }
 0x718   : > { %v9062_v10 = vpop.f32.mrf.mxu0  ;;  %10125 = vrot.lane.b32.xlu0 %v17113_v47, %s11978_s20  ;;  %10046 = vrot.lane.b32.xlu1 %v17113_v47, %s11977_s15  ;;  %v9982_v4 = vrot.slane %v17113_v47, 1  ;;  %v9864_v45 = vshll.u32 %v17113_v47, 16  ;;  %v9862_v23 = vshrl.u32 %v17113_v47, 16  ;;  %v9871_v48 = vrot.slane %v9869_v30, 1 }
 0x719   : > { %v9596_v22 = vshrl.u32 %v9481_v36, 16  ;;  %v9599_v19 = vshll.u32 %v9481_v36, 16 }
 0x71a   : > { %v9064_v25 = vpop.f32.mrf.mxu0  ;;  %v10150_v17 = vpop.permute.xlu0 %10149  ;;  %v9984_v32 = vsel %vm2097_vm3, %v9982_v4, %v9983_v53  ;;  %v9866_v62 = vrot.slane %v9864_v45, 1  ;;  %v10188_v53 = vsel %vm2444_vm6, %v16711_v40, %v17081_v5  ;;  %v10305_v45 = vsel %vm2444_vm6, %v16758_v50, %v10075_v12 }
 0x71b   : > { %v9598_v9 = vrot.slane %v9596_v22, 7  ;;  %v9884_v42 = vpop.permute.xlu1 %9883  ;;  %11720 = vmatmul.mubr.msk.bf16.gmra.mxu0 %vm2444_vm6, %v9984_v32  ;;  %v10381_v21 = vsel %vm2542_vm8, %v10346_v16, %v10150_v17  ;;  %v10220_v25 = vsel %vm2493_vm7, %v10188_v53, %v17061_v2 }
 0x71c   : > { %v9065_v43 = vpop.f32.mrf.mxu0  ;;  %10094 = vrot.lane.b32.xlu0 %v9984_v32, %s11979_s21  ;;  %10584 = vmatprep.mubr.bf16.mxu1 %v10381_v21  ;;  %v9867_v49 = vor.u32 %v9866_v62, %v9862_v23  ;;  %v10190_v34 = vsel %vm2444_vm6, %v16741_v1, %v9884_v42 }
 0x71d   : > { %v9601_v20 = vor.u32 %v9599_v19, %v9598_v9  ;;  %10585 = vmatmul.mubr.bf16.gmra.mxu1 %v10253_v37  ;;  %v9679_v59 = vsel %vm12074_vm2, %v9598_v9, 0  ;;  %v10222_v21 = vsel %vm2493_vm7, %v10190_v34, %v17109_v51 }
 0x71e   : > { %v9067_v54 = vpop.f32.mrf.mxu0  ;;  %v10108_v14 = vpop.permute.xlu0 %10107  ;;  %v17137_v46 = vsel %vm1712_vm5, %v9867_v49, %v9871_v48  ;;  %v10064_v27 = vrot.slane %v9679_v59, 1  ;;  %v10058_v56 = vshll.u32 %v9679_v59, 16 }
 0x71f   : > { %v9661_v24 = vsel %vm12074_vm2, 0, %v9601_v20  ;;  %v10029_v28 = vpop.permute.xlu1 %10028  ;;  %9903 = vrot.lane.b32.xlu1 %v17137_v46, %s11979_s21  ;;  %v10348_v22 = vsel %vm2493_vm7, %v10305_v45, %v10108_v14 }
 0x720   : > { %10169 = vrot.lane.b32.xlu0 %v17137_v46, %s11977_s15  ;;  %v10063_v52 = vrot.slane %v9661_v24, 1  ;;  %v10053_v11 = vshll.u32 %v9661_v24, 16  ;;  %v10051_v30 = vshrl.u32 %v9661_v24, 16  ;;  %v10060_v50 = vrot.slane %v10058_v56, 1 }
 0x721   : > { %v10259_v49 = vsel %vm2542_vm8, %v10222_v21, %v10029_v28 }
 0x722   : > { %v10077_v36 = vpop.permute.xlu0 %10076  ;;  %v10065_v10 = vsel %vm2097_vm3, %v10063_v52, %v10064_v27  ;;  %v10055_v38 = vrot.slane %v10053_v11, 1 }
 0x723   : > { %v9998_v4 = vpop.permute.xlu1 %9997  ;;  %11723 = vmatprep.mubr.msk.bf16.mxu0 %vm2444_vm6, %v10065_v10  ;;  %10015 = vrot.lane.b32.xlu1 %v9984_v32, %s11978_s20 }
 0x724   : > { %10127 = vrot.lane.b32.xlu0 %v9661_v24, %s11978_s20  ;;  %11724 = vmatmul.mubr.msk.bf16.gmra.mxu0 %vm2444_vm6, %v12118_v18  ;;  %v10056_v5 = vor.u32 %v10055_v38, %v10051_v30  ;;  %v10256_v18 = vsel %vm2542_vm8, %v10220_v25, %v17096_v6  ;;  %v10308_v6 = vsel %vm2444_vm6, %v16788_v44, %v10077_v36 }
 0x726   : > { %v10152_v16 = vpop.permute.xlu0 %10151  ;;  %v17165_v23 = vsel %vm1712_vm5, %v10056_v5, %v10060_v50 }
 0x727   : > { %v9886_v17 = vpop.permute.xlu1 %9885  ;;  %10048 = vrot.lane.b32.xlu1 %v9661_v24, %s11977_s15  ;;  %v10384_v40 = vsel %vm2542_vm8, %v10348_v22, %v10152_v16 }
 0x728   : > { %10096 = vrot.lane.b32.xlu0 %v10065_v10, %s11979_s21  ;;  %10592 = vmatprep.mubr.bf16.mxu1 %v10384_v40  ;;  %v10192_v48 = vsel %vm2444_vm6, %v16771_v7, %v9886_v17  ;;  %s11148_s21 = sshll.u32 %s17697_s25, 8 }
 0x729   : > { %10593 = vmatmul.mubr.bf16.gmra.mxu1 %v10256_v18  ;;  %v10224_v54 = vsel %vm2493_vm7, %v10192_v48, %v9998_v4  ;;  %s17272_s14 = scalar_lea.vmem %s17391_s13, %s11148_s21 }
 0x72a   : > { %v10110_v12 = vpop.permute.xlu0 %10109 }
 0x72b   : > { %v10031_v32 = vpop.permute.xlu1 %10030  ;;  %v10350_v9 = vsel %vm2493_vm7, %v10308_v6, %v10110_v12 }
 0x72c   : > { %10171 = vrot.lane.b32.xlu0 %v17165_v23, %s11977_s15  ;;  %v10262_v24 = vsel %vm2542_vm8, %v10224_v54, %v10031_v32 }
 0x72e   : > { %v10079_v2 = vpop.permute.xlu0 %10078 }
 0x72f   : > { %v10000_v62 = vpop.permute.xlu1 %9999  ;;  %v10311_v51 = vsel %vm2444_vm6, %v16818_v57, %v10079_v2 }
 0x730   : > { %10129 = vrot.lane.b32.xlu0 %v12090_v8, %s11978_s20 }
 0x732   : > { %v10154_v19 = vpop.permute.xlu0 %10153 }
 0x733   : > { %v9888_v37 = vpop.permute.xlu1 %9887  ;;  %v10387_v43 = vsel %vm2542_vm8, %v10350_v9, %v10154_v19 }
 0x734   : > { %10173 = vrot.lane.b32.xlu0 %v12147_v33, %s11977_s15  ;;  %10600 = vmatprep.mubr.bf16.mxu1 %v10387_v43  ;;  %v10194_v7 = vsel %vm2444_vm6, %v16801_v58, %v9888_v37 }
 0x735   : > { %10601 = vmatmul.mubr.bf16.gmra.mxu1 %v10259_v49  ;;  %v10226_v4 = vsel %vm2493_vm7, %v10194_v7, %v10000_v62 }
 0x736   : > { %v10112_v8 = vpop.permute.xlu0 %10111 }
 0x737   : > { %v10033_v1 = vpop.permute.xlu1 %10032  ;;  %v10352_v20 = vsel %vm2493_vm7, %v10311_v51, %v10112_v8 }
 0x738   : > { %v10265_v45 = vsel %vm2542_vm8, %v10226_v4, %v10033_v1 }
 0x73a   : > { %v10081_v42 = vpop.permute.xlu0 %10080 }
 0x73b   : > { %v10002_v44 = vpop.permute.xlu1 %10001  ;;  %v10314_v57 = vsel %vm2444_vm6, %v16848_v13, %v10081_v42 }
 0x73e   : > { %v10156_v59 = vpop.permute.xlu0 %10155 }
 0x73f   : > { %v9890_v14 = vpop.permute.xlu1 %9889  ;;  %v10390_v33 = vsel %vm2542_vm8, %v10352_v20, %v10156_v59 }
 0x740   : > { %10608 = vmatprep.mubr.bf16.mxu1 %v10390_v33  ;;  %v10196_v58 = vsel %vm2444_vm6, %v16831_v60, %v9890_v14 }
 0x741   : > { %10609 = vmatmul.mubr.bf16.gmra.mxu1 %v10262_v24  ;;  %v10228_v40 = vsel %vm2493_vm7, %v10196_v58, %v10002_v44 }
 0x742   : > { %v10114_v28 = vpop.permute.xlu0 %10113 }
 0x743   : > { %v10035_v52 = vpop.permute.xlu1 %10034  ;;  %v10354_v36 = vsel %vm2493_vm7, %v10314_v57, %v10114_v28 }
 0x744   : > { %v10268_v50 = vsel %vm2542_vm8, %v10228_v40, %v10035_v52 }
 0x746   : > { %v10083_v27 = vpop.permute.xlu0 %10082 }
 0x747   : > { %v10004_v11 = vpop.permute.xlu1 %10003  ;;  %v10317_v13 = vsel %vm2444_vm6, %v16878_v31, %v10083_v27 }
 0x74a   : > { %v10158_v10 = vpop.permute.xlu0 %10157 }
 0x74b   : > { %v9892_v38 = vpop.permute.xlu1 %9891  ;;  %v10393_v53 = vsel %vm2542_vm8, %v10354_v36, %v10158_v10 }
 0x74c   : > { %10616 = vmatprep.mubr.bf16.mxu1 %v10393_v53  ;;  %v10198_v60 = vsel %vm2444_vm6, %v16861_v39, %v9892_v38 }
 0x74d   : > { %10617 = vmatmul.mubr.bf16.gmra.mxu1 %v10265_v45  ;;  %v10230_v9 = vsel %vm2493_vm7, %v10198_v60, %v10004_v11 }
 0x74e   : > { %v10116_v30 = vpop.permute.xlu0 %10115 }
 0x74f   : > { %v10037_v56 = vpop.permute.xlu1 %10036  ;;  %v10356_v25 = vsel %vm2493_vm7, %v10317_v13, %v10116_v30 }
 0x750   : > { %v10271_v37 = vsel %vm2542_vm8, %v10230_v9, %v10037_v56 }
 0x752   : > { %v10085_v22 = vpop.permute.xlu0 %10084 }
 0x753   : > { %v10006_v16 = vpop.permute.xlu1 %10005  ;;  %v10320_v31 = vsel %vm2444_vm6, %v16910_v3, %v10085_v22 }
 0x756   : > { %v10160_v17 = vpop.permute.xlu0 %10159 }
 0x757   : > { %v9894_v5 = vpop.permute.xlu1 %9893  ;;  %v10396_v18 = vsel %vm2542_vm8, %v10356_v25, %v10160_v17 }
 0x758   : > { %10624 = vmatprep.mubr.bf16.mxu1 %v10396_v18  ;;  %v10200_v39 = vsel %vm2444_vm6, %v16891_v55, %v9894_v5 }
 0x759   : > { %10625 = vmatmul.mubr.bf16.gmra.mxu1 %v10268_v50  ;;  %v10232_v48 = vsel %vm2493_vm7, %v10200_v39, %v10006_v16  ;;  %v11697_v39 = vpop.f32.mrf.mxu0 }
 0x75a   : > { %v10118_v12 = vpop.permute.xlu0 %10117 }
 0x75b   : > { %v10039_v32 = vpop.permute.xlu1 %10038  ;;  %v10358_v34 = vsel %vm2493_vm7, %v10320_v31, %v10118_v12 }
 0x75c   : > { %v10274_v59 = vsel %vm2542_vm8, %v10232_v48, %v10039_v32 }
 0x75e   : > { %v10087_v2 = vpop.permute.xlu0 %10086 }
 0x75f   : > { %v10008_v62 = vpop.permute.xlu1 %10007  ;;  %v10323_v3 = vsel %vm2444_vm6, %v16944_v61, %v10087_v2 }
 0x762   : > { %v10162_v6 = vpop.permute.xlu0 %10161 }
 0x763   : > { %v9896_v19 = vpop.permute.xlu1 %9895  ;;  %v10399_v21 = vsel %vm2542_vm8, %v10358_v34, %v10162_v6 }
 0x764   : > { %10632 = vmatprep.mubr.bf16.mxu1 %v10399_v21  ;;  %v10202_v55 = vsel %vm2444_vm6, %v16925_v15, %v9896_v19 }
 0x765   : > { %10633 = vmatmul.mubr.bf16.gmra.mxu1 %v10271_v37  ;;  %v10234_v27 = vsel %vm2493_vm7, %v10202_v55, %v10008_v62 }
 0x766   : > { %v10120_v43 = vpop.permute.xlu0 %10119 }
 0x767   : > { %v10041_v49 = vpop.permute.xlu1 %10040  ;;  %v10360_v42 = vsel %vm2493_vm7, %v10323_v3, %v10120_v43 }
 0x768   : > { %v10277_v7 = vsel %vm2542_vm8, %v10234_v27, %v10041_v49 }
 0x76a   : > { %v10089_v8 = vpop.permute.xlu0 %10088 }
 0x76b   : > { %v10010_v1 = vpop.permute.xlu1 %10009  ;;  %v10326_v61 = vsel %vm2444_vm6, %v16991_v35, %v10089_v8 }
 0x76e   : > { %v10164_v44 = vpop.permute.xlu0 %10163 }
 0x76f   : > { %v9898_v51 = vpop.permute.xlu1 %9897  ;;  %v10402_v20 = vsel %vm2542_vm8, %v10360_v42, %v10164_v44  ;;  %v10723_v42 = vpop.f32.mrf.mxu0 }
 0x770   : > { %10640 = vmatprep.mubr.bf16.mxu1 %v10402_v20  ;;  %v10204_v15 = vsel %vm2444_vm6, %v16964_v29, %v9898_v51 }
 0x771   : > { %10641 = vmatmul.mubr.bf16.gmra.mxu1 %v10274_v59  ;;  %v10236_v45 = vsel %vm2493_vm7, %v10204_v15, %v10010_v1  ;;  %v11698_v20 = vpop.f32.mrf.mxu0 }
 0x772   : > { %v10122_v54 = vpop.permute.xlu0 %10121 }
 0x773   : > { %v10043_v14 = vpop.permute.xlu1 %10042  ;;  %v10362_v28 = vsel %vm2493_vm7, %v10326_v61, %v10122_v54 }
 0x774   : > { %v10280_v56 = vsel %vm2542_vm8, %v10236_v45, %v10043_v14 }
 0x776   : > { %v10091_v33 = vpop.permute.xlu0 %10090 }
 0x777   : > { %v10012_v24 = vpop.permute.xlu1 %10011  ;;  %v10329_v35 = vsel %vm2444_vm6, %v17043_v63, %v10091_v33 }
 0x77a   : > { %v10166_v52 = vpop.permute.xlu0 %10165 }
 0x77b   : > { %v10405_v11 = vsel %vm2542_vm8, %v10362_v28, %v10166_v52  ;;  %v9900_v57 = vpop.permute.xlu1 %9899 }
 0x77c   : > { %10648 = vmatprep.mubr.bf16.mxu1 %v10405_v11  ;;  %v10206_v29 = vsel %vm2444_vm6, %v17013_v0, %v9900_v57 }
 0x77d   : > { %10649 = vmatmul.mubr.bf16.gmra.mxu1 %v10277_v7  ;;  %v10238_v40 = vsel %vm2493_vm7, %v10206_v29, %v10012_v24  ;;  %v10726_v24 = vpop.f32.mrf.mxu0 }
 0x77e   : > { %v10124_v36 = vpop.permute.xlu0 %10123 }
 0x77f   : > { %v10045_v4 = vpop.permute.xlu1 %10044  ;;  %v10364_v38 = vsel %vm2493_vm7, %v10329_v35, %v10124_v36 }
 0x780   : > { %v10283_v18 = vsel %vm2542_vm8, %v10238_v40, %v10045_v4  ;;  %v11701_v4 = vpop.f32.mrf.mxu0 }
 0x782   : > { %v10093_v10 = vpop.permute.xlu0 %10092 }
 0x783   : > { %v10014_v22 = vpop.permute.xlu1 %10013  ;;  %v10332_v63 = vsel %vm2444_vm6, %v17094_v26, %v10093_v10 }
 0x786   : > { %v10168_v53 = vpop.permute.xlu0 %10167 }
 0x787   : > { %v10408_v30 = vsel %vm2542_vm8, %v10364_v38, %v10168_v53  ;;  %v9902_v13 = vpop.permute.xlu1 %9901  ;;  %v10739_v38 = vpop.f32.mrf.mxu0 }
 0x788   : > { %10656 = vmatprep.mubr.bf16.mxu1 %v10408_v30  ;;  %v10208_v0 = vsel %vm2444_vm6, %v17065_v41, %v9902_v13 }
 0x789   : > { %10657 = vmatmul.mubr.bf16.gmra.mxu1 %v10280_v56  ;;  %v10240_v31 = vsel %vm2493_vm7, %v10208_v0, %v10014_v22  ;;  %v11702_v22 = vpop.f32.mrf.mxu0 }
 0x78a   : > { %v10126_v16 = vpop.permute.xlu0 %10125 }
 0x78b   : > { %v10366_v25 = vsel %vm2493_vm7, %v10332_v63, %v10126_v16  ;;  %v10047_v50 = vpop.permute.xlu1 %10046  ;;  %v10742_v63 = vpop.f32.mrf.mxu0 }
 0x78c   : > { %v10286_v9 = vsel %vm2542_vm8, %v10240_v31, %v10047_v50 }
 0x78e   : > { %v10095_v58 = vpop.permute.xlu0 %10094 }
 0x78f   : > { %v10335_v26 = vsel %vm2444_vm6, %v17137_v46, %v10095_v58 }
 0x791   : > { %v9904_v32 = vpop.permute.xlu1 %9903 }
 0x792   : > { %v10170_v17 = vpop.permute.xlu0 %10169  ;;  %v10210_v46 = vsel %vm2444_vm6, %v17113_v47, %v9904_v32 }
 0x793   : > { %v10411_v5 = vsel %vm2542_vm8, %v10366_v25, %v10170_v17 }
 0x794   : > { %10664 = vmatprep.mubr.bf16.mxu1 %v10411_v5 }
 0x795   : > { %10665 = vmatmul.mubr.bf16.gmra.mxu1 %v10283_v18  ;;  %v10016_v34 = vpop.permute.xlu1 %10015 }
 0x796   : > { %v10128_v12 = vpop.permute.xlu0 %10127  ;;  %v10242_v49 = vsel %vm2493_vm7, %v10210_v46, %v10016_v34 }
 0x797   : > { %v10368_v62 = vsel %vm2493_vm7, %v10335_v26, %v10128_v12  ;;  %v11705_v26 = vpop.f32.mrf.mxu0 }
 0x799   : > { %v10049_v21 = vpop.permute.xlu1 %10048  ;;  %v10755_v31 = vpop.f32.mrf.mxu0 }
 0x79a   : > { %v10097_v2 = vpop.permute.xlu0 %10096  ;;  %v10289_v1 = vsel %vm2542_vm8, %v10242_v49, %v10049_v21 }
 0x79b   : > { %v10338_v41 = vsel %vm2444_vm6, %v17165_v23, %v10097_v2  ;;  %v17265_v23 = vld [vmem:[%s17390_s12] ss:$0 sm:$0xff]  ;;  %v11706_v21 = vpop.f32.mrf.mxu0 }
 0x79d   : > { %v10758_v49 = vpop.f32.mrf.mxu0 }
 0x79e   : > { %v10172_v60 = vpop.permute.xlu0 %10171 }
 0x79f   : > { %v10414_v6 = vsel %vm2542_vm8, %v10368_v62, %v10172_v60 }
 0x7a0   : > { %10672 = vmatprep.mubr.bf16.mxu1 %v10414_v6 }
 0x7a1   : > { %10673 = vmatmul.mubr.bf16.gmra.mxu1 %v10286_v9 }
 0x7a2   : > { %v10130_v19 = vpop.permute.xlu0 %10129 }
 0x7a3   : > { %v10370_v37 = vsel %vm2493_vm7, %v10338_v41, %v10130_v19 }
 0x7a6   : > { %v10174_v43 = vpop.permute.xlu0 %10173 }
 0x7a7   : > { %v10417_v8 = vsel %vm2542_vm8, %v10370_v37, %v10174_v43 }
 0x7a8   : > { %10680 = vmatprep.mubr.bf16.mxu1 %v10417_v8 }
 0x7a9   : > { %10681 = vmatmul.mubr.bf16.gmra.mxu1 %v10289_v1 }
 0x7ba   : > { %v11311_v3 = vpop.f32.mrf.mxu1 }
 0x7bc   : > { %v11312_v47 = vpop.f32.mrf.mxu1 }
 0x7bd   : > { %v11313_v44 = vadd.f32 %v11312_v47, %v11311_v3 }
 0x7be   : > { %v11314_v48 = vpop.f32.mrf.mxu1 }
 0x7bf   : > { %v10563_v51 = vadd.f32 %v11313_v44, %v17265_v23 }
 0x7c0   : > { %v11315_v59 = vpop.f32.mrf.mxu1 }
 0x7c1   : > { %v10724_v54 = vadd.f32 %v10723_v42, %v10563_v51  ;;  %v11316_v14 = vadd.f32 %v11315_v59, %v11314_v48  ;;  %v11709_v59 = vpop.f32.mrf.mxu0 }
 0x7c3   : > { %10851 = vst.msk [vmem:[%s17272_s14] sm:$0xff] %vm10850_vm9, %v10724_v54  ;;  %v10566_v33 = vadd.f32 %v11316_v14, %v17265_v23 }
 0x7c5   : > { %v10727_v55 = vadd.f32 %v10726_v24, %v10566_v33  ;;  %v10771_v33 = vpop.f32.mrf.mxu0 }
 0x7c6   : > { %v11317_v61 = vpop.f32.mrf.mxu1 }
 0x7c7   : > { %10852 = vst.msk [vmem:[%s17272_s14 + $0x8] sm:$0xff] %vm10850_vm9, %v10727_v55 }
 0x7c8   : > { %v11318_v28 = vpop.f32.mrf.mxu1 }
 0x7c9   : > { %v11319_v52 = vadd.f32 %v11318_v28, %v11317_v61 }
 0x7ca   : > { %v11320_v27 = vpop.f32.mrf.mxu1 }
 0x7cb   : > { %v10571_v11 = vadd.f32 %v11319_v52, %v17265_v23  ;;  %v11710_v52 = vpop.f32.mrf.mxu0 }
 0x7cc   : > { %v11321_v7 = vpop.f32.mrf.mxu1 }
 0x7cd   : > { %v10732_v57 = vadd.f32 %v11697_v39, %v10571_v11  ;;  %v11322_v36 = vadd.f32 %v11321_v7, %v11320_v27 }
 0x7cf   : > { %10853 = vst.msk [vmem:[%s17272_s14 + $0x10] sm:$0xff] %vm10850_vm9, %v10732_v57  ;;  %v10574_v10 = vadd.f32 %v11322_v36, %v17265_v23  ;;  %v10774_v36 = vpop.f32.mrf.mxu0 }
 0x7d1   : > { %v10735_v15 = vadd.f32 %v11698_v20, %v10574_v10 }
 0x7d2   : > { %v11323_v35 = vpop.f32.mrf.mxu1 }
 0x7d3   : > { %10854 = vst.msk [vmem:[%s17272_s14 + $0x18] sm:$0xff] %vm10850_vm9, %v10735_v15 }
 0x7d4   : > { %v11324_v53 = vpop.f32.mrf.mxu1 }
 0x7d5   : > { %v11325_v45 = vadd.f32 %v11324_v53, %v11323_v35 }
 0x7d6   : > { %v11326_v30 = vpop.f32.mrf.mxu1 }
 0x7d7   : > { %v10579_v56 = vadd.f32 %v11325_v45, %v17265_v23 }
 0x7d8   : > { %v11327_v16 = vpop.f32.mrf.mxu1 }
 0x7d9   : > { %v10740_v58 = vadd.f32 %v10739_v38, %v10579_v56  ;;  %v11328_v13 = vadd.f32 %v11327_v16, %v11326_v30  ;;  %v11713_v16 = vpop.f32.mrf.mxu0 }
 0x7db   : > { %10855 = vst.msk [vmem:[%s17272_s14 + $0x20] sm:$0xff] %vm10850_vm9, %v10740_v58  ;;  %v10582_v29 = vadd.f32 %v11328_v13, %v17265_v23 }
 0x7dd   : > { %v10743_v25 = vadd.f32 %v10742_v63, %v10582_v29  ;;  %v11329_v17 = vpop.f32.mrf.mxu1  ;;  %v10787_v29 = vpop.f32.mrf.mxu0 }
 0x7df   : > { %10856 = vst.msk [vmem:[%s17272_s14 + $0x28] sm:$0xff] %vm10850_vm9, %v10743_v25  ;;  %v11330_v40 = vpop.f32.mrf.mxu1 }
 0x7e0   : > { %v11331_v5 = vadd.f32 %v11330_v40, %v11329_v17 }
 0x7e1   : > { %v11332_v18 = vpop.f32.mrf.mxu1 }
 0x7e2   : > { %v10587_v50 = vadd.f32 %v11331_v5, %v17265_v23  ;;  %v11714_v5 = vpop.f32.mrf.mxu0 }
 0x7e3   : > { %v11333_v12 = vpop.f32.mrf.mxu1 }
 0x7e4   : > { %v10748_v32 = vadd.f32 %v11701_v4, %v10587_v50  ;;  %v11334_v2 = vadd.f32 %v11333_v12, %v11332_v18 }
 0x7e6   : > { %10857 = vst.msk [vmem:[%s17272_s14 + $0x30] sm:$0xff] %vm10850_vm9, %v10748_v32  ;;  %v10590_v0 = vadd.f32 %v11334_v2, %v17265_v23  ;;  %v10790_v2 = vpop.f32.mrf.mxu0 }
 0x7e8   : > { %v10751_v62 = vadd.f32 %v11702_v22, %v10590_v0 }
 0x7e9   : > { %v11335_v60 = vpop.f32.mrf.mxu1 }
 0x7ea   : > { %10858 = vst.msk [vmem:[%s17272_s14 + $0x38] sm:$0xff] %vm10850_vm9, %v10751_v62 }
 0x7eb   : > { %v11336_v34 = vpop.f32.mrf.mxu1 }
 0x7ec   : > { %v11337_v6 = vadd.f32 %v11336_v34, %v11335_v60 }
 0x7ed   : > { %v11338_v9 = vpop.f32.mrf.mxu1 }
 0x7ee   : > { %v10595_v19 = vadd.f32 %v11337_v6, %v17265_v23 }
 0x7ef   : > { %v11339_v41 = vpop.f32.mrf.mxu1 }
 0x7f0   : > { %v10756_v46 = vadd.f32 %v10755_v31, %v10595_v19  ;;  %v11340_v37 = vadd.f32 %v11339_v41, %v11338_v9  ;;  %v11717_v41 = vpop.f32.mrf.mxu0 }
 0x7f2   : > { %10859 = vst.msk [vmem:[%s17272_s14 + $0x40] sm:$0xff] %vm10850_vm9, %v10756_v46  ;;  %v10598_v43 = vadd.f32 %v11340_v37, %v17265_v23 }
 0x7f4   : > { %v10759_v8 = vadd.f32 %v10758_v49, %v10598_v43  ;;  %v10803_v43 = vpop.f32.mrf.mxu0 }
 0x7f5   : > { %v11341_v1 = vpop.f32.mrf.mxu1 }
 0x7f6   : > { %10860 = vst.msk [vmem:[%s17272_s14 + $0x48] sm:$0xff] %vm10850_vm9, %v10759_v8 }
 0x7f7   : > { %v11342_v39 = vpop.f32.mrf.mxu1 }
 0x7f8   : > { %v11343_v3 = vadd.f32 %v11342_v39, %v11341_v1 }
 0x7f9   : > { %v11344_v42 = vpop.f32.mrf.mxu1 }
 0x7fa   : > { %v10603_v47 = vadd.f32 %v11343_v3, %v17265_v23  ;;  %v11718_v3 = vpop.f32.mrf.mxu0 }
 0x7fb   : > { %v11345_v44 = vpop.f32.mrf.mxu1 }
 0x7fc   : > { %v10764_v48 = vadd.f32 %v11705_v26, %v10603_v47  ;;  %v11346_v51 = vadd.f32 %v11345_v44, %v11344_v42 }
 0x7fe   : > { %10861 = vst.msk [vmem:[%s17272_s14 + $0x50] sm:$0xff] %vm10850_vm9, %v10764_v48  ;;  %v10606_v20 = vadd.f32 %v11346_v51, %v17265_v23  ;;  %v10806_v51 = vpop.f32.mrf.mxu0 }
 0x800   : > { %v10767_v54 = vadd.f32 %v11706_v21, %v10606_v20 }
 0x801   : > { %v11347_v14 = vpop.f32.mrf.mxu1 }
 0x802   : > { %10862 = vst.msk [vmem:[%s17272_s14 + $0x58] sm:$0xff] %vm10850_vm9, %v10767_v54 }
 0x803   : > { %v11348_v24 = vpop.f32.mrf.mxu1 }
 0x804   : > { %v11349_v55 = vadd.f32 %v11348_v24, %v11347_v14 }
 0x805   : > { %v11350_v61 = vpop.f32.mrf.mxu1 }
 0x806   : > { %v10611_v28 = vadd.f32 %v11349_v55, %v17265_v23 }
 0x807   : > { %v11351_v27 = vpop.f32.mrf.mxu1 }
 0x808   : > { %v10772_v11 = vadd.f32 %v10771_v33, %v10611_v28  ;;  %v11352_v7 = vadd.f32 %v11351_v27, %v11350_v61  ;;  %v11721_v27 = vpop.f32.mrf.mxu0 }
 0x80a   : > { %10863 = vst.msk [vmem:[%s17272_s14 + $0x60] sm:$0xff] %vm10850_vm9, %v10772_v11  ;;  %v10614_v57 = vadd.f32 %v11352_v7, %v17265_v23 }
 0x80c   : > { %v10775_v10 = vadd.f32 %v10774_v36, %v10614_v57  ;;  %v10819_v57 = vpop.f32.mrf.mxu0 }
 0x80d   : > { %v11353_v4 = vpop.f32.mrf.mxu1 }
 0x80e   : > { %10864 = vst.msk [vmem:[%s17272_s14 + $0x68] sm:$0xff] %vm10850_vm9, %v10775_v10 }
 0x80f   : > { %v11354_v15 = vpop.f32.mrf.mxu1 }
 0x810   : > { %v11355_v35 = vadd.f32 %v11354_v15, %v11353_v4 }
 0x811   : > { %v11356_v38 = vpop.f32.mrf.mxu1 }
 0x812   : > { %v10619_v53 = vadd.f32 %v11355_v35, %v17265_v23  ;;  %v11722_v35 = vpop.f32.mrf.mxu0 }
 0x813   : > { %v11357_v45 = vpop.f32.mrf.mxu1 }
 0x814   : > { %v10780_v30 = vadd.f32 %v11709_v59, %v10619_v53  ;;  %v11358_v56 = vadd.f32 %v11357_v45, %v11356_v38 }
 0x816   : > { %10865 = vst.msk [vmem:[%s17272_s14 + $0x70] sm:$0xff] %vm10850_vm9, %v10780_v30  ;;  %v10622_v22 = vadd.f32 %v11358_v56, %v17265_v23  ;;  %v10822_v56 = vpop.f32.mrf.mxu0 }
 0x818   : > { %v10783_v58 = vadd.f32 %v11710_v52, %v10622_v22 }
 0x819   : > { %v11359_v13 = vpop.f32.mrf.mxu1 }
 0x81a   : > { %10866 = vst.msk [vmem:[%s17272_s14 + $0x78] sm:$0xff] %vm10850_vm9, %v10783_v58 }
 0x81b   : > { %v11360_v63 = vpop.f32.mrf.mxu1 }
 0x81c   : > { %v11361_v25 = vadd.f32 %v11360_v63, %v11359_v13 }
 0x81d   : > { %v11362_v17 = vpop.f32.mrf.mxu1 }
 0x81e   : > { %v10627_v40 = vadd.f32 %v11361_v25, %v17265_v23 }
 0x81f   : > { %v11363_v18 = vpop.f32.mrf.mxu1 }
 0x820   : > { %v10788_v50 = vadd.f32 %v10787_v29, %v10627_v40  ;;  %v11364_v12 = vadd.f32 %v11363_v18, %v11362_v17 }
 0x822   : > { %10867 = vst.msk [vmem:[%s17272_s14 + $0x80] sm:$0xff] %vm10850_vm9, %v10788_v50  ;;  %v10630_v32 = vadd.f32 %v11364_v12, %v17265_v23 }
 0x824   : > { %v10791_v0 = vadd.f32 %v10790_v2, %v10630_v32 }
 0x825   : > { %v11365_v26 = vpop.f32.mrf.mxu1 }
 0x826   : > { %10868 = vst.msk [vmem:[%s17272_s14 + $0x88] sm:$0xff] %vm10850_vm9, %v10791_v0 }
 0x827   : > { %v11366_v62 = vpop.f32.mrf.mxu1 }
 0x828   : > { %v11367_v60 = vadd.f32 %v11366_v62, %v11365_v26 }
 0x829   : > { %v11368_v31 = vpop.f32.mrf.mxu1 }
 0x82a   : > { %v10635_v34 = vadd.f32 %v11367_v60, %v17265_v23 }
 0x82b   : > { %v11369_v6 = vpop.f32.mrf.mxu1 }
 0x82c   : > { %v10796_v9 = vadd.f32 %v11713_v16, %v10635_v34  ;;  %v11370_v19 = vadd.f32 %v11369_v6, %v11368_v31 }
 0x82e   : > { %10869 = vst.msk [vmem:[%s17272_s14 + $0x90] sm:$0xff] %vm10850_vm9, %v10796_v9  ;;  %v10638_v21 = vadd.f32 %v11370_v19, %v17265_v23 }
 0x830   : > { %v10799_v46 = vadd.f32 %v11714_v5, %v10638_v21  ;;  %v11725_v5 = vpop.f32.mrf.mxu0 }
 0x831   : > { %v11371_v37 = vpop.f32.mrf.mxu1 }
 0x832   : > { %10870 = vst.msk [vmem:[%s17272_s14 + $0x98] sm:$0xff] %vm10850_vm9, %v10799_v46  ;;  %v10835_v32 = vpop.f32.mrf.mxu0 }
 0x833   : > { %v11372_v49 = vpop.f32.mrf.mxu1 }
 0x834   : > { %v11373_v8 = vadd.f32 %v11372_v49, %v11371_v37  ;;  %v11726_v62 = vpop.f32.mrf.mxu0 }
 0x835   : > { %v11374_v1 = vpop.f32.mrf.mxu1 }
 0x836   : > { %v10643_v39 = vadd.f32 %v11373_v8, %v17265_v23  ;;  %v10838_v19 = vpop.f32.mrf.mxu0 }
 0x837   : > { %v11375_v42 = vpop.f32.mrf.mxu1 }
 0x838   : > { %v10804_v47 = vadd.f32 %v10803_v43, %v10643_v39  ;;  %v11376_v44 = vadd.f32 %v11375_v42, %v11374_v1 }
 0x83a   : > { %10871 = vst.msk [vmem:[%s17272_s14 + $0xa0] sm:$0xff] %vm10850_vm9, %v10804_v47  ;;  %v10646_v48 = vadd.f32 %v11376_v44, %v17265_v23 }
 0x83c   : > { %v10807_v20 = vadd.f32 %v10806_v51, %v10646_v48 }
 0x83d   : > { %v11377_v59 = vpop.f32.mrf.mxu1 }
 0x83e   : > { %10872 = vst.msk [vmem:[%s17272_s14 + $0xa8] sm:$0xff] %vm10850_vm9, %v10807_v20 }
 0x83f   : > { %v11378_v54 = vpop.f32.mrf.mxu1 }
 0x840   : > { %v11379_v14 = vadd.f32 %v11378_v54, %v11377_v59 }
 0x841   : > { %v11380_v33 = vpop.f32.mrf.mxu1 }
 0x842   : > { %v10651_v24 = vadd.f32 %v11379_v14, %v17265_v23 }
 0x843   : > { %v11381_v55 = vpop.f32.mrf.mxu1 }
 0x844   : > { %v10812_v61 = vadd.f32 %v11717_v41, %v10651_v24  ;;  %v11382_v28 = vadd.f32 %v11381_v55, %v11380_v33 }
 0x846   : > { %10873 = vst.msk [vmem:[%s17272_s14 + $0xb0] sm:$0xff] %vm10850_vm9, %v10812_v61  ;;  %v10654_v52 = vadd.f32 %v11382_v28, %v17265_v23 }
 0x848   : > { %v10815_v11 = vadd.f32 %v11718_v3, %v10654_v52 }
 0x849   : > { %v11383_v7 = vpop.f32.mrf.mxu1 }
 0x84a   : > { %10874 = vst.msk [vmem:[%s17272_s14 + $0xb8] sm:$0xff] %vm10850_vm9, %v10815_v11 }
 0x84b   : > { %v11384_v36 = vpop.f32.mrf.mxu1 }
 0x84c   : > { %v11385_v10 = vadd.f32 %v11384_v36, %v11383_v7 }
 0x84d   : > { %v11386_v4 = vpop.f32.mrf.mxu1 }
 0x84e   : > { %v10659_v15 = vadd.f32 %v11385_v10, %v17265_v23 }
 0x84f   : > { %v11387_v38 = vpop.f32.mrf.mxu1 }
 0x850   : > { %v10820_v53 = vadd.f32 %v10819_v57, %v10659_v15  ;;  %v11388_v45 = vadd.f32 %v11387_v38, %v11386_v4 }
 0x852   : > { %10875 = vst.msk [vmem:[%s17272_s14 + $0xc0] sm:$0xff] %vm10850_vm9, %v10820_v53  ;;  %v10662_v30 = vadd.f32 %v11388_v45, %v17265_v23 }
 0x854   : > { %v10823_v22 = vadd.f32 %v10822_v56, %v10662_v30 }
 0x855   : > { %v11389_v16 = vpop.f32.mrf.mxu1 }
 0x856   : > { %10876 = vst.msk [vmem:[%s17272_s14 + $0xc8] sm:$0xff] %vm10850_vm9, %v10823_v22 }
 0x857   : > { %v11390_v58 = vpop.f32.mrf.mxu1 }
 0x858   : > { %v11391_v13 = vadd.f32 %v11390_v58, %v11389_v16 }
 0x859   : > { %v11392_v29 = vpop.f32.mrf.mxu1 }
 0x85a   : > { %v10667_v63 = vadd.f32 %v11391_v13, %v17265_v23 }
 0x85b   : > { %v11393_v25 = vpop.f32.mrf.mxu1 }
 0x85c   : > { %v10828_v17 = vadd.f32 %v11721_v27, %v10667_v63  ;;  %v11394_v40 = vadd.f32 %v11393_v25, %v11392_v29 }
 0x85e   : > { %10877 = vst.msk [vmem:[%s17272_s14 + $0xd0] sm:$0xff] %vm10850_vm9, %v10828_v17  ;;  %v10670_v18 = vadd.f32 %v11394_v40, %v17265_v23 }
 0x860   : > { %v10831_v50 = vadd.f32 %v11722_v35, %v10670_v18 }
 0x861   : > { %v11395_v12 = vpop.f32.mrf.mxu1 }
 0x862   : > { %10878 = vst.msk [vmem:[%s17272_s14 + $0xd8] sm:$0xff] %vm10850_vm9, %v10831_v50 }
 0x863   : > { %v11396_v2 = vpop.f32.mrf.mxu1 }
 0x864   : > { %v11397_v0 = vadd.f32 %v11396_v2, %v11395_v12 }
 0x865   : > { %v11398_v26 = vpop.f32.mrf.mxu1 }
 0x866   : > { %v10675_v60 = vadd.f32 %v11397_v0, %v17265_v23 }
 0x867   : > { %v11399_v31 = vpop.f32.mrf.mxu1 }
 0x868   : > { %v11400_v34 = vadd.f32 %v11399_v31, %v11398_v26  ;;  %v10836_v6 = vadd.f32 %v10835_v32, %v10675_v60 }
 0x869   : > { %v11401_v9 = vpop.f32.mrf.mxu1 }
 0x86a   : > { %10879 = vst.msk [vmem:[%s17272_s14 + $0xe0] sm:$0xff] %vm10850_vm9, %v10836_v6  ;;  %v10678_v21 = vadd.f32 %v11400_v34, %v17265_v23 }
 0x86b   : > { %v11402_v41 = vpop.f32.mrf.mxu1 }
 0x86c   : > { %v11403_v46 = vadd.f32 %v11402_v41, %v11401_v9  ;;  %v10839_v37 = vadd.f32 %v10838_v19, %v10678_v21 }
 0x86d   : > { %v11404_v43 = vpop.f32.mrf.mxu1 }
 0x86e   : > { %v10683_v49 = vadd.f32 %v11403_v46, %v17265_v23  ;;  %10880 = vst.msk [vmem:[%s17272_s14 + $0xe8] sm:$0xff] %vm10850_vm9, %v10839_v37 }
 0x86f   : > { %v11405_v8 = vpop.f32.mrf.mxu1 }
 0x870   : > { %v10844_v1 = vadd.f32 %v11725_v5, %v10683_v49  ;;  %v11406_v39 = vadd.f32 %v11405_v8, %v11404_v43 }
 0x872   : > { %10881 = vst.msk [vmem:[%s17272_s14 + $0xf0] sm:$0xff] %vm10850_vm9, %v10844_v1  ;;  %v10686_v3 = vadd.f32 %v11406_v39, %v17265_v23 }
 0x874   : > { %v10847_v42 = vadd.f32 %v11726_v62, %v10686_v3 }
 0x876   : > { %10882 = vst.msk [vmem:[%s17272_s14 + $0xf8] sm:$0xff] %vm10850_vm9, %v10847_v42 }
 0x877 PF: > { %s23_s27 = sadd.s32 1, %s11974_s27   ;;  %s17692_s25 = smov %s11970_s26 }
 0x878   : > { %p20_p5 = scmp.ge.s32.totalorder %s23_s27, 4   ;;  %s17693_s26 = smov %s17695_s28 }
 0x87a   :  { %22 = sbr.rel (!%p20_p5) target bundleno = 2 (0x2), region = 102 }

</bundles_post_ra>
